<compile_context>
chip_gen: v7x
topology: tpu7x:2x2x1
jax: 0.10.0
libtpu: 0.0.40
codegen_flags: <defaults>
</compile_context>

<pallas_src>
import functools

import jax
import jax.numpy as jnp
from jax.experimental import pallas as pl
from jax.experimental.pallas import tpu as pltpu


_VMEM = pl.BlockSpec(memory_space=pltpu.MemorySpace.VMEM)


# ----------------------------------------------------------------------------
# Fused kernel
# ----------------------------------------------------------------------------
def _sqf_rnn_fused_kernel(n_layers, beta_cols,
                          x_ref, wih_ref, whh_ref, b_ref, hw_ref, hb_ref,
                          out_ref, hbuf_ref):
    # x_ref:    (T, B, H)        bf16  encoder input, lanes >= d_input are 0
    # wih_ref:  (2L, H, 4H)      bf16  W_ih^T per layer (enc layers, then dec)
    # whh_ref:  (2L, H, 4H)      bf16  W_hh^T per layer
    # b_ref:    (2L, 1, 4H)      f32   b_ih + b_hh per layer
    # hw_ref:   (H, P)           bf16  [beta_map^T | gamma_map^T | 0-pad]
    # hb_ref:   (1, P)           f32
    # out_ref:  (tau*B, P)       f32   head outputs, row t*B+b = (step t, seq b)
    # hbuf_ref: (tau*B, H)  VMEM f32   per-step decoder top hidden
    T = x_ref.shape[0]
    B = x_ref.shape[1]
    P = out_ref.shape[1]
    H = whh_ref.shape[1]
    tau = out_ref.shape[0] // B

    # Hoisted loads / broadcasts (stay resident; JAX does not CSE
    # broadcast_in_dim, so doing this per-cell would re-emit 48 broadcasts).
    biases = [jnp.broadcast_to(b_ref[idx], (B, 4 * H))
              for idx in range(2 * n_layers)]
    head_w = hw_ref[...]
    head_b = hb_ref[...]

    def lstm_cell(w_idx, inp_bf16, h_prev, c_prev):
        # Two MXU matmuls with vreg operands, f32 accumulation (MRB in-place
        # accumulate on v7x), bias add on the VPU.
        gates = (jnp.dot(inp_bf16, wih_ref[w_idx],
                         preferred_element_type=jnp.float32)
                 + jnp.dot(h_prev.astype(jnp.bfloat16), whh_ref[w_idx],
                           preferred_element_type=jnp.float32)
                 + biases[w_idx])                          # (B, 4H) f32
        # Full-width (4H-lane) nonlinearities, then static gate slices
        # (PyTorch gate order i, f, g, o).  Elementwise math stays f32.
        sig = jax.nn.sigmoid(gates)
        tnh = jnp.tanh(gates)
        i = sig[:, 0 * H:1 * H]
        f = sig[:, 1 * H:2 * H]
        g = tnh[:, 2 * H:3 * H]
        o = sig[:, 3 * H:4 * H]
        c_new = f * c_prev + i * g
        h_new = o * jnp.tanh(c_new)
        return h_new, c_new

    h = [jnp.zeros((B, H), jnp.float32) for _ in range(n_layers)]
    c = [jnp.zeros((B, H), jnp.float32) for _ in range(n_layers)]

    # ---------------- Encoder: T steps over n_layers ----------------
    for t in range(T):
        inp = x_ref[t]                                     # bf16 (B, H)
        for l in range(n_layers):
            h[l], c[l] = lstm_cell(l, inp, h[l], c[l])
            inp = h[l].astype(jnp.bfloat16)

    # ---------------- Decoder: tau steps, feeding back top hidden ----
    for t in range(tau):
        inp = h[n_layers - 1].astype(jnp.bfloat16)         # prev top hidden
        for l in range(n_layers):
            h[l], c[l] = lstm_cell(n_layers + l, inp, h[l], c[l])
            inp = h[l].astype(jnp.bfloat16)
        hbuf_ref[t * B:(t + 1) * B, :] = h[n_layers - 1]   # off critical path

    # ---------------- Batched head epilogue -------------------------
    h_all = hbuf_ref[...].astype(jnp.bfloat16)             # (tau*B, H)
    y = jnp.dot(h_all, head_w, preferred_element_type=jnp.float32) + head_b
    # softplus with PyTorch's threshold=20 behavior (only on the beta lanes)
    sp = jnp.where(y > 20.0, y, jnp.log1p(jnp.exp(jnp.minimum(y, 20.0))))
    col = jax.lax.broadcasted_iota(jnp.int32, (tau * B, P), 1)
    out_ref[...] = jnp.where(col < beta_cols, sp, y)       # full-lane vst


# ----------------------------------------------------------------------------
# Parameter construction (deterministic, PyTorch-style uniform init)
# ----------------------------------------------------------------------------
def _uniform(key, shape, k):
    return jax.random.uniform(key, shape, jnp.float32, minval=-k, maxval=k)


def init_params(key, d_input, d_model, n_layers, M, lane_pad=128):
    H = d_model
    assert d_input <= H, "layer-0 input is packed into an H-wide input slot"
    k = 1.0 / jnp.sqrt(H)

    wihs, whhs, bs = [], [], []
    # encoder layer input sizes, then decoder layer input sizes
    layer_in = [d_input] + [H] * (n_layers - 1) + [H] * n_layers
    for in_sz in layer_in:
        key, k1, k2, k3, k4 = jax.random.split(key, 5)
        w_ih = _uniform(k1, (4 * H, in_sz), k)             # torch weight_ih_l{k}
        w_hh = _uniform(k2, (4 * H, H), k)                 # torch weight_hh_l{k}
        b_ih = _uniform(k3, (4 * H,), k)
        b_hh = _uniform(k4, (4 * H,), k)
        w_ih_t = jnp.zeros((H, 4 * H), jnp.float32).at[:in_sz, :].set(w_ih.T)
        wihs.append(w_ih_t)                                # (H, 4H), 0-padded rows
        whhs.append(w_hh.T)                                # (H, 4H)
        bs.append((b_ih + b_hh)[None, :])                  # (1, 4H)
    w_ih = jnp.stack(wihs)                                 # (2L, H, 4H)
    w_hh = jnp.stack(whhs)                                 # (2L, H, 4H)
    b_lstm = jnp.stack(bs)                                 # (2L, 1, 4H)

    # Merged beta/gamma head, zero-padded to a lane-dense slab.
    beta_cols = d_input * (M + 1)
    P = max(lane_pad, beta_cols + d_input)
    kl = 1.0 / jnp.sqrt(H)
    key, k1, k2, k3, k4 = jax.random.split(key, 5)
    w_beta = _uniform(k1, (beta_cols, H), kl)
    b_beta = _uniform(k2, (beta_cols,), kl)
    w_gamma = _uniform(k3, (d_input, H), kl)
    b_gamma = _uniform(k4, (d_input,), kl)
    head_w = jnp.zeros((H, P), jnp.float32)
    head_w = head_w.at[:, :beta_cols].set(w_beta.T)
    head_w = head_w.at[:, beta_cols:beta_cols + d_input].set(w_gamma.T)
    head_b = jnp.zeros((1, P), jnp.float32)
    head_b = head_b.at[0, :beta_cols].set(b_beta)
    head_b = head_b.at[0, beta_cols:beta_cols + d_input].set(b_gamma)

    return dict(w_ih=w_ih, w_hh=w_hh, b_lstm=b_lstm,
                head_w=head_w, head_b=head_b), key


# ----------------------------------------------------------------------------
# SQF_RNN forward wrapper
# ----------------------------------------------------------------------------
def sqf_rnn_forward(params, x, tau, d_input, M):
    B, T, _ = x.shape
    n_layers = params["w_ih"].shape[0] // 2
    H = params["w_ih"].shape[1]
    P = params["head_w"].shape[1]
    beta_cols = d_input * (M + 1)

    # Pad batch to the f32 sublane tile (8), pad input lanes to the full
    # H-wide input slot, time on the leading axis; bf16 matmul operand.
    B_pad = ((B + 7) // 8) * 8
    x_p = jnp.zeros((T, B_pad, H), jnp.float32)
    x_p = x_p.at[:, :B, :d_input].set(
        jnp.transpose(x.astype(jnp.float32), (1, 0, 2)))
    x_p = x_p.astype(jnp.bfloat16)

    # bf16 MXU operands; biases / accumulation stay f32.
    w_ih = params["w_ih"].astype(jnp.bfloat16)
    w_hh = params["w_hh"].astype(jnp.bfloat16)
    head_w = params["head_w"].astype(jnp.bfloat16)

    kernel = functools.partial(_sqf_rnn_fused_kernel, n_layers, beta_cols)
    out = pl.pallas_call(
        kernel,
        out_shape=jax.ShapeDtypeStruct((tau * B_pad, P), jnp.float32),
        in_specs=[_VMEM] * 6,
        out_specs=_VMEM,
        scratch_shapes=[pltpu.VMEM((tau * B_pad, H), jnp.float32)],
    )(x_p, w_ih, w_hh, params["b_lstm"], head_w, params["head_b"])

    out = jnp.transpose(out.reshape(tau, B_pad, P), (1, 0, 2))[:B]  # (B, tau, P)
    beta = out[..., :beta_cols].reshape(B, tau, d_input, M + 1)
    gamma = out[..., beta_cols:beta_cols + d_input].reshape(B, tau, d_input, 1)
    return gamma, beta


# ----------------------------------------------------------------------------
# Main
# ----------------------------------------------------------------------------
if __name__ == "__main__":
    d_input = 4
    d_model = 32
    tau = 8
    n_layers = 3
    M = 5
    batch = 2
    seq_len = 8

    key = jax.random.PRNGKey(0)
    params, key = init_params(key, d_input, d_model, n_layers, M)

    key, xk = jax.random.split(key)
    x = jax.random.normal(xk, (batch, seq_len, d_input), jnp.float32)

    fwd = jax.jit(lambda p, xx: sqf_rnn_forward(p, xx, tau, d_input, M))
    gamma, beta = fwd(params, x)
    jax.block_until_ready((gamma, beta))

    assert gamma.shape == (batch, tau, d_input, 1), gamma.shape
    assert beta.shape == (batch, tau, d_input, M + 1), beta.shape
    assert bool(jnp.all(jnp.isfinite(gamma))) and bool(jnp.all(jnp.isfinite(beta)))
    assert bool(jnp.all(beta >= 0.0))   # softplus output is non-negative
    print("KERNEL_OK")
</pallas_src>

<mosaic_0001>
module attributes {stable_mosaic.version = 11 : i64} {
  func.func @_sqf_rnn_fused_kernel(%arg0: memref<8x8x32xbf16, #tpu.memory_space<vmem>>, %arg1: memref<6x32x128xbf16, #tpu.memory_space<vmem>>, %arg2: memref<6x32x128xbf16, #tpu.memory_space<vmem>>, %arg3: memref<6x1x128xf32, #tpu.memory_space<vmem>>, %arg4: memref<32x128xbf16, #tpu.memory_space<vmem>>, %arg5: memref<1x128xf32, #tpu.memory_space<vmem>>, %arg6: memref<64x128xf32, #tpu.memory_space<vmem>>, %arg7: memref<64x32xf32, #tpu.memory_space<vmem>>) attributes {dimension_semantics = [], scalar_prefetch = 0 : i64, scratch_operands = 1 : i64, tpu.core_type = #tpu.core_type<tc>} {
    %c0 = arith.constant 0 : index
    %c0_0 = arith.constant 0 : index
    %c0_1 = arith.constant 0 : index
    %0 = vector.load %arg3[%c0, %c0_0, %c0_1] : memref<6x1x128xf32, #tpu.memory_space<vmem>>, vector<1x1x128xf32>
    %1 = vector.shape_cast %0 : vector<1x1x128xf32> to vector<1x128xf32>
    %2 = vector.shape_cast %1 : vector<1x128xf32> to vector<1x128xf32>
    %3 = vector.broadcast %2 : vector<1x128xf32> to vector<8x128xf32>
    %c1 = arith.constant 1 : index
    %c0_2 = arith.constant 0 : index
    %c0_3 = arith.constant 0 : index
    %4 = vector.load %arg3[%c1, %c0_2, %c0_3] : memref<6x1x128xf32, #tpu.memory_space<vmem>>, vector<1x1x128xf32>
    %5 = vector.shape_cast %4 : vector<1x1x128xf32> to vector<1x128xf32>
    %6 = vector.shape_cast %5 : vector<1x128xf32> to vector<1x128xf32>
    %7 = vector.broadcast %6 : vector<1x128xf32> to vector<8x128xf32>
    %c2 = arith.constant 2 : index
    %c0_4 = arith.constant 0 : index
    %c0_5 = arith.constant 0 : index
    %8 = vector.load %arg3[%c2, %c0_4, %c0_5] : memref<6x1x128xf32, #tpu.memory_space<vmem>>, vector<1x1x128xf32>
    %9 = vector.shape_cast %8 : vector<1x1x128xf32> to vector<1x128xf32>
    %10 = vector.shape_cast %9 : vector<1x128xf32> to vector<1x128xf32>
    %11 = vector.broadcast %10 : vector<1x128xf32> to vector<8x128xf32>
    %c3 = arith.constant 3 : index
    %c0_6 = arith.constant 0 : index
    %c0_7 = arith.constant 0 : index
    %12 = vector.load %arg3[%c3, %c0_6, %c0_7] : memref<6x1x128xf32, #tpu.memory_space<vmem>>, vector<1x1x128xf32>
    %13 = vector.shape_cast %12 : vector<1x1x128xf32> to vector<1x128xf32>
    %14 = vector.shape_cast %13 : vector<1x128xf32> to vector<1x128xf32>
    %15 = vector.broadcast %14 : vector<1x128xf32> to vector<8x128xf32>
    %c4 = arith.constant 4 : index
    %c0_8 = arith.constant 0 : index
    %c0_9 = arith.constant 0 : index
    %16 = vector.load %arg3[%c4, %c0_8, %c0_9] : memref<6x1x128xf32, #tpu.memory_space<vmem>>, vector<1x1x128xf32>
    %17 = vector.shape_cast %16 : vector<1x1x128xf32> to vector<1x128xf32>
    %18 = vector.shape_cast %17 : vector<1x128xf32> to vector<1x128xf32>
    %19 = vector.broadcast %18 : vector<1x128xf32> to vector<8x128xf32>
    %c5 = arith.constant 5 : index
    %c0_10 = arith.constant 0 : index
    %c0_11 = arith.constant 0 : index
    %20 = vector.load %arg3[%c5, %c0_10, %c0_11] : memref<6x1x128xf32, #tpu.memory_space<vmem>>, vector<1x1x128xf32>
    %21 = vector.shape_cast %20 : vector<1x1x128xf32> to vector<1x128xf32>
    %22 = vector.shape_cast %21 : vector<1x128xf32> to vector<1x128xf32>
    %23 = vector.broadcast %22 : vector<1x128xf32> to vector<8x128xf32>
    %c0_12 = arith.constant 0 : index
    %c0_13 = arith.constant 0 : index
    %24 = vector.load %arg4[%c0_12, %c0_13] : memref<32x128xbf16, #tpu.memory_space<vmem>>, vector<32x128xbf16>
    %c0_14 = arith.constant 0 : index
    %c0_15 = arith.constant 0 : index
    %25 = vector.load %arg5[%c0_14, %c0_15] : memref<1x128xf32, #tpu.memory_space<vmem>>, vector<1x128xf32>
    %cst = arith.constant 0.000000e+00 : f32
    %26 = vector.broadcast %cst : f32 to vector<8x32xf32>
    %cst_16 = arith.constant 0.000000e+00 : f32
    %27 = vector.broadcast %cst_16 : f32 to vector<8x32xf32>
    %cst_17 = arith.constant 0.000000e+00 : f32
    %28 = vector.broadcast %cst_17 : f32 to vector<8x32xf32>
    %cst_18 = arith.constant 0.000000e+00 : f32
    %29 = vector.broadcast %cst_18 : f32 to vector<8x32xf32>
    %cst_19 = arith.constant 0.000000e+00 : f32
    %30 = vector.broadcast %cst_19 : f32 to vector<8x32xf32>
    %cst_20 = arith.constant 0.000000e+00 : f32
    %31 = vector.broadcast %cst_20 : f32 to vector<8x32xf32>
    %c0_21 = arith.constant 0 : index
    %c0_22 = arith.constant 0 : index
    %c0_23 = arith.constant 0 : index
    %32 = vector.load %arg0[%c0_21, %c0_22, %c0_23] : memref<8x8x32xbf16, #tpu.memory_space<vmem>>, vector<1x8x32xbf16>
    %33 = vector.shape_cast %32 : vector<1x8x32xbf16> to vector<8x32xbf16>
    %c0_24 = arith.constant 0 : index
    %c0_25 = arith.constant 0 : index
    %c0_26 = arith.constant 0 : index
    %34 = vector.load %arg1[%c0_24, %c0_25, %c0_26] : memref<6x32x128xbf16, #tpu.memory_space<vmem>>, vector<1x32x128xbf16>
    %35 = vector.shape_cast %34 : vector<1x32x128xbf16> to vector<32x128xbf16>
    %cst_27 = arith.constant dense<0.000000e+00> : vector<8x128xf32>
    %36 = tpu.matmul %33, %35, %cst_27 {dimension_numbers = #tpu.dot_dimension_numbers<[1], [0], [0], [1], [0, 0, 1, 1], [], []>} : vector<8x32xbf16>, vector<32x128xbf16>, vector<8x128xf32> -> vector<8x128xf32>
    %37 = arith.truncf %26 : vector<8x32xf32> to vector<8x32xbf16>
    %c0_28 = arith.constant 0 : index
    %c0_29 = arith.constant 0 : index
    %c0_30 = arith.constant 0 : index
    %38 = vector.load %arg2[%c0_28, %c0_29, %c0_30] : memref<6x32x128xbf16, #tpu.memory_space<vmem>>, vector<1x32x128xbf16>
    %39 = vector.shape_cast %38 : vector<1x32x128xbf16> to vector<32x128xbf16>
    %cst_31 = arith.constant dense<0.000000e+00> : vector<8x128xf32>
    %40 = tpu.matmul %37, %39, %cst_31 {dimension_numbers = #tpu.dot_dimension_numbers<[1], [0], [0], [1], [0, 0, 1, 1], [], []>} : vector<8x32xbf16>, vector<32x128xbf16>, vector<8x128xf32> -> vector<8x128xf32>
    %41 = arith.addf %36, %40 : vector<8x128xf32>
    %42 = arith.addf %41, %3 : vector<8x128xf32>
    %43 = arith.negf %42 : vector<8x128xf32>
    %44 = math.exp %43 : vector<8x128xf32>
    %cst_32 = arith.constant 1.000000e+00 : f32
    %45 = vector.broadcast %cst_32 : f32 to vector<8x128xf32>
    %46 = arith.addf %45, %44 : vector<8x128xf32>
    %47 = arith.divf %45, %46 : vector<8x128xf32>
    %48 = math.tanh %42 : vector<8x128xf32>
    %49 = vector.extract_strided_slice %47 {offsets = [0, 0], sizes = [8, 32], strides = [1, 1]} : vector<8x128xf32> to vector<8x32xf32>
    %50 = vector.extract_strided_slice %47 {offsets = [0, 32], sizes = [8, 32], strides = [1, 1]} : vector<8x128xf32> to vector<8x32xf32>
    %51 = vector.extract_strided_slice %48 {offsets = [0, 64], sizes = [8, 32], strides = [1, 1]} : vector<8x128xf32> to vector<8x32xf32>
    %52 = vector.extract_strided_slice %47 {offsets = [0, 96], sizes = [8, 32], strides = [1, 1]} : vector<8x128xf32> to vector<8x32xf32>
    %53 = arith.mulf %50, %29 : vector<8x32xf32>
    %54 = arith.mulf %49, %51 : vector<8x32xf32>
    %55 = arith.addf %53, %54 : vector<8x32xf32>
    %56 = math.tanh %55 : vector<8x32xf32>
    %57 = arith.mulf %52, %56 : vector<8x32xf32>
    %58 = arith.truncf %57 : vector<8x32xf32> to vector<8x32xbf16>
    %c1_33 = arith.constant 1 : index
    %c0_34 = arith.constant 0 : index
    %c0_35 = arith.constant 0 : index
    %59 = vector.load %arg1[%c1_33, %c0_34, %c0_35] : memref<6x32x128xbf16, #tpu.memory_space<vmem>>, vector<1x32x128xbf16>
    %60 = vector.shape_cast %59 : vector<1x32x128xbf16> to vector<32x128xbf16>
    %cst_36 = arith.constant dense<0.000000e+00> : vector<8x128xf32>
    %61 = tpu.matmul %58, %60, %cst_36 {dimension_numbers = #tpu.dot_dimension_numbers<[1], [0], [0], [1], [0, 0, 1, 1], [], []>} : vector<8x32xbf16>, vector<32x128xbf16>, vector<8x128xf32> -> vector<8x128xf32>
    %62 = arith.truncf %27 : vector<8x32xf32> to vector<8x32xbf16>
    %c1_37 = arith.constant 1 : index
    %c0_38 = arith.constant 0 : index
    %c0_39 = arith.constant 0 : index
    %63 = vector.load %arg2[%c1_37, %c0_38, %c0_39] : memref<6x32x128xbf16, #tpu.memory_space<vmem>>, vector<1x32x128xbf16>
    %64 = vector.shape_cast %63 : vector<1x32x128xbf16> to vector<32x128xbf16>
    %cst_40 = arith.constant dense<0.000000e+00> : vector<8x128xf32>
    %65 = tpu.matmul %62, %64, %cst_40 {dimension_numbers = #tpu.dot_dimension_numbers<[1], [0], [0], [1], [0, 0, 1, 1], [], []>} : vector<8x32xbf16>, vector<32x128xbf16>, vector<8x128xf32> -> vector<8x128xf32>
    %66 = arith.addf %61, %65 : vector<8x128xf32>
    %67 = arith.addf %66, %7 : vector<8x128xf32>
    %68 = arith.negf %67 : vector<8x128xf32>
    %69 = math.exp %68 : vector<8x128xf32>
    %cst_41 = arith.constant 1.000000e+00 : f32
    %70 = vector.broadcast %cst_41 : f32 to vector<8x128xf32>
    %71 = arith.addf %70, %69 : vector<8x128xf32>
    %72 = arith.divf %70, %71 : vector<8x128xf32>
    %73 = math.tanh %67 : vector<8x128xf32>
    %74 = vector.extract_strided_slice %72 {offsets = [0, 0], sizes = [8, 32], strides = [1, 1]} : vector<8x128xf32> to vector<8x32xf32>
    %75 = vector.extract_strided_slice %72 {offsets = [0, 32], sizes = [8, 32], strides = [1, 1]} : vector<8x128xf32> to vector<8x32xf32>
    %76 = vector.extract_strided_slice %73 {offsets = [0, 64], sizes = [8, 32], strides = [1, 1]} : vector<8x128xf32> to vector<8x32xf32>
    %77 = vector.extract_strided_slice %72 {offsets = [0, 96], sizes = [8, 32], strides = [1, 1]} : vector<8x128xf32> to vector<8x32xf32>
    %78 = arith.mulf %75, %30 : vector<8x32xf32>
    %79 = arith.mulf %74, %76 : vector<8x32xf32>
    %80 = arith.addf %78, %79 : vector<8x32xf32>
    %81 = math.tanh %80 : vector<8x32xf32>
    %82 = arith.mulf %77, %81 : vector<8x32xf32>
    %83 = arith.truncf %82 : vector<8x32xf32> to vector<8x32xbf16>
    %c2_42 = arith.constant 2 : index
    %c0_43 = arith.constant 0 : index
    %c0_44 = arith.constant 0 : index
    %84 = vector.load %arg1[%c2_42, %c0_43, %c0_44] : memref<6x32x128xbf16, #tpu.memory_space<vmem>>, vector<1x32x128xbf16>
    %85 = vector.shape_cast %84 : vector<1x32x128xbf16> to vector<32x128xbf16>
    %cst_45 = arith.constant dense<0.000000e+00> : vector<8x128xf32>
    %86 = tpu.matmul %83, %85, %cst_45 {dimension_numbers = #tpu.dot_dimension_numbers<[1], [0], [0], [1], [0, 0, 1, 1], [], []>} : vector<8x32xbf16>, vector<32x128xbf16>, vector<8x128xf32> -> vector<8x128xf32>
    %87 = arith.truncf %28 : vector<8x32xf32> to vector<8x32xbf16>
    %c2_46 = arith.constant 2 : index
    %c0_47 = arith.constant 0 : index
    %c0_48 = arith.constant 0 : index
    %88 = vector.load %arg2[%c2_46, %c0_47, %c0_48] : memref<6x32x128xbf16, #tpu.memory_space<vmem>>, vector<1x32x128xbf16>
    %89 = vector.shape_cast %88 : vector<1x32x128xbf16> to vector<32x128xbf16>
    %cst_49 = arith.constant dense<0.000000e+00> : vector<8x128xf32>
    %90 = tpu.matmul %87, %89, %cst_49 {dimension_numbers = #tpu.dot_dimension_numbers<[1], [0], [0], [1], [0, 0, 1, 1], [], []>} : vector<8x32xbf16>, vector<32x128xbf16>, vector<8x128xf32> -> vector<8x128xf32>
    %91 = arith.addf %86, %90 : vector<8x128xf32>
    %92 = arith.addf %91, %11 : vector<8x128xf32>
    %93 = arith.negf %92 : vector<8x128xf32>
    %94 = math.exp %93 : vector<8x128xf32>
    %cst_50 = arith.constant 1.000000e+00 : f32
    %95 = vector.broadcast %cst_50 : f32 to vector<8x128xf32>
    %96 = arith.addf %95, %94 : vector<8x128xf32>
    %97 = arith.divf %95, %96 : vector<8x128xf32>
    %98 = math.tanh %92 : vector<8x128xf32>
    %99 = vector.extract_strided_slice %97 {offsets = [0, 0], sizes = [8, 32], strides = [1, 1]} : vector<8x128xf32> to vector<8x32xf32>
    %100 = vector.extract_strided_slice %97 {offsets = [0, 32], sizes = [8, 32], strides = [1, 1]} : vector<8x128xf32> to vector<8x32xf32>
    %101 = vector.extract_strided_slice %98 {offsets = [0, 64], sizes = [8, 32], strides = [1, 1]} : vector<8x128xf32> to vector<8x32xf32>
    %102 = vector.extract_strided_slice %97 {offsets = [0, 96], sizes = [8, 32], strides = [1, 1]} : vector<8x128xf32> to vector<8x32xf32>
    %103 = arith.mulf %100, %31 : vector<8x32xf32>
    %104 = arith.mulf %99, %101 : vector<8x32xf32>
    %105 = arith.addf %103, %104 : vector<8x32xf32>
    %106 = math.tanh %105 : vector<8x32xf32>
    %107 = arith.mulf %102, %106 : vector<8x32xf32>
    %c1_51 = arith.constant 1 : index
    %c0_52 = arith.constant 0 : index
    %c0_53 = arith.constant 0 : index
    %108 = vector.load %arg0[%c1_51, %c0_52, %c0_53] : memref<8x8x32xbf16, #tpu.memory_space<vmem>>, vector<1x8x32xbf16>
    %109 = vector.shape_cast %108 : vector<1x8x32xbf16> to vector<8x32xbf16>
    %c0_54 = arith.constant 0 : index
    %c0_55 = arith.constant 0 : index
    %c0_56 = arith.constant 0 : index
    %110 = vector.load %arg1[%c0_54, %c0_55, %c0_56] : memref<6x32x128xbf16, #tpu.memory_space<vmem>>, vector<1x32x128xbf16>
    %111 = vector.shape_cast %110 : vector<1x32x128xbf16> to vector<32x128xbf16>
    %cst_57 = arith.constant dense<0.000000e+00> : vector<8x128xf32>
    %112 = tpu.matmul %109, %111, %cst_57 {dimension_numbers = #tpu.dot_dimension_numbers<[1], [0], [0], [1], [0, 0, 1, 1], [], []>} : vector<8x32xbf16>, vector<32x128xbf16>, vector<8x128xf32> -> vector<8x128xf32>
    %113 = arith.truncf %57 : vector<8x32xf32> to vector<8x32xbf16>
    %c0_58 = arith.constant 0 : index
    %c0_59 = arith.constant 0 : index
    %c0_60 = arith.constant 0 : index
    %114 = vector.load %arg2[%c0_58, %c0_59, %c0_60] : memref<6x32x128xbf16, #tpu.memory_space<vmem>>, vector<1x32x128xbf16>
    %115 = vector.shape_cast %114 : vector<1x32x128xbf16> to vector<32x128xbf16>
    %cst_61 = arith.constant dense<0.000000e+00> : vector<8x128xf32>
    %116 = tpu.matmul %113, %115, %cst_61 {dimension_numbers = #tpu.dot_dimension_numbers<[1], [0], [0], [1], [0, 0, 1, 1], [], []>} : vector<8x32xbf16>, vector<32x128xbf16>, vector<8x128xf32> -> vector<8x128xf32>
    %117 = arith.addf %112, %116 : vector<8x128xf32>
    %118 = arith.addf %117, %3 : vector<8x128xf32>
    %119 = arith.negf %118 : vector<8x128xf32>
    %120 = math.exp %119 : vector<8x128xf32>
    %cst_62 = arith.constant 1.000000e+00 : f32
    %121 = vector.broadcast %cst_62 : f32 to vector<8x128xf32>
    %122 = arith.addf %121, %120 : vector<8x128xf32>
    %123 = arith.divf %121, %122 : vector<8x128xf32>
    %124 = math.tanh %118 : vector<8x128xf32>
    %125 = vector.extract_strided_slice %123 {offsets = [0, 0], sizes = [8, 32], strides = [1, 1]} : vector<8x128xf32> to vector<8x32xf32>
    %126 = vector.extract_strided_slice %123 {offsets = [0, 32], sizes = [8, 32], strides = [1, 1]} : vector<8x128xf32> to vector<8x32xf32>
    %127 = vector.extract_strided_slice %124 {offsets = [0, 64], sizes = [8, 32], strides = [1, 1]} : vector<8x128xf32> to vector<8x32xf32>
    %128 = vector.extract_strided_slice %123 {offsets = [0, 96], sizes = [8, 32], strides = [1, 1]} : vector<8x128xf32> to vector<8x32xf32>
    %129 = arith.mulf %126, %55 : vector<8x32xf32>
    %130 = arith.mulf %125, %127 : vector<8x32xf32>
    %131 = arith.addf %129, %130 : vector<8x32xf32>
    %132 = math.tanh %131 : vector<8x32xf32>
    %133 = arith.mulf %128, %132 : vector<8x32xf32>
    %134 = arith.truncf %133 : vector<8x32xf32> to vector<8x32xbf16>
    %c1_63 = arith.constant 1 : index
    %c0_64 = arith.constant 0 : index
    %c0_65 = arith.constant 0 : index
    %135 = vector.load %arg1[%c1_63, %c0_64, %c0_65] : memref<6x32x128xbf16, #tpu.memory_space<vmem>>, vector<1x32x128xbf16>
    %136 = vector.shape_cast %135 : vector<1x32x128xbf16> to vector<32x128xbf16>
    %cst_66 = arith.constant dense<0.000000e+00> : vector<8x128xf32>
    %137 = tpu.matmul %134, %136, %cst_66 {dimension_numbers = #tpu.dot_dimension_numbers<[1], [0], [0], [1], [0, 0, 1, 1], [], []>} : vector<8x32xbf16>, vector<32x128xbf16>, vector<8x128xf32> -> vector<8x128xf32>
    %138 = arith.truncf %82 : vector<8x32xf32> to vector<8x32xbf16>
    %c1_67 = arith.constant 1 : index
    %c0_68 = arith.constant 0 : index
    %c0_69 = arith.constant 0 : index
    %139 = vector.load %arg2[%c1_67, %c0_68, %c0_69] : memref<6x32x128xbf16, #tpu.memory_space<vmem>>, vector<1x32x128xbf16>
    %140 = vector.shape_cast %139 : vector<1x32x128xbf16> to vector<32x128xbf16>
    %cst_70 = arith.constant dense<0.000000e+00> : vector<8x128xf32>
    %141 = tpu.matmul %138, %140, %cst_70 {dimension_numbers = #tpu.dot_dimension_numbers<[1], [0], [0], [1], [0, 0, 1, 1], [], []>} : vector<8x32xbf16>, vector<32x128xbf16>, vector<8x128xf32> -> vector<8x128xf32>
    %142 = arith.addf %137, %141 : vector<8x128xf32>
    %143 = arith.addf %142, %7 : vector<8x128xf32>
    %144 = arith.negf %143 : vector<8x128xf32>
    %145 = math.exp %144 : vector<8x128xf32>
    %cst_71 = arith.constant 1.000000e+00 : f32
    %146 = vector.broadcast %cst_71 : f32 to vector<8x128xf32>
    %147 = arith.addf %146, %145 : vector<8x128xf32>
    %148 = arith.divf %146, %147 : vector<8x128xf32>
    %149 = math.tanh %143 : vector<8x128xf32>
    %150 = vector.extract_strided_slice %148 {offsets = [0, 0], sizes = [8, 32], strides = [1, 1]} : vector<8x128xf32> to vector<8x32xf32>
    %151 = vector.extract_strided_slice %148 {offsets = [0, 32], sizes = [8, 32], strides = [1, 1]} : vector<8x128xf32> to vector<8x32xf32>
    %152 = vector.extract_strided_slice %149 {offsets = [0, 64], sizes = [8, 32], strides = [1, 1]} : vector<8x128xf32> to vector<8x32xf32>
    %153 = vector.extract_strided_slice %148 {offsets = [0, 96], sizes = [8, 32], strides = [1, 1]} : vector<8x128xf32> to vector<8x32xf32>
    %154 = arith.mulf %151, %80 : vector<8x32xf32>
    %155 = arith.mulf %150, %152 : vector<8x32xf32>
    %156 = arith.addf %154, %155 : vector<8x32xf32>
    %157 = math.tanh %156 : vector<8x32xf32>
    %158 = arith.mulf %153, %157 : vector<8x32xf32>
    %159 = arith.truncf %158 : vector<8x32xf32> to vector<8x32xbf16>
    %c2_72 = arith.constant 2 : index
    %c0_73 = arith.constant 0 : index
    %c0_74 = arith.constant 0 : index
    %160 = vector.load %arg1[%c2_72, %c0_73, %c0_74] : memref<6x32x128xbf16, #tpu.memory_space<vmem>>, vector<1x32x128xbf16>
    %161 = vector.shape_cast %160 : vector<1x32x128xbf16> to vector<32x128xbf16>
    %cst_75 = arith.constant dense<0.000000e+00> : vector<8x128xf32>
    %162 = tpu.matmul %159, %161, %cst_75 {dimension_numbers = #tpu.dot_dimension_numbers<[1], [0], [0], [1], [0, 0, 1, 1], [], []>} : vector<8x32xbf16>, vector<32x128xbf16>, vector<8x128xf32> -> vector<8x128xf32>
    %163 = arith.truncf %107 : vector<8x32xf32> to vector<8x32xbf16>
    %c2_76 = arith.constant 2 : index
    %c0_77 = arith.constant 0 : index
    %c0_78 = arith.constant 0 : index
    %164 = vector.load %arg2[%c2_76, %c0_77, %c0_78] : memref<6x32x128xbf16, #tpu.memory_space<vmem>>, vector<1x32x128xbf16>
    %165 = vector.shape_cast %164 : vector<1x32x128xbf16> to vector<32x128xbf16>
    %cst_79 = arith.constant dense<0.000000e+00> : vector<8x128xf32>
    %166 = tpu.matmul %163, %165, %cst_79 {dimension_numbers = #tpu.dot_dimension_numbers<[1], [0], [0], [1], [0, 0, 1, 1], [], []>} : vector<8x32xbf16>, vector<32x128xbf16>, vector<8x128xf32> -> vector<8x128xf32>
    %167 = arith.addf %162, %166 : vector<8x128xf32>
    %168 = arith.addf %167, %11 : vector<8x128xf32>
    %169 = arith.negf %168 : vector<8x128xf32>
    %170 = math.exp %169 : vector<8x128xf32>
    %cst_80 = arith.constant 1.000000e+00 : f32
    %171 = vector.broadcast %cst_80 : f32 to vector<8x128xf32>
    %172 = arith.addf %171, %170 : vector<8x128xf32>
    %173 = arith.divf %171, %172 : vector<8x128xf32>
    %174 = math.tanh %168 : vector<8x128xf32>
    %175 = vector.extract_strided_slice %173 {offsets = [0, 0], sizes = [8, 32], strides = [1, 1]} : vector<8x128xf32> to vector<8x32xf32>
    %176 = vector.extract_strided_slice %173 {offsets = [0, 32], sizes = [8, 32], strides = [1, 1]} : vector<8x128xf32> to vector<8x32xf32>
    %177 = vector.extract_strided_slice %174 {offsets = [0, 64], sizes = [8, 32], strides = [1, 1]} : vector<8x128xf32> to vector<8x32xf32>
    %178 = vector.extract_strided_slice %173 {offsets = [0, 96], sizes = [8, 32], strides = [1, 1]} : vector<8x128xf32> to vector<8x32xf32>
    %179 = arith.mulf %176, %105 : vector<8x32xf32>
    %180 = arith.mulf %175, %177 : vector<8x32xf32>
    %181 = arith.addf %179, %180 : vector<8x32xf32>
    %182 = math.tanh %181 : vector<8x32xf32>
    %183 = arith.mulf %178, %182 : vector<8x32xf32>
    %c2_81 = arith.constant 2 : index
    %c0_82 = arith.constant 0 : index
    %c0_83 = arith.constant 0 : index
    %184 = vector.load %arg0[%c2_81, %c0_82, %c0_83] : memref<8x8x32xbf16, #tpu.memory_space<vmem>>, vector<1x8x32xbf16>
    %185 = vector.shape_cast %184 : vector<1x8x32xbf16> to vector<8x32xbf16>
    %c0_84 = arith.constant 0 : index
    %c0_85 = arith.constant 0 : index
    %c0_86 = arith.constant 0 : index
    %186 = vector.load %arg1[%c0_84, %c0_85, %c0_86] : memref<6x32x128xbf16, #tpu.memory_space<vmem>>, vector<1x32x128xbf16>
    %187 = vector.shape_cast %186 : vector<1x32x128xbf16> to vector<32x128xbf16>
    %cst_87 = arith.constant dense<0.000000e+00> : vector<8x128xf32>
    %188 = tpu.matmul %185, %187, %cst_87 {dimension_numbers = #tpu.dot_dimension_numbers<[1], [0], [0], [1], [0, 0, 1, 1], [], []>} : vector<8x32xbf16>, vector<32x128xbf16>, vector<8x128xf32> -> vector<8x128xf32>
    %189 = arith.truncf %133 : vector<8x32xf32> to vector<8x32xbf16>
    %c0_88 = arith.constant 0 : index
    %c0_89 = arith.constant 0 : index
    %c0_90 = arith.constant 0 : index
    %190 = vector.load %arg2[%c0_88, %c0_89, %c0_90] : memref<6x32x128xbf16, #tpu.memory_space<vmem>>, vector<1x32x128xbf16>
    %191 = vector.shape_cast %190 : vector<1x32x128xbf16> to vector<32x128xbf16>
    %cst_91 = arith.constant dense<0.000000e+00> : vector<8x128xf32>
    %192 = tpu.matmul %189, %191, %cst_91 {dimension_numbers = #tpu.dot_dimension_numbers<[1], [0], [0], [1], [0, 0, 1, 1], [], []>} : vector<8x32xbf16>, vector<32x128xbf16>, vector<8x128xf32> -> vector<8x128xf32>
    %193 = arith.addf %188, %192 : vector<8x128xf32>
    %194 = arith.addf %193, %3 : vector<8x128xf32>
    %195 = arith.negf %194 : vector<8x128xf32>
    %196 = math.exp %195 : vector<8x128xf32>
    %cst_92 = arith.constant 1.000000e+00 : f32
    %197 = vector.broadcast %cst_92 : f32 to vector<8x128xf32>
    %198 = arith.addf %197, %196 : vector<8x128xf32>
    %199 = arith.divf %197, %198 : vector<8x128xf32>
    %200 = math.tanh %194 : vector<8x128xf32>
    %201 = vector.extract_strided_slice %199 {offsets = [0, 0], sizes = [8, 32], strides = [1, 1]} : vector<8x128xf32> to vector<8x32xf32>
    %202 = vector.extract_strided_slice %199 {offsets = [0, 32], sizes = [8, 32], strides = [1, 1]} : vector<8x128xf32> to vector<8x32xf32>
    %203 = vector.extract_strided_slice %200 {offsets = [0, 64], sizes = [8, 32], strides = [1, 1]} : vector<8x128xf32> to vector<8x32xf32>
    %204 = vector.extract_strided_slice %199 {offsets = [0, 96], sizes = [8, 32], strides = [1, 1]} : vector<8x128xf32> to vector<8x32xf32>
    %205 = arith.mulf %202, %131 : vector<8x32xf32>
    %206 = arith.mulf %201, %203 : vector<8x32xf32>
    %207 = arith.addf %205, %206 : vector<8x32xf32>
    %208 = math.tanh %207 : vector<8x32xf32>
    %209 = arith.mulf %204, %208 : vector<8x32xf32>
    %210 = arith.truncf %209 : vector<8x32xf32> to vector<8x32xbf16>
    %c1_93 = arith.constant 1 : index
    %c0_94 = arith.constant 0 : index
    %c0_95 = arith.constant 0 : index
    %211 = vector.load %arg1[%c1_93, %c0_94, %c0_95] : memref<6x32x128xbf16, #tpu.memory_space<vmem>>, vector<1x32x128xbf16>
    %212 = vector.shape_cast %211 : vector<1x32x128xbf16> to vector<32x128xbf16>
    %cst_96 = arith.constant dense<0.000000e+00> : vector<8x128xf32>
    %213 = tpu.matmul %210, %212, %cst_96 {dimension_numbers = #tpu.dot_dimension_numbers<[1], [0], [0], [1], [0, 0, 1, 1], [], []>} : vector<8x32xbf16>, vector<32x128xbf16>, vector<8x128xf32> -> vector<8x128xf32>
    %214 = arith.truncf %158 : vector<8x32xf32> to vector<8x32xbf16>
    %c1_97 = arith.constant 1 : index
    %c0_98 = arith.constant 0 : index
    %c0_99 = arith.constant 0 : index
    %215 = vector.load %arg2[%c1_97, %c0_98, %c0_99] : memref<6x32x128xbf16, #tpu.memory_space<vmem>>, vector<1x32x128xbf16>
    %216 = vector.shape_cast %215 : vector<1x32x128xbf16> to vector<32x128xbf16>
    %cst_100 = arith.constant dense<0.000000e+00> : vector<8x128xf32>
    %217 = tpu.matmul %214, %216, %cst_100 {dimension_numbers = #tpu.dot_dimension_numbers<[1], [0], [0], [1], [0, 0, 1, 1], [], []>} : vector<8x32xbf16>, vector<32x128xbf16>, vector<8x128xf32> -> vector<8x128xf32>
    %218 = arith.addf %213, %217 : vector<8x128xf32>
    %219 = arith.addf %218, %7 : vector<8x128xf32>
    %220 = arith.negf %219 : vector<8x128xf32>
    %221 = math.exp %220 : vector<8x128xf32>
    %cst_101 = arith.constant 1.000000e+00 : f32
    %222 = vector.broadcast %cst_101 : f32 to vector<8x128xf32>
    %223 = arith.addf %222, %221 : vector<8x128xf32>
    %224 = arith.divf %222, %223 : vector<8x128xf32>
    %225 = math.tanh %219 : vector<8x128xf32>
    %226 = vector.extract_strided_slice %224 {offsets = [0, 0], sizes = [8, 32], strides = [1, 1]} : vector<8x128xf32> to vector<8x32xf32>
    %227 = vector.extract_strided_slice %224 {offsets = [0, 32], sizes = [8, 32], strides = [1, 1]} : vector<8x128xf32> to vector<8x32xf32>
    %228 = vector.extract_strided_slice %225 {offsets = [0, 64], sizes = [8, 32], strides = [1, 1]} : vector<8x128xf32> to vector<8x32xf32>
    %229 = vector.extract_strided_slice %224 {offsets = [0, 96], sizes = [8, 32], strides = [1, 1]} : vector<8x128xf32> to vector<8x32xf32>
    %230 = arith.mulf %227, %156 : vector<8x32xf32>
    %231 = arith.mulf %226, %228 : vector<8x32xf32>
    %232 = arith.addf %230, %231 : vector<8x32xf32>
    %233 = math.tanh %232 : vector<8x32xf32>
    %234 = arith.mulf %229, %233 : vector<8x32xf32>
    %235 = arith.truncf %234 : vector<8x32xf32> to vector<8x32xbf16>
    %c2_102 = arith.constant 2 : index
    %c0_103 = arith.constant 0 : index
    %c0_104 = arith.constant 0 : index
    %236 = vector.load %arg1[%c2_102, %c0_103, %c0_104] : memref<6x32x128xbf16, #tpu.memory_space<vmem>>, vector<1x32x128xbf16>
    %237 = vector.shape_cast %236 : vector<1x32x128xbf16> to vector<32x128xbf16>
    %cst_105 = arith.constant dense<0.000000e+00> : vector<8x128xf32>
    %238 = tpu.matmul %235, %237, %cst_105 {dimension_numbers = #tpu.dot_dimension_numbers<[1], [0], [0], [1], [0, 0, 1, 1], [], []>} : vector<8x32xbf16>, vector<32x128xbf16>, vector<8x128xf32> -> vector<8x128xf32>
    %239 = arith.truncf %183 : vector<8x32xf32> to vector<8x32xbf16>
    %c2_106 = arith.constant 2 : index
    %c0_107 = arith.constant 0 : index
    %c0_108 = arith.constant 0 : index
    %240 = vector.load %arg2[%c2_106, %c0_107, %c0_108] : memref<6x32x128xbf16, #tpu.memory_space<vmem>>, vector<1x32x128xbf16>
    %241 = vector.shape_cast %240 : vector<1x32x128xbf16> to vector<32x128xbf16>
    %cst_109 = arith.constant dense<0.000000e+00> : vector<8x128xf32>
    %242 = tpu.matmul %239, %241, %cst_109 {dimension_numbers = #tpu.dot_dimension_numbers<[1], [0], [0], [1], [0, 0, 1, 1], [], []>} : vector<8x32xbf16>, vector<32x128xbf16>, vector<8x128xf32> -> vector<8x128xf32>
    %243 = arith.addf %238, %242 : vector<8x128xf32>
    %244 = arith.addf %243, %11 : vector<8x128xf32>
    %245 = arith.negf %244 : vector<8x128xf32>
    %246 = math.exp %245 : vector<8x128xf32>
    %cst_110 = arith.constant 1.000000e+00 : f32
    %247 = vector.broadcast %cst_110 : f32 to vector<8x128xf32>
    %248 = arith.addf %247, %246 : vector<8x128xf32>
    %249 = arith.divf %247, %248 : vector<8x128xf32>
    %250 = math.tanh %244 : vector<8x128xf32>
    %251 = vector.extract_strided_slice %249 {offsets = [0, 0], sizes = [8, 32], strides = [1, 1]} : vector<8x128xf32> to vector<8x32xf32>
    %252 = vector.extract_strided_slice %249 {offsets = [0, 32], sizes = [8, 32], strides = [1, 1]} : vector<8x128xf32> to vector<8x32xf32>
    %253 = vector.extract_strided_slice %250 {offsets = [0, 64], sizes = [8, 32], strides = [1, 1]} : vector<8x128xf32> to vector<8x32xf32>
    %254 = vector.extract_strided_slice %249 {offsets = [0, 96], sizes = [8, 32], strides = [1, 1]} : vector<8x128xf32> to vector<8x32xf32>
    %255 = arith.mulf %252, %181 : vector<8x32xf32>
    %256 = arith.mulf %251, %253 : vector<8x32xf32>
    %257 = arith.addf %255, %256 : vector<8x32xf32>
    %258 = math.tanh %257 : vector<8x32xf32>
    %259 = arith.mulf %254, %258 : vector<8x32xf32>
    %c3_111 = arith.constant 3 : index
    %c0_112 = arith.constant 0 : index
    %c0_113 = arith.constant 0 : index
    %260 = vector.load %arg0[%c3_111, %c0_112, %c0_113] : memref<8x8x32xbf16, #tpu.memory_space<vmem>>, vector<1x8x32xbf16>
    %261 = vector.shape_cast %260 : vector<1x8x32xbf16> to vector<8x32xbf16>
    %c0_114 = arith.constant 0 : index
    %c0_115 = arith.constant 0 : index
    %c0_116 = arith.constant 0 : index
    %262 = vector.load %arg1[%c0_114, %c0_115, %c0_116] : memref<6x32x128xbf16, #tpu.memory_space<vmem>>, vector<1x32x128xbf16>
    %263 = vector.shape_cast %262 : vector<1x32x128xbf16> to vector<32x128xbf16>
    %cst_117 = arith.constant dense<0.000000e+00> : vector<8x128xf32>
    %264 = tpu.matmul %261, %263, %cst_117 {dimension_numbers = #tpu.dot_dimension_numbers<[1], [0], [0], [1], [0, 0, 1, 1], [], []>} : vector<8x32xbf16>, vector<32x128xbf16>, vector<8x128xf32> -> vector<8x128xf32>
    %265 = arith.truncf %209 : vector<8x32xf32> to vector<8x32xbf16>
    %c0_118 = arith.constant 0 : index
    %c0_119 = arith.constant 0 : index
    %c0_120 = arith.constant 0 : index
    %266 = vector.load %arg2[%c0_118, %c0_119, %c0_120] : memref<6x32x128xbf16, #tpu.memory_space<vmem>>, vector<1x32x128xbf16>
    %267 = vector.shape_cast %266 : vector<1x32x128xbf16> to vector<32x128xbf16>
    %cst_121 = arith.constant dense<0.000000e+00> : vector<8x128xf32>
    %268 = tpu.matmul %265, %267, %cst_121 {dimension_numbers = #tpu.dot_dimension_numbers<[1], [0], [0], [1], [0, 0, 1, 1], [], []>} : vector<8x32xbf16>, vector<32x128xbf16>, vector<8x128xf32> -> vector<8x128xf32>
    %269 = arith.addf %264, %268 : vector<8x128xf32>
    %270 = arith.addf %269, %3 : vector<8x128xf32>
    %271 = arith.negf %270 : vector<8x128xf32>
    %272 = math.exp %271 : vector<8x128xf32>
    %cst_122 = arith.constant 1.000000e+00 : f32
    %273 = vector.broadcast %cst_122 : f32 to vector<8x128xf32>
    %274 = arith.addf %273, %272 : vector<8x128xf32>
    %275 = arith.divf %273, %274 : vector<8x128xf32>
    %276 = math.tanh %270 : vector<8x128xf32>
    %277 = vector.extract_strided_slice %275 {offsets = [0, 0], sizes = [8, 32], strides = [1, 1]} : vector<8x128xf32> to vector<8x32xf32>
    %278 = vector.extract_strided_slice %275 {offsets = [0, 32], sizes = [8, 32], strides = [1, 1]} : vector<8x128xf32> to vector<8x32xf32>
    %279 = vector.extract_strided_slice %276 {offsets = [0, 64], sizes = [8, 32], strides = [1, 1]} : vector<8x128xf32> to vector<8x32xf32>
    %280 = vector.extract_strided_slice %275 {offsets = [0, 96], sizes = [8, 32], strides = [1, 1]} : vector<8x128xf32> to vector<8x32xf32>
    %281 = arith.mulf %278, %207 : vector<8x32xf32>
    %282 = arith.mulf %277, %279 : vector<8x32xf32>
    %283 = arith.addf %281, %282 : vector<8x32xf32>
    %284 = math.tanh %283 : vector<8x32xf32>
    %285 = arith.mulf %280, %284 : vector<8x32xf32>
    %286 = arith.truncf %285 : vector<8x32xf32> to vector<8x32xbf16>
    %c1_123 = arith.constant 1 : index
    %c0_124 = arith.constant 0 : index
    %c0_125 = arith.constant 0 : index
    %287 = vector.load %arg1[%c1_123, %c0_124, %c0_125] : memref<6x32x128xbf16, #tpu.memory_space<vmem>>, vector<1x32x128xbf16>
    %288 = vector.shape_cast %287 : vector<1x32x128xbf16> to vector<32x128xbf16>
    %cst_126 = arith.constant dense<0.000000e+00> : vector<8x128xf32>
    %289 = tpu.matmul %286, %288, %cst_126 {dimension_numbers = #tpu.dot_dimension_numbers<[1], [0], [0], [1], [0, 0, 1, 1], [], []>} : vector<8x32xbf16>, vector<32x128xbf16>, vector<8x128xf32> -> vector<8x128xf32>
    %290 = arith.truncf %234 : vector<8x32xf32> to vector<8x32xbf16>
    %c1_127 = arith.constant 1 : index
    %c0_128 = arith.constant 0 : index
    %c0_129 = arith.constant 0 : index
    %291 = vector.load %arg2[%c1_127, %c0_128, %c0_129] : memref<6x32x128xbf16, #tpu.memory_space<vmem>>, vector<1x32x128xbf16>
    %292 = vector.shape_cast %291 : vector<1x32x128xbf16> to vector<32x128xbf16>
    %cst_130 = arith.constant dense<0.000000e+00> : vector<8x128xf32>
    %293 = tpu.matmul %290, %292, %cst_130 {dimension_numbers = #tpu.dot_dimension_numbers<[1], [0], [0], [1], [0, 0, 1, 1], [], []>} : vector<8x32xbf16>, vector<32x128xbf16>, vector<8x128xf32> -> vector<8x128xf32>
    %294 = arith.addf %289, %293 : vector<8x128xf32>
    %295 = arith.addf %294, %7 : vector<8x128xf32>
    %296 = arith.negf %295 : vector<8x128xf32>
    %297 = math.exp %296 : vector<8x128xf32>
    %cst_131 = arith.constant 1.000000e+00 : f32
    %298 = vector.broadcast %cst_131 : f32 to vector<8x128xf32>
    %299 = arith.addf %298, %297 : vector<8x128xf32>
    %300 = arith.divf %298, %299 : vector<8x128xf32>
    %301 = math.tanh %295 : vector<8x128xf32>
    %302 = vector.extract_strided_slice %300 {offsets = [0, 0], sizes = [8, 32], strides = [1, 1]} : vector<8x128xf32> to vector<8x32xf32>
    %303 = vector.extract_strided_slice %300 {offsets = [0, 32], sizes = [8, 32], strides = [1, 1]} : vector<8x128xf32> to vector<8x32xf32>
    %304 = vector.extract_strided_slice %301 {offsets = [0, 64], sizes = [8, 32], strides = [1, 1]} : vector<8x128xf32> to vector<8x32xf32>
    %305 = vector.extract_strided_slice %300 {offsets = [0, 96], sizes = [8, 32], strides = [1, 1]} : vector<8x128xf32> to vector<8x32xf32>
    %306 = arith.mulf %303, %232 : vector<8x32xf32>
    %307 = arith.mulf %302, %304 : vector<8x32xf32>
    %308 = arith.addf %306, %307 : vector<8x32xf32>
    %309 = math.tanh %308 : vector<8x32xf32>
    %310 = arith.mulf %305, %309 : vector<8x32xf32>
    %311 = arith.truncf %310 : vector<8x32xf32> to vector<8x32xbf16>
    %c2_132 = arith.constant 2 : index
    %c0_133 = arith.constant 0 : index
    %c0_134 = arith.constant 0 : index
    %312 = vector.load %arg1[%c2_132, %c0_133, %c0_134] : memref<6x32x128xbf16, #tpu.memory_space<vmem>>, vector<1x32x128xbf16>
    %313 = vector.shape_cast %312 : vector<1x32x128xbf16> to vector<32x128xbf16>
    %cst_135 = arith.constant dense<0.000000e+00> : vector<8x128xf32>
    %314 = tpu.matmul %311, %313, %cst_135 {dimension_numbers = #tpu.dot_dimension_numbers<[1], [0], [0], [1], [0, 0, 1, 1], [], []>} : vector<8x32xbf16>, vector<32x128xbf16>, vector<8x128xf32> -> vector<8x128xf32>
    %315 = arith.truncf %259 : vector<8x32xf32> to vector<8x32xbf16>
    %c2_136 = arith.constant 2 : index
    %c0_137 = arith.constant 0 : index
    %c0_138 = arith.constant 0 : index
    %316 = vector.load %arg2[%c2_136, %c0_137, %c0_138] : memref<6x32x128xbf16, #tpu.memory_space<vmem>>, vector<1x32x128xbf16>
    %317 = vector.shape_cast %316 : vector<1x32x128xbf16> to vector<32x128xbf16>
    %cst_139 = arith.constant dense<0.000000e+00> : vector<8x128xf32>
    %318 = tpu.matmul %315, %317, %cst_139 {dimension_numbers = #tpu.dot_dimension_numbers<[1], [0], [0], [1], [0, 0, 1, 1], [], []>} : vector<8x32xbf16>, vector<32x128xbf16>, vector<8x128xf32> -> vector<8x128xf32>
    %319 = arith.addf %314, %318 : vector<8x128xf32>
    %320 = arith.addf %319, %11 : vector<8x128xf32>
    %321 = arith.negf %320 : vector<8x128xf32>
    %322 = math.exp %321 : vector<8x128xf32>
    %cst_140 = arith.constant 1.000000e+00 : f32
    %323 = vector.broadcast %cst_140 : f32 to vector<8x128xf32>
    %324 = arith.addf %323, %322 : vector<8x128xf32>
    %325 = arith.divf %323, %324 : vector<8x128xf32>
    %326 = math.tanh %320 : vector<8x128xf32>
    %327 = vector.extract_strided_slice %325 {offsets = [0, 0], sizes = [8, 32], strides = [1, 1]} : vector<8x128xf32> to vector<8x32xf32>
    %328 = vector.extract_strided_slice %325 {offsets = [0, 32], sizes = [8, 32], strides = [1, 1]} : vector<8x128xf32> to vector<8x32xf32>
    %329 = vector.extract_strided_slice %326 {offsets = [0, 64], sizes = [8, 32], strides = [1, 1]} : vector<8x128xf32> to vector<8x32xf32>
    %330 = vector.extract_strided_slice %325 {offsets = [0, 96], sizes = [8, 32], strides = [1, 1]} : vector<8x128xf32> to vector<8x32xf32>
    %331 = arith.mulf %328, %257 : vector<8x32xf32>
    %332 = arith.mulf %327, %329 : vector<8x32xf32>
    %333 = arith.addf %331, %332 : vector<8x32xf32>
    %334 = math.tanh %333 : vector<8x32xf32>
    %335 = arith.mulf %330, %334 : vector<8x32xf32>
    %c4_141 = arith.constant 4 : index
    %c0_142 = arith.constant 0 : index
    %c0_143 = arith.constant 0 : index
    %336 = vector.load %arg0[%c4_141, %c0_142, %c0_143] : memref<8x8x32xbf16, #tpu.memory_space<vmem>>, vector<1x8x32xbf16>
    %337 = vector.shape_cast %336 : vector<1x8x32xbf16> to vector<8x32xbf16>
    %c0_144 = arith.constant 0 : index
    %c0_145 = arith.constant 0 : index
    %c0_146 = arith.constant 0 : index
    %338 = vector.load %arg1[%c0_144, %c0_145, %c0_146] : memref<6x32x128xbf16, #tpu.memory_space<vmem>>, vector<1x32x128xbf16>
    %339 = vector.shape_cast %338 : vector<1x32x128xbf16> to vector<32x128xbf16>
    %cst_147 = arith.constant dense<0.000000e+00> : vector<8x128xf32>
    %340 = tpu.matmul %337, %339, %cst_147 {dimension_numbers = #tpu.dot_dimension_numbers<[1], [0], [0], [1], [0, 0, 1, 1], [], []>} : vector<8x32xbf16>, vector<32x128xbf16>, vector<8x128xf32> -> vector<8x128xf32>
    %341 = arith.truncf %285 : vector<8x32xf32> to vector<8x32xbf16>
    %c0_148 = arith.constant 0 : index
    %c0_149 = arith.constant 0 : index
    %c0_150 = arith.constant 0 : index
    %342 = vector.load %arg2[%c0_148, %c0_149, %c0_150] : memref<6x32x128xbf16, #tpu.memory_space<vmem>>, vector<1x32x128xbf16>
    %343 = vector.shape_cast %342 : vector<1x32x128xbf16> to vector<32x128xbf16>
    %cst_151 = arith.constant dense<0.000000e+00> : vector<8x128xf32>
    %344 = tpu.matmul %341, %343, %cst_151 {dimension_numbers = #tpu.dot_dimension_numbers<[1], [0], [0], [1], [0, 0, 1, 1], [], []>} : vector<8x32xbf16>, vector<32x128xbf16>, vector<8x128xf32> -> vector<8x128xf32>
    %345 = arith.addf %340, %344 : vector<8x128xf32>
    %346 = arith.addf %345, %3 : vector<8x128xf32>
    %347 = arith.negf %346 : vector<8x128xf32>
    %348 = math.exp %347 : vector<8x128xf32>
    %cst_152 = arith.constant 1.000000e+00 : f32
    %349 = vector.broadcast %cst_152 : f32 to vector<8x128xf32>
    %350 = arith.addf %349, %348 : vector<8x128xf32>
    %351 = arith.divf %349, %350 : vector<8x128xf32>
    %352 = math.tanh %346 : vector<8x128xf32>
    %353 = vector.extract_strided_slice %351 {offsets = [0, 0], sizes = [8, 32], strides = [1, 1]} : vector<8x128xf32> to vector<8x32xf32>
    %354 = vector.extract_strided_slice %351 {offsets = [0, 32], sizes = [8, 32], strides = [1, 1]} : vector<8x128xf32> to vector<8x32xf32>
    %355 = vector.extract_strided_slice %352 {offsets = [0, 64], sizes = [8, 32], strides = [1, 1]} : vector<8x128xf32> to vector<8x32xf32>
    %356 = vector.extract_strided_slice %351 {offsets = [0, 96], sizes = [8, 32], strides = [1, 1]} : vector<8x128xf32> to vector<8x32xf32>
    %357 = arith.mulf %354, %283 : vector<8x32xf32>
    %358 = arith.mulf %353, %355 : vector<8x32xf32>
    %359 = arith.addf %357, %358 : vector<8x32xf32>
    %360 = math.tanh %359 : vector<8x32xf32>
    %361 = arith.mulf %356, %360 : vector<8x32xf32>
    %362 = arith.truncf %361 : vector<8x32xf32> to vector<8x32xbf16>
    %c1_153 = arith.constant 1 : index
    %c0_154 = arith.constant 0 : index
    %c0_155 = arith.constant 0 : index
    %363 = vector.load %arg1[%c1_153, %c0_154, %c0_155] : memref<6x32x128xbf16, #tpu.memory_space<vmem>>, vector<1x32x128xbf16>
    %364 = vector.shape_cast %363 : vector<1x32x128xbf16> to vector<32x128xbf16>
    %cst_156 = arith.constant dense<0.000000e+00> : vector<8x128xf32>
    %365 = tpu.matmul %362, %364, %cst_156 {dimension_numbers = #tpu.dot_dimension_numbers<[1], [0], [0], [1], [0, 0, 1, 1], [], []>} : vector<8x32xbf16>, vector<32x128xbf16>, vector<8x128xf32> -> vector<8x128xf32>
    %366 = arith.truncf %310 : vector<8x32xf32> to vector<8x32xbf16>
    %c1_157 = arith.constant 1 : index
    %c0_158 = arith.constant 0 : index
    %c0_159 = arith.constant 0 : index
    %367 = vector.load %arg2[%c1_157, %c0_158, %c0_159] : memref<6x32x128xbf16, #tpu.memory_space<vmem>>, vector<1x32x128xbf16>
    %368 = vector.shape_cast %367 : vector<1x32x128xbf16> to vector<32x128xbf16>
    %cst_160 = arith.constant dense<0.000000e+00> : vector<8x128xf32>
    %369 = tpu.matmul %366, %368, %cst_160 {dimension_numbers = #tpu.dot_dimension_numbers<[1], [0], [0], [1], [0, 0, 1, 1], [], []>} : vector<8x32xbf16>, vector<32x128xbf16>, vector<8x128xf32> -> vector<8x128xf32>
    %370 = arith.addf %365, %369 : vector<8x128xf32>
    %371 = arith.addf %370, %7 : vector<8x128xf32>
    %372 = arith.negf %371 : vector<8x128xf32>
    %373 = math.exp %372 : vector<8x128xf32>
    %cst_161 = arith.constant 1.000000e+00 : f32
    %374 = vector.broadcast %cst_161 : f32 to vector<8x128xf32>
    %375 = arith.addf %374, %373 : vector<8x128xf32>
    %376 = arith.divf %374, %375 : vector<8x128xf32>
    %377 = math.tanh %371 : vector<8x128xf32>
    %378 = vector.extract_strided_slice %376 {offsets = [0, 0], sizes = [8, 32], strides = [1, 1]} : vector<8x128xf32> to vector<8x32xf32>
    %379 = vector.extract_strided_slice %376 {offsets = [0, 32], sizes = [8, 32], strides = [1, 1]} : vector<8x128xf32> to vector<8x32xf32>
    %380 = vector.extract_strided_slice %377 {offsets = [0, 64], sizes = [8, 32], strides = [1, 1]} : vector<8x128xf32> to vector<8x32xf32>
    %381 = vector.extract_strided_slice %376 {offsets = [0, 96], sizes = [8, 32], strides = [1, 1]} : vector<8x128xf32> to vector<8x32xf32>
    %382 = arith.mulf %379, %308 : vector<8x32xf32>
    %383 = arith.mulf %378, %380 : vector<8x32xf32>
    %384 = arith.addf %382, %383 : vector<8x32xf32>
    %385 = math.tanh %384 : vector<8x32xf32>
    %386 = arith.mulf %381, %385 : vector<8x32xf32>
    %387 = arith.truncf %386 : vector<8x32xf32> to vector<8x32xbf16>
    %c2_162 = arith.constant 2 : index
    %c0_163 = arith.constant 0 : index
    %c0_164 = arith.constant 0 : index
    %388 = vector.load %arg1[%c2_162, %c0_163, %c0_164] : memref<6x32x128xbf16, #tpu.memory_space<vmem>>, vector<1x32x128xbf16>
    %389 = vector.shape_cast %388 : vector<1x32x128xbf16> to vector<32x128xbf16>
    %cst_165 = arith.constant dense<0.000000e+00> : vector<8x128xf32>
    %390 = tpu.matmul %387, %389, %cst_165 {dimension_numbers = #tpu.dot_dimension_numbers<[1], [0], [0], [1], [0, 0, 1, 1], [], []>} : vector<8x32xbf16>, vector<32x128xbf16>, vector<8x128xf32> -> vector<8x128xf32>
    %391 = arith.truncf %335 : vector<8x32xf32> to vector<8x32xbf16>
    %c2_166 = arith.constant 2 : index
    %c0_167 = arith.constant 0 : index
    %c0_168 = arith.constant 0 : index
    %392 = vector.load %arg2[%c2_166, %c0_167, %c0_168] : memref<6x32x128xbf16, #tpu.memory_space<vmem>>, vector<1x32x128xbf16>
    %393 = vector.shape_cast %392 : vector<1x32x128xbf16> to vector<32x128xbf16>
    %cst_169 = arith.constant dense<0.000000e+00> : vector<8x128xf32>
    %394 = tpu.matmul %391, %393, %cst_169 {dimension_numbers = #tpu.dot_dimension_numbers<[1], [0], [0], [1], [0, 0, 1, 1], [], []>} : vector<8x32xbf16>, vector<32x128xbf16>, vector<8x128xf32> -> vector<8x128xf32>
    %395 = arith.addf %390, %394 : vector<8x128xf32>
    %396 = arith.addf %395, %11 : vector<8x128xf32>
    %397 = arith.negf %396 : vector<8x128xf32>
    %398 = math.exp %397 : vector<8x128xf32>
    %cst_170 = arith.constant 1.000000e+00 : f32
    %399 = vector.broadcast %cst_170 : f32 to vector<8x128xf32>
    %400 = arith.addf %399, %398 : vector<8x128xf32>
    %401 = arith.divf %399, %400 : vector<8x128xf32>
    %402 = math.tanh %396 : vector<8x128xf32>
    %403 = vector.extract_strided_slice %401 {offsets = [0, 0], sizes = [8, 32], strides = [1, 1]} : vector<8x128xf32> to vector<8x32xf32>
    %404 = vector.extract_strided_slice %401 {offsets = [0, 32], sizes = [8, 32], strides = [1, 1]} : vector<8x128xf32> to vector<8x32xf32>
    %405 = vector.extract_strided_slice %402 {offsets = [0, 64], sizes = [8, 32], strides = [1, 1]} : vector<8x128xf32> to vector<8x32xf32>
    %406 = vector.extract_strided_slice %401 {offsets = [0, 96], sizes = [8, 32], strides = [1, 1]} : vector<8x128xf32> to vector<8x32xf32>
    %407 = arith.mulf %404, %333 : vector<8x32xf32>
    %408 = arith.mulf %403, %405 : vector<8x32xf32>
    %409 = arith.addf %407, %408 : vector<8x32xf32>
    %410 = math.tanh %409 : vector<8x32xf32>
    %411 = arith.mulf %406, %410 : vector<8x32xf32>
    %c5_171 = arith.constant 5 : index
    %c0_172 = arith.constant 0 : index
    %c0_173 = arith.constant 0 : index
    %412 = vector.load %arg0[%c5_171, %c0_172, %c0_173] : memref<8x8x32xbf16, #tpu.memory_space<vmem>>, vector<1x8x32xbf16>
    %413 = vector.shape_cast %412 : vector<1x8x32xbf16> to vector<8x32xbf16>
    %c0_174 = arith.constant 0 : index
    %c0_175 = arith.constant 0 : index
    %c0_176 = arith.constant 0 : index
    %414 = vector.load %arg1[%c0_174, %c0_175, %c0_176] : memref<6x32x128xbf16, #tpu.memory_space<vmem>>, vector<1x32x128xbf16>
    %415 = vector.shape_cast %414 : vector<1x32x128xbf16> to vector<32x128xbf16>
    %cst_177 = arith.constant dense<0.000000e+00> : vector<8x128xf32>
    %416 = tpu.matmul %413, %415, %cst_177 {dimension_numbers = #tpu.dot_dimension_numbers<[1], [0], [0], [1], [0, 0, 1, 1], [], []>} : vector<8x32xbf16>, vector<32x128xbf16>, vector<8x128xf32> -> vector<8x128xf32>
    %417 = arith.truncf %361 : vector<8x32xf32> to vector<8x32xbf16>
    %c0_178 = arith.constant 0 : index
    %c0_179 = arith.constant 0 : index
    %c0_180 = arith.constant 0 : index
    %418 = vector.load %arg2[%c0_178, %c0_179, %c0_180] : memref<6x32x128xbf16, #tpu.memory_space<vmem>>, vector<1x32x128xbf16>
    %419 = vector.shape_cast %418 : vector<1x32x128xbf16> to vector<32x128xbf16>
    %cst_181 = arith.constant dense<0.000000e+00> : vector<8x128xf32>
    %420 = tpu.matmul %417, %419, %cst_181 {dimension_numbers = #tpu.dot_dimension_numbers<[1], [0], [0], [1], [0, 0, 1, 1], [], []>} : vector<8x32xbf16>, vector<32x128xbf16>, vector<8x128xf32> -> vector<8x128xf32>
    %421 = arith.addf %416, %420 : vector<8x128xf32>
    %422 = arith.addf %421, %3 : vector<8x128xf32>
    %423 = arith.negf %422 : vector<8x128xf32>
    %424 = math.exp %423 : vector<8x128xf32>
    %cst_182 = arith.constant 1.000000e+00 : f32
    %425 = vector.broadcast %cst_182 : f32 to vector<8x128xf32>
    %426 = arith.addf %425, %424 : vector<8x128xf32>
    %427 = arith.divf %425, %426 : vector<8x128xf32>
    %428 = math.tanh %422 : vector<8x128xf32>
    %429 = vector.extract_strided_slice %427 {offsets = [0, 0], sizes = [8, 32], strides = [1, 1]} : vector<8x128xf32> to vector<8x32xf32>
    %430 = vector.extract_strided_slice %427 {offsets = [0, 32], sizes = [8, 32], strides = [1, 1]} : vector<8x128xf32> to vector<8x32xf32>
    %431 = vector.extract_strided_slice %428 {offsets = [0, 64], sizes = [8, 32], strides = [1, 1]} : vector<8x128xf32> to vector<8x32xf32>
    %432 = vector.extract_strided_slice %427 {offsets = [0, 96], sizes = [8, 32], strides = [1, 1]} : vector<8x128xf32> to vector<8x32xf32>
    %433 = arith.mulf %430, %359 : vector<8x32xf32>
    %434 = arith.mulf %429, %431 : vector<8x32xf32>
    %435 = arith.addf %433, %434 : vector<8x32xf32>
    %436 = math.tanh %435 : vector<8x32xf32>
    %437 = arith.mulf %432, %436 : vector<8x32xf32>
    %438 = arith.truncf %437 : vector<8x32xf32> to vector<8x32xbf16>
    %c1_183 = arith.constant 1 : index
    %c0_184 = arith.constant 0 : index
    %c0_185 = arith.constant 0 : index
    %439 = vector.load %arg1[%c1_183, %c0_184, %c0_185] : memref<6x32x128xbf16, #tpu.memory_space<vmem>>, vector<1x32x128xbf16>
    %440 = vector.shape_cast %439 : vector<1x32x128xbf16> to vector<32x128xbf16>
    %cst_186 = arith.constant dense<0.000000e+00> : vector<8x128xf32>
    %441 = tpu.matmul %438, %440, %cst_186 {dimension_numbers = #tpu.dot_dimension_numbers<[1], [0], [0], [1], [0, 0, 1, 1], [], []>} : vector<8x32xbf16>, vector<32x128xbf16>, vector<8x128xf32> -> vector<8x128xf32>
    %442 = arith.truncf %386 : vector<8x32xf32> to vector<8x32xbf16>
    %c1_187 = arith.constant 1 : index
    %c0_188 = arith.constant 0 : index
    %c0_189 = arith.constant 0 : index
    %443 = vector.load %arg2[%c1_187, %c0_188, %c0_189] : memref<6x32x128xbf16, #tpu.memory_space<vmem>>, vector<1x32x128xbf16>
    %444 = vector.shape_cast %443 : vector<1x32x128xbf16> to vector<32x128xbf16>
    %cst_190 = arith.constant dense<0.000000e+00> : vector<8x128xf32>
    %445 = tpu.matmul %442, %444, %cst_190 {dimension_numbers = #tpu.dot_dimension_numbers<[1], [0], [0], [1], [0, 0, 1, 1], [], []>} : vector<8x32xbf16>, vector<32x128xbf16>, vector<8x128xf32> -> vector<8x128xf32>
    %446 = arith.addf %441, %445 : vector<8x128xf32>
    %447 = arith.addf %446, %7 : vector<8x128xf32>
    %448 = arith.negf %447 : vector<8x128xf32>
    %449 = math.exp %448 : vector<8x128xf32>
    %cst_191 = arith.constant 1.000000e+00 : f32
    %450 = vector.broadcast %cst_191 : f32 to vector<8x128xf32>
    %451 = arith.addf %450, %449 : vector<8x128xf32>
    %452 = arith.divf %450, %451 : vector<8x128xf32>
    %453 = math.tanh %447 : vector<8x128xf32>
    %454 = vector.extract_strided_slice %452 {offsets = [0, 0], sizes = [8, 32], strides = [1, 1]} : vector<8x128xf32> to vector<8x32xf32>
    %455 = vector.extract_strided_slice %452 {offsets = [0, 32], sizes = [8, 32], strides = [1, 1]} : vector<8x128xf32> to vector<8x32xf32>
    %456 = vector.extract_strided_slice %453 {offsets = [0, 64], sizes = [8, 32], strides = [1, 1]} : vector<8x128xf32> to vector<8x32xf32>
    %457 = vector.extract_strided_slice %452 {offsets = [0, 96], sizes = [8, 32], strides = [1, 1]} : vector<8x128xf32> to vector<8x32xf32>
    %458 = arith.mulf %455, %384 : vector<8x32xf32>
    %459 = arith.mulf %454, %456 : vector<8x32xf32>
    %460 = arith.addf %458, %459 : vector<8x32xf32>
    %461 = math.tanh %460 : vector<8x32xf32>
    %462 = arith.mulf %457, %461 : vector<8x32xf32>
    %463 = arith.truncf %462 : vector<8x32xf32> to vector<8x32xbf16>
    %c2_192 = arith.constant 2 : index
    %c0_193 = arith.constant 0 : index
    %c0_194 = arith.constant 0 : index
    %464 = vector.load %arg1[%c2_192, %c0_193, %c0_194] : memref<6x32x128xbf16, #tpu.memory_space<vmem>>, vector<1x32x128xbf16>
    %465 = vector.shape_cast %464 : vector<1x32x128xbf16> to vector<32x128xbf16>
    %cst_195 = arith.constant dense<0.000000e+00> : vector<8x128xf32>
    %466 = tpu.matmul %463, %465, %cst_195 {dimension_numbers = #tpu.dot_dimension_numbers<[1], [0], [0], [1], [0, 0, 1, 1], [], []>} : vector<8x32xbf16>, vector<32x128xbf16>, vector<8x128xf32> -> vector<8x128xf32>
    %467 = arith.truncf %411 : vector<8x32xf32> to vector<8x32xbf16>
    %c2_196 = arith.constant 2 : index
    %c0_197 = arith.constant 0 : index
    %c0_198 = arith.constant 0 : index
    %468 = vector.load %arg2[%c2_196, %c0_197, %c0_198] : memref<6x32x128xbf16, #tpu.memory_space<vmem>>, vector<1x32x128xbf16>
    %469 = vector.shape_cast %468 : vector<1x32x128xbf16> to vector<32x128xbf16>
    %cst_199 = arith.constant dense<0.000000e+00> : vector<8x128xf32>
    %470 = tpu.matmul %467, %469, %cst_199 {dimension_numbers = #tpu.dot_dimension_numbers<[1], [0], [0], [1], [0, 0, 1, 1], [], []>} : vector<8x32xbf16>, vector<32x128xbf16>, vector<8x128xf32> -> vector<8x128xf32>
    %471 = arith.addf %466, %470 : vector<8x128xf32>
    %472 = arith.addf %471, %11 : vector<8x128xf32>
    %473 = arith.negf %472 : vector<8x128xf32>
    %474 = math.exp %473 : vector<8x128xf32>
    %cst_200 = arith.constant 1.000000e+00 : f32
    %475 = vector.broadcast %cst_200 : f32 to vector<8x128xf32>
    %476 = arith.addf %475, %474 : vector<8x128xf32>
    %477 = arith.divf %475, %476 : vector<8x128xf32>
    %478 = math.tanh %472 : vector<8x128xf32>
    %479 = vector.extract_strided_slice %477 {offsets = [0, 0], sizes = [8, 32], strides = [1, 1]} : vector<8x128xf32> to vector<8x32xf32>
    %480 = vector.extract_strided_slice %477 {offsets = [0, 32], sizes = [8, 32], strides = [1, 1]} : vector<8x128xf32> to vector<8x32xf32>
    %481 = vector.extract_strided_slice %478 {offsets = [0, 64], sizes = [8, 32], strides = [1, 1]} : vector<8x128xf32> to vector<8x32xf32>
    %482 = vector.extract_strided_slice %477 {offsets = [0, 96], sizes = [8, 32], strides = [1, 1]} : vector<8x128xf32> to vector<8x32xf32>
    %483 = arith.mulf %480, %409 : vector<8x32xf32>
    %484 = arith.mulf %479, %481 : vector<8x32xf32>
    %485 = arith.addf %483, %484 : vector<8x32xf32>
    %486 = math.tanh %485 : vector<8x32xf32>
    %487 = arith.mulf %482, %486 : vector<8x32xf32>
    %c6 = arith.constant 6 : index
    %c0_201 = arith.constant 0 : index
    %c0_202 = arith.constant 0 : index
    %488 = vector.load %arg0[%c6, %c0_201, %c0_202] : memref<8x8x32xbf16, #tpu.memory_space<vmem>>, vector<1x8x32xbf16>
    %489 = vector.shape_cast %488 : vector<1x8x32xbf16> to vector<8x32xbf16>
    %c0_203 = arith.constant 0 : index
    %c0_204 = arith.constant 0 : index
    %c0_205 = arith.constant 0 : index
    %490 = vector.load %arg1[%c0_203, %c0_204, %c0_205] : memref<6x32x128xbf16, #tpu.memory_space<vmem>>, vector<1x32x128xbf16>
    %491 = vector.shape_cast %490 : vector<1x32x128xbf16> to vector<32x128xbf16>
    %cst_206 = arith.constant dense<0.000000e+00> : vector<8x128xf32>
    %492 = tpu.matmul %489, %491, %cst_206 {dimension_numbers = #tpu.dot_dimension_numbers<[1], [0], [0], [1], [0, 0, 1, 1], [], []>} : vector<8x32xbf16>, vector<32x128xbf16>, vector<8x128xf32> -> vector<8x128xf32>
    %493 = arith.truncf %437 : vector<8x32xf32> to vector<8x32xbf16>
    %c0_207 = arith.constant 0 : index
    %c0_208 = arith.constant 0 : index
    %c0_209 = arith.constant 0 : index
    %494 = vector.load %arg2[%c0_207, %c0_208, %c0_209] : memref<6x32x128xbf16, #tpu.memory_space<vmem>>, vector<1x32x128xbf16>
    %495 = vector.shape_cast %494 : vector<1x32x128xbf16> to vector<32x128xbf16>
    %cst_210 = arith.constant dense<0.000000e+00> : vector<8x128xf32>
    %496 = tpu.matmul %493, %495, %cst_210 {dimension_numbers = #tpu.dot_dimension_numbers<[1], [0], [0], [1], [0, 0, 1, 1], [], []>} : vector<8x32xbf16>, vector<32x128xbf16>, vector<8x128xf32> -> vector<8x128xf32>
    %497 = arith.addf %492, %496 : vector<8x128xf32>
    %498 = arith.addf %497, %3 : vector<8x128xf32>
    %499 = arith.negf %498 : vector<8x128xf32>
    %500 = math.exp %499 : vector<8x128xf32>
    %cst_211 = arith.constant 1.000000e+00 : f32
    %501 = vector.broadcast %cst_211 : f32 to vector<8x128xf32>
    %502 = arith.addf %501, %500 : vector<8x128xf32>
    %503 = arith.divf %501, %502 : vector<8x128xf32>
    %504 = math.tanh %498 : vector<8x128xf32>
    %505 = vector.extract_strided_slice %503 {offsets = [0, 0], sizes = [8, 32], strides = [1, 1]} : vector<8x128xf32> to vector<8x32xf32>
    %506 = vector.extract_strided_slice %503 {offsets = [0, 32], sizes = [8, 32], strides = [1, 1]} : vector<8x128xf32> to vector<8x32xf32>
    %507 = vector.extract_strided_slice %504 {offsets = [0, 64], sizes = [8, 32], strides = [1, 1]} : vector<8x128xf32> to vector<8x32xf32>
    %508 = vector.extract_strided_slice %503 {offsets = [0, 96], sizes = [8, 32], strides = [1, 1]} : vector<8x128xf32> to vector<8x32xf32>
    %509 = arith.mulf %506, %435 : vector<8x32xf32>
    %510 = arith.mulf %505, %507 : vector<8x32xf32>
    %511 = arith.addf %509, %510 : vector<8x32xf32>
    %512 = math.tanh %511 : vector<8x32xf32>
    %513 = arith.mulf %508, %512 : vector<8x32xf32>
    %514 = arith.truncf %513 : vector<8x32xf32> to vector<8x32xbf16>
    %c1_212 = arith.constant 1 : index
    %c0_213 = arith.constant 0 : index
    %c0_214 = arith.constant 0 : index
    %515 = vector.load %arg1[%c1_212, %c0_213, %c0_214] : memref<6x32x128xbf16, #tpu.memory_space<vmem>>, vector<1x32x128xbf16>
    %516 = vector.shape_cast %515 : vector<1x32x128xbf16> to vector<32x128xbf16>
    %cst_215 = arith.constant dense<0.000000e+00> : vector<8x128xf32>
    %517 = tpu.matmul %514, %516, %cst_215 {dimension_numbers = #tpu.dot_dimension_numbers<[1], [0], [0], [1], [0, 0, 1, 1], [], []>} : vector<8x32xbf16>, vector<32x128xbf16>, vector<8x128xf32> -> vector<8x128xf32>
    %518 = arith.truncf %462 : vector<8x32xf32> to vector<8x32xbf16>
    %c1_216 = arith.constant 1 : index
    %c0_217 = arith.constant 0 : index
    %c0_218 = arith.constant 0 : index
    %519 = vector.load %arg2[%c1_216, %c0_217, %c0_218] : memref<6x32x128xbf16, #tpu.memory_space<vmem>>, vector<1x32x128xbf16>
    %520 = vector.shape_cast %519 : vector<1x32x128xbf16> to vector<32x128xbf16>
    %cst_219 = arith.constant dense<0.000000e+00> : vector<8x128xf32>
    %521 = tpu.matmul %518, %520, %cst_219 {dimension_numbers = #tpu.dot_dimension_numbers<[1], [0], [0], [1], [0, 0, 1, 1], [], []>} : vector<8x32xbf16>, vector<32x128xbf16>, vector<8x128xf32> -> vector<8x128xf32>
    %522 = arith.addf %517, %521 : vector<8x128xf32>
    %523 = arith.addf %522, %7 : vector<8x128xf32>
    %524 = arith.negf %523 : vector<8x128xf32>
    %525 = math.exp %524 : vector<8x128xf32>
    %cst_220 = arith.constant 1.000000e+00 : f32
    %526 = vector.broadcast %cst_220 : f32 to vector<8x128xf32>
    %527 = arith.addf %526, %525 : vector<8x128xf32>
    %528 = arith.divf %526, %527 : vector<8x128xf32>
    %529 = math.tanh %523 : vector<8x128xf32>
    %530 = vector.extract_strided_slice %528 {offsets = [0, 0], sizes = [8, 32], strides = [1, 1]} : vector<8x128xf32> to vector<8x32xf32>
    %531 = vector.extract_strided_slice %528 {offsets = [0, 32], sizes = [8, 32], strides = [1, 1]} : vector<8x128xf32> to vector<8x32xf32>
    %532 = vector.extract_strided_slice %529 {offsets = [0, 64], sizes = [8, 32], strides = [1, 1]} : vector<8x128xf32> to vector<8x32xf32>
    %533 = vector.extract_strided_slice %528 {offsets = [0, 96], sizes = [8, 32], strides = [1, 1]} : vector<8x128xf32> to vector<8x32xf32>
    %534 = arith.mulf %531, %460 : vector<8x32xf32>
    %535 = arith.mulf %530, %532 : vector<8x32xf32>
    %536 = arith.addf %534, %535 : vector<8x32xf32>
    %537 = math.tanh %536 : vector<8x32xf32>
    %538 = arith.mulf %533, %537 : vector<8x32xf32>
    %539 = arith.truncf %538 : vector<8x32xf32> to vector<8x32xbf16>
    %c2_221 = arith.constant 2 : index
    %c0_222 = arith.constant 0 : index
    %c0_223 = arith.constant 0 : index
    %540 = vector.load %arg1[%c2_221, %c0_222, %c0_223] : memref<6x32x128xbf16, #tpu.memory_space<vmem>>, vector<1x32x128xbf16>
    %541 = vector.shape_cast %540 : vector<1x32x128xbf16> to vector<32x128xbf16>
    %cst_224 = arith.constant dense<0.000000e+00> : vector<8x128xf32>
    %542 = tpu.matmul %539, %541, %cst_224 {dimension_numbers = #tpu.dot_dimension_numbers<[1], [0], [0], [1], [0, 0, 1, 1], [], []>} : vector<8x32xbf16>, vector<32x128xbf16>, vector<8x128xf32> -> vector<8x128xf32>
    %543 = arith.truncf %487 : vector<8x32xf32> to vector<8x32xbf16>
    %c2_225 = arith.constant 2 : index
    %c0_226 = arith.constant 0 : index
    %c0_227 = arith.constant 0 : index
    %544 = vector.load %arg2[%c2_225, %c0_226, %c0_227] : memref<6x32x128xbf16, #tpu.memory_space<vmem>>, vector<1x32x128xbf16>
    %545 = vector.shape_cast %544 : vector<1x32x128xbf16> to vector<32x128xbf16>
    %cst_228 = arith.constant dense<0.000000e+00> : vector<8x128xf32>
    %546 = tpu.matmul %543, %545, %cst_228 {dimension_numbers = #tpu.dot_dimension_numbers<[1], [0], [0], [1], [0, 0, 1, 1], [], []>} : vector<8x32xbf16>, vector<32x128xbf16>, vector<8x128xf32> -> vector<8x128xf32>
    %547 = arith.addf %542, %546 : vector<8x128xf32>
    %548 = arith.addf %547, %11 : vector<8x128xf32>
    %549 = arith.negf %548 : vector<8x128xf32>
    %550 = math.exp %549 : vector<8x128xf32>
    %cst_229 = arith.constant 1.000000e+00 : f32
    %551 = vector.broadcast %cst_229 : f32 to vector<8x128xf32>
    %552 = arith.addf %551, %550 : vector<8x128xf32>
    %553 = arith.divf %551, %552 : vector<8x128xf32>
    %554 = math.tanh %548 : vector<8x128xf32>
    %555 = vector.extract_strided_slice %553 {offsets = [0, 0], sizes = [8, 32], strides = [1, 1]} : vector<8x128xf32> to vector<8x32xf32>
    %556 = vector.extract_strided_slice %553 {offsets = [0, 32], sizes = [8, 32], strides = [1, 1]} : vector<8x128xf32> to vector<8x32xf32>
    %557 = vector.extract_strided_slice %554 {offsets = [0, 64], sizes = [8, 32], strides = [1, 1]} : vector<8x128xf32> to vector<8x32xf32>
    %558 = vector.extract_strided_slice %553 {offsets = [0, 96], sizes = [8, 32], strides = [1, 1]} : vector<8x128xf32> to vector<8x32xf32>
    %559 = arith.mulf %556, %485 : vector<8x32xf32>
    %560 = arith.mulf %555, %557 : vector<8x32xf32>
    %561 = arith.addf %559, %560 : vector<8x32xf32>
    %562 = math.tanh %561 : vector<8x32xf32>
    %563 = arith.mulf %558, %562 : vector<8x32xf32>
    %c7 = arith.constant 7 : index
    %c0_230 = arith.constant 0 : index
    %c0_231 = arith.constant 0 : index
    %564 = vector.load %arg0[%c7, %c0_230, %c0_231] : memref<8x8x32xbf16, #tpu.memory_space<vmem>>, vector<1x8x32xbf16>
    %565 = vector.shape_cast %564 : vector<1x8x32xbf16> to vector<8x32xbf16>
    %c0_232 = arith.constant 0 : index
    %c0_233 = arith.constant 0 : index
    %c0_234 = arith.constant 0 : index
    %566 = vector.load %arg1[%c0_232, %c0_233, %c0_234] : memref<6x32x128xbf16, #tpu.memory_space<vmem>>, vector<1x32x128xbf16>
    %567 = vector.shape_cast %566 : vector<1x32x128xbf16> to vector<32x128xbf16>
    %cst_235 = arith.constant dense<0.000000e+00> : vector<8x128xf32>
    %568 = tpu.matmul %565, %567, %cst_235 {dimension_numbers = #tpu.dot_dimension_numbers<[1], [0], [0], [1], [0, 0, 1, 1], [], []>} : vector<8x32xbf16>, vector<32x128xbf16>, vector<8x128xf32> -> vector<8x128xf32>
    %569 = arith.truncf %513 : vector<8x32xf32> to vector<8x32xbf16>
    %c0_236 = arith.constant 0 : index
    %c0_237 = arith.constant 0 : index
    %c0_238 = arith.constant 0 : index
    %570 = vector.load %arg2[%c0_236, %c0_237, %c0_238] : memref<6x32x128xbf16, #tpu.memory_space<vmem>>, vector<1x32x128xbf16>
    %571 = vector.shape_cast %570 : vector<1x32x128xbf16> to vector<32x128xbf16>
    %cst_239 = arith.constant dense<0.000000e+00> : vector<8x128xf32>
    %572 = tpu.matmul %569, %571, %cst_239 {dimension_numbers = #tpu.dot_dimension_numbers<[1], [0], [0], [1], [0, 0, 1, 1], [], []>} : vector<8x32xbf16>, vector<32x128xbf16>, vector<8x128xf32> -> vector<8x128xf32>
    %573 = arith.addf %568, %572 : vector<8x128xf32>
    %574 = arith.addf %573, %3 : vector<8x128xf32>
    %575 = arith.negf %574 : vector<8x128xf32>
    %576 = math.exp %575 : vector<8x128xf32>
    %cst_240 = arith.constant 1.000000e+00 : f32
    %577 = vector.broadcast %cst_240 : f32 to vector<8x128xf32>
    %578 = arith.addf %577, %576 : vector<8x128xf32>
    %579 = arith.divf %577, %578 : vector<8x128xf32>
    %580 = math.tanh %574 : vector<8x128xf32>
    %581 = vector.extract_strided_slice %579 {offsets = [0, 0], sizes = [8, 32], strides = [1, 1]} : vector<8x128xf32> to vector<8x32xf32>
    %582 = vector.extract_strided_slice %579 {offsets = [0, 32], sizes = [8, 32], strides = [1, 1]} : vector<8x128xf32> to vector<8x32xf32>
    %583 = vector.extract_strided_slice %580 {offsets = [0, 64], sizes = [8, 32], strides = [1, 1]} : vector<8x128xf32> to vector<8x32xf32>
    %584 = vector.extract_strided_slice %579 {offsets = [0, 96], sizes = [8, 32], strides = [1, 1]} : vector<8x128xf32> to vector<8x32xf32>
    %585 = arith.mulf %582, %511 : vector<8x32xf32>
    %586 = arith.mulf %581, %583 : vector<8x32xf32>
    %587 = arith.addf %585, %586 : vector<8x32xf32>
    %588 = math.tanh %587 : vector<8x32xf32>
    %589 = arith.mulf %584, %588 : vector<8x32xf32>
    %590 = arith.truncf %589 : vector<8x32xf32> to vector<8x32xbf16>
    %c1_241 = arith.constant 1 : index
    %c0_242 = arith.constant 0 : index
    %c0_243 = arith.constant 0 : index
    %591 = vector.load %arg1[%c1_241, %c0_242, %c0_243] : memref<6x32x128xbf16, #tpu.memory_space<vmem>>, vector<1x32x128xbf16>
    %592 = vector.shape_cast %591 : vector<1x32x128xbf16> to vector<32x128xbf16>
    %cst_244 = arith.constant dense<0.000000e+00> : vector<8x128xf32>
    %593 = tpu.matmul %590, %592, %cst_244 {dimension_numbers = #tpu.dot_dimension_numbers<[1], [0], [0], [1], [0, 0, 1, 1], [], []>} : vector<8x32xbf16>, vector<32x128xbf16>, vector<8x128xf32> -> vector<8x128xf32>
    %594 = arith.truncf %538 : vector<8x32xf32> to vector<8x32xbf16>
    %c1_245 = arith.constant 1 : index
    %c0_246 = arith.constant 0 : index
    %c0_247 = arith.constant 0 : index
    %595 = vector.load %arg2[%c1_245, %c0_246, %c0_247] : memref<6x32x128xbf16, #tpu.memory_space<vmem>>, vector<1x32x128xbf16>
    %596 = vector.shape_cast %595 : vector<1x32x128xbf16> to vector<32x128xbf16>
    %cst_248 = arith.constant dense<0.000000e+00> : vector<8x128xf32>
    %597 = tpu.matmul %594, %596, %cst_248 {dimension_numbers = #tpu.dot_dimension_numbers<[1], [0], [0], [1], [0, 0, 1, 1], [], []>} : vector<8x32xbf16>, vector<32x128xbf16>, vector<8x128xf32> -> vector<8x128xf32>
    %598 = arith.addf %593, %597 : vector<8x128xf32>
    %599 = arith.addf %598, %7 : vector<8x128xf32>
    %600 = arith.negf %599 : vector<8x128xf32>
    %601 = math.exp %600 : vector<8x128xf32>
    %cst_249 = arith.constant 1.000000e+00 : f32
    %602 = vector.broadcast %cst_249 : f32 to vector<8x128xf32>
    %603 = arith.addf %602, %601 : vector<8x128xf32>
    %604 = arith.divf %602, %603 : vector<8x128xf32>
    %605 = math.tanh %599 : vector<8x128xf32>
    %606 = vector.extract_strided_slice %604 {offsets = [0, 0], sizes = [8, 32], strides = [1, 1]} : vector<8x128xf32> to vector<8x32xf32>
    %607 = vector.extract_strided_slice %604 {offsets = [0, 32], sizes = [8, 32], strides = [1, 1]} : vector<8x128xf32> to vector<8x32xf32>
    %608 = vector.extract_strided_slice %605 {offsets = [0, 64], sizes = [8, 32], strides = [1, 1]} : vector<8x128xf32> to vector<8x32xf32>
    %609 = vector.extract_strided_slice %604 {offsets = [0, 96], sizes = [8, 32], strides = [1, 1]} : vector<8x128xf32> to vector<8x32xf32>
    %610 = arith.mulf %607, %536 : vector<8x32xf32>
    %611 = arith.mulf %606, %608 : vector<8x32xf32>
    %612 = arith.addf %610, %611 : vector<8x32xf32>
    %613 = math.tanh %612 : vector<8x32xf32>
    %614 = arith.mulf %609, %613 : vector<8x32xf32>
    %615 = arith.truncf %614 : vector<8x32xf32> to vector<8x32xbf16>
    %c2_250 = arith.constant 2 : index
    %c0_251 = arith.constant 0 : index
    %c0_252 = arith.constant 0 : index
    %616 = vector.load %arg1[%c2_250, %c0_251, %c0_252] : memref<6x32x128xbf16, #tpu.memory_space<vmem>>, vector<1x32x128xbf16>
    %617 = vector.shape_cast %616 : vector<1x32x128xbf16> to vector<32x128xbf16>
    %cst_253 = arith.constant dense<0.000000e+00> : vector<8x128xf32>
    %618 = tpu.matmul %615, %617, %cst_253 {dimension_numbers = #tpu.dot_dimension_numbers<[1], [0], [0], [1], [0, 0, 1, 1], [], []>} : vector<8x32xbf16>, vector<32x128xbf16>, vector<8x128xf32> -> vector<8x128xf32>
    %619 = arith.truncf %563 : vector<8x32xf32> to vector<8x32xbf16>
    %c2_254 = arith.constant 2 : index
    %c0_255 = arith.constant 0 : index
    %c0_256 = arith.constant 0 : index
    %620 = vector.load %arg2[%c2_254, %c0_255, %c0_256] : memref<6x32x128xbf16, #tpu.memory_space<vmem>>, vector<1x32x128xbf16>
    %621 = vector.shape_cast %620 : vector<1x32x128xbf16> to vector<32x128xbf16>
    %cst_257 = arith.constant dense<0.000000e+00> : vector<8x128xf32>
    %622 = tpu.matmul %619, %621, %cst_257 {dimension_numbers = #tpu.dot_dimension_numbers<[1], [0], [0], [1], [0, 0, 1, 1], [], []>} : vector<8x32xbf16>, vector<32x128xbf16>, vector<8x128xf32> -> vector<8x128xf32>
    %623 = arith.addf %618, %622 : vector<8x128xf32>
    %624 = arith.addf %623, %11 : vector<8x128xf32>
    %625 = arith.negf %624 : vector<8x128xf32>
    %626 = math.exp %625 : vector<8x128xf32>
    %cst_258 = arith.constant 1.000000e+00 : f32
    %627 = vector.broadcast %cst_258 : f32 to vector<8x128xf32>
    %628 = arith.addf %627, %626 : vector<8x128xf32>
    %629 = arith.divf %627, %628 : vector<8x128xf32>
    %630 = math.tanh %624 : vector<8x128xf32>
    %631 = vector.extract_strided_slice %629 {offsets = [0, 0], sizes = [8, 32], strides = [1, 1]} : vector<8x128xf32> to vector<8x32xf32>
    %632 = vector.extract_strided_slice %629 {offsets = [0, 32], sizes = [8, 32], strides = [1, 1]} : vector<8x128xf32> to vector<8x32xf32>
    %633 = vector.extract_strided_slice %630 {offsets = [0, 64], sizes = [8, 32], strides = [1, 1]} : vector<8x128xf32> to vector<8x32xf32>
    %634 = vector.extract_strided_slice %629 {offsets = [0, 96], sizes = [8, 32], strides = [1, 1]} : vector<8x128xf32> to vector<8x32xf32>
    %635 = arith.mulf %632, %561 : vector<8x32xf32>
    %636 = arith.mulf %631, %633 : vector<8x32xf32>
    %637 = arith.addf %635, %636 : vector<8x32xf32>
    %638 = math.tanh %637 : vector<8x32xf32>
    %639 = arith.mulf %634, %638 : vector<8x32xf32>
    %640 = arith.truncf %639 : vector<8x32xf32> to vector<8x32xbf16>
    %c3_259 = arith.constant 3 : index
    %c0_260 = arith.constant 0 : index
    %c0_261 = arith.constant 0 : index
    %641 = vector.load %arg1[%c3_259, %c0_260, %c0_261] : memref<6x32x128xbf16, #tpu.memory_space<vmem>>, vector<1x32x128xbf16>
    %642 = vector.shape_cast %641 : vector<1x32x128xbf16> to vector<32x128xbf16>
    %cst_262 = arith.constant dense<0.000000e+00> : vector<8x128xf32>
    %643 = tpu.matmul %640, %642, %cst_262 {dimension_numbers = #tpu.dot_dimension_numbers<[1], [0], [0], [1], [0, 0, 1, 1], [], []>} : vector<8x32xbf16>, vector<32x128xbf16>, vector<8x128xf32> -> vector<8x128xf32>
    %644 = arith.truncf %589 : vector<8x32xf32> to vector<8x32xbf16>
    %c3_263 = arith.constant 3 : index
    %c0_264 = arith.constant 0 : index
    %c0_265 = arith.constant 0 : index
    %645 = vector.load %arg2[%c3_263, %c0_264, %c0_265] : memref<6x32x128xbf16, #tpu.memory_space<vmem>>, vector<1x32x128xbf16>
    %646 = vector.shape_cast %645 : vector<1x32x128xbf16> to vector<32x128xbf16>
    %cst_266 = arith.constant dense<0.000000e+00> : vector<8x128xf32>
    %647 = tpu.matmul %644, %646, %cst_266 {dimension_numbers = #tpu.dot_dimension_numbers<[1], [0], [0], [1], [0, 0, 1, 1], [], []>} : vector<8x32xbf16>, vector<32x128xbf16>, vector<8x128xf32> -> vector<8x128xf32>
    %648 = arith.addf %643, %647 : vector<8x128xf32>
    %649 = arith.addf %648, %15 : vector<8x128xf32>
    %650 = arith.negf %649 : vector<8x128xf32>
    %651 = math.exp %650 : vector<8x128xf32>
    %cst_267 = arith.constant 1.000000e+00 : f32
    %652 = vector.broadcast %cst_267 : f32 to vector<8x128xf32>
    %653 = arith.addf %652, %651 : vector<8x128xf32>
    %654 = arith.divf %652, %653 : vector<8x128xf32>
    %655 = math.tanh %649 : vector<8x128xf32>
    %656 = vector.extract_strided_slice %654 {offsets = [0, 0], sizes = [8, 32], strides = [1, 1]} : vector<8x128xf32> to vector<8x32xf32>
    %657 = vector.extract_strided_slice %654 {offsets = [0, 32], sizes = [8, 32], strides = [1, 1]} : vector<8x128xf32> to vector<8x32xf32>
    %658 = vector.extract_strided_slice %655 {offsets = [0, 64], sizes = [8, 32], strides = [1, 1]} : vector<8x128xf32> to vector<8x32xf32>
    %659 = vector.extract_strided_slice %654 {offsets = [0, 96], sizes = [8, 32], strides = [1, 1]} : vector<8x128xf32> to vector<8x32xf32>
    %660 = arith.mulf %657, %587 : vector<8x32xf32>
    %661 = arith.mulf %656, %658 : vector<8x32xf32>
    %662 = arith.addf %660, %661 : vector<8x32xf32>
    %663 = math.tanh %662 : vector<8x32xf32>
    %664 = arith.mulf %659, %663 : vector<8x32xf32>
    %665 = arith.truncf %664 : vector<8x32xf32> to vector<8x32xbf16>
    %c4_268 = arith.constant 4 : index
    %c0_269 = arith.constant 0 : index
    %c0_270 = arith.constant 0 : index
    %666 = vector.load %arg1[%c4_268, %c0_269, %c0_270] : memref<6x32x128xbf16, #tpu.memory_space<vmem>>, vector<1x32x128xbf16>
    %667 = vector.shape_cast %666 : vector<1x32x128xbf16> to vector<32x128xbf16>
    %cst_271 = arith.constant dense<0.000000e+00> : vector<8x128xf32>
    %668 = tpu.matmul %665, %667, %cst_271 {dimension_numbers = #tpu.dot_dimension_numbers<[1], [0], [0], [1], [0, 0, 1, 1], [], []>} : vector<8x32xbf16>, vector<32x128xbf16>, vector<8x128xf32> -> vector<8x128xf32>
    %669 = arith.truncf %614 : vector<8x32xf32> to vector<8x32xbf16>
    %c4_272 = arith.constant 4 : index
    %c0_273 = arith.constant 0 : index
    %c0_274 = arith.constant 0 : index
    %670 = vector.load %arg2[%c4_272, %c0_273, %c0_274] : memref<6x32x128xbf16, #tpu.memory_space<vmem>>, vector<1x32x128xbf16>
    %671 = vector.shape_cast %670 : vector<1x32x128xbf16> to vector<32x128xbf16>
    %cst_275 = arith.constant dense<0.000000e+00> : vector<8x128xf32>
    %672 = tpu.matmul %669, %671, %cst_275 {dimension_numbers = #tpu.dot_dimension_numbers<[1], [0], [0], [1], [0, 0, 1, 1], [], []>} : vector<8x32xbf16>, vector<32x128xbf16>, vector<8x128xf32> -> vector<8x128xf32>
    %673 = arith.addf %668, %672 : vector<8x128xf32>
    %674 = arith.addf %673, %19 : vector<8x128xf32>
    %675 = arith.negf %674 : vector<8x128xf32>
    %676 = math.exp %675 : vector<8x128xf32>
    %cst_276 = arith.constant 1.000000e+00 : f32
    %677 = vector.broadcast %cst_276 : f32 to vector<8x128xf32>
    %678 = arith.addf %677, %676 : vector<8x128xf32>
    %679 = arith.divf %677, %678 : vector<8x128xf32>
    %680 = math.tanh %674 : vector<8x128xf32>
    %681 = vector.extract_strided_slice %679 {offsets = [0, 0], sizes = [8, 32], strides = [1, 1]} : vector<8x128xf32> to vector<8x32xf32>
    %682 = vector.extract_strided_slice %679 {offsets = [0, 32], sizes = [8, 32], strides = [1, 1]} : vector<8x128xf32> to vector<8x32xf32>
    %683 = vector.extract_strided_slice %680 {offsets = [0, 64], sizes = [8, 32], strides = [1, 1]} : vector<8x128xf32> to vector<8x32xf32>
    %684 = vector.extract_strided_slice %679 {offsets = [0, 96], sizes = [8, 32], strides = [1, 1]} : vector<8x128xf32> to vector<8x32xf32>
    %685 = arith.mulf %682, %612 : vector<8x32xf32>
    %686 = arith.mulf %681, %683 : vector<8x32xf32>
    %687 = arith.addf %685, %686 : vector<8x32xf32>
    %688 = math.tanh %687 : vector<8x32xf32>
    %689 = arith.mulf %684, %688 : vector<8x32xf32>
    %690 = arith.truncf %689 : vector<8x32xf32> to vector<8x32xbf16>
    %c5_277 = arith.constant 5 : index
    %c0_278 = arith.constant 0 : index
    %c0_279 = arith.constant 0 : index
    %691 = vector.load %arg1[%c5_277, %c0_278, %c0_279] : memref<6x32x128xbf16, #tpu.memory_space<vmem>>, vector<1x32x128xbf16>
    %692 = vector.shape_cast %691 : vector<1x32x128xbf16> to vector<32x128xbf16>
    %cst_280 = arith.constant dense<0.000000e+00> : vector<8x128xf32>
    %693 = tpu.matmul %690, %692, %cst_280 {dimension_numbers = #tpu.dot_dimension_numbers<[1], [0], [0], [1], [0, 0, 1, 1], [], []>} : vector<8x32xbf16>, vector<32x128xbf16>, vector<8x128xf32> -> vector<8x128xf32>
    %694 = arith.truncf %639 : vector<8x32xf32> to vector<8x32xbf16>
    %c5_281 = arith.constant 5 : index
    %c0_282 = arith.constant 0 : index
    %c0_283 = arith.constant 0 : index
    %695 = vector.load %arg2[%c5_281, %c0_282, %c0_283] : memref<6x32x128xbf16, #tpu.memory_space<vmem>>, vector<1x32x128xbf16>
    %696 = vector.shape_cast %695 : vector<1x32x128xbf16> to vector<32x128xbf16>
    %cst_284 = arith.constant dense<0.000000e+00> : vector<8x128xf32>
    %697 = tpu.matmul %694, %696, %cst_284 {dimension_numbers = #tpu.dot_dimension_numbers<[1], [0], [0], [1], [0, 0, 1, 1], [], []>} : vector<8x32xbf16>, vector<32x128xbf16>, vector<8x128xf32> -> vector<8x128xf32>
    %698 = arith.addf %693, %697 : vector<8x128xf32>
    %699 = arith.addf %698, %23 : vector<8x128xf32>
    %700 = arith.negf %699 : vector<8x128xf32>
    %701 = math.exp %700 : vector<8x128xf32>
    %cst_285 = arith.constant 1.000000e+00 : f32
    %702 = vector.broadcast %cst_285 : f32 to vector<8x128xf32>
    %703 = arith.addf %702, %701 : vector<8x128xf32>
    %704 = arith.divf %702, %703 : vector<8x128xf32>
    %705 = math.tanh %699 : vector<8x128xf32>
    %706 = vector.extract_strided_slice %704 {offsets = [0, 0], sizes = [8, 32], strides = [1, 1]} : vector<8x128xf32> to vector<8x32xf32>
    %707 = vector.extract_strided_slice %704 {offsets = [0, 32], sizes = [8, 32], strides = [1, 1]} : vector<8x128xf32> to vector<8x32xf32>
    %708 = vector.extract_strided_slice %705 {offsets = [0, 64], sizes = [8, 32], strides = [1, 1]} : vector<8x128xf32> to vector<8x32xf32>
    %709 = vector.extract_strided_slice %704 {offsets = [0, 96], sizes = [8, 32], strides = [1, 1]} : vector<8x128xf32> to vector<8x32xf32>
    %710 = arith.mulf %707, %637 : vector<8x32xf32>
    %711 = arith.mulf %706, %708 : vector<8x32xf32>
    %712 = arith.addf %710, %711 : vector<8x32xf32>
    %713 = math.tanh %712 : vector<8x32xf32>
    %714 = arith.mulf %709, %713 : vector<8x32xf32>
    %c0_286 = arith.constant 0 : index
    %c0_287 = arith.constant 0 : index
    %715 = vector.load %arg7[%c0_286, %c0_287] : memref<64x32xf32, #tpu.memory_space<vmem>>, vector<8x32xf32>
    tpu.vector_store %arg7[%c0_286, %c0_287], %714 {strides = array<i32>} : memref<64x32xf32, #tpu.memory_space<vmem>>, vector<8x32xf32>,
    %716 = arith.truncf %714 : vector<8x32xf32> to vector<8x32xbf16>
    %c3_288 = arith.constant 3 : index
    %c0_289 = arith.constant 0 : index
    %c0_290 = arith.constant 0 : index
    %717 = vector.load %arg1[%c3_288, %c0_289, %c0_290] : memref<6x32x128xbf16, #tpu.memory_space<vmem>>, vector<1x32x128xbf16>
    %718 = vector.shape_cast %717 : vector<1x32x128xbf16> to vector<32x128xbf16>
    %cst_291 = arith.constant dense<0.000000e+00> : vector<8x128xf32>
    %719 = tpu.matmul %716, %718, %cst_291 {dimension_numbers = #tpu.dot_dimension_numbers<[1], [0], [0], [1], [0, 0, 1, 1], [], []>} : vector<8x32xbf16>, vector<32x128xbf16>, vector<8x128xf32> -> vector<8x128xf32>
    %720 = arith.truncf %664 : vector<8x32xf32> to vector<8x32xbf16>
    %c3_292 = arith.constant 3 : index
    %c0_293 = arith.constant 0 : index
    %c0_294 = arith.constant 0 : index
    %721 = vector.load %arg2[%c3_292, %c0_293, %c0_294] : memref<6x32x128xbf16, #tpu.memory_space<vmem>>, vector<1x32x128xbf16>
    %722 = vector.shape_cast %721 : vector<1x32x128xbf16> to vector<32x128xbf16>
    %cst_295 = arith.constant dense<0.000000e+00> : vector<8x128xf32>
    %723 = tpu.matmul %720, %722, %cst_295 {dimension_numbers = #tpu.dot_dimension_numbers<[1], [0], [0], [1], [0, 0, 1, 1], [], []>} : vector<8x32xbf16>, vector<32x128xbf16>, vector<8x128xf32> -> vector<8x128xf32>
    %724 = arith.addf %719, %723 : vector<8x128xf32>
    %725 = arith.addf %724, %15 : vector<8x128xf32>
    %726 = arith.negf %725 : vector<8x128xf32>
    %727 = math.exp %726 : vector<8x128xf32>
    %cst_296 = arith.constant 1.000000e+00 : f32
    %728 = vector.broadcast %cst_296 : f32 to vector<8x128xf32>
    %729 = arith.addf %728, %727 : vector<8x128xf32>
    %730 = arith.divf %728, %729 : vector<8x128xf32>
    %731 = math.tanh %725 : vector<8x128xf32>
    %732 = vector.extract_strided_slice %730 {offsets = [0, 0], sizes = [8, 32], strides = [1, 1]} : vector<8x128xf32> to vector<8x32xf32>
    %733 = vector.extract_strided_slice %730 {offsets = [0, 32], sizes = [8, 32], strides = [1, 1]} : vector<8x128xf32> to vector<8x32xf32>
    %734 = vector.extract_strided_slice %731 {offsets = [0, 64], sizes = [8, 32], strides = [1, 1]} : vector<8x128xf32> to vector<8x32xf32>
    %735 = vector.extract_strided_slice %730 {offsets = [0, 96], sizes = [8, 32], strides = [1, 1]} : vector<8x128xf32> to vector<8x32xf32>
    %736 = arith.mulf %733, %662 : vector<8x32xf32>
    %737 = arith.mulf %732, %734 : vector<8x32xf32>
    %738 = arith.addf %736, %737 : vector<8x32xf32>
    %739 = math.tanh %738 : vector<8x32xf32>
    %740 = arith.mulf %735, %739 : vector<8x32xf32>
    %741 = arith.truncf %740 : vector<8x32xf32> to vector<8x32xbf16>
    %c4_297 = arith.constant 4 : index
    %c0_298 = arith.constant 0 : index
    %c0_299 = arith.constant 0 : index
    %742 = vector.load %arg1[%c4_297, %c0_298, %c0_299] : memref<6x32x128xbf16, #tpu.memory_space<vmem>>, vector<1x32x128xbf16>
    %743 = vector.shape_cast %742 : vector<1x32x128xbf16> to vector<32x128xbf16>
    %cst_300 = arith.constant dense<0.000000e+00> : vector<8x128xf32>
    %744 = tpu.matmul %741, %743, %cst_300 {dimension_numbers = #tpu.dot_dimension_numbers<[1], [0], [0], [1], [0, 0, 1, 1], [], []>} : vector<8x32xbf16>, vector<32x128xbf16>, vector<8x128xf32> -> vector<8x128xf32>
    %745 = arith.truncf %689 : vector<8x32xf32> to vector<8x32xbf16>
    %c4_301 = arith.constant 4 : index
    %c0_302 = arith.constant 0 : index
    %c0_303 = arith.constant 0 : index
    %746 = vector.load %arg2[%c4_301, %c0_302, %c0_303] : memref<6x32x128xbf16, #tpu.memory_space<vmem>>, vector<1x32x128xbf16>
    %747 = vector.shape_cast %746 : vector<1x32x128xbf16> to vector<32x128xbf16>
    %cst_304 = arith.constant dense<0.000000e+00> : vector<8x128xf32>
    %748 = tpu.matmul %745, %747, %cst_304 {dimension_numbers = #tpu.dot_dimension_numbers<[1], [0], [0], [1], [0, 0, 1, 1], [], []>} : vector<8x32xbf16>, vector<32x128xbf16>, vector<8x128xf32> -> vector<8x128xf32>
    %749 = arith.addf %744, %748 : vector<8x128xf32>
    %750 = arith.addf %749, %19 : vector<8x128xf32>
    %751 = arith.negf %750 : vector<8x128xf32>
    %752 = math.exp %751 : vector<8x128xf32>
    %cst_305 = arith.constant 1.000000e+00 : f32
    %753 = vector.broadcast %cst_305 : f32 to vector<8x128xf32>
    %754 = arith.addf %753, %752 : vector<8x128xf32>
    %755 = arith.divf %753, %754 : vector<8x128xf32>
    %756 = math.tanh %750 : vector<8x128xf32>
    %757 = vector.extract_strided_slice %755 {offsets = [0, 0], sizes = [8, 32], strides = [1, 1]} : vector<8x128xf32> to vector<8x32xf32>
    %758 = vector.extract_strided_slice %755 {offsets = [0, 32], sizes = [8, 32], strides = [1, 1]} : vector<8x128xf32> to vector<8x32xf32>
    %759 = vector.extract_strided_slice %756 {offsets = [0, 64], sizes = [8, 32], strides = [1, 1]} : vector<8x128xf32> to vector<8x32xf32>
    %760 = vector.extract_strided_slice %755 {offsets = [0, 96], sizes = [8, 32], strides = [1, 1]} : vector<8x128xf32> to vector<8x32xf32>
    %761 = arith.mulf %758, %687 : vector<8x32xf32>
    %762 = arith.mulf %757, %759 : vector<8x32xf32>
    %763 = arith.addf %761, %762 : vector<8x32xf32>
    %764 = math.tanh %763 : vector<8x32xf32>
    %765 = arith.mulf %760, %764 : vector<8x32xf32>
    %766 = arith.truncf %765 : vector<8x32xf32> to vector<8x32xbf16>
    %c5_306 = arith.constant 5 : index
    %c0_307 = arith.constant 0 : index
    %c0_308 = arith.constant 0 : index
    %767 = vector.load %arg1[%c5_306, %c0_307, %c0_308] : memref<6x32x128xbf16, #tpu.memory_space<vmem>>, vector<1x32x128xbf16>
    %768 = vector.shape_cast %767 : vector<1x32x128xbf16> to vector<32x128xbf16>
    %cst_309 = arith.constant dense<0.000000e+00> : vector<8x128xf32>
    %769 = tpu.matmul %766, %768, %cst_309 {dimension_numbers = #tpu.dot_dimension_numbers<[1], [0], [0], [1], [0, 0, 1, 1], [], []>} : vector<8x32xbf16>, vector<32x128xbf16>, vector<8x128xf32> -> vector<8x128xf32>
    %770 = arith.truncf %714 : vector<8x32xf32> to vector<8x32xbf16>
    %c5_310 = arith.constant 5 : index
    %c0_311 = arith.constant 0 : index
    %c0_312 = arith.constant 0 : index
    %771 = vector.load %arg2[%c5_310, %c0_311, %c0_312] : memref<6x32x128xbf16, #tpu.memory_space<vmem>>, vector<1x32x128xbf16>
    %772 = vector.shape_cast %771 : vector<1x32x128xbf16> to vector<32x128xbf16>
    %cst_313 = arith.constant dense<0.000000e+00> : vector<8x128xf32>
    %773 = tpu.matmul %770, %772, %cst_313 {dimension_numbers = #tpu.dot_dimension_numbers<[1], [0], [0], [1], [0, 0, 1, 1], [], []>} : vector<8x32xbf16>, vector<32x128xbf16>, vector<8x128xf32> -> vector<8x128xf32>
    %774 = arith.addf %769, %773 : vector<8x128xf32>
    %775 = arith.addf %774, %23 : vector<8x128xf32>
    %776 = arith.negf %775 : vector<8x128xf32>
    %777 = math.exp %776 : vector<8x128xf32>
    %cst_314 = arith.constant 1.000000e+00 : f32
    %778 = vector.broadcast %cst_314 : f32 to vector<8x128xf32>
    %779 = arith.addf %778, %777 : vector<8x128xf32>
    %780 = arith.divf %778, %779 : vector<8x128xf32>
    %781 = math.tanh %775 : vector<8x128xf32>
    %782 = vector.extract_strided_slice %780 {offsets = [0, 0], sizes = [8, 32], strides = [1, 1]} : vector<8x128xf32> to vector<8x32xf32>
    %783 = vector.extract_strided_slice %780 {offsets = [0, 32], sizes = [8, 32], strides = [1, 1]} : vector<8x128xf32> to vector<8x32xf32>
    %784 = vector.extract_strided_slice %781 {offsets = [0, 64], sizes = [8, 32], strides = [1, 1]} : vector<8x128xf32> to vector<8x32xf32>
    %785 = vector.extract_strided_slice %780 {offsets = [0, 96], sizes = [8, 32], strides = [1, 1]} : vector<8x128xf32> to vector<8x32xf32>
    %786 = arith.mulf %783, %712 : vector<8x32xf32>
    %787 = arith.mulf %782, %784 : vector<8x32xf32>
    %788 = arith.addf %786, %787 : vector<8x32xf32>
    %789 = math.tanh %788 : vector<8x32xf32>
    %790 = arith.mulf %785, %789 : vector<8x32xf32>
    %c8 = arith.constant 8 : index
    %c0_315 = arith.constant 0 : index
    %791 = vector.load %arg7[%c8, %c0_315] : memref<64x32xf32, #tpu.memory_space<vmem>>, vector<8x32xf32>
    tpu.vector_store %arg7[%c8, %c0_315], %790 {strides = array<i32>} : memref<64x32xf32, #tpu.memory_space<vmem>>, vector<8x32xf32>,
    %792 = arith.truncf %790 : vector<8x32xf32> to vector<8x32xbf16>
    %c3_316 = arith.constant 3 : index
    %c0_317 = arith.constant 0 : index
    %c0_318 = arith.constant 0 : index
    %793 = vector.load %arg1[%c3_316, %c0_317, %c0_318] : memref<6x32x128xbf16, #tpu.memory_space<vmem>>, vector<1x32x128xbf16>
    %794 = vector.shape_cast %793 : vector<1x32x128xbf16> to vector<32x128xbf16>
    %cst_319 = arith.constant dense<0.000000e+00> : vector<8x128xf32>
    %795 = tpu.matmul %792, %794, %cst_319 {dimension_numbers = #tpu.dot_dimension_numbers<[1], [0], [0], [1], [0, 0, 1, 1], [], []>} : vector<8x32xbf16>, vector<32x128xbf16>, vector<8x128xf32> -> vector<8x128xf32>
    %796 = arith.truncf %740 : vector<8x32xf32> to vector<8x32xbf16>
    %c3_320 = arith.constant 3 : index
    %c0_321 = arith.constant 0 : index
    %c0_322 = arith.constant 0 : index
    %797 = vector.load %arg2[%c3_320, %c0_321, %c0_322] : memref<6x32x128xbf16, #tpu.memory_space<vmem>>, vector<1x32x128xbf16>
    %798 = vector.shape_cast %797 : vector<1x32x128xbf16> to vector<32x128xbf16>
    %cst_323 = arith.constant dense<0.000000e+00> : vector<8x128xf32>
    %799 = tpu.matmul %796, %798, %cst_323 {dimension_numbers = #tpu.dot_dimension_numbers<[1], [0], [0], [1], [0, 0, 1, 1], [], []>} : vector<8x32xbf16>, vector<32x128xbf16>, vector<8x128xf32> -> vector<8x128xf32>
    %800 = arith.addf %795, %799 : vector<8x128xf32>
    %801 = arith.addf %800, %15 : vector<8x128xf32>
    %802 = arith.negf %801 : vector<8x128xf32>
    %803 = math.exp %802 : vector<8x128xf32>
    %cst_324 = arith.constant 1.000000e+00 : f32
    %804 = vector.broadcast %cst_324 : f32 to vector<8x128xf32>
    %805 = arith.addf %804, %803 : vector<8x128xf32>
    %806 = arith.divf %804, %805 : vector<8x128xf32>
    %807 = math.tanh %801 : vector<8x128xf32>
    %808 = vector.extract_strided_slice %806 {offsets = [0, 0], sizes = [8, 32], strides = [1, 1]} : vector<8x128xf32> to vector<8x32xf32>
    %809 = vector.extract_strided_slice %806 {offsets = [0, 32], sizes = [8, 32], strides = [1, 1]} : vector<8x128xf32> to vector<8x32xf32>
    %810 = vector.extract_strided_slice %807 {offsets = [0, 64], sizes = [8, 32], strides = [1, 1]} : vector<8x128xf32> to vector<8x32xf32>
    %811 = vector.extract_strided_slice %806 {offsets = [0, 96], sizes = [8, 32], strides = [1, 1]} : vector<8x128xf32> to vector<8x32xf32>
    %812 = arith.mulf %809, %738 : vector<8x32xf32>
    %813 = arith.mulf %808, %810 : vector<8x32xf32>
    %814 = arith.addf %812, %813 : vector<8x32xf32>
    %815 = math.tanh %814 : vector<8x32xf32>
    %816 = arith.mulf %811, %815 : vector<8x32xf32>
    %817 = arith.truncf %816 : vector<8x32xf32> to vector<8x32xbf16>
    %c4_325 = arith.constant 4 : index
    %c0_326 = arith.constant 0 : index
    %c0_327 = arith.constant 0 : index
    %818 = vector.load %arg1[%c4_325, %c0_326, %c0_327] : memref<6x32x128xbf16, #tpu.memory_space<vmem>>, vector<1x32x128xbf16>
    %819 = vector.shape_cast %818 : vector<1x32x128xbf16> to vector<32x128xbf16>
    %cst_328 = arith.constant dense<0.000000e+00> : vector<8x128xf32>
    %820 = tpu.matmul %817, %819, %cst_328 {dimension_numbers = #tpu.dot_dimension_numbers<[1], [0], [0], [1], [0, 0, 1, 1], [], []>} : vector<8x32xbf16>, vector<32x128xbf16>, vector<8x128xf32> -> vector<8x128xf32>
    %821 = arith.truncf %765 : vector<8x32xf32> to vector<8x32xbf16>
    %c4_329 = arith.constant 4 : index
    %c0_330 = arith.constant 0 : index
    %c0_331 = arith.constant 0 : index
    %822 = vector.load %arg2[%c4_329, %c0_330, %c0_331] : memref<6x32x128xbf16, #tpu.memory_space<vmem>>, vector<1x32x128xbf16>
    %823 = vector.shape_cast %822 : vector<1x32x128xbf16> to vector<32x128xbf16>
    %cst_332 = arith.constant dense<0.000000e+00> : vector<8x128xf32>
    %824 = tpu.matmul %821, %823, %cst_332 {dimension_numbers = #tpu.dot_dimension_numbers<[1], [0], [0], [1], [0, 0, 1, 1], [], []>} : vector<8x32xbf16>, vector<32x128xbf16>, vector<8x128xf32> -> vector<8x128xf32>
    %825 = arith.addf %820, %824 : vector<8x128xf32>
    %826 = arith.addf %825, %19 : vector<8x128xf32>
    %827 = arith.negf %826 : vector<8x128xf32>
    %828 = math.exp %827 : vector<8x128xf32>
    %cst_333 = arith.constant 1.000000e+00 : f32
    %829 = vector.broadcast %cst_333 : f32 to vector<8x128xf32>
    %830 = arith.addf %829, %828 : vector<8x128xf32>
    %831 = arith.divf %829, %830 : vector<8x128xf32>
    %832 = math.tanh %826 : vector<8x128xf32>
    %833 = vector.extract_strided_slice %831 {offsets = [0, 0], sizes = [8, 32], strides = [1, 1]} : vector<8x128xf32> to vector<8x32xf32>
    %834 = vector.extract_strided_slice %831 {offsets = [0, 32], sizes = [8, 32], strides = [1, 1]} : vector<8x128xf32> to vector<8x32xf32>
    %835 = vector.extract_strided_slice %832 {offsets = [0, 64], sizes = [8, 32], strides = [1, 1]} : vector<8x128xf32> to vector<8x32xf32>
    %836 = vector.extract_strided_slice %831 {offsets = [0, 96], sizes = [8, 32], strides = [1, 1]} : vector<8x128xf32> to vector<8x32xf32>
    %837 = arith.mulf %834, %763 : vector<8x32xf32>
    %838 = arith.mulf %833, %835 : vector<8x32xf32>
    %839 = arith.addf %837, %838 : vector<8x32xf32>
    %840 = math.tanh %839 : vector<8x32xf32>
    %841 = arith.mulf %836, %840 : vector<8x32xf32>
    %842 = arith.truncf %841 : vector<8x32xf32> to vector<8x32xbf16>
    %c5_334 = arith.constant 5 : index
    %c0_335 = arith.constant 0 : index
    %c0_336 = arith.constant 0 : index
    %843 = vector.load %arg1[%c5_334, %c0_335, %c0_336] : memref<6x32x128xbf16, #tpu.memory_space<vmem>>, vector<1x32x128xbf16>
    %844 = vector.shape_cast %843 : vector<1x32x128xbf16> to vector<32x128xbf16>
    %cst_337 = arith.constant dense<0.000000e+00> : vector<8x128xf32>
    %845 = tpu.matmul %842, %844, %cst_337 {dimension_numbers = #tpu.dot_dimension_numbers<[1], [0], [0], [1], [0, 0, 1, 1], [], []>} : vector<8x32xbf16>, vector<32x128xbf16>, vector<8x128xf32> -> vector<8x128xf32>
    %846 = arith.truncf %790 : vector<8x32xf32> to vector<8x32xbf16>
    %c5_338 = arith.constant 5 : index
    %c0_339 = arith.constant 0 : index
    %c0_340 = arith.constant 0 : index
    %847 = vector.load %arg2[%c5_338, %c0_339, %c0_340] : memref<6x32x128xbf16, #tpu.memory_space<vmem>>, vector<1x32x128xbf16>
    %848 = vector.shape_cast %847 : vector<1x32x128xbf16> to vector<32x128xbf16>
    %cst_341 = arith.constant dense<0.000000e+00> : vector<8x128xf32>
    %849 = tpu.matmul %846, %848, %cst_341 {dimension_numbers = #tpu.dot_dimension_numbers<[1], [0], [0], [1], [0, 0, 1, 1], [], []>} : vector<8x32xbf16>, vector<32x128xbf16>, vector<8x128xf32> -> vector<8x128xf32>
    %850 = arith.addf %845, %849 : vector<8x128xf32>
    %851 = arith.addf %850, %23 : vector<8x128xf32>
    %852 = arith.negf %851 : vector<8x128xf32>
    %853 = math.exp %852 : vector<8x128xf32>
    %cst_342 = arith.constant 1.000000e+00 : f32
    %854 = vector.broadcast %cst_342 : f32 to vector<8x128xf32>
    %855 = arith.addf %854, %853 : vector<8x128xf32>
    %856 = arith.divf %854, %855 : vector<8x128xf32>
    %857 = math.tanh %851 : vector<8x128xf32>
    %858 = vector.extract_strided_slice %856 {offsets = [0, 0], sizes = [8, 32], strides = [1, 1]} : vector<8x128xf32> to vector<8x32xf32>
    %859 = vector.extract_strided_slice %856 {offsets = [0, 32], sizes = [8, 32], strides = [1, 1]} : vector<8x128xf32> to vector<8x32xf32>
    %860 = vector.extract_strided_slice %857 {offsets = [0, 64], sizes = [8, 32], strides = [1, 1]} : vector<8x128xf32> to vector<8x32xf32>
    %861 = vector.extract_strided_slice %856 {offsets = [0, 96], sizes = [8, 32], strides = [1, 1]} : vector<8x128xf32> to vector<8x32xf32>
    %862 = arith.mulf %859, %788 : vector<8x32xf32>
    %863 = arith.mulf %858, %860 : vector<8x32xf32>
    %864 = arith.addf %862, %863 : vector<8x32xf32>
    %865 = math.tanh %864 : vector<8x32xf32>
    %866 = arith.mulf %861, %865 : vector<8x32xf32>
    %c16 = arith.constant 16 : index
    %c0_343 = arith.constant 0 : index
    %867 = vector.load %arg7[%c16, %c0_343] : memref<64x32xf32, #tpu.memory_space<vmem>>, vector<8x32xf32>
    tpu.vector_store %arg7[%c16, %c0_343], %866 {strides = array<i32>} : memref<64x32xf32, #tpu.memory_space<vmem>>, vector<8x32xf32>,
    %868 = arith.truncf %866 : vector<8x32xf32> to vector<8x32xbf16>
    %c3_344 = arith.constant 3 : index
    %c0_345 = arith.constant 0 : index
    %c0_346 = arith.constant 0 : index
    %869 = vector.load %arg1[%c3_344, %c0_345, %c0_346] : memref<6x32x128xbf16, #tpu.memory_space<vmem>>, vector<1x32x128xbf16>
    %870 = vector.shape_cast %869 : vector<1x32x128xbf16> to vector<32x128xbf16>
    %cst_347 = arith.constant dense<0.000000e+00> : vector<8x128xf32>
    %871 = tpu.matmul %868, %870, %cst_347 {dimension_numbers = #tpu.dot_dimension_numbers<[1], [0], [0], [1], [0, 0, 1, 1], [], []>} : vector<8x32xbf16>, vector<32x128xbf16>, vector<8x128xf32> -> vector<8x128xf32>
    %872 = arith.truncf %816 : vector<8x32xf32> to vector<8x32xbf16>
    %c3_348 = arith.constant 3 : index
    %c0_349 = arith.constant 0 : index
    %c0_350 = arith.constant 0 : index
    %873 = vector.load %arg2[%c3_348, %c0_349, %c0_350] : memref<6x32x128xbf16, #tpu.memory_space<vmem>>, vector<1x32x128xbf16>
    %874 = vector.shape_cast %873 : vector<1x32x128xbf16> to vector<32x128xbf16>
    %cst_351 = arith.constant dense<0.000000e+00> : vector<8x128xf32>
    %875 = tpu.matmul %872, %874, %cst_351 {dimension_numbers = #tpu.dot_dimension_numbers<[1], [0], [0], [1], [0, 0, 1, 1], [], []>} : vector<8x32xbf16>, vector<32x128xbf16>, vector<8x128xf32> -> vector<8x128xf32>
    %876 = arith.addf %871, %875 : vector<8x128xf32>
    %877 = arith.addf %876, %15 : vector<8x128xf32>
    %878 = arith.negf %877 : vector<8x128xf32>
    %879 = math.exp %878 : vector<8x128xf32>
    %cst_352 = arith.constant 1.000000e+00 : f32
    %880 = vector.broadcast %cst_352 : f32 to vector<8x128xf32>
    %881 = arith.addf %880, %879 : vector<8x128xf32>
    %882 = arith.divf %880, %881 : vector<8x128xf32>
    %883 = math.tanh %877 : vector<8x128xf32>
    %884 = vector.extract_strided_slice %882 {offsets = [0, 0], sizes = [8, 32], strides = [1, 1]} : vector<8x128xf32> to vector<8x32xf32>
    %885 = vector.extract_strided_slice %882 {offsets = [0, 32], sizes = [8, 32], strides = [1, 1]} : vector<8x128xf32> to vector<8x32xf32>
    %886 = vector.extract_strided_slice %883 {offsets = [0, 64], sizes = [8, 32], strides = [1, 1]} : vector<8x128xf32> to vector<8x32xf32>
    %887 = vector.extract_strided_slice %882 {offsets = [0, 96], sizes = [8, 32], strides = [1, 1]} : vector<8x128xf32> to vector<8x32xf32>
    %888 = arith.mulf %885, %814 : vector<8x32xf32>
    %889 = arith.mulf %884, %886 : vector<8x32xf32>
    %890 = arith.addf %888, %889 : vector<8x32xf32>
    %891 = math.tanh %890 : vector<8x32xf32>
    %892 = arith.mulf %887, %891 : vector<8x32xf32>
    %893 = arith.truncf %892 : vector<8x32xf32> to vector<8x32xbf16>
    %c4_353 = arith.constant 4 : index
    %c0_354 = arith.constant 0 : index
    %c0_355 = arith.constant 0 : index
    %894 = vector.load %arg1[%c4_353, %c0_354, %c0_355] : memref<6x32x128xbf16, #tpu.memory_space<vmem>>, vector<1x32x128xbf16>
    %895 = vector.shape_cast %894 : vector<1x32x128xbf16> to vector<32x128xbf16>
    %cst_356 = arith.constant dense<0.000000e+00> : vector<8x128xf32>
    %896 = tpu.matmul %893, %895, %cst_356 {dimension_numbers = #tpu.dot_dimension_numbers<[1], [0], [0], [1], [0, 0, 1, 1], [], []>} : vector<8x32xbf16>, vector<32x128xbf16>, vector<8x128xf32> -> vector<8x128xf32>
    %897 = arith.truncf %841 : vector<8x32xf32> to vector<8x32xbf16>
    %c4_357 = arith.constant 4 : index
    %c0_358 = arith.constant 0 : index
    %c0_359 = arith.constant 0 : index
    %898 = vector.load %arg2[%c4_357, %c0_358, %c0_359] : memref<6x32x128xbf16, #tpu.memory_space<vmem>>, vector<1x32x128xbf16>
    %899 = vector.shape_cast %898 : vector<1x32x128xbf16> to vector<32x128xbf16>
    %cst_360 = arith.constant dense<0.000000e+00> : vector<8x128xf32>
    %900 = tpu.matmul %897, %899, %cst_360 {dimension_numbers = #tpu.dot_dimension_numbers<[1], [0], [0], [1], [0, 0, 1, 1], [], []>} : vector<8x32xbf16>, vector<32x128xbf16>, vector<8x128xf32> -> vector<8x128xf32>
    %901 = arith.addf %896, %900 : vector<8x128xf32>
    %902 = arith.addf %901, %19 : vector<8x128xf32>
    %903 = arith.negf %902 : vector<8x128xf32>
    %904 = math.exp %903 : vector<8x128xf32>
    %cst_361 = arith.constant 1.000000e+00 : f32
    %905 = vector.broadcast %cst_361 : f32 to vector<8x128xf32>
    %906 = arith.addf %905, %904 : vector<8x128xf32>
    %907 = arith.divf %905, %906 : vector<8x128xf32>
    %908 = math.tanh %902 : vector<8x128xf32>
    %909 = vector.extract_strided_slice %907 {offsets = [0, 0], sizes = [8, 32], strides = [1, 1]} : vector<8x128xf32> to vector<8x32xf32>
    %910 = vector.extract_strided_slice %907 {offsets = [0, 32], sizes = [8, 32], strides = [1, 1]} : vector<8x128xf32> to vector<8x32xf32>
    %911 = vector.extract_strided_slice %908 {offsets = [0, 64], sizes = [8, 32], strides = [1, 1]} : vector<8x128xf32> to vector<8x32xf32>
    %912 = vector.extract_strided_slice %907 {offsets = [0, 96], sizes = [8, 32], strides = [1, 1]} : vector<8x128xf32> to vector<8x32xf32>
    %913 = arith.mulf %910, %839 : vector<8x32xf32>
    %914 = arith.mulf %909, %911 : vector<8x32xf32>
    %915 = arith.addf %913, %914 : vector<8x32xf32>
    %916 = math.tanh %915 : vector<8x32xf32>
    %917 = arith.mulf %912, %916 : vector<8x32xf32>
    %918 = arith.truncf %917 : vector<8x32xf32> to vector<8x32xbf16>
    %c5_362 = arith.constant 5 : index
    %c0_363 = arith.constant 0 : index
    %c0_364 = arith.constant 0 : index
    %919 = vector.load %arg1[%c5_362, %c0_363, %c0_364] : memref<6x32x128xbf16, #tpu.memory_space<vmem>>, vector<1x32x128xbf16>
    %920 = vector.shape_cast %919 : vector<1x32x128xbf16> to vector<32x128xbf16>
    %cst_365 = arith.constant dense<0.000000e+00> : vector<8x128xf32>
    %921 = tpu.matmul %918, %920, %cst_365 {dimension_numbers = #tpu.dot_dimension_numbers<[1], [0], [0], [1], [0, 0, 1, 1], [], []>} : vector<8x32xbf16>, vector<32x128xbf16>, vector<8x128xf32> -> vector<8x128xf32>
    %922 = arith.truncf %866 : vector<8x32xf32> to vector<8x32xbf16>
    %c5_366 = arith.constant 5 : index
    %c0_367 = arith.constant 0 : index
    %c0_368 = arith.constant 0 : index
    %923 = vector.load %arg2[%c5_366, %c0_367, %c0_368] : memref<6x32x128xbf16, #tpu.memory_space<vmem>>, vector<1x32x128xbf16>
    %924 = vector.shape_cast %923 : vector<1x32x128xbf16> to vector<32x128xbf16>
    %cst_369 = arith.constant dense<0.000000e+00> : vector<8x128xf32>
    %925 = tpu.matmul %922, %924, %cst_369 {dimension_numbers = #tpu.dot_dimension_numbers<[1], [0], [0], [1], [0, 0, 1, 1], [], []>} : vector<8x32xbf16>, vector<32x128xbf16>, vector<8x128xf32> -> vector<8x128xf32>
    %926 = arith.addf %921, %925 : vector<8x128xf32>
    %927 = arith.addf %926, %23 : vector<8x128xf32>
    %928 = arith.negf %927 : vector<8x128xf32>
    %929 = math.exp %928 : vector<8x128xf32>
    %cst_370 = arith.constant 1.000000e+00 : f32
    %930 = vector.broadcast %cst_370 : f32 to vector<8x128xf32>
    %931 = arith.addf %930, %929 : vector<8x128xf32>
    %932 = arith.divf %930, %931 : vector<8x128xf32>
    %933 = math.tanh %927 : vector<8x128xf32>
    %934 = vector.extract_strided_slice %932 {offsets = [0, 0], sizes = [8, 32], strides = [1, 1]} : vector<8x128xf32> to vector<8x32xf32>
    %935 = vector.extract_strided_slice %932 {offsets = [0, 32], sizes = [8, 32], strides = [1, 1]} : vector<8x128xf32> to vector<8x32xf32>
    %936 = vector.extract_strided_slice %933 {offsets = [0, 64], sizes = [8, 32], strides = [1, 1]} : vector<8x128xf32> to vector<8x32xf32>
    %937 = vector.extract_strided_slice %932 {offsets = [0, 96], sizes = [8, 32], strides = [1, 1]} : vector<8x128xf32> to vector<8x32xf32>
    %938 = arith.mulf %935, %864 : vector<8x32xf32>
    %939 = arith.mulf %934, %936 : vector<8x32xf32>
    %940 = arith.addf %938, %939 : vector<8x32xf32>
    %941 = math.tanh %940 : vector<8x32xf32>
    %942 = arith.mulf %937, %941 : vector<8x32xf32>
    %c24 = arith.constant 24 : index
    %c0_371 = arith.constant 0 : index
    %943 = vector.load %arg7[%c24, %c0_371] : memref<64x32xf32, #tpu.memory_space<vmem>>, vector<8x32xf32>
    tpu.vector_store %arg7[%c24, %c0_371], %942 {strides = array<i32>} : memref<64x32xf32, #tpu.memory_space<vmem>>, vector<8x32xf32>,
    %944 = arith.truncf %942 : vector<8x32xf32> to vector<8x32xbf16>
    %c3_372 = arith.constant 3 : index
    %c0_373 = arith.constant 0 : index
    %c0_374 = arith.constant 0 : index
    %945 = vector.load %arg1[%c3_372, %c0_373, %c0_374] : memref<6x32x128xbf16, #tpu.memory_space<vmem>>, vector<1x32x128xbf16>
    %946 = vector.shape_cast %945 : vector<1x32x128xbf16> to vector<32x128xbf16>
    %cst_375 = arith.constant dense<0.000000e+00> : vector<8x128xf32>
    %947 = tpu.matmul %944, %946, %cst_375 {dimension_numbers = #tpu.dot_dimension_numbers<[1], [0], [0], [1], [0, 0, 1, 1], [], []>} : vector<8x32xbf16>, vector<32x128xbf16>, vector<8x128xf32> -> vector<8x128xf32>
    %948 = arith.truncf %892 : vector<8x32xf32> to vector<8x32xbf16>
    %c3_376 = arith.constant 3 : index
    %c0_377 = arith.constant 0 : index
    %c0_378 = arith.constant 0 : index
    %949 = vector.load %arg2[%c3_376, %c0_377, %c0_378] : memref<6x32x128xbf16, #tpu.memory_space<vmem>>, vector<1x32x128xbf16>
    %950 = vector.shape_cast %949 : vector<1x32x128xbf16> to vector<32x128xbf16>
    %cst_379 = arith.constant dense<0.000000e+00> : vector<8x128xf32>
    %951 = tpu.matmul %948, %950, %cst_379 {dimension_numbers = #tpu.dot_dimension_numbers<[1], [0], [0], [1], [0, 0, 1, 1], [], []>} : vector<8x32xbf16>, vector<32x128xbf16>, vector<8x128xf32> -> vector<8x128xf32>
    %952 = arith.addf %947, %951 : vector<8x128xf32>
    %953 = arith.addf %952, %15 : vector<8x128xf32>
    %954 = arith.negf %953 : vector<8x128xf32>
    %955 = math.exp %954 : vector<8x128xf32>
    %cst_380 = arith.constant 1.000000e+00 : f32
    %956 = vector.broadcast %cst_380 : f32 to vector<8x128xf32>
    %957 = arith.addf %956, %955 : vector<8x128xf32>
    %958 = arith.divf %956, %957 : vector<8x128xf32>
    %959 = math.tanh %953 : vector<8x128xf32>
    %960 = vector.extract_strided_slice %958 {offsets = [0, 0], sizes = [8, 32], strides = [1, 1]} : vector<8x128xf32> to vector<8x32xf32>
    %961 = vector.extract_strided_slice %958 {offsets = [0, 32], sizes = [8, 32], strides = [1, 1]} : vector<8x128xf32> to vector<8x32xf32>
    %962 = vector.extract_strided_slice %959 {offsets = [0, 64], sizes = [8, 32], strides = [1, 1]} : vector<8x128xf32> to vector<8x32xf32>
    %963 = vector.extract_strided_slice %958 {offsets = [0, 96], sizes = [8, 32], strides = [1, 1]} : vector<8x128xf32> to vector<8x32xf32>
    %964 = arith.mulf %961, %890 : vector<8x32xf32>
    %965 = arith.mulf %960, %962 : vector<8x32xf32>
    %966 = arith.addf %964, %965 : vector<8x32xf32>
    %967 = math.tanh %966 : vector<8x32xf32>
    %968 = arith.mulf %963, %967 : vector<8x32xf32>
    %969 = arith.truncf %968 : vector<8x32xf32> to vector<8x32xbf16>
    %c4_381 = arith.constant 4 : index
    %c0_382 = arith.constant 0 : index
    %c0_383 = arith.constant 0 : index
    %970 = vector.load %arg1[%c4_381, %c0_382, %c0_383] : memref<6x32x128xbf16, #tpu.memory_space<vmem>>, vector<1x32x128xbf16>
    %971 = vector.shape_cast %970 : vector<1x32x128xbf16> to vector<32x128xbf16>
    %cst_384 = arith.constant dense<0.000000e+00> : vector<8x128xf32>
    %972 = tpu.matmul %969, %971, %cst_384 {dimension_numbers = #tpu.dot_dimension_numbers<[1], [0], [0], [1], [0, 0, 1, 1], [], []>} : vector<8x32xbf16>, vector<32x128xbf16>, vector<8x128xf32> -> vector<8x128xf32>
    %973 = arith.truncf %917 : vector<8x32xf32> to vector<8x32xbf16>
    %c4_385 = arith.constant 4 : index
    %c0_386 = arith.constant 0 : index
    %c0_387 = arith.constant 0 : index
    %974 = vector.load %arg2[%c4_385, %c0_386, %c0_387] : memref<6x32x128xbf16, #tpu.memory_space<vmem>>, vector<1x32x128xbf16>
    %975 = vector.shape_cast %974 : vector<1x32x128xbf16> to vector<32x128xbf16>
    %cst_388 = arith.constant dense<0.000000e+00> : vector<8x128xf32>
    %976 = tpu.matmul %973, %975, %cst_388 {dimension_numbers = #tpu.dot_dimension_numbers<[1], [0], [0], [1], [0, 0, 1, 1], [], []>} : vector<8x32xbf16>, vector<32x128xbf16>, vector<8x128xf32> -> vector<8x128xf32>
    %977 = arith.addf %972, %976 : vector<8x128xf32>
    %978 = arith.addf %977, %19 : vector<8x128xf32>
    %979 = arith.negf %978 : vector<8x128xf32>
    %980 = math.exp %979 : vector<8x128xf32>
    %cst_389 = arith.constant 1.000000e+00 : f32
    %981 = vector.broadcast %cst_389 : f32 to vector<8x128xf32>
    %982 = arith.addf %981, %980 : vector<8x128xf32>
    %983 = arith.divf %981, %982 : vector<8x128xf32>
    %984 = math.tanh %978 : vector<8x128xf32>
    %985 = vector.extract_strided_slice %983 {offsets = [0, 0], sizes = [8, 32], strides = [1, 1]} : vector<8x128xf32> to vector<8x32xf32>
    %986 = vector.extract_strided_slice %983 {offsets = [0, 32], sizes = [8, 32], strides = [1, 1]} : vector<8x128xf32> to vector<8x32xf32>
    %987 = vector.extract_strided_slice %984 {offsets = [0, 64], sizes = [8, 32], strides = [1, 1]} : vector<8x128xf32> to vector<8x32xf32>
    %988 = vector.extract_strided_slice %983 {offsets = [0, 96], sizes = [8, 32], strides = [1, 1]} : vector<8x128xf32> to vector<8x32xf32>
    %989 = arith.mulf %986, %915 : vector<8x32xf32>
    %990 = arith.mulf %985, %987 : vector<8x32xf32>
    %991 = arith.addf %989, %990 : vector<8x32xf32>
    %992 = math.tanh %991 : vector<8x32xf32>
    %993 = arith.mulf %988, %992 : vector<8x32xf32>
    %994 = arith.truncf %993 : vector<8x32xf32> to vector<8x32xbf16>
    %c5_390 = arith.constant 5 : index
    %c0_391 = arith.constant 0 : index
    %c0_392 = arith.constant 0 : index
    %995 = vector.load %arg1[%c5_390, %c0_391, %c0_392] : memref<6x32x128xbf16, #tpu.memory_space<vmem>>, vector<1x32x128xbf16>
    %996 = vector.shape_cast %995 : vector<1x32x128xbf16> to vector<32x128xbf16>
    %cst_393 = arith.constant dense<0.000000e+00> : vector<8x128xf32>
    %997 = tpu.matmul %994, %996, %cst_393 {dimension_numbers = #tpu.dot_dimension_numbers<[1], [0], [0], [1], [0, 0, 1, 1], [], []>} : vector<8x32xbf16>, vector<32x128xbf16>, vector<8x128xf32> -> vector<8x128xf32>
    %998 = arith.truncf %942 : vector<8x32xf32> to vector<8x32xbf16>
    %c5_394 = arith.constant 5 : index
    %c0_395 = arith.constant 0 : index
    %c0_396 = arith.constant 0 : index
    %999 = vector.load %arg2[%c5_394, %c0_395, %c0_396] : memref<6x32x128xbf16, #tpu.memory_space<vmem>>, vector<1x32x128xbf16>
    %1000 = vector.shape_cast %999 : vector<1x32x128xbf16> to vector<32x128xbf16>
    %cst_397 = arith.constant dense<0.000000e+00> : vector<8x128xf32>
    %1001 = tpu.matmul %998, %1000, %cst_397 {dimension_numbers = #tpu.dot_dimension_numbers<[1], [0], [0], [1], [0, 0, 1, 1], [], []>} : vector<8x32xbf16>, vector<32x128xbf16>, vector<8x128xf32> -> vector<8x128xf32>
    %1002 = arith.addf %997, %1001 : vector<8x128xf32>
    %1003 = arith.addf %1002, %23 : vector<8x128xf32>
    %1004 = arith.negf %1003 : vector<8x128xf32>
    %1005 = math.exp %1004 : vector<8x128xf32>
    %cst_398 = arith.constant 1.000000e+00 : f32
    %1006 = vector.broadcast %cst_398 : f32 to vector<8x128xf32>
    %1007 = arith.addf %1006, %1005 : vector<8x128xf32>
    %1008 = arith.divf %1006, %1007 : vector<8x128xf32>
    %1009 = math.tanh %1003 : vector<8x128xf32>
    %1010 = vector.extract_strided_slice %1008 {offsets = [0, 0], sizes = [8, 32], strides = [1, 1]} : vector<8x128xf32> to vector<8x32xf32>
    %1011 = vector.extract_strided_slice %1008 {offsets = [0, 32], sizes = [8, 32], strides = [1, 1]} : vector<8x128xf32> to vector<8x32xf32>
    %1012 = vector.extract_strided_slice %1009 {offsets = [0, 64], sizes = [8, 32], strides = [1, 1]} : vector<8x128xf32> to vector<8x32xf32>
    %1013 = vector.extract_strided_slice %1008 {offsets = [0, 96], sizes = [8, 32], strides = [1, 1]} : vector<8x128xf32> to vector<8x32xf32>
    %1014 = arith.mulf %1011, %940 : vector<8x32xf32>
    %1015 = arith.mulf %1010, %1012 : vector<8x32xf32>
    %1016 = arith.addf %1014, %1015 : vector<8x32xf32>
    %1017 = math.tanh %1016 : vector<8x32xf32>
    %1018 = arith.mulf %1013, %1017 : vector<8x32xf32>
    %c32 = arith.constant 32 : index
    %c0_399 = arith.constant 0 : index
    %1019 = vector.load %arg7[%c32, %c0_399] : memref<64x32xf32, #tpu.memory_space<vmem>>, vector<8x32xf32>
    tpu.vector_store %arg7[%c32, %c0_399], %1018 {strides = array<i32>} : memref<64x32xf32, #tpu.memory_space<vmem>>, vector<8x32xf32>,
    %1020 = arith.truncf %1018 : vector<8x32xf32> to vector<8x32xbf16>
    %c3_400 = arith.constant 3 : index
    %c0_401 = arith.constant 0 : index
    %c0_402 = arith.constant 0 : index
    %1021 = vector.load %arg1[%c3_400, %c0_401, %c0_402] : memref<6x32x128xbf16, #tpu.memory_space<vmem>>, vector<1x32x128xbf16>
    %1022 = vector.shape_cast %1021 : vector<1x32x128xbf16> to vector<32x128xbf16>
    %cst_403 = arith.constant dense<0.000000e+00> : vector<8x128xf32>
    %1023 = tpu.matmul %1020, %1022, %cst_403 {dimension_numbers = #tpu.dot_dimension_numbers<[1], [0], [0], [1], [0, 0, 1, 1], [], []>} : vector<8x32xbf16>, vector<32x128xbf16>, vector<8x128xf32> -> vector<8x128xf32>
    %1024 = arith.truncf %968 : vector<8x32xf32> to vector<8x32xbf16>
    %c3_404 = arith.constant 3 : index
    %c0_405 = arith.constant 0 : index
    %c0_406 = arith.constant 0 : index
    %1025 = vector.load %arg2[%c3_404, %c0_405, %c0_406] : memref<6x32x128xbf16, #tpu.memory_space<vmem>>, vector<1x32x128xbf16>
    %1026 = vector.shape_cast %1025 : vector<1x32x128xbf16> to vector<32x128xbf16>
    %cst_407 = arith.constant dense<0.000000e+00> : vector<8x128xf32>
    %1027 = tpu.matmul %1024, %1026, %cst_407 {dimension_numbers = #tpu.dot_dimension_numbers<[1], [0], [0], [1], [0, 0, 1, 1], [], []>} : vector<8x32xbf16>, vector<32x128xbf16>, vector<8x128xf32> -> vector<8x128xf32>
    %1028 = arith.addf %1023, %1027 : vector<8x128xf32>
    %1029 = arith.addf %1028, %15 : vector<8x128xf32>
    %1030 = arith.negf %1029 : vector<8x128xf32>
    %1031 = math.exp %1030 : vector<8x128xf32>
    %cst_408 = arith.constant 1.000000e+00 : f32
    %1032 = vector.broadcast %cst_408 : f32 to vector<8x128xf32>
    %1033 = arith.addf %1032, %1031 : vector<8x128xf32>
    %1034 = arith.divf %1032, %1033 : vector<8x128xf32>
    %1035 = math.tanh %1029 : vector<8x128xf32>
    %1036 = vector.extract_strided_slice %1034 {offsets = [0, 0], sizes = [8, 32], strides = [1, 1]} : vector<8x128xf32> to vector<8x32xf32>
    %1037 = vector.extract_strided_slice %1034 {offsets = [0, 32], sizes = [8, 32], strides = [1, 1]} : vector<8x128xf32> to vector<8x32xf32>
    %1038 = vector.extract_strided_slice %1035 {offsets = [0, 64], sizes = [8, 32], strides = [1, 1]} : vector<8x128xf32> to vector<8x32xf32>
    %1039 = vector.extract_strided_slice %1034 {offsets = [0, 96], sizes = [8, 32], strides = [1, 1]} : vector<8x128xf32> to vector<8x32xf32>
    %1040 = arith.mulf %1037, %966 : vector<8x32xf32>
    %1041 = arith.mulf %1036, %1038 : vector<8x32xf32>
    %1042 = arith.addf %1040, %1041 : vector<8x32xf32>
    %1043 = math.tanh %1042 : vector<8x32xf32>
    %1044 = arith.mulf %1039, %1043 : vector<8x32xf32>
    %1045 = arith.truncf %1044 : vector<8x32xf32> to vector<8x32xbf16>
    %c4_409 = arith.constant 4 : index
    %c0_410 = arith.constant 0 : index
    %c0_411 = arith.constant 0 : index
    %1046 = vector.load %arg1[%c4_409, %c0_410, %c0_411] : memref<6x32x128xbf16, #tpu.memory_space<vmem>>, vector<1x32x128xbf16>
    %1047 = vector.shape_cast %1046 : vector<1x32x128xbf16> to vector<32x128xbf16>
    %cst_412 = arith.constant dense<0.000000e+00> : vector<8x128xf32>
    %1048 = tpu.matmul %1045, %1047, %cst_412 {dimension_numbers = #tpu.dot_dimension_numbers<[1], [0], [0], [1], [0, 0, 1, 1], [], []>} : vector<8x32xbf16>, vector<32x128xbf16>, vector<8x128xf32> -> vector<8x128xf32>
    %1049 = arith.truncf %993 : vector<8x32xf32> to vector<8x32xbf16>
    %c4_413 = arith.constant 4 : index
    %c0_414 = arith.constant 0 : index
    %c0_415 = arith.constant 0 : index
    %1050 = vector.load %arg2[%c4_413, %c0_414, %c0_415] : memref<6x32x128xbf16, #tpu.memory_space<vmem>>, vector<1x32x128xbf16>
    %1051 = vector.shape_cast %1050 : vector<1x32x128xbf16> to vector<32x128xbf16>
    %cst_416 = arith.constant dense<0.000000e+00> : vector<8x128xf32>
    %1052 = tpu.matmul %1049, %1051, %cst_416 {dimension_numbers = #tpu.dot_dimension_numbers<[1], [0], [0], [1], [0, 0, 1, 1], [], []>} : vector<8x32xbf16>, vector<32x128xbf16>, vector<8x128xf32> -> vector<8x128xf32>
    %1053 = arith.addf %1048, %1052 : vector<8x128xf32>
    %1054 = arith.addf %1053, %19 : vector<8x128xf32>
    %1055 = arith.negf %1054 : vector<8x128xf32>
    %1056 = math.exp %1055 : vector<8x128xf32>
    %cst_417 = arith.constant 1.000000e+00 : f32
    %1057 = vector.broadcast %cst_417 : f32 to vector<8x128xf32>
    %1058 = arith.addf %1057, %1056 : vector<8x128xf32>
    %1059 = arith.divf %1057, %1058 : vector<8x128xf32>
    %1060 = math.tanh %1054 : vector<8x128xf32>
    %1061 = vector.extract_strided_slice %1059 {offsets = [0, 0], sizes = [8, 32], strides = [1, 1]} : vector<8x128xf32> to vector<8x32xf32>
    %1062 = vector.extract_strided_slice %1059 {offsets = [0, 32], sizes = [8, 32], strides = [1, 1]} : vector<8x128xf32> to vector<8x32xf32>
    %1063 = vector.extract_strided_slice %1060 {offsets = [0, 64], sizes = [8, 32], strides = [1, 1]} : vector<8x128xf32> to vector<8x32xf32>
    %1064 = vector.extract_strided_slice %1059 {offsets = [0, 96], sizes = [8, 32], strides = [1, 1]} : vector<8x128xf32> to vector<8x32xf32>
    %1065 = arith.mulf %1062, %991 : vector<8x32xf32>
    %1066 = arith.mulf %1061, %1063 : vector<8x32xf32>
    %1067 = arith.addf %1065, %1066 : vector<8x32xf32>
    %1068 = math.tanh %1067 : vector<8x32xf32>
    %1069 = arith.mulf %1064, %1068 : vector<8x32xf32>
    %1070 = arith.truncf %1069 : vector<8x32xf32> to vector<8x32xbf16>
    %c5_418 = arith.constant 5 : index
    %c0_419 = arith.constant 0 : index
    %c0_420 = arith.constant 0 : index
    %1071 = vector.load %arg1[%c5_418, %c0_419, %c0_420] : memref<6x32x128xbf16, #tpu.memory_space<vmem>>, vector<1x32x128xbf16>
    %1072 = vector.shape_cast %1071 : vector<1x32x128xbf16> to vector<32x128xbf16>
    %cst_421 = arith.constant dense<0.000000e+00> : vector<8x128xf32>
    %1073 = tpu.matmul %1070, %1072, %cst_421 {dimension_numbers = #tpu.dot_dimension_numbers<[1], [0], [0], [1], [0, 0, 1, 1], [], []>} : vector<8x32xbf16>, vector<32x128xbf16>, vector<8x128xf32> -> vector<8x128xf32>
    %1074 = arith.truncf %1018 : vector<8x32xf32> to vector<8x32xbf16>
    %c5_422 = arith.constant 5 : index
    %c0_423 = arith.constant 0 : index
    %c0_424 = arith.constant 0 : index
    %1075 = vector.load %arg2[%c5_422, %c0_423, %c0_424] : memref<6x32x128xbf16, #tpu.memory_space<vmem>>, vector<1x32x128xbf16>
    %1076 = vector.shape_cast %1075 : vector<1x32x128xbf16> to vector<32x128xbf16>
    %cst_425 = arith.constant dense<0.000000e+00> : vector<8x128xf32>
    %1077 = tpu.matmul %1074, %1076, %cst_425 {dimension_numbers = #tpu.dot_dimension_numbers<[1], [0], [0], [1], [0, 0, 1, 1], [], []>} : vector<8x32xbf16>, vector<32x128xbf16>, vector<8x128xf32> -> vector<8x128xf32>
    %1078 = arith.addf %1073, %1077 : vector<8x128xf32>
    %1079 = arith.addf %1078, %23 : vector<8x128xf32>
    %1080 = arith.negf %1079 : vector<8x128xf32>
    %1081 = math.exp %1080 : vector<8x128xf32>
    %cst_426 = arith.constant 1.000000e+00 : f32
    %1082 = vector.broadcast %cst_426 : f32 to vector<8x128xf32>
    %1083 = arith.addf %1082, %1081 : vector<8x128xf32>
    %1084 = arith.divf %1082, %1083 : vector<8x128xf32>
    %1085 = math.tanh %1079 : vector<8x128xf32>
    %1086 = vector.extract_strided_slice %1084 {offsets = [0, 0], sizes = [8, 32], strides = [1, 1]} : vector<8x128xf32> to vector<8x32xf32>
    %1087 = vector.extract_strided_slice %1084 {offsets = [0, 32], sizes = [8, 32], strides = [1, 1]} : vector<8x128xf32> to vector<8x32xf32>
    %1088 = vector.extract_strided_slice %1085 {offsets = [0, 64], sizes = [8, 32], strides = [1, 1]} : vector<8x128xf32> to vector<8x32xf32>
    %1089 = vector.extract_strided_slice %1084 {offsets = [0, 96], sizes = [8, 32], strides = [1, 1]} : vector<8x128xf32> to vector<8x32xf32>
    %1090 = arith.mulf %1087, %1016 : vector<8x32xf32>
    %1091 = arith.mulf %1086, %1088 : vector<8x32xf32>
    %1092 = arith.addf %1090, %1091 : vector<8x32xf32>
    %1093 = math.tanh %1092 : vector<8x32xf32>
    %1094 = arith.mulf %1089, %1093 : vector<8x32xf32>
    %c40 = arith.constant 40 : index
    %c0_427 = arith.constant 0 : index
    %1095 = vector.load %arg7[%c40, %c0_427] : memref<64x32xf32, #tpu.memory_space<vmem>>, vector<8x32xf32>
    tpu.vector_store %arg7[%c40, %c0_427], %1094 {strides = array<i32>} : memref<64x32xf32, #tpu.memory_space<vmem>>, vector<8x32xf32>,
    %1096 = arith.truncf %1094 : vector<8x32xf32> to vector<8x32xbf16>
    %c3_428 = arith.constant 3 : index
    %c0_429 = arith.constant 0 : index
    %c0_430 = arith.constant 0 : index
    %1097 = vector.load %arg1[%c3_428, %c0_429, %c0_430] : memref<6x32x128xbf16, #tpu.memory_space<vmem>>, vector<1x32x128xbf16>
    %1098 = vector.shape_cast %1097 : vector<1x32x128xbf16> to vector<32x128xbf16>
    %cst_431 = arith.constant dense<0.000000e+00> : vector<8x128xf32>
    %1099 = tpu.matmul %1096, %1098, %cst_431 {dimension_numbers = #tpu.dot_dimension_numbers<[1], [0], [0], [1], [0, 0, 1, 1], [], []>} : vector<8x32xbf16>, vector<32x128xbf16>, vector<8x128xf32> -> vector<8x128xf32>
    %1100 = arith.truncf %1044 : vector<8x32xf32> to vector<8x32xbf16>
    %c3_432 = arith.constant 3 : index
    %c0_433 = arith.constant 0 : index
    %c0_434 = arith.constant 0 : index
    %1101 = vector.load %arg2[%c3_432, %c0_433, %c0_434] : memref<6x32x128xbf16, #tpu.memory_space<vmem>>, vector<1x32x128xbf16>
    %1102 = vector.shape_cast %1101 : vector<1x32x128xbf16> to vector<32x128xbf16>
    %cst_435 = arith.constant dense<0.000000e+00> : vector<8x128xf32>
    %1103 = tpu.matmul %1100, %1102, %cst_435 {dimension_numbers = #tpu.dot_dimension_numbers<[1], [0], [0], [1], [0, 0, 1, 1], [], []>} : vector<8x32xbf16>, vector<32x128xbf16>, vector<8x128xf32> -> vector<8x128xf32>
    %1104 = arith.addf %1099, %1103 : vector<8x128xf32>
    %1105 = arith.addf %1104, %15 : vector<8x128xf32>
    %1106 = arith.negf %1105 : vector<8x128xf32>
    %1107 = math.exp %1106 : vector<8x128xf32>
    %cst_436 = arith.constant 1.000000e+00 : f32
    %1108 = vector.broadcast %cst_436 : f32 to vector<8x128xf32>
    %1109 = arith.addf %1108, %1107 : vector<8x128xf32>
    %1110 = arith.divf %1108, %1109 : vector<8x128xf32>
    %1111 = math.tanh %1105 : vector<8x128xf32>
    %1112 = vector.extract_strided_slice %1110 {offsets = [0, 0], sizes = [8, 32], strides = [1, 1]} : vector<8x128xf32> to vector<8x32xf32>
    %1113 = vector.extract_strided_slice %1110 {offsets = [0, 32], sizes = [8, 32], strides = [1, 1]} : vector<8x128xf32> to vector<8x32xf32>
    %1114 = vector.extract_strided_slice %1111 {offsets = [0, 64], sizes = [8, 32], strides = [1, 1]} : vector<8x128xf32> to vector<8x32xf32>
    %1115 = vector.extract_strided_slice %1110 {offsets = [0, 96], sizes = [8, 32], strides = [1, 1]} : vector<8x128xf32> to vector<8x32xf32>
    %1116 = arith.mulf %1113, %1042 : vector<8x32xf32>
    %1117 = arith.mulf %1112, %1114 : vector<8x32xf32>
    %1118 = arith.addf %1116, %1117 : vector<8x32xf32>
    %1119 = math.tanh %1118 : vector<8x32xf32>
    %1120 = arith.mulf %1115, %1119 : vector<8x32xf32>
    %1121 = arith.truncf %1120 : vector<8x32xf32> to vector<8x32xbf16>
    %c4_437 = arith.constant 4 : index
    %c0_438 = arith.constant 0 : index
    %c0_439 = arith.constant 0 : index
    %1122 = vector.load %arg1[%c4_437, %c0_438, %c0_439] : memref<6x32x128xbf16, #tpu.memory_space<vmem>>, vector<1x32x128xbf16>
    %1123 = vector.shape_cast %1122 : vector<1x32x128xbf16> to vector<32x128xbf16>
    %cst_440 = arith.constant dense<0.000000e+00> : vector<8x128xf32>
    %1124 = tpu.matmul %1121, %1123, %cst_440 {dimension_numbers = #tpu.dot_dimension_numbers<[1], [0], [0], [1], [0, 0, 1, 1], [], []>} : vector<8x32xbf16>, vector<32x128xbf16>, vector<8x128xf32> -> vector<8x128xf32>
    %1125 = arith.truncf %1069 : vector<8x32xf32> to vector<8x32xbf16>
    %c4_441 = arith.constant 4 : index
    %c0_442 = arith.constant 0 : index
    %c0_443 = arith.constant 0 : index
    %1126 = vector.load %arg2[%c4_441, %c0_442, %c0_443] : memref<6x32x128xbf16, #tpu.memory_space<vmem>>, vector<1x32x128xbf16>
    %1127 = vector.shape_cast %1126 : vector<1x32x128xbf16> to vector<32x128xbf16>
    %cst_444 = arith.constant dense<0.000000e+00> : vector<8x128xf32>
    %1128 = tpu.matmul %1125, %1127, %cst_444 {dimension_numbers = #tpu.dot_dimension_numbers<[1], [0], [0], [1], [0, 0, 1, 1], [], []>} : vector<8x32xbf16>, vector<32x128xbf16>, vector<8x128xf32> -> vector<8x128xf32>
    %1129 = arith.addf %1124, %1128 : vector<8x128xf32>
    %1130 = arith.addf %1129, %19 : vector<8x128xf32>
    %1131 = arith.negf %1130 : vector<8x128xf32>
    %1132 = math.exp %1131 : vector<8x128xf32>
    %cst_445 = arith.constant 1.000000e+00 : f32
    %1133 = vector.broadcast %cst_445 : f32 to vector<8x128xf32>
    %1134 = arith.addf %1133, %1132 : vector<8x128xf32>
    %1135 = arith.divf %1133, %1134 : vector<8x128xf32>
    %1136 = math.tanh %1130 : vector<8x128xf32>
    %1137 = vector.extract_strided_slice %1135 {offsets = [0, 0], sizes = [8, 32], strides = [1, 1]} : vector<8x128xf32> to vector<8x32xf32>
    %1138 = vector.extract_strided_slice %1135 {offsets = [0, 32], sizes = [8, 32], strides = [1, 1]} : vector<8x128xf32> to vector<8x32xf32>
    %1139 = vector.extract_strided_slice %1136 {offsets = [0, 64], sizes = [8, 32], strides = [1, 1]} : vector<8x128xf32> to vector<8x32xf32>
    %1140 = vector.extract_strided_slice %1135 {offsets = [0, 96], sizes = [8, 32], strides = [1, 1]} : vector<8x128xf32> to vector<8x32xf32>
    %1141 = arith.mulf %1138, %1067 : vector<8x32xf32>
    %1142 = arith.mulf %1137, %1139 : vector<8x32xf32>
    %1143 = arith.addf %1141, %1142 : vector<8x32xf32>
    %1144 = math.tanh %1143 : vector<8x32xf32>
    %1145 = arith.mulf %1140, %1144 : vector<8x32xf32>
    %1146 = arith.truncf %1145 : vector<8x32xf32> to vector<8x32xbf16>
    %c5_446 = arith.constant 5 : index
    %c0_447 = arith.constant 0 : index
    %c0_448 = arith.constant 0 : index
    %1147 = vector.load %arg1[%c5_446, %c0_447, %c0_448] : memref<6x32x128xbf16, #tpu.memory_space<vmem>>, vector<1x32x128xbf16>
    %1148 = vector.shape_cast %1147 : vector<1x32x128xbf16> to vector<32x128xbf16>
    %cst_449 = arith.constant dense<0.000000e+00> : vector<8x128xf32>
    %1149 = tpu.matmul %1146, %1148, %cst_449 {dimension_numbers = #tpu.dot_dimension_numbers<[1], [0], [0], [1], [0, 0, 1, 1], [], []>} : vector<8x32xbf16>, vector<32x128xbf16>, vector<8x128xf32> -> vector<8x128xf32>
    %1150 = arith.truncf %1094 : vector<8x32xf32> to vector<8x32xbf16>
    %c5_450 = arith.constant 5 : index
    %c0_451 = arith.constant 0 : index
    %c0_452 = arith.constant 0 : index
    %1151 = vector.load %arg2[%c5_450, %c0_451, %c0_452] : memref<6x32x128xbf16, #tpu.memory_space<vmem>>, vector<1x32x128xbf16>
    %1152 = vector.shape_cast %1151 : vector<1x32x128xbf16> to vector<32x128xbf16>
    %cst_453 = arith.constant dense<0.000000e+00> : vector<8x128xf32>
    %1153 = tpu.matmul %1150, %1152, %cst_453 {dimension_numbers = #tpu.dot_dimension_numbers<[1], [0], [0], [1], [0, 0, 1, 1], [], []>} : vector<8x32xbf16>, vector<32x128xbf16>, vector<8x128xf32> -> vector<8x128xf32>
    %1154 = arith.addf %1149, %1153 : vector<8x128xf32>
    %1155 = arith.addf %1154, %23 : vector<8x128xf32>
    %1156 = arith.negf %1155 : vector<8x128xf32>
    %1157 = math.exp %1156 : vector<8x128xf32>
    %cst_454 = arith.constant 1.000000e+00 : f32
    %1158 = vector.broadcast %cst_454 : f32 to vector<8x128xf32>
    %1159 = arith.addf %1158, %1157 : vector<8x128xf32>
    %1160 = arith.divf %1158, %1159 : vector<8x128xf32>
    %1161 = math.tanh %1155 : vector<8x128xf32>
    %1162 = vector.extract_strided_slice %1160 {offsets = [0, 0], sizes = [8, 32], strides = [1, 1]} : vector<8x128xf32> to vector<8x32xf32>
    %1163 = vector.extract_strided_slice %1160 {offsets = [0, 32], sizes = [8, 32], strides = [1, 1]} : vector<8x128xf32> to vector<8x32xf32>
    %1164 = vector.extract_strided_slice %1161 {offsets = [0, 64], sizes = [8, 32], strides = [1, 1]} : vector<8x128xf32> to vector<8x32xf32>
    %1165 = vector.extract_strided_slice %1160 {offsets = [0, 96], sizes = [8, 32], strides = [1, 1]} : vector<8x128xf32> to vector<8x32xf32>
    %1166 = arith.mulf %1163, %1092 : vector<8x32xf32>
    %1167 = arith.mulf %1162, %1164 : vector<8x32xf32>
    %1168 = arith.addf %1166, %1167 : vector<8x32xf32>
    %1169 = math.tanh %1168 : vector<8x32xf32>
    %1170 = arith.mulf %1165, %1169 : vector<8x32xf32>
    %c48 = arith.constant 48 : index
    %c0_455 = arith.constant 0 : index
    %1171 = vector.load %arg7[%c48, %c0_455] : memref<64x32xf32, #tpu.memory_space<vmem>>, vector<8x32xf32>
    tpu.vector_store %arg7[%c48, %c0_455], %1170 {strides = array<i32>} : memref<64x32xf32, #tpu.memory_space<vmem>>, vector<8x32xf32>,
    %1172 = arith.truncf %1170 : vector<8x32xf32> to vector<8x32xbf16>
    %c3_456 = arith.constant 3 : index
    %c0_457 = arith.constant 0 : index
    %c0_458 = arith.constant 0 : index
    %1173 = vector.load %arg1[%c3_456, %c0_457, %c0_458] : memref<6x32x128xbf16, #tpu.memory_space<vmem>>, vector<1x32x128xbf16>
    %1174 = vector.shape_cast %1173 : vector<1x32x128xbf16> to vector<32x128xbf16>
    %cst_459 = arith.constant dense<0.000000e+00> : vector<8x128xf32>
    %1175 = tpu.matmul %1172, %1174, %cst_459 {dimension_numbers = #tpu.dot_dimension_numbers<[1], [0], [0], [1], [0, 0, 1, 1], [], []>} : vector<8x32xbf16>, vector<32x128xbf16>, vector<8x128xf32> -> vector<8x128xf32>
    %1176 = arith.truncf %1120 : vector<8x32xf32> to vector<8x32xbf16>
    %c3_460 = arith.constant 3 : index
    %c0_461 = arith.constant 0 : index
    %c0_462 = arith.constant 0 : index
    %1177 = vector.load %arg2[%c3_460, %c0_461, %c0_462] : memref<6x32x128xbf16, #tpu.memory_space<vmem>>, vector<1x32x128xbf16>
    %1178 = vector.shape_cast %1177 : vector<1x32x128xbf16> to vector<32x128xbf16>
    %cst_463 = arith.constant dense<0.000000e+00> : vector<8x128xf32>
    %1179 = tpu.matmul %1176, %1178, %cst_463 {dimension_numbers = #tpu.dot_dimension_numbers<[1], [0], [0], [1], [0, 0, 1, 1], [], []>} : vector<8x32xbf16>, vector<32x128xbf16>, vector<8x128xf32> -> vector<8x128xf32>
    %1180 = arith.addf %1175, %1179 : vector<8x128xf32>
    %1181 = arith.addf %1180, %15 : vector<8x128xf32>
    %1182 = arith.negf %1181 : vector<8x128xf32>
    %1183 = math.exp %1182 : vector<8x128xf32>
    %cst_464 = arith.constant 1.000000e+00 : f32
    %1184 = vector.broadcast %cst_464 : f32 to vector<8x128xf32>
    %1185 = arith.addf %1184, %1183 : vector<8x128xf32>
    %1186 = arith.divf %1184, %1185 : vector<8x128xf32>
    %1187 = math.tanh %1181 : vector<8x128xf32>
    %1188 = vector.extract_strided_slice %1186 {offsets = [0, 0], sizes = [8, 32], strides = [1, 1]} : vector<8x128xf32> to vector<8x32xf32>
    %1189 = vector.extract_strided_slice %1186 {offsets = [0, 32], sizes = [8, 32], strides = [1, 1]} : vector<8x128xf32> to vector<8x32xf32>
    %1190 = vector.extract_strided_slice %1187 {offsets = [0, 64], sizes = [8, 32], strides = [1, 1]} : vector<8x128xf32> to vector<8x32xf32>
    %1191 = vector.extract_strided_slice %1186 {offsets = [0, 96], sizes = [8, 32], strides = [1, 1]} : vector<8x128xf32> to vector<8x32xf32>
    %1192 = arith.mulf %1189, %1118 : vector<8x32xf32>
    %1193 = arith.mulf %1188, %1190 : vector<8x32xf32>
    %1194 = arith.addf %1192, %1193 : vector<8x32xf32>
    %1195 = math.tanh %1194 : vector<8x32xf32>
    %1196 = arith.mulf %1191, %1195 : vector<8x32xf32>
    %1197 = arith.truncf %1196 : vector<8x32xf32> to vector<8x32xbf16>
    %c4_465 = arith.constant 4 : index
    %c0_466 = arith.constant 0 : index
    %c0_467 = arith.constant 0 : index
    %1198 = vector.load %arg1[%c4_465, %c0_466, %c0_467] : memref<6x32x128xbf16, #tpu.memory_space<vmem>>, vector<1x32x128xbf16>
    %1199 = vector.shape_cast %1198 : vector<1x32x128xbf16> to vector<32x128xbf16>
    %cst_468 = arith.constant dense<0.000000e+00> : vector<8x128xf32>
    %1200 = tpu.matmul %1197, %1199, %cst_468 {dimension_numbers = #tpu.dot_dimension_numbers<[1], [0], [0], [1], [0, 0, 1, 1], [], []>} : vector<8x32xbf16>, vector<32x128xbf16>, vector<8x128xf32> -> vector<8x128xf32>
    %1201 = arith.truncf %1145 : vector<8x32xf32> to vector<8x32xbf16>
    %c4_469 = arith.constant 4 : index
    %c0_470 = arith.constant 0 : index
    %c0_471 = arith.constant 0 : index
    %1202 = vector.load %arg2[%c4_469, %c0_470, %c0_471] : memref<6x32x128xbf16, #tpu.memory_space<vmem>>, vector<1x32x128xbf16>
    %1203 = vector.shape_cast %1202 : vector<1x32x128xbf16> to vector<32x128xbf16>
    %cst_472 = arith.constant dense<0.000000e+00> : vector<8x128xf32>
    %1204 = tpu.matmul %1201, %1203, %cst_472 {dimension_numbers = #tpu.dot_dimension_numbers<[1], [0], [0], [1], [0, 0, 1, 1], [], []>} : vector<8x32xbf16>, vector<32x128xbf16>, vector<8x128xf32> -> vector<8x128xf32>
    %1205 = arith.addf %1200, %1204 : vector<8x128xf32>
    %1206 = arith.addf %1205, %19 : vector<8x128xf32>
    %1207 = arith.negf %1206 : vector<8x128xf32>
    %1208 = math.exp %1207 : vector<8x128xf32>
    %cst_473 = arith.constant 1.000000e+00 : f32
    %1209 = vector.broadcast %cst_473 : f32 to vector<8x128xf32>
    %1210 = arith.addf %1209, %1208 : vector<8x128xf32>
    %1211 = arith.divf %1209, %1210 : vector<8x128xf32>
    %1212 = math.tanh %1206 : vector<8x128xf32>
    %1213 = vector.extract_strided_slice %1211 {offsets = [0, 0], sizes = [8, 32], strides = [1, 1]} : vector<8x128xf32> to vector<8x32xf32>
    %1214 = vector.extract_strided_slice %1211 {offsets = [0, 32], sizes = [8, 32], strides = [1, 1]} : vector<8x128xf32> to vector<8x32xf32>
    %1215 = vector.extract_strided_slice %1212 {offsets = [0, 64], sizes = [8, 32], strides = [1, 1]} : vector<8x128xf32> to vector<8x32xf32>
    %1216 = vector.extract_strided_slice %1211 {offsets = [0, 96], sizes = [8, 32], strides = [1, 1]} : vector<8x128xf32> to vector<8x32xf32>
    %1217 = arith.mulf %1214, %1143 : vector<8x32xf32>
    %1218 = arith.mulf %1213, %1215 : vector<8x32xf32>
    %1219 = arith.addf %1217, %1218 : vector<8x32xf32>
    %1220 = math.tanh %1219 : vector<8x32xf32>
    %1221 = arith.mulf %1216, %1220 : vector<8x32xf32>
    %1222 = arith.truncf %1221 : vector<8x32xf32> to vector<8x32xbf16>
    %c5_474 = arith.constant 5 : index
    %c0_475 = arith.constant 0 : index
    %c0_476 = arith.constant 0 : index
    %1223 = vector.load %arg1[%c5_474, %c0_475, %c0_476] : memref<6x32x128xbf16, #tpu.memory_space<vmem>>, vector<1x32x128xbf16>
    %1224 = vector.shape_cast %1223 : vector<1x32x128xbf16> to vector<32x128xbf16>
    %cst_477 = arith.constant dense<0.000000e+00> : vector<8x128xf32>
    %1225 = tpu.matmul %1222, %1224, %cst_477 {dimension_numbers = #tpu.dot_dimension_numbers<[1], [0], [0], [1], [0, 0, 1, 1], [], []>} : vector<8x32xbf16>, vector<32x128xbf16>, vector<8x128xf32> -> vector<8x128xf32>
    %1226 = arith.truncf %1170 : vector<8x32xf32> to vector<8x32xbf16>
    %c5_478 = arith.constant 5 : index
    %c0_479 = arith.constant 0 : index
    %c0_480 = arith.constant 0 : index
    %1227 = vector.load %arg2[%c5_478, %c0_479, %c0_480] : memref<6x32x128xbf16, #tpu.memory_space<vmem>>, vector<1x32x128xbf16>
    %1228 = vector.shape_cast %1227 : vector<1x32x128xbf16> to vector<32x128xbf16>
    %cst_481 = arith.constant dense<0.000000e+00> : vector<8x128xf32>
    %1229 = tpu.matmul %1226, %1228, %cst_481 {dimension_numbers = #tpu.dot_dimension_numbers<[1], [0], [0], [1], [0, 0, 1, 1], [], []>} : vector<8x32xbf16>, vector<32x128xbf16>, vector<8x128xf32> -> vector<8x128xf32>
    %1230 = arith.addf %1225, %1229 : vector<8x128xf32>
    %1231 = arith.addf %1230, %23 : vector<8x128xf32>
    %1232 = arith.negf %1231 : vector<8x128xf32>
    %1233 = math.exp %1232 : vector<8x128xf32>
    %cst_482 = arith.constant 1.000000e+00 : f32
    %1234 = vector.broadcast %cst_482 : f32 to vector<8x128xf32>
    %1235 = arith.addf %1234, %1233 : vector<8x128xf32>
    %1236 = arith.divf %1234, %1235 : vector<8x128xf32>
    %1237 = math.tanh %1231 : vector<8x128xf32>
    %1238 = vector.extract_strided_slice %1236 {offsets = [0, 0], sizes = [8, 32], strides = [1, 1]} : vector<8x128xf32> to vector<8x32xf32>
    %1239 = vector.extract_strided_slice %1236 {offsets = [0, 32], sizes = [8, 32], strides = [1, 1]} : vector<8x128xf32> to vector<8x32xf32>
    %1240 = vector.extract_strided_slice %1237 {offsets = [0, 64], sizes = [8, 32], strides = [1, 1]} : vector<8x128xf32> to vector<8x32xf32>
    %1241 = vector.extract_strided_slice %1236 {offsets = [0, 96], sizes = [8, 32], strides = [1, 1]} : vector<8x128xf32> to vector<8x32xf32>
    %1242 = arith.mulf %1239, %1168 : vector<8x32xf32>
    %1243 = arith.mulf %1238, %1240 : vector<8x32xf32>
    %1244 = arith.addf %1242, %1243 : vector<8x32xf32>
    %1245 = math.tanh %1244 : vector<8x32xf32>
    %1246 = arith.mulf %1241, %1245 : vector<8x32xf32>
    %c56 = arith.constant 56 : index
    %c0_483 = arith.constant 0 : index
    %1247 = vector.load %arg7[%c56, %c0_483] : memref<64x32xf32, #tpu.memory_space<vmem>>, vector<8x32xf32>
    tpu.vector_store %arg7[%c56, %c0_483], %1246 {strides = array<i32>} : memref<64x32xf32, #tpu.memory_space<vmem>>, vector<8x32xf32>,
    %c0_484 = arith.constant 0 : index
    %c0_485 = arith.constant 0 : index
    %1248 = vector.load %arg7[%c0_484, %c0_485] : memref<64x32xf32, #tpu.memory_space<vmem>>, vector<64x32xf32>
    %1249 = arith.truncf %1248 : vector<64x32xf32> to vector<64x32xbf16>
    %cst_486 = arith.constant dense<0.000000e+00> : vector<64x128xf32>
    %1250 = tpu.matmul %1249, %24, %cst_486 {dimension_numbers = #tpu.dot_dimension_numbers<[1], [0], [0], [1], [0, 0, 1, 1], [], []>} : vector<64x32xbf16>, vector<32x128xbf16>, vector<64x128xf32> -> vector<64x128xf32>
    %1251 = vector.broadcast %25 : vector<1x128xf32> to vector<64x128xf32>
    %1252 = arith.addf %1250, %1251 : vector<64x128xf32>
    %cst_487 = arith.constant 2.000000e+01 : f32
    %1253 = vector.broadcast %cst_487 : f32 to vector<64x128xf32>
    %1254 = arith.cmpf ogt, %1252, %1253 : vector<64x128xf32>
    %cst_488 = arith.constant 2.000000e+01 : f32
    %1255 = vector.broadcast %cst_488 : f32 to vector<64x128xf32>
    %1256 = arith.minimumf %1252, %1255 : vector<64x128xf32>
    %1257 = math.exp %1256 : vector<64x128xf32>
    %1258 = math.log1p %1257 : vector<64x128xf32>
    %1259 = arith.select %1254, %1252, %1258 : vector<64x128xi1>, vector<64x128xf32>
    %1260 = tpu.iota {dimensions = array<i32: 1>} : vector<64x128xi32>
    %c24_i32 = arith.constant 24 : i32
    %1261 = vector.broadcast %c24_i32 : i32 to vector<64x128xi32>
    %1262 = arith.cmpi slt, %1260, %1261 : vector<64x128xi32>
    %1263 = arith.select %1262, %1259, %1252 : vector<64x128xi1>, vector<64x128xf32>
    %c0_489 = arith.constant 0 : index
    %c0_490 = arith.constant 0 : index
    %1264 = vector.load %arg6[%c0_489, %c0_490] : memref<64x128xf32, #tpu.memory_space<vmem>>, vector<64x128xf32>
    tpu.vector_store %arg6[%c0_489, %c0_490], %1263 {strides = array<i32>} : memref<64x128xf32, #tpu.memory_space<vmem>>, vector<64x128xf32>,
    return
  }
}

</mosaic_0001>

<bundles_post_ra>
// kernel: _lambda_.1
= control target key start
LH: loop header
LB: loop body
LE: loop exit
PB: predicated region body
PF: predicated region fallthrough
CT: control target
= control target key end

     0   :  { %v8753_v0 = vmov 0.0   ;;  %vm8754_vm0 = vmmov 0   ;;  %vm97_vm1 = vcmask 261120   ;;  %v8755_v5 = vmov 0   ;;  %s8756_s9 = smov 64   ;;  %s8757_s10 = smov 32   ;;  %s10561_s2 = inlined_call_operand.vmem [shape: bf16[6,32,128], index: 2, kind: input, shape index: {}]   ;;  %s10562_s1 = inlined_call_operand.vmem [shape: bf16[6,32,128], index: 1, kind: input, shape index: {}]   ;;  %s10563_s0 = inlined_call_operand.vmem [shape: bf16[8,8,32], index: 0, kind: input, shape index: {}]   ;;  %s10564_s3 = inlined_call_operand.vmem [shape: f32[6,1,128], index: 3, kind: input, shape index: {}]   ;;  %s10565_s4 = inlined_call_operand.vmem [shape: bf16[32,128], index: 4, kind: input, shape index: {}]   ;;  %s10566_s5 = inlined_call_operand.vmem [shape: f32[1,128], index: 5, kind: input, shape index: {}]   ;;  %s10567_s6 = inlined_call_operand.vmem [shape: f32[64,128], index: 6, kind: output, shape index: {}]  }
   0x1   :  { %7420 = vmatprep.subr.bf16.mxu1 %v8753_v0  ;;  %v8797_v1 = vld [vmem:[%s10561_s2] sm:$0xff]   ;;  %7424 = vmatprep.mubr.msk.bf16.mxu1 %vm8754_vm0, %v8753_v0  ;;  %v8808_v2 = vld [vmem:[%s10561_s2 + $0x8] sm:$0xff]   ;;  %v8849_v28 = vld [vmem:[%s10561_s2 + $0x10] sm:$0xff]  }
   0x2   :  { %7436 = vmatprep.subr.bf16.mxu0 %v8753_v0  ;;  %7440 = vmatprep.mubr.msk.bf16.mxu0 %vm8754_vm0, %v8753_v0  ;;  %v8814_v3 = vld [vmem:[%s10562_s1] sm:$0xff]   ;;  %v8821_v4 = vld [vmem:[%s10562_s1 + $0x8] sm:$0xff]   ;;  %v8854_v29 = vld [vmem:[%s10562_s1 + $0x10] sm:$0xff]  }
   0x3   :  { %7421 = vmatpush3.bf16.msra.mxu1 %v8797_v1  ;;  %v76_v6 = vld [vmem:[%s10563_s0] sm:$0xf]  ;;  %7437 = vmatpush3.bf16.msra.mxu0 %v8849_v28  ;;  %v8860_v30 = vld [vmem:[%s10561_s2 + $0x18] sm:$0xff]   ;;  %v8884_v34 = vld [vmem:[%s10561_s2 + $0x28] sm:$0xff]  }
   0x4   :  { %7422 = vmatprep.subr.bf16.mxu1 %v8753_v0  ;;  %v8838_v11 = vld [vmem:[%s10564_s3] ss:$0 sm:$0xff]  ;;  %7438 = vmatprep.subr.bf16.mxu0 %v8753_v0  ;;  %v8867_v31 = vld [vmem:[%s10562_s1 + $0x18] sm:$0xff]   ;;  %v8913_v47 = vld [vmem:[%s10564_s3 + $0x1] ss:$0 sm:$0xff] }
   0x5   :  { %v8874_v32 = vld [vmem:[%s10561_s2 + $0x20] sm:$0xff]  }
   0x7   :  { %7423 = vmatpush3.bf16.msra.mxu1 %v8808_v2  ;;  %7439 = vmatpush3.bf16.msra.mxu0 %v8860_v30 }
   0x8   :  { %7428 = vmatprep.subr.bf16.mxu1 %v8753_v0  ;;  %7452 = vmatprep.subr.bf16.mxu0 %v8753_v0 }
   0xa   :  { %7425 = vmatmul.mubr.bf16.vlgmr.msra.gmra.mrb[0].mxu1 %v8755_v5  ;;  %7441 = vmatmul.mubr.bf16.vlgmr.msra.gmra.mrb[0].mxu0 %v8755_v5 }
   0xb   :  { %7429 = vmatpush3.bf16.msra.mxu1 %v8814_v3  ;;  %7432 = vmatprep.mubr.msk.bf16.mxu1 %vm8754_vm0, %v8753_v0 }
   0xc   :  { %7430 = vmatprep.subr.bf16.mxu1 %v8753_v0  ;;  %7453 = vmatpush3.bf16.msra.mxu0 %v8874_v32 }
   0xd   :  { %7456 = vmatprep.mubr.msk.bf16.mxu0 %vm8754_vm0, %v8753_v0  ;;  %7454 = vmatprep.subr.bf16.mxu0 %v8753_v0 }
   0xf   :  { %7431 = vmatpush3.bf16.msra.mxu1 %v8821_v4 }
  0x10   :  { %7444 = vmatprep.subr.bf16.mxu1 %v8753_v0  ;;  %7455 = vmatpush3.bf16.msra.mxu0 %v8884_v34 }
  0x11   :  { %7468 = vmatprep.subr.bf16.mxu0 %v8753_v0 }
  0x12   :  { %7433 = vmatmul.mubr.msk.bf16.vlgmr.msra.gmra.mrb[4].mxu1 %vm97_vm1, %v76_v6 }
  0x13   :  { %7448 = vmatprep.mubr.msk.bf16.mxu1 %vm8754_vm0, %v8753_v0  ;;  %7445 = vmatpush3.bf16.msra.mxu1 %v8854_v29 }
  0x14   :  { %7446 = vmatprep.subr.bf16.mxu1 %v8753_v0  ;;  %7457 = vmatmul.mubr.bf16.vlgmr.msra.gmra.mrb[4].mxu0 %v8755_v5 }
  0x15   :  { %7469 = vmatpush3.bf16.msra.mxu0 %v8797_v1  ;;  %7472 = vmatprep.mubr.msk.bf16.mxu0 %vm8754_vm0, %v8753_v0 }
  0x16   :  { %7470 = vmatprep.subr.bf16.mxu0 %v8753_v0 }
  0x17   :  { %7447 = vmatpush3.bf16.msra.mxu1 %v8867_v31 }
  0x18   :  { %7460 = vmatprep.subr.bf16.mxu1 %v8753_v0 }
  0x19   :  { %7471 = vmatpush3.bf16.msra.mxu0 %v8808_v2 }
  0x1a   :  { %7484 = vmatprep.subr.bf16.mxu0 %v8753_v0 }
  0xdd   :  { %v135_v7 = vpop.f32.mrb[0].mxu1  ;;  %v278_v38 = vpop.f32.mrb[0].mxu0 }
  0xde   :  { %v7426_v8 = vpop.f32.mrb[1].mxu1  ;;  %v7442_v39 = vpop.f32.mrb[1].mxu0 }
  0xdf   :  { %v138_v9 = vpop.f32.mrb[2].mxu1  ;;  %v281_v40 = vpop.f32.mrb[2].mxu0 }
  0xe0   :  { %v7427_v10 = vpop.f32.mrb[3].mxu1  ;;  %v7443_v41 = vpop.f32.mrb[3].mxu0  ;;  %v8926_v9 = vld [vmem:[%s10562_s1 + $0x20] sm:$0xff]  }
  0xe1   :  { %v8932_v10 = vld [vmem:[%s10562_s1 + $0x28] sm:$0xff]  }
  0xe5   :  { %v190_v12 = vpop.f32.mrb[4].mxu1 }
  0xe6   :  { %v191_v13 = vadd.f32 %v190_v12, %v135_v7  ;;  %v7434_v14 = vpop.f32.mrb[5].mxu1 }
  0xe7   :  { %v193_v15 = vpop.f32.mrb[6].mxu1  ;;  %v8898_v42 = vpop.f32.mrb[4].mxu0 }
  0xe8   :  { %v196_v16 = vadd.f32 %v8838_v11, %v191_v13  ;;  %v7435_v17 = vpop.f32.mrb[7].mxu1  ;;  %v7458_v43 = vpop.f32.mrb[5].mxu0 }
  0xe9   :  { %v427_v44 = vpop.f32.mrb[6].mxu0  ;;  %v6689_v17 = vld [vmem:[%s10563_s0 + $0x4] sm:$0xf] }
  0xea   :  { %8315 = vtanh.f32 %v196_v16  ;;  %v6660_v19 = vmul.f32 -1.442695, %v196_v16  ;;  %v7459_v45 = vpop.f32.mrb[7].mxu0 }
  0xec   :  { %8317 = vpow2.f32 %v6660_v19 }
  0xf4   :  { %v8316_v18 = vpop.eup %8315 }
  0xf5   :  { %206 = vrot.lane.b32.xlu0 %v8316_v18, %s8756_s9 }
  0xf6   :  { %v8318_v20 = vpop.eup %8317 }
  0xf7   :  { %v200_v21 = vadd.f32 1.0, %v8318_v20 }
  0xf9   :  { %8319 = vrcp.f32 %v200_v21 }
 0x103   :  { %v8320_v22 = vpop.eup %8319 }
 0x104   :  { %v204_v25 = vmul.f32 0.0, %v8320_v22 }
 0x167   :  { %v207_v23 = vpop.permute.xlu0 %206 }
 0x168   :  { %v209_v24 = vmul.f32 %v8320_v22, %v207_v23 }
 0x16a   :  { %211 = vrot.lane.b32.xlu0 %v209_v24, %s8757_s10 }
 0x1dc   :  { %v212_v26 = vpop.permute.xlu0 %211 }
 0x1dd   :  { %v8843_v27 = vadd.f32 %v212_v26, %v204_v25 }
 0x1df   :  { %8321 = vtanh.f32 %v8843_v27 }
 0x1e9   :  { %v8322_v33 = vpop.eup %8321 }
 0x1ea   :  { %217 = vrot.lane.b32.xlu1 %v8322_v33, %s8756_s9 }
 0x25c   :  { %v218_v35 = vpop.permute.xlu1 %217 }
 0x25d   :  { %v220_v36 = vmul.f32 %v8320_v22, %v218_v35 }
 0x25f   :  { %v221_v37 = vpack.c.bf16 %v220_v36, %v220_v36 }
 0x261   :  { %285 = vrot.lane.b32.xlu1 %v221_v37, %s8757_s10 }
 0x2d3   :  { %v286_v46 = vpop.permute.xlu1 %285 }
 0x2d4   :  { %7449 = vmatmul.mubr.msk.bf16.vlgmr.msra.gmra.mrb[8].mxu1 %vm97_vm1, %v286_v46  ;;  %7473 = vmatmul.mubr.msk.bf16.vlgmr.msra.gmra.mrb[8].mxu0 %vm97_vm1, %v286_v46 }
 0x2d5   :  { %7485 = vmatpush3.bf16.msra.mxu0 %v8849_v28  ;;  %7464 = vmatprep.mubr.msk.bf16.mxu1 %vm8754_vm0, %v8753_v0 }
 0x2d6   :  { %7486 = vmatprep.subr.bf16.mxu0 %v8753_v0  ;;  %7488 = vmatprep.mubr.msk.bf16.mxu0 %vm8754_vm0, %v8753_v0 }
 0x2d7   :  { %7461 = vmatpush3.bf16.msra.mxu1 %v8926_v9 }
 0x2d8   :  { %7462 = vmatprep.subr.bf16.mxu1 %v8753_v0 }
 0x2d9   :  { %7487 = vmatpush3.bf16.msra.mxu0 %v8860_v30 }
 0x2da   :  { %7500 = vmatprep.subr.bf16.mxu0 %v8753_v0 }
 0x2db   :  { %7463 = vmatpush3.bf16.msra.mxu1 %v8932_v10 }
 0x2dc   :  { %7476 = vmatprep.subr.bf16.mxu1 %v8753_v0 }
 0x3a7   :  { %v336_v48 = vpop.f32.mrb[8].mxu1  ;;  %v8915_v49 = vpop.f32.mrb[8].mxu0 }
 0x3a8   :  { %v337_v50 = vadd.f32 %v336_v48, %v278_v38  ;;  %v7450_v51 = vpop.f32.mrb[9].mxu1  ;;  %v7474_v52 = vpop.f32.mrb[9].mxu0 }
 0x3a9   :  { %v339_v53 = vpop.f32.mrb[10].mxu1  ;;  %v552_v54 = vpop.f32.mrb[10].mxu0 }
 0x3aa   :  { %v342_v55 = vadd.f32 %v8913_v47, %v337_v50  ;;  %v7451_v56 = vpop.f32.mrb[11].mxu1  ;;  %v7475_v57 = vpop.f32.mrb[11].mxu0 }
 0x3ac   :  { %8323 = vtanh.f32 %v342_v55  ;;  %v6674_v59 = vmul.f32 -1.442695, %v342_v55 }
 0x3ae   :  { %8325 = vpow2.f32 %v6674_v59 }
 0x3b6   :  { %v8324_v58 = vpop.eup %8323 }
 0x3b7   :  { %352 = vrot.lane.b32.xlu0 %v8324_v58, %s8756_s9 }
 0x3b8   :  { %v8326_v60 = vpop.eup %8325 }
 0x3b9   :  { %v346_v61 = vadd.f32 1.0, %v8326_v60 }
 0x3bb   :  { %8327 = vrcp.f32 %v346_v61 }
 0x3c5   :  { %v8328_v62 = vpop.eup %8327 }
 0x3c6   :  { %v350_v6 = vmul.f32 0.0, %v8328_v62 }
 0x429   :  { %v353_v63 = vpop.permute.xlu0 %352 }
 0x42a   :  { %v355_v5 = vmul.f32 %v8328_v62, %v353_v63 }
 0x42c   :  { %357 = vrot.lane.b32.xlu1 %v355_v5, %s8757_s10 }
 0x49e   :  { %v358_v7 = vpop.permute.xlu1 %357 }
 0x49f   :  { %v8920_v8 = vadd.f32 %v358_v7, %v350_v6 }
 0x4a1   :  { %8329 = vtanh.f32 %v8920_v8 }
 0x4ab   :  { %v8330_v12 = vpop.eup %8329 }
 0x4ac   :  { %363 = vrot.lane.b32.xlu0 %v8330_v12, %s8756_s9 }
 0x51e   :  { %v364_v13 = vpop.permute.xlu0 %363 }
 0x51f   :  { %v366_v14 = vmul.f32 %v8328_v62, %v364_v13 }
 0x521   :  { %v367_v15 = vpack.c.bf16 %v366_v14, %v366_v14 }
 0x523   :  { %431 = vrot.lane.b32.xlu1 %v367_v15, %s8757_s10 }
 0x595   :  { %v432_v16 = vpop.permute.xlu1 %431 }
 0x596   :  { %7465 = vmatmul.mubr.msk.bf16.vlgmr.msra.gmra.mrb[12].mxu1 %vm97_vm1, %v432_v16  ;;  %7489 = vmatmul.mubr.msk.bf16.vlgmr.msra.gmra.mrb[12].mxu0 %vm97_vm1, %v432_v16 }
 0x597   :  { %7477 = vmatpush3.bf16.msra.mxu1 %v8814_v3  ;;  %7480 = vmatprep.mubr.msk.bf16.mxu1 %vm8754_vm0, %v8753_v0 }
 0x598   :  { %7478 = vmatprep.subr.bf16.mxu1 %v8753_v0  ;;  %7501 = vmatpush3.bf16.msra.mxu0 %v8874_v32 }
 0x599   :  { %7502 = vmatprep.subr.bf16.mxu0 %v8753_v0  ;;  %7504 = vmatprep.mubr.msk.bf16.mxu0 %vm8754_vm0, %v8753_v0 }
 0x59b   :  { %7479 = vmatpush3.bf16.msra.mxu1 %v8821_v4 }
 0x59c   :  { %7492 = vmatprep.subr.bf16.mxu1 %v8753_v0  ;;  %7503 = vmatpush3.bf16.msra.mxu0 %v8884_v34 }
 0x59d   :  { %7516 = vmatprep.subr.bf16.mxu0 %v8753_v0 }
 0x59e   :  { %7481 = vmatmul.mubr.msk.bf16.vlgmr.msra.gmra.mrb[16].mxu1 %vm97_vm1, %v6689_v17 }
 0x59f   :  { %7493 = vmatpush3.bf16.msra.mxu1 %v8854_v29  ;;  %7496 = vmatprep.mubr.msk.bf16.mxu1 %vm8754_vm0, %v8753_v0 }
 0x5a0   :  { %7494 = vmatprep.subr.bf16.mxu1 %v8753_v0 }
 0x5a3   :  { %7495 = vmatpush3.bf16.msra.mxu1 %v8867_v31 }
 0x5a4   :  { %7508 = vmatprep.subr.bf16.mxu1 %v8753_v0 }
 0x669   :  { %v482_v18 = vpop.f32.mrb[12].mxu1  ;;  %v8963_v19 = vpop.f32.mrb[12].mxu0 }
 0x66a   :  { %v483_v20 = vadd.f32 %v482_v18, %v8898_v42  ;;  %v7466_v21 = vpop.f32.mrb[13].mxu1  ;;  %v7490_v22 = vpop.f32.mrb[13].mxu0 }
 0x66b   :  { %v485_v23 = vpop.f32.mrb[14].mxu1  ;;  %v661_v24 = vpop.f32.mrb[14].mxu0 }
 0x66c   :  { %v7467_v25 = vpop.f32.mrb[15].mxu1  ;;  %v7491_v26 = vpop.f32.mrb[15].mxu0 }
 0x671   :  { %v592_v33 = vpop.f32.mrb[16].mxu1 }
 0x672   :  { %v593_v35 = vadd.f32 %v592_v33, %v8915_v49  ;;  %v7482_v36 = vpop.f32.mrb[17].mxu1  ;;  %v8974_v49 = vld [vmem:[%s10564_s3 + $0x2] ss:$0 sm:$0xff] }
 0x673   :  { %v595_v37 = vpop.f32.mrb[18].mxu1  ;;  %v488_v52 = vadd.f32 %v8974_v49, %v483_v20 }
 0x674   :  { %v598_v38 = vadd.f32 %v8838_v11, %v593_v35  ;;  %v7483_v39 = vpop.f32.mrb[19].mxu1 }
 0x676   :  { %8331 = vtanh.f32 %v598_v38  ;;  %v6692_v41 = vmul.f32 -1.442695, %v598_v38 }
 0x678   :  { %8333 = vpow2.f32 %v6692_v41 }
 0x680   :  { %v8332_v40 = vpop.eup %8331 }
 0x681   :  { %608 = vrot.lane.b32.xlu0 %v8332_v40, %s8756_s9 }
 0x682   :  { %v8334_v42 = vpop.eup %8333 }
 0x683   :  { %v602_v43 = vadd.f32 1.0, %v8334_v42 }
 0x685   :  { %8335 = vrcp.f32 %v602_v43 }
 0x68f   :  { %v8336_v44 = vpop.eup %8335 }
 0x690   :  { %v606_v48 = vmul.f32 %v8336_v44, %v8843_v27  ;;  %v6688_v27 = vmul.f32 -1.442695, %v488_v52 }
 0x6f3   :  { %v609_v45 = vpop.permute.xlu0 %608 }
 0x6f4   :  { %v611_v46 = vmul.f32 %v8336_v44, %v609_v45 }
 0x6f6   :  { %613 = vrot.lane.b32.xlu1 %v611_v46, %s8757_s10 }
 0x768   :  { %v614_v50 = vpop.permute.xlu1 %613 }
 0x769   :  { %v8976_v51 = vadd.f32 %v614_v50, %v606_v48 }
 0x76b   :  { %8337 = vtanh.f32 %v8976_v51 }
 0x76c   :  { %8339 = vtanh.f32 %v488_v52 }
 0x76d   :  { %8341 = vpow2.f32 %v6688_v27 }
 0x775   :  { %v8338_v53 = vpop.eup %8337 }
 0x776   :  { %619 = vrot.lane.b32.xlu0 %v8338_v53, %s8756_s9  ;;  %v8340_v54 = vpop.eup %8339  ;;  %v6699_v53 = vld [vmem:[%s10563_s0 + $0x8] sm:$0xf] }
 0x777   :  { %v8342_v55 = vpop.eup %8341 }
 0x778   :  { %v492_v56 = vadd.f32 1.0, %v8342_v55 }
 0x77a   :  { %498 = vrot.lane.b32.xlu0 %v8340_v54, %s8756_s9  ;;  %8343 = vrcp.f32 %v492_v56 }
 0x784   :  { %v8344_v60 = vpop.eup %8343 }
 0x785   :  { %v496_v5 = vmul.f32 0.0, %v8344_v60 }
 0x7e8   :  { %v620_v57 = vpop.permute.xlu0 %619 }
 0x7e9   :  { %v622_v58 = vmul.f32 %v8336_v44, %v620_v57 }
 0x7eb   :  { %v623_v59 = vpack.c.bf16 %v622_v58, %v622_v58 }
 0x7ec   :  { %v499_v61 = vpop.permute.xlu0 %498 }
 0x7ed   :  { %v501_v62 = vmul.f32 %v8344_v60, %v499_v61  ;;  %665 = vrot.lane.b32.xlu1 %v623_v59, %s8757_s10 }
 0x7ef   :  { %503 = vrot.lane.b32.xlu0 %v501_v62, %s8757_s10 }
 0x85f   :  { %v666_v63 = vpop.permute.xlu1 %665 }
 0x860   :  { %7497 = vmatmul.mubr.msk.bf16.vlgmr.msra.gmra.mrb[20].mxu1 %vm97_vm1, %v666_v63 }
 0x861   :  { %v504_v6 = vpop.permute.xlu0 %503  ;;  %7509 = vmatpush3.bf16.msra.mxu1 %v8926_v9  ;;  %7512 = vmatprep.mubr.msk.bf16.mxu1 %vm8754_vm0, %v8753_v0 }
 0x862   :  { %v8988_v7 = vadd.f32 %v504_v6, %v496_v5  ;;  %7510 = vmatprep.subr.bf16.mxu1 %v8753_v0 }
 0x864   :  { %8345 = vtanh.f32 %v8988_v7 }
 0x865   :  { %7511 = vmatpush3.bf16.msra.mxu1 %v8932_v10 }
 0x866   :  { %7524 = vmatprep.subr.bf16.mxu1 %v8753_v0 }
 0x86e   :  { %v8346_v12 = vpop.eup %8345 }
 0x86f   :  { %509 = vrot.lane.b32.xlu0 %v8346_v12, %s8756_s9 }
 0x8e1   :  { %v510_v13 = vpop.permute.xlu0 %509 }
 0x8e2   :  { %v512_v14 = vmul.f32 %v8344_v60, %v510_v13 }
 0x8e4   :  { %v736_v15 = vpack.c.bf16 %v512_v14, %v512_v14 }
 0x8e6   :  { %738 = vrot.lane.b32.xlu0 %v736_v15, %s8757_s10 }
 0x933   :  { %v704_v16 = vpop.f32.mrb[20].mxu1 }
 0x934   :  { %v705_v17 = vadd.f32 %v704_v16, %v8963_v19  ;;  %v7498_v18 = vpop.f32.mrb[21].mxu1 }
 0x935   :  { %v707_v20 = vpop.f32.mrb[22].mxu1 }
 0x936   :  { %v710_v21 = vadd.f32 %v8913_v47, %v705_v17  ;;  %v7499_v22 = vpop.f32.mrb[23].mxu1 }
 0x938   :  { %8347 = vtanh.f32 %v710_v21 }
 0x942   :  { %v8348_v23 = vpop.eup %8347 }
 0x943   :  { %720 = vrot.lane.b32.xlu1 %v8348_v23, %s8756_s9 }
 0x958   :  { %v739_v24 = vpop.permute.xlu0 %738 }
 0x959   :  { %7505 = vmatmul.mubr.msk.bf16.vlgmr.msra.gmra.mrb[16].mxu0 %vm97_vm1, %v739_v24 }
 0x95a   :  { %7517 = vmatpush3.bf16.msra.mxu0 %v8797_v1  ;;  %7520 = vmatprep.mubr.msk.bf16.mxu0 %vm8754_vm0, %v8753_v0  ;;  %v6695_v1 = vmul.f32 -1.442695, %v710_v21 }
 0x95b   :  { %7518 = vmatprep.subr.bf16.mxu0 %v8753_v0 }
 0x95c   :  { %8349 = vpow2.f32 %v6695_v1 }
 0x95e   :  { %7519 = vmatpush3.bf16.msra.mxu0 %v8808_v2 }
 0x95f   :  { %7532 = vmatprep.subr.bf16.mxu0 %v8753_v0 }
 0x961   :  { %7521 = vmatmul.mubr.msk.bf16.vlgmr.msra.gmra.mrb[20].mxu0 %vm97_vm1, %v666_v63 }
 0x962   :  { %7533 = vmatpush3.bf16.msra.mxu0 %v8849_v28  ;;  %7536 = vmatprep.mubr.msk.bf16.mxu0 %vm8754_vm0, %v8753_v0 }
 0x963   :  { %7534 = vmatprep.subr.bf16.mxu0 %v8753_v0 }
 0x966   :  { %7535 = vmatpush3.bf16.msra.mxu0 %v8860_v30  ;;  %v8350_v19 = vpop.eup %8349 }
 0x967   :  { %7548 = vmatprep.subr.bf16.mxu0 %v8753_v0  ;;  %v714_v25 = vadd.f32 1.0, %v8350_v19 }
 0x969   :  { %8351 = vrcp.f32 %v714_v25 }
 0x973   :  { %v8352_v2 = vpop.eup %8351 }
 0x974   :  { %v718_v35 = vmul.f32 %v8352_v2, %v8920_v8 }
 0x9b5   :  { %v721_v26 = vpop.permute.xlu1 %720 }
 0x9b6   :  { %v723_v33 = vmul.f32 %v8352_v2, %v721_v26 }
 0x9b8   :  { %725 = vrot.lane.b32.xlu1 %v723_v33, %s8757_s10 }
 0xa2a   :  { %v726_v36 = vpop.permute.xlu1 %725 }
 0xa2b   :  { %v9015_v37 = vadd.f32 %v726_v36, %v718_v35 }
 0xa2c   :  { %v777_v38 = vpop.f32.mrb[16].mxu0 }
 0xa2d   :  { %8353 = vtanh.f32 %v9015_v37  ;;  %v7506_v39 = vpop.f32.mrb[17].mxu0 }
 0xa2e   :  { %v780_v40 = vpop.f32.mrb[18].mxu0 }
 0xa2f   :  { %v7507_v41 = vpop.f32.mrb[19].mxu0 }
 0xa34   :  { %v890_v42 = vpop.f32.mrb[20].mxu0 }
 0xa35   :  { %v7522_v43 = vpop.f32.mrb[21].mxu0 }
 0xa36   :  { %v893_v44 = vpop.f32.mrb[22].mxu0 }
 0xa37   :  { %v8354_v45 = vpop.eup %8353  ;;  %v7523_v46 = vpop.f32.mrb[23].mxu0 }
 0xa38   :  { %731 = vrot.lane.b32.xlu1 %v8354_v45, %s8756_s9 }
 0xaaa   :  { %v732_v48 = vpop.permute.xlu1 %731 }
 0xaab   :  { %v734_v50 = vmul.f32 %v8352_v2, %v732_v48 }
 0xaad   :  { %v735_v52 = vpack.c.bf16 %v734_v50, %v734_v50 }
 0xaaf   :  { %784 = vrot.lane.b32.xlu1 %v735_v52, %s8757_s10 }
 0xb21   :  { %v785_v8 = vpop.permute.xlu1 %784 }
 0xb22   :  { %7513 = vmatmul.mubr.msk.bf16.vlgmr.msra.gmra.mrb[24].mxu1 %vm97_vm1, %v785_v8  ;;  %7537 = vmatmul.mubr.msk.bf16.vlgmr.msra.gmra.mrb[24].mxu0 %vm97_vm1, %v785_v8 }
 0xb23   :  { %7525 = vmatpush3.bf16.msra.mxu1 %v8814_v3  ;;  %7528 = vmatprep.mubr.msk.bf16.mxu1 %vm8754_vm0, %v8753_v0 }
 0xb24   :  { %7526 = vmatprep.subr.bf16.mxu1 %v8753_v0  ;;  %7549 = vmatpush3.bf16.msra.mxu0 %v8874_v32 }
 0xb25   :  { %7550 = vmatprep.subr.bf16.mxu0 %v8753_v0  ;;  %7552 = vmatprep.mubr.msk.bf16.mxu0 %vm8754_vm0, %v8753_v0 }
 0xb27   :  { %7527 = vmatpush3.bf16.msra.mxu1 %v8821_v4 }
 0xb28   :  { %7540 = vmatprep.subr.bf16.mxu1 %v8753_v0  ;;  %7551 = vmatpush3.bf16.msra.mxu0 %v8884_v34 }
 0xb29   :  { %7564 = vmatprep.subr.bf16.mxu0 %v8753_v0 }
 0xb2a   :  { %7529 = vmatmul.mubr.msk.bf16.vlgmr.msra.gmra.mrb[28].mxu1 %vm97_vm1, %v6699_v53 }
 0xb2b   :  { %7541 = vmatpush3.bf16.msra.mxu1 %v8854_v29  ;;  %7544 = vmatprep.mubr.msk.bf16.mxu1 %vm8754_vm0, %v8753_v0 }
 0xb2c   :  { %7542 = vmatprep.subr.bf16.mxu1 %v8753_v0 }
 0xb2f   :  { %7543 = vmatpush3.bf16.msra.mxu1 %v8867_v31 }
 0xb30   :  { %7556 = vmatprep.subr.bf16.mxu1 %v8753_v0 }
 0xbf5   :  { %v823_v3 = vpop.f32.mrb[24].mxu1  ;;  %v9044_v4 = vpop.f32.mrb[24].mxu0 }
 0xbf6   :  { %v824_v54 = vadd.f32 %v823_v3, %v777_v38  ;;  %v7514_v27 = vpop.f32.mrb[25].mxu1  ;;  %v7538_v55 = vpop.f32.mrb[25].mxu0 }
 0xbf7   :  { %v826_v56 = vpop.f32.mrb[26].mxu1  ;;  %v1002_v57 = vpop.f32.mrb[26].mxu0  ;;  %v9078_v27 = vld [vmem:[%s10561_s2] sm:$0xff]  }
 0xbf8   :  { %v7515_v58 = vpop.f32.mrb[27].mxu1  ;;  %v7539_v59 = vpop.f32.mrb[27].mxu0  ;;  %v829_v23 = vadd.f32 %v8974_v49, %v824_v54 }
 0xbfa   :  { %v6698_v19 = vmul.f32 -1.442695, %v829_v23 }
 0xbfd   :  { %v933_v60 = vpop.f32.mrb[28].mxu1 }
 0xbfe   :  { %v934_v61 = vadd.f32 %v933_v60, %v890_v42  ;;  %v7530_v62 = vpop.f32.mrb[29].mxu1 }
 0xbff   :  { %v936_v63 = vpop.f32.mrb[30].mxu1 }
 0xc00   :  { %v939_v5 = vadd.f32 %v8838_v11, %v934_v61  ;;  %v7531_v6 = vpop.f32.mrb[31].mxu1 }
 0xc02   :  { %8355 = vtanh.f32 %v939_v5  ;;  %v6702_v13 = vmul.f32 -1.442695, %v939_v5 }
 0xc04   :  { %8357 = vpow2.f32 %v6702_v13 }
 0xc0c   :  { %v8356_v12 = vpop.eup %8355 }
 0xc0d   :  { %949 = vrot.lane.b32.xlu0 %v8356_v12, %s8756_s9 }
 0xc0e   :  { %v8358_v14 = vpop.eup %8357 }
 0xc0f   :  { %v943_v15 = vadd.f32 1.0, %v8358_v14 }
 0xc11   :  { %8359 = vrcp.f32 %v943_v15 }
 0xc1b   :  { %v8360_v16 = vpop.eup %8359 }
 0xc1c   :  { %v947_v20 = vmul.f32 %v8360_v16, %v8976_v51 }
 0xc7f   :  { %v950_v17 = vpop.permute.xlu0 %949 }
 0xc80   :  { %v952_v18 = vmul.f32 %v8360_v16, %v950_v17 }
 0xc82   :  { %954 = vrot.lane.b32.xlu1 %v952_v18, %s8757_s10 }
 0xcf4   :  { %v955_v21 = vpop.permute.xlu1 %954 }
 0xcf5   :  { %v9050_v22 = vadd.f32 %v955_v21, %v947_v20 }
 0xcf7   :  { %8361 = vtanh.f32 %v9050_v22 }
 0xcf8   :  { %8363 = vtanh.f32 %v829_v23 }
 0xcf9   :  { %8365 = vpow2.f32 %v6698_v19  ;;  %v6709_v19 = vld [vmem:[%s10563_s0 + $0xc] sm:$0xf] }
 0xd01   :  { %v8362_v24 = vpop.eup %8361 }
 0xd02   :  { %960 = vrot.lane.b32.xlu0 %v8362_v24, %s8756_s9  ;;  %v8364_v1 = vpop.eup %8363  ;;  %v9110_v24 = vld [vmem:[%s10562_s1] sm:$0xff]  }
 0xd03   :  { %v8366_v25 = vpop.eup %8365 }
 0xd04   :  { %v833_v2 = vadd.f32 1.0, %v8366_v25 }
 0xd06   :  { %839 = vrot.lane.b32.xlu0 %v8364_v1, %s8756_s9  ;;  %8367 = vrcp.f32 %v833_v2  ;;  %v9123_v1 = vld [vmem:[%s10562_s1 + $0x8] sm:$0xff]  }
 0xd10   :  { %v8368_v35 = vpop.eup %8367 }
 0xd11   :  { %v837_v40 = vmul.f32 %v8368_v35, %v8988_v7 }
 0xd74   :  { %v961_v51 = vpop.permute.xlu0 %960 }
 0xd75   :  { %v963_v26 = vmul.f32 %v8360_v16, %v961_v51 }
 0xd77   :  { %v964_v33 = vpack.c.bf16 %v963_v26, %v963_v26 }
 0xd78   :  { %v840_v36 = vpop.permute.xlu0 %839 }
 0xd79   :  { %v842_v38 = vmul.f32 %v8368_v35, %v840_v36  ;;  %1006 = vrot.lane.b32.xlu1 %v964_v33, %s8757_s10 }
 0xd7b   :  { %844 = vrot.lane.b32.xlu0 %v842_v38, %s8757_s10 }
 0xdeb   :  { %v1007_v39 = vpop.permute.xlu1 %1006 }
 0xdec   :  { %7545 = vmatmul.mubr.msk.bf16.vlgmr.msra.gmra.mrb[32].mxu1 %vm97_vm1, %v1007_v39 }
 0xded   :  { %v845_v41 = vpop.permute.xlu0 %844  ;;  %7557 = vmatpush3.bf16.msra.mxu1 %v8926_v9  ;;  %7560 = vmatprep.mubr.msk.bf16.mxu1 %vm8754_vm0, %v8753_v0 }
 0xdee   :  { %v9063_v42 = vadd.f32 %v845_v41, %v837_v40  ;;  %7558 = vmatprep.subr.bf16.mxu1 %v8753_v0 }
 0xdf0   :  { %8369 = vtanh.f32 %v9063_v42 }
 0xdf1   :  { %7559 = vmatpush3.bf16.msra.mxu1 %v8932_v10 }
 0xdf2   :  { %7572 = vmatprep.subr.bf16.mxu1 %v8753_v0 }
 0xdfa   :  { %v8370_v43 = vpop.eup %8369 }
 0xdfb   :  { %850 = vrot.lane.b32.xlu0 %v8370_v43, %s8756_s9 }
 0xe6d   :  { %v851_v7 = vpop.permute.xlu0 %850 }
 0xe6e   :  { %v853_v44 = vmul.f32 %v8368_v35, %v851_v7 }
 0xe70   :  { %v1077_v45 = vpack.c.bf16 %v853_v44, %v853_v44 }
 0xe72   :  { %1079 = vrot.lane.b32.xlu0 %v1077_v45, %s8757_s10 }
 0xebf   :  { %v1045_v46 = vpop.f32.mrb[32].mxu1 }
 0xec0   :  { %v1046_v48 = vadd.f32 %v1045_v46, %v9044_v4  ;;  %v7546_v50 = vpop.f32.mrb[33].mxu1  ;;  %v9087_v4 = vld [vmem:[%s10561_s2 + $0x8] sm:$0xff]  }
 0xec1   :  { %v1048_v52 = vpop.f32.mrb[34].mxu1 }
 0xec2   :  { %v1051_v8 = vadd.f32 %v8913_v47, %v1046_v48  ;;  %v7547_v53 = vpop.f32.mrb[35].mxu1 }
 0xec4   :  { %8371 = vtanh.f32 %v1051_v8  ;;  %v6705_v55 = vmul.f32 -1.442695, %v1051_v8 }
 0xec6   :  { %8373 = vpow2.f32 %v6705_v55 }
 0xece   :  { %v8372_v3 = vpop.eup %8371 }
 0xecf   :  { %1061 = vrot.lane.b32.xlu1 %v8372_v3, %s8756_s9 }
 0xed0   :  { %v8374_v56 = vpop.eup %8373 }
 0xed1   :  { %v1055_v57 = vadd.f32 1.0, %v8374_v56 }
 0xed3   :  { %8375 = vrcp.f32 %v1055_v57 }
 0xedd   :  { %v8376_v58 = vpop.eup %8375 }
 0xede   :  { %v1059_v61 = vmul.f32 %v8376_v58, %v9015_v37 }
 0xee4   :  { %v1080_v54 = vpop.permute.xlu0 %1079 }
 0xee5   :  { %7553 = vmatmul.mubr.msk.bf16.vlgmr.msra.gmra.mrb[28].mxu0 %vm97_vm1, %v1080_v54 }
 0xee6   :  { %7565 = vmatpush3.bf16.msra.mxu0 %v9078_v27  ;;  %7568 = vmatprep.mubr.msk.bf16.mxu0 %vm8754_vm0, %v8753_v0 }
 0xee7   :  { %7566 = vmatprep.subr.bf16.mxu0 %v8753_v0 }
 0xeea   :  { %7567 = vmatpush3.bf16.msra.mxu0 %v9087_v4 }
 0xeeb   :  { %7580 = vmatprep.subr.bf16.mxu0 %v8753_v0 }
 0xeed   :  { %7569 = vmatmul.mubr.msk.bf16.vlgmr.msra.gmra.mrb[32].mxu0 %vm97_vm1, %v1007_v39 }
 0xeee   :  { %7581 = vmatpush3.bf16.msra.mxu0 %v8849_v28  ;;  %7584 = vmatprep.mubr.msk.bf16.mxu0 %vm8754_vm0, %v8753_v0 }
 0xeef   :  { %7582 = vmatprep.subr.bf16.mxu0 %v8753_v0 }
 0xef2   :  { %7583 = vmatpush3.bf16.msra.mxu0 %v8860_v30 }
 0xef3   :  { %7596 = vmatprep.subr.bf16.mxu0 %v8753_v0 }
 0xf41   :  { %v1062_v59 = vpop.permute.xlu1 %1061 }
 0xf42   :  { %v1064_v60 = vmul.f32 %v8376_v58, %v1062_v59 }
 0xf44   :  { %1066 = vrot.lane.b32.xlu1 %v1064_v60, %s8757_s10 }
 0xfb6   :  { %v1067_v62 = vpop.permute.xlu1 %1066 }
 0xfb7   :  { %v9100_v63 = vadd.f32 %v1067_v62, %v1059_v61 }
 0xfb8   :  { %v1118_v5 = vpop.f32.mrb[28].mxu0 }
 0xfb9   :  { %8377 = vtanh.f32 %v9100_v63  ;;  %v7554_v6 = vpop.f32.mrb[29].mxu0 }
 0xfba   :  { %v1121_v12 = vpop.f32.mrb[30].mxu0 }
 0xfbb   :  { %v7555_v13 = vpop.f32.mrb[31].mxu0 }
 0xfc0   :  { %v1231_v14 = vpop.f32.mrb[32].mxu0 }
 0xfc1   :  { %v7570_v15 = vpop.f32.mrb[33].mxu0 }
 0xfc2   :  { %v1234_v16 = vpop.f32.mrb[34].mxu0 }
 0xfc3   :  { %v8378_v17 = vpop.eup %8377  ;;  %v7571_v18 = vpop.f32.mrb[35].mxu0 }
 0xfc4   :  { %1072 = vrot.lane.b32.xlu1 %v8378_v17, %s8756_s9 }
0x1036   :  { %v1073_v20 = vpop.permute.xlu1 %1072 }
0x1037   :  { %v1075_v21 = vmul.f32 %v8376_v58, %v1073_v20 }
0x1039   :  { %v1076_v23 = vpack.c.bf16 %v1075_v21, %v1075_v21 }
0x103b   :  { %1125 = vrot.lane.b32.xlu1 %v1076_v23, %s8757_s10 }
0x10ad   :  { %v1126_v37 = vpop.permute.xlu1 %1125 }
0x10ae   :  { %7561 = vmatmul.mubr.msk.bf16.vlgmr.msra.gmra.mrb[36].mxu1 %vm97_vm1, %v1126_v37  ;;  %7585 = vmatmul.mubr.msk.bf16.vlgmr.msra.gmra.mrb[36].mxu0 %vm97_vm1, %v1126_v37 }
0x10af   :  { %7573 = vmatpush3.bf16.msra.mxu1 %v9110_v24  ;;  %7576 = vmatprep.mubr.msk.bf16.mxu1 %vm8754_vm0, %v8753_v0 }
0x10b0   :  { %7574 = vmatprep.subr.bf16.mxu1 %v8753_v0  ;;  %7597 = vmatpush3.bf16.msra.mxu0 %v8874_v32 }
0x10b1   :  { %7598 = vmatprep.subr.bf16.mxu0 %v8753_v0  ;;  %7600 = vmatprep.mubr.msk.bf16.mxu0 %vm8754_vm0, %v8753_v0 }
0x10b3   :  { %7575 = vmatpush3.bf16.msra.mxu1 %v9123_v1 }
0x10b4   :  { %7588 = vmatprep.subr.bf16.mxu1 %v8753_v0  ;;  %7599 = vmatpush3.bf16.msra.mxu0 %v8884_v34 }
0x10b5   :  { %7612 = vmatprep.subr.bf16.mxu0 %v8753_v0 }
0x10b6   :  { %7577 = vmatmul.mubr.msk.bf16.vlgmr.msra.gmra.mrb[40].mxu1 %vm97_vm1, %v6709_v19 }
0x10b7   :  { %7589 = vmatpush3.bf16.msra.mxu1 %v8854_v29  ;;  %7592 = vmatprep.mubr.msk.bf16.mxu1 %vm8754_vm0, %v8753_v0 }
0x10b8   :  { %7590 = vmatprep.subr.bf16.mxu1 %v8753_v0 }
0x10bb   :  { %7591 = vmatpush3.bf16.msra.mxu1 %v8867_v31 }
0x10bc   :  { %7604 = vmatprep.subr.bf16.mxu1 %v8753_v0 }
0x1181   :  { %v1164_v25 = vpop.f32.mrb[36].mxu1  ;;  %v9139_v2 = vpop.f32.mrb[36].mxu0 }
0x1182   :  { %v1165_v51 = vadd.f32 %v1164_v25, %v1118_v5  ;;  %v7562_v26 = vpop.f32.mrb[37].mxu1  ;;  %v7586_v33 = vpop.f32.mrb[37].mxu0 }
0x1183   :  { %v1167_v35 = vpop.f32.mrb[38].mxu1  ;;  %v1343_v36 = vpop.f32.mrb[38].mxu0 }
0x1184   :  { %v7563_v38 = vpop.f32.mrb[39].mxu1  ;;  %v7587_v39 = vpop.f32.mrb[39].mxu0 }
0x1189   :  { %v1274_v40 = vpop.f32.mrb[40].mxu1 }
0x118a   :  { %v1275_v41 = vadd.f32 %v1274_v40, %v1231_v14  ;;  %v7578_v43 = vpop.f32.mrb[41].mxu1 }
0x118b   :  { %v1277_v7 = vpop.f32.mrb[42].mxu1 }
0x118c   :  { %v1280_v44 = vadd.f32 %v8838_v11, %v1275_v41  ;;  %v7579_v45 = vpop.f32.mrb[43].mxu1  ;;  %v1170_v11 = vadd.f32 %v8974_v49, %v1165_v51 }
0x118e   :  { %8379 = vtanh.f32 %v1280_v44  ;;  %v6712_v48 = vmul.f32 -1.442695, %v1280_v44  ;;  %v6708_v59 = vmul.f32 -1.442695, %v1170_v11 }
0x1190   :  { %8381 = vpow2.f32 %v6712_v48 }
0x1198   :  { %v8380_v46 = vpop.eup %8379 }
0x1199   :  { %1290 = vrot.lane.b32.xlu0 %v8380_v46, %s8756_s9 }
0x119a   :  { %v8382_v50 = vpop.eup %8381 }
0x119b   :  { %v1284_v52 = vadd.f32 1.0, %v8382_v50 }
0x119d   :  { %8383 = vrcp.f32 %v1284_v52 }
0x11a7   :  { %v8384_v8 = vpop.eup %8383 }
0x11a8   :  { %v1288_v54 = vmul.f32 %v8384_v8, %v9050_v22 }
0x120b   :  { %v1291_v53 = vpop.permute.xlu0 %1290 }
0x120c   :  { %v1293_v3 = vmul.f32 %v8384_v8, %v1291_v53 }
0x120e   :  { %1295 = vrot.lane.b32.xlu1 %v1293_v3, %s8757_s10 }
0x1280   :  { %v1296_v55 = vpop.permute.xlu1 %1295 }
0x1281   :  { %v9145_v56 = vadd.f32 %v1296_v55, %v1288_v54  ;;  %v6719_v55 = vld [vmem:[%s10563_s0 + $0x10] sm:$0xf] }
0x1283   :  { %8385 = vtanh.f32 %v9145_v56 }
0x1284   :  { %8387 = vtanh.f32 %v1170_v11 }
0x1285   :  { %8389 = vpow2.f32 %v6708_v59 }
0x128d   :  { %v8386_v57 = vpop.eup %8385 }
0x128e   :  { %1301 = vrot.lane.b32.xlu0 %v8386_v57, %s8756_s9  ;;  %v8388_v58 = vpop.eup %8387 }
0x128f   :  { %v8390_v60 = vpop.eup %8389 }
0x1290   :  { %v1174_v61 = vadd.f32 1.0, %v8390_v60 }
0x1292   :  { %1180 = vrot.lane.b32.xlu0 %v8388_v58, %s8756_s9  ;;  %8391 = vrcp.f32 %v1174_v61 }
0x129c   :  { %v8392_v6 = vpop.eup %8391 }
0x129d   :  { %v1178_v15 = vmul.f32 %v8392_v6, %v9063_v42 }
0x1300   :  { %v1302_v22 = vpop.permute.xlu0 %1301 }
0x1301   :  { %v1304_v62 = vmul.f32 %v8384_v8, %v1302_v22 }
0x1303   :  { %v1305_v5 = vpack.c.bf16 %v1304_v62, %v1304_v62 }
0x1304   :  { %v1181_v12 = vpop.permute.xlu0 %1180 }
0x1305   :  { %v1183_v13 = vmul.f32 %v8392_v6, %v1181_v12  ;;  %1347 = vrot.lane.b32.xlu1 %v1305_v5, %s8757_s10 }
0x1307   :  { %1185 = vrot.lane.b32.xlu0 %v1183_v13, %s8757_s10 }
0x1377   :  { %v1348_v14 = vpop.permute.xlu1 %1347 }
0x1378   :  { %7593 = vmatmul.mubr.msk.bf16.vlgmr.msra.gmra.mrb[44].mxu1 %vm97_vm1, %v1348_v14 }
0x1379   :  { %v1186_v16 = vpop.permute.xlu0 %1185  ;;  %7605 = vmatpush3.bf16.msra.mxu1 %v8926_v9  ;;  %7608 = vmatprep.mubr.msk.bf16.mxu1 %vm8754_vm0, %v8753_v0 }
0x137a   :  { %v9158_v17 = vadd.f32 %v1186_v16, %v1178_v15  ;;  %7606 = vmatprep.subr.bf16.mxu1 %v8753_v0 }
0x137c   :  { %8393 = vtanh.f32 %v9158_v17 }
0x137d   :  { %7607 = vmatpush3.bf16.msra.mxu1 %v8932_v10 }
0x137e   :  { %7620 = vmatprep.subr.bf16.mxu1 %v8753_v0 }
0x1386   :  { %v8394_v18 = vpop.eup %8393 }
0x1387   :  { %1191 = vrot.lane.b32.xlu0 %v8394_v18, %s8756_s9 }
0x13f9   :  { %v1192_v42 = vpop.permute.xlu0 %1191 }
0x13fa   :  { %v1194_v20 = vmul.f32 %v8392_v6, %v1192_v42 }
0x13fc   :  { %v1418_v21 = vpack.c.bf16 %v1194_v20, %v1194_v20 }
0x13fe   :  { %1420 = vrot.lane.b32.xlu0 %v1418_v21, %s8757_s10 }
0x144b   :  { %v1386_v23 = vpop.f32.mrb[44].mxu1 }
0x144c   :  { %v1387_v37 = vadd.f32 %v1386_v23, %v9139_v2  ;;  %v7594_v19 = vpop.f32.mrb[45].mxu1 }
0x144d   :  { %v1389_v25 = vpop.f32.mrb[46].mxu1 }
0x144e   :  { %v1392_v51 = vadd.f32 %v8913_v47, %v1387_v37  ;;  %v7595_v26 = vpop.f32.mrb[47].mxu1 }
0x1450   :  { %8395 = vtanh.f32 %v1392_v51  ;;  %v6715_v47 = vmul.f32 -1.442695, %v1392_v51 }
0x1452   :  { %8397 = vpow2.f32 %v6715_v47 }
0x145a   :  { %v8396_v33 = vpop.eup %8395 }
0x145b   :  { %1402 = vrot.lane.b32.xlu1 %v8396_v33, %s8756_s9 }
0x145c   :  { %v8398_v2 = vpop.eup %8397 }
0x145d   :  { %v1396_v36 = vadd.f32 1.0, %v8398_v2 }
0x145f   :  { %8399 = vrcp.f32 %v1396_v36 }
0x1469   :  { %v8400_v38 = vpop.eup %8399 }
0x1470   :  { %v1421_v35 = vpop.permute.xlu0 %1420 }
0x1471   :  { %7601 = vmatmul.mubr.msk.bf16.vlgmr.msra.gmra.mrb[40].mxu0 %vm97_vm1, %v1421_v35 }
0x1472   :  { %7613 = vmatpush3.bf16.msra.mxu0 %v9078_v27  ;;  %7616 = vmatprep.mubr.msk.bf16.mxu0 %vm8754_vm0, %v8753_v0 }
0x1473   :  { %7614 = vmatprep.subr.bf16.mxu0 %v8753_v0 }
0x1476   :  { %7615 = vmatpush3.bf16.msra.mxu0 %v9087_v4 }
0x1477   :  { %7628 = vmatprep.subr.bf16.mxu0 %v8753_v0 }
0x1479   :  { %7617 = vmatmul.mubr.msk.bf16.vlgmr.msra.gmra.mrb[44].mxu0 %vm97_vm1, %v1348_v14 }
0x147a   :  { %7629 = vmatpush3.bf16.msra.mxu0 %v8849_v28  ;;  %7632 = vmatprep.mubr.msk.bf16.mxu0 %vm8754_vm0, %v8753_v0  ;;  %v1400_v28 = vmul.f32 %v8400_v38, %v9100_v63 }
0x147b   :  { %7630 = vmatprep.subr.bf16.mxu0 %v8753_v0 }
0x147e   :  { %7631 = vmatpush3.bf16.msra.mxu0 %v8860_v30 }
0x147f   :  { %7644 = vmatprep.subr.bf16.mxu0 %v8753_v0 }
0x14cd   :  { %v1403_v39 = vpop.permute.xlu1 %1402 }
0x14ce   :  { %v1405_v40 = vmul.f32 %v8400_v38, %v1403_v39 }
0x14d0   :  { %1407 = vrot.lane.b32.xlu1 %v1405_v40, %s8757_s10 }
0x1542   :  { %v1408_v41 = vpop.permute.xlu1 %1407 }
0x1543   :  { %v9185_v43 = vadd.f32 %v1408_v41, %v1400_v28 }
0x1544   :  { %v1459_v7 = vpop.f32.mrb[40].mxu0 }
0x1545   :  { %8401 = vtanh.f32 %v9185_v43  ;;  %v7602_v30 = vpop.f32.mrb[41].mxu0 }
0x1546   :  { %v1462_v44 = vpop.f32.mrb[42].mxu0 }
0x1547   :  { %v7603_v45 = vpop.f32.mrb[43].mxu0 }
0x154c   :  { %v1572_v46 = vpop.f32.mrb[44].mxu0 }
0x154d   :  { %v7618_v48 = vpop.f32.mrb[45].mxu0 }
0x154e   :  { %v1575_v50 = vpop.f32.mrb[46].mxu0 }
0x154f   :  { %v8402_v52 = vpop.eup %8401  ;;  %v7619_v8 = vpop.f32.mrb[47].mxu0 }
0x1550   :  { %1413 = vrot.lane.b32.xlu1 %v8402_v52, %s8756_s9  ;;  %v9250_v52 = vld [vmem:[%s10564_s3 + $0x1] ss:$0 sm:$0xff] }
0x15c2   :  { %v1414_v53 = vpop.permute.xlu1 %1413 }
0x15c3   :  { %v1416_v3 = vmul.f32 %v8400_v38, %v1414_v53 }
0x15c5   :  { %v1417_v54 = vpack.c.bf16 %v1416_v3, %v1416_v3 }
0x15c7   :  { %1466 = vrot.lane.b32.xlu1 %v1417_v54, %s8757_s10  ;;  %v9265_v54 = vld [vmem:[%s10561_s2 + $0x10] sm:$0xff]  }
0x1639   :  { %v1467_v63 = vpop.permute.xlu1 %1466 }
0x163a   :  { %7609 = vmatmul.mubr.msk.bf16.vlgmr.msra.gmra.mrb[48].mxu1 %vm97_vm1, %v1467_v63  ;;  %7633 = vmatmul.mubr.msk.bf16.vlgmr.msra.gmra.mrb[48].mxu0 %vm97_vm1, %v1467_v63  ;;  %v9274_v63 = vld [vmem:[%s10561_s2 + $0x18] sm:$0xff]  }
0x163b   :  { %7621 = vmatpush3.bf16.msra.mxu1 %v9110_v24  ;;  %7624 = vmatprep.mubr.msk.bf16.mxu1 %vm8754_vm0, %v8753_v0 }
0x163c   :  { %7622 = vmatprep.subr.bf16.mxu1 %v8753_v0  ;;  %7645 = vmatpush3.bf16.msra.mxu0 %v8874_v32 }
0x163d   :  { %7646 = vmatprep.subr.bf16.mxu0 %v8753_v0  ;;  %7648 = vmatprep.mubr.msk.bf16.mxu0 %vm8754_vm0, %v8753_v0 }
0x163f   :  { %7623 = vmatpush3.bf16.msra.mxu1 %v9123_v1 }
0x1640   :  { %7636 = vmatprep.subr.bf16.mxu1 %v8753_v0  ;;  %7647 = vmatpush3.bf16.msra.mxu0 %v8884_v34 }
0x1641   :  { %7660 = vmatprep.subr.bf16.mxu0 %v8753_v0 }
0x1642   :  { %7625 = vmatmul.mubr.msk.bf16.vlgmr.msra.gmra.mrb[52].mxu1 %vm97_vm1, %v6719_v55 }
0x1643   :  { %7637 = vmatpush3.bf16.msra.mxu1 %v8854_v29  ;;  %7640 = vmatprep.mubr.msk.bf16.mxu1 %vm8754_vm0, %v8753_v0 }
0x1644   :  { %7638 = vmatprep.subr.bf16.mxu1 %v8753_v0 }
0x1647   :  { %7639 = vmatpush3.bf16.msra.mxu1 %v8867_v31  ;;  %v9219_v31 = vld [vmem:[%s10564_s3] ss:$0 sm:$0xff] }
0x1648   :  { %7652 = vmatprep.subr.bf16.mxu1 %v8753_v0 }
0x170d   :  { %v1505_v32 = vpop.f32.mrb[48].mxu1  ;;  %v9214_v11 = vpop.f32.mrb[48].mxu0 }
0x170e   :  { %v1506_v57 = vadd.f32 %v1505_v32, %v1459_v7  ;;  %v7610_v34 = vpop.f32.mrb[49].mxu1  ;;  %v7634_v58 = vpop.f32.mrb[49].mxu0 }
0x170f   :  { %v1508_v59 = vpop.f32.mrb[50].mxu1  ;;  %v1684_v60 = vpop.f32.mrb[50].mxu0 }
0x1710   :  { %v7611_v61 = vpop.f32.mrb[51].mxu1  ;;  %v7635_v22 = vpop.f32.mrb[51].mxu0  ;;  %v1511_v25 = vadd.f32 %v8974_v49, %v1506_v57 }
0x1712   :  { %v6718_v33 = vmul.f32 -1.442695, %v1511_v25 }
0x1715   :  { %v1615_v29 = vpop.f32.mrb[52].mxu1 }
0x1716   :  { %v1616_v62 = vadd.f32 %v1615_v29, %v1572_v46  ;;  %v7626_v5 = vpop.f32.mrb[53].mxu1 }
0x1717   :  { %v1618_v6 = vpop.f32.mrb[54].mxu1 }
0x1718   :  { %v1621_v12 = vadd.f32 %v9219_v31, %v1616_v62  ;;  %v7627_v13 = vpop.f32.mrb[55].mxu1 }
0x171a   :  { %8403 = vtanh.f32 %v1621_v12  ;;  %v6722_v15 = vmul.f32 -1.442695, %v1621_v12 }
0x171c   :  { %8405 = vpow2.f32 %v6722_v15 }
0x1724   :  { %v8404_v14 = vpop.eup %8403 }
0x1725   :  { %1631 = vrot.lane.b32.xlu0 %v8404_v14, %s8756_s9 }
0x1726   :  { %v8406_v16 = vpop.eup %8405 }
0x1727   :  { %v1625_v18 = vadd.f32 1.0, %v8406_v16 }
0x1729   :  { %8407 = vrcp.f32 %v1625_v18 }
0x1733   :  { %v8408_v42 = vpop.eup %8407 }
0x1734   :  { %v1629_v23 = vmul.f32 %v8408_v42, %v9145_v56 }
0x1797   :  { %v1632_v20 = vpop.permute.xlu0 %1631 }
0x1798   :  { %v1634_v21 = vmul.f32 %v8408_v42, %v1632_v20  ;;  %v9294_v20 = vld [vmem:[%s10561_s2 + $0x20] sm:$0xff]  }
0x179a   :  { %1636 = vrot.lane.b32.xlu1 %v1634_v21, %s8757_s10  ;;  %v6729_v21 = vld [vmem:[%s10563_s0 + $0x14] sm:$0xf] }
0x180c   :  { %v1637_v37 = vpop.permute.xlu1 %1636 }
0x180d   :  { %v9225_v19 = vadd.f32 %v1637_v37, %v1629_v23  ;;  %v9308_v23 = vld [vmem:[%s10561_s2 + $0x28] sm:$0xff]   ;;  %v9316_v37 = vld [vmem:[%s10562_s1 + $0x10] sm:$0xff]  }
0x180f   :  { %8409 = vtanh.f32 %v9225_v19 }
0x1810   :  { %8411 = vtanh.f32 %v1511_v25  ;;  %v9325_v25 = vld [vmem:[%s10562_s1 + $0x18] sm:$0xff]  }
0x1811   :  { %8413 = vpow2.f32 %v6718_v33 }
0x1819   :  { %v8410_v51 = vpop.eup %8409 }
0x181a   :  { %1642 = vrot.lane.b32.xlu0 %v8410_v51, %s8756_s9  ;;  %v8412_v26 = vpop.eup %8411 }
0x181b   :  { %v8414_v35 = vpop.eup %8413 }
0x181c   :  { %v1515_v47 = vadd.f32 1.0, %v8414_v35 }
0x181e   :  { %1521 = vrot.lane.b32.xlu0 %v8412_v26, %s8756_s9  ;;  %8415 = vrcp.f32 %v1515_v47 }
0x1828   :  { %v8416_v38 = vpop.eup %8415 }
0x1829   :  { %v1519_v28 = vmul.f32 %v8416_v38, %v9158_v17 }
0x188c   :  { %v1643_v56 = vpop.permute.xlu0 %1642 }
0x188d   :  { %v1645_v2 = vmul.f32 %v8408_v42, %v1643_v56 }
0x188f   :  { %v1646_v36 = vpack.c.bf16 %v1645_v2, %v1645_v2 }
0x1890   :  { %v1522_v39 = vpop.permute.xlu0 %1521 }
0x1891   :  { %v1524_v49 = vmul.f32 %v8416_v38, %v1522_v39  ;;  %1688 = vrot.lane.b32.xlu1 %v1646_v36, %s8757_s10 }
0x1893   :  { %1526 = vrot.lane.b32.xlu0 %v1524_v49, %s8757_s10 }
0x1903   :  { %v1689_v40 = vpop.permute.xlu1 %1688 }
0x1904   :  { %7641 = vmatmul.mubr.msk.bf16.vlgmr.msra.gmra.mrb[56].mxu1 %vm97_vm1, %v1689_v40 }
0x1905   :  { %v1527_v41 = vpop.permute.xlu0 %1526  ;;  %7653 = vmatpush3.bf16.msra.mxu1 %v8926_v9  ;;  %7656 = vmatprep.mubr.msk.bf16.mxu1 %vm8754_vm0, %v8753_v0 }
0x1906   :  { %v9238_v7 = vadd.f32 %v1527_v41, %v1519_v28  ;;  %7654 = vmatprep.subr.bf16.mxu1 %v8753_v0 }
0x1908   :  { %8417 = vtanh.f32 %v9238_v7 }
0x1909   :  { %7655 = vmatpush3.bf16.msra.mxu1 %v8932_v10 }
0x190a   :  { %7668 = vmatprep.subr.bf16.mxu1 %v8753_v0 }
0x1912   :  { %v8418_v30 = vpop.eup %8417 }
0x1913   :  { %1532 = vrot.lane.b32.xlu0 %v8418_v30, %s8756_s9 }
0x1985   :  { %v1533_v17 = vpop.permute.xlu0 %1532 }
0x1986   :  { %v1535_v44 = vmul.f32 %v8416_v38, %v1533_v17 }
0x1988   :  { %v1759_v45 = vpack.c.bf16 %v1535_v44, %v1535_v44 }
0x198a   :  { %1761 = vrot.lane.b32.xlu0 %v1759_v45, %s8757_s10 }
0x19d7   :  { %v1727_v9 = vpop.f32.mrb[56].mxu1 }
0x19d8   :  { %v1728_v46 = vadd.f32 %v1727_v9, %v9214_v11  ;;  %v7642_v48 = vpop.f32.mrb[57].mxu1 }
0x19d9   :  { %v1730_v50 = vpop.f32.mrb[58].mxu1 }
0x19da   :  { %v1733_v10 = vadd.f32 %v9250_v52, %v1728_v46  ;;  %v7643_v8 = vpop.f32.mrb[59].mxu1 }
0x19dc   :  { %8419 = vtanh.f32 %v1733_v10  ;;  %v6725_v55 = vmul.f32 -1.442695, %v1733_v10 }
0x19de   :  { %8421 = vpow2.f32 %v6725_v55 }
0x19e6   :  { %v8420_v53 = vpop.eup %8419 }
0x19e7   :  { %1743 = vrot.lane.b32.xlu1 %v8420_v53, %s8756_s9 }
0x19e8   :  { %v8422_v32 = vpop.eup %8421 }
0x19e9   :  { %v1737_v11 = vadd.f32 1.0, %v8422_v32 }
0x19eb   :  { %8423 = vrcp.f32 %v1737_v11 }
0x19f5   :  { %v8424_v57 = vpop.eup %8423 }
0x19f6   :  { %v1741_v59 = vmul.f32 %v8424_v57, %v9185_v43 }
0x19fc   :  { %v1762_v3 = vpop.permute.xlu0 %1761 }
0x19fd   :  { %7649 = vmatmul.mubr.msk.bf16.vlgmr.msra.gmra.mrb[52].mxu0 %vm97_vm1, %v1762_v3  ;;  %v9340_v3 = vld [vmem:[%s10564_s3 + $0x2] ss:$0 sm:$0xff] }
0x19fe   :  { %7661 = vmatpush3.bf16.msra.mxu0 %v9078_v27  ;;  %7664 = vmatprep.mubr.msk.bf16.mxu0 %vm8754_vm0, %v8753_v0 }
0x19ff   :  { %7662 = vmatprep.subr.bf16.mxu0 %v8753_v0 }
0x1a02   :  { %7663 = vmatpush3.bf16.msra.mxu0 %v9087_v4 }
0x1a03   :  { %7676 = vmatprep.subr.bf16.mxu0 %v8753_v0 }
0x1a05   :  { %7665 = vmatmul.mubr.msk.bf16.vlgmr.msra.gmra.mrb[56].mxu0 %vm97_vm1, %v1689_v40 }
0x1a06   :  { %7677 = vmatpush3.bf16.msra.mxu0 %v9265_v54  ;;  %7680 = vmatprep.mubr.msk.bf16.mxu0 %vm8754_vm0, %v8753_v0 }
0x1a07   :  { %7678 = vmatprep.subr.bf16.mxu0 %v8753_v0 }
0x1a0a   :  { %7679 = vmatpush3.bf16.msra.mxu0 %v9274_v63 }
0x1a0b   :  { %7692 = vmatprep.subr.bf16.mxu0 %v8753_v0 }
0x1a59   :  { %v1744_v34 = vpop.permute.xlu1 %1743 }
0x1a5a   :  { %v1746_v58 = vmul.f32 %v8424_v57, %v1744_v34 }
0x1a5c   :  { %1748 = vrot.lane.b32.xlu1 %v1746_v58, %s8757_s10 }
0x1ace   :  { %v1749_v60 = vpop.permute.xlu1 %1748 }
0x1acf   :  { %v9280_v61 = vadd.f32 %v1749_v60, %v1741_v59 }
0x1ad0   :  { %v1800_v22 = vpop.f32.mrb[52].mxu0 }
0x1ad1   :  { %8425 = vtanh.f32 %v9280_v61  ;;  %v7650_v29 = vpop.f32.mrb[53].mxu0 }
0x1ad2   :  { %v1803_v62 = vpop.f32.mrb[54].mxu0 }
0x1ad3   :  { %v7651_v5 = vpop.f32.mrb[55].mxu0 }
0x1ad8   :  { %v1913_v6 = vpop.f32.mrb[56].mxu0 }
0x1ad9   :  { %v7666_v12 = vpop.f32.mrb[57].mxu0 }
0x1ada   :  { %v1916_v13 = vpop.f32.mrb[58].mxu0 }
0x1adb   :  { %v8426_v14 = vpop.eup %8425  ;;  %v7667_v15 = vpop.f32.mrb[59].mxu0  ;;  %v9353_v13 = vld [vmem:[%s10562_s1 + $0x20] sm:$0xff]  }
0x1adc   :  { %1754 = vrot.lane.b32.xlu1 %v8426_v14, %s8756_s9 }
0x1b4e   :  { %v1755_v16 = vpop.permute.xlu1 %1754 }
0x1b4f   :  { %v1757_v18 = vmul.f32 %v8424_v57, %v1755_v16 }
0x1b51   :  { %v1758_v42 = vpack.c.bf16 %v1757_v18, %v1757_v18 }
0x1b53   :  { %1807 = vrot.lane.b32.xlu1 %v1758_v42, %s8757_s10 }
0x1bc5   :  { %v1808_v43 = vpop.permute.xlu1 %1807 }
0x1bc6   :  { %7657 = vmatmul.mubr.msk.bf16.vlgmr.msra.gmra.mrb[60].mxu1 %vm97_vm1, %v1808_v43  ;;  %7681 = vmatmul.mubr.msk.bf16.vlgmr.msra.gmra.mrb[60].mxu0 %vm97_vm1, %v1808_v43 }
0x1bc7   :  { %7669 = vmatpush3.bf16.msra.mxu1 %v9110_v24  ;;  %7672 = vmatprep.mubr.msk.bf16.mxu1 %vm8754_vm0, %v8753_v0 }
0x1bc8   :  { %7670 = vmatprep.subr.bf16.mxu1 %v8753_v0  ;;  %7693 = vmatpush3.bf16.msra.mxu0 %v9294_v20 }
0x1bc9   :  { %7694 = vmatprep.subr.bf16.mxu0 %v8753_v0  ;;  %7696 = vmatprep.mubr.msk.bf16.mxu0 %vm8754_vm0, %v8753_v0 }
0x1bcb   :  { %7671 = vmatpush3.bf16.msra.mxu1 %v9123_v1 }
0x1bcc   :  { %7684 = vmatprep.subr.bf16.mxu1 %v8753_v0  ;;  %7695 = vmatpush3.bf16.msra.mxu0 %v9308_v23 }
0x1bcd   :  { %7708 = vmatprep.subr.bf16.mxu0 %v8753_v0 }
0x1bce   :  { %7673 = vmatmul.mubr.msk.bf16.vlgmr.msra.gmra.mrb[64].mxu1 %vm97_vm1, %v6729_v21 }
0x1bcf   :  { %7685 = vmatpush3.bf16.msra.mxu1 %v9316_v37  ;;  %7688 = vmatprep.mubr.msk.bf16.mxu1 %vm8754_vm0, %v8753_v0 }
0x1bd0   :  { %7686 = vmatprep.subr.bf16.mxu1 %v8753_v0 }
0x1bd3   :  { %7687 = vmatpush3.bf16.msra.mxu1 %v9325_v25 }
0x1bd4   :  { %7700 = vmatprep.subr.bf16.mxu1 %v8753_v0 }
0x1c99   :  { %v1846_v51 = vpop.f32.mrb[60].mxu1  ;;  %v9329_v26 = vpop.f32.mrb[60].mxu0 }
0x1c9a   :  { %v1847_v33 = vadd.f32 %v1846_v51, %v1800_v22  ;;  %v7658_v35 = vpop.f32.mrb[61].mxu1  ;;  %v7682_v47 = vpop.f32.mrb[61].mxu0 }
0x1c9b   :  { %v1849_v56 = vpop.f32.mrb[62].mxu1  ;;  %v2025_v2 = vpop.f32.mrb[62].mxu0 }
0x1c9c   :  { %v7659_v36 = vpop.f32.mrb[63].mxu1  ;;  %v7683_v38 = vpop.f32.mrb[63].mxu0  ;;  %v1852_v55 = vadd.f32 %v9340_v3, %v1847_v33 }
0x1ca1   :  { %v1956_v39 = vpop.f32.mrb[64].mxu1 }
0x1ca2   :  { %v1957_v49 = vadd.f32 %v1956_v39, %v1913_v6  ;;  %v7674_v40 = vpop.f32.mrb[65].mxu1 }
0x1ca3   :  { %v1959_v28 = vpop.f32.mrb[66].mxu1 }
0x1ca4   :  { %v1962_v41 = vadd.f32 %v9219_v31, %v1957_v49  ;;  %v7675_v30 = vpop.f32.mrb[67].mxu1 }
0x1ca6   :  { %8427 = vtanh.f32 %v1962_v41  ;;  %v6732_v44 = vmul.f32 -1.442695, %v1962_v41 }
0x1ca8   :  { %8429 = vpow2.f32 %v6732_v44 }
0x1cb0   :  { %v8428_v17 = vpop.eup %8427 }
0x1cb1   :  { %1972 = vrot.lane.b32.xlu0 %v8428_v17, %s8756_s9 }
0x1cb2   :  { %v8430_v45 = vpop.eup %8429 }
0x1cb3   :  { %v1966_v9 = vadd.f32 1.0, %v8430_v45 }
0x1cb5   :  { %8431 = vrcp.f32 %v1966_v9 }
0x1cbf   :  { %v8432_v46 = vpop.eup %8431 }
0x1cc0   :  { %v1970_v10 = vmul.f32 %v8432_v46, %v9225_v19  ;;  %v6728_v19 = vmul.f32 -1.442695, %v1852_v55 }
0x1d23   :  { %v1973_v48 = vpop.permute.xlu0 %1972 }
0x1d24   :  { %v1975_v50 = vmul.f32 %v8432_v46, %v1973_v48 }
0x1d26   :  { %1977 = vrot.lane.b32.xlu1 %v1975_v50, %s8757_s10 }
0x1d98   :  { %v1978_v8 = vpop.permute.xlu1 %1977 }
0x1d99   :  { %v9335_v53 = vadd.f32 %v1978_v8, %v1970_v10 }
0x1d9b   :  { %8433 = vtanh.f32 %v9335_v53 }
0x1d9c   :  { %8435 = vtanh.f32 %v1852_v55 }
0x1d9d   :  { %8437 = vpow2.f32 %v6728_v19 }
0x1da5   :  { %v8434_v32 = vpop.eup %8433 }
0x1da6   :  { %1983 = vrot.lane.b32.xlu0 %v8434_v32, %s8756_s9  ;;  %v8436_v11 = vpop.eup %8435  ;;  %v6739_v32 = vld [vmem:[%s10563_s0 + $0x18] sm:$0xf] }
0x1da7   :  { %v8438_v57 = vpop.eup %8437 }
0x1da8   :  { %v1856_v34 = vadd.f32 1.0, %v8438_v57 }
0x1daa   :  { %1862 = vrot.lane.b32.xlu0 %v8436_v11, %s8756_s9  ;;  %8439 = vrcp.f32 %v1856_v34 }
0x1db4   :  { %v8440_v22 = vpop.eup %8439 }
0x1db5   :  { %v1860_v6 = vmul.f32 %v8440_v22, %v9238_v7  ;;  %v9365_v7 = vld [vmem:[%s10562_s1 + $0x28] sm:$0xff]  }
0x1e18   :  { %v1984_v58 = vpop.permute.xlu0 %1983 }
0x1e19   :  { %v1986_v59 = vmul.f32 %v8432_v46, %v1984_v58 }
0x1e1b   :  { %v1987_v60 = vpack.c.bf16 %v1986_v59, %v1986_v59 }
0x1e1c   :  { %v1863_v29 = vpop.permute.xlu0 %1862 }
0x1e1d   :  { %v1865_v62 = vmul.f32 %v8440_v22, %v1863_v29  ;;  %2029 = vrot.lane.b32.xlu1 %v1987_v60, %s8757_s10 }
0x1e1f   :  { %1867 = vrot.lane.b32.xlu0 %v1865_v62, %s8757_s10 }
0x1e8f   :  { %v2030_v5 = vpop.permute.xlu1 %2029 }
0x1e90   :  { %7689 = vmatmul.mubr.msk.bf16.vlgmr.msra.gmra.mrb[68].mxu1 %vm97_vm1, %v2030_v5 }
0x1e91   :  { %v1868_v12 = vpop.permute.xlu0 %1867  ;;  %7701 = vmatpush3.bf16.msra.mxu1 %v9353_v13  ;;  %7704 = vmatprep.mubr.msk.bf16.mxu1 %vm8754_vm0, %v8753_v0 }
0x1e92   :  { %v9358_v14 = vadd.f32 %v1868_v12, %v1860_v6  ;;  %7702 = vmatprep.subr.bf16.mxu1 %v8753_v0 }
0x1e94   :  { %8441 = vtanh.f32 %v9358_v14 }
0x1e95   :  { %7703 = vmatpush3.bf16.msra.mxu1 %v9365_v7 }
0x1e96   :  { %7716 = vmatprep.subr.bf16.mxu1 %v8753_v0 }
0x1e9e   :  { %v8442_v15 = vpop.eup %8441 }
0x1e9f   :  { %1873 = vrot.lane.b32.xlu0 %v8442_v15, %s8756_s9 }
0x1f11   :  { %v1874_v16 = vpop.permute.xlu0 %1873 }
0x1f12   :  { %v1876_v18 = vmul.f32 %v8440_v22, %v1874_v16 }
0x1f14   :  { %v2100_v42 = vpack.c.bf16 %v1876_v18, %v1876_v18 }
0x1f16   :  { %2102 = vrot.lane.b32.xlu0 %v2100_v42, %s8757_s10 }
0x1f63   :  { %v2068_v43 = vpop.f32.mrb[68].mxu1 }
0x1f64   :  { %v2069_v21 = vadd.f32 %v2068_v43, %v9329_v26  ;;  %v7690_v51 = vpop.f32.mrb[69].mxu1 }
0x1f65   :  { %v2071_v33 = vpop.f32.mrb[70].mxu1 }
0x1f66   :  { %v2074_v35 = vadd.f32 %v9250_v52, %v2069_v21  ;;  %v7691_v47 = vpop.f32.mrb[71].mxu1 }
0x1f68   :  { %8443 = vtanh.f32 %v2074_v35 }
0x1f72   :  { %v8444_v56 = vpop.eup %8443 }
0x1f73   :  { %2084 = vrot.lane.b32.xlu1 %v8444_v56, %s8756_s9 }
0x1f88   :  { %v2103_v2 = vpop.permute.xlu0 %2102 }
0x1f89   :  { %7697 = vmatmul.mubr.msk.bf16.vlgmr.msra.gmra.mrb[64].mxu0 %vm97_vm1, %v2103_v2 }
0x1f8a   :  { %7709 = vmatpush3.bf16.msra.mxu0 %v9078_v27  ;;  %7712 = vmatprep.mubr.msk.bf16.mxu0 %vm8754_vm0, %v8753_v0  ;;  %v6735_v27 = vmul.f32 -1.442695, %v2074_v35 }
0x1f8b   :  { %7710 = vmatprep.subr.bf16.mxu0 %v8753_v0 }
0x1f8c   :  { %8445 = vpow2.f32 %v6735_v27 }
0x1f8e   :  { %7711 = vmatpush3.bf16.msra.mxu0 %v9087_v4 }
0x1f8f   :  { %7724 = vmatprep.subr.bf16.mxu0 %v8753_v0 }
0x1f91   :  { %7713 = vmatmul.mubr.msk.bf16.vlgmr.msra.gmra.mrb[68].mxu0 %vm97_vm1, %v2030_v5 }
0x1f92   :  { %7725 = vmatpush3.bf16.msra.mxu0 %v9265_v54  ;;  %7728 = vmatprep.mubr.msk.bf16.mxu0 %vm8754_vm0, %v8753_v0 }
0x1f93   :  { %7726 = vmatprep.subr.bf16.mxu0 %v8753_v0 }
0x1f96   :  { %7727 = vmatpush3.bf16.msra.mxu0 %v9274_v63  ;;  %v8446_v26 = vpop.eup %8445 }
0x1f97   :  { %7740 = vmatprep.subr.bf16.mxu0 %v8753_v0  ;;  %v2078_v36 = vadd.f32 1.0, %v8446_v26 }
0x1f99   :  { %8447 = vrcp.f32 %v2078_v36 }
0x1fa3   :  { %v8448_v4 = vpop.eup %8447 }
0x1fa4   :  { %v2082_v49 = vmul.f32 %v8448_v4, %v9280_v61 }
0x1fe5   :  { %v2085_v38 = vpop.permute.xlu1 %2084 }
0x1fe6   :  { %v2087_v39 = vmul.f32 %v8448_v4, %v2085_v38 }
0x1fe8   :  { %2089 = vrot.lane.b32.xlu1 %v2087_v39, %s8757_s10 }
0x205a   :  { %v2090_v40 = vpop.permute.xlu1 %2089 }
0x205b   :  { %v9390_v28 = vadd.f32 %v2090_v40, %v2082_v49 }
0x205c   :  { %v2141_v41 = vpop.f32.mrb[64].mxu0 }
0x205d   :  { %8449 = vtanh.f32 %v9390_v28  ;;  %v7698_v30 = vpop.f32.mrb[65].mxu0 }
0x205e   :  { %v2144_v17 = vpop.f32.mrb[66].mxu0 }
0x205f   :  { %v7699_v44 = vpop.f32.mrb[67].mxu0 }
0x2064   :  { %v2254_v45 = vpop.f32.mrb[68].mxu0 }
0x2065   :  { %v7714_v9 = vpop.f32.mrb[69].mxu0 }
0x2066   :  { %v2257_v46 = vpop.f32.mrb[70].mxu0 }
0x2067   :  { %v8450_v48 = vpop.eup %8449  ;;  %v7715_v50 = vpop.f32.mrb[71].mxu0 }
0x2068   :  { %2095 = vrot.lane.b32.xlu1 %v8450_v48, %s8756_s9 }
0x20da   :  { %v2096_v10 = vpop.permute.xlu1 %2095 }
0x20db   :  { %v2098_v8 = vmul.f32 %v8448_v4, %v2096_v10 }
0x20dd   :  { %v2099_v55 = vpack.c.bf16 %v2098_v8, %v2098_v8 }
0x20df   :  { %2148 = vrot.lane.b32.xlu1 %v2099_v55, %s8757_s10 }
0x2151   :  { %v2149_v61 = vpop.permute.xlu1 %2148 }
0x2152   :  { %7705 = vmatmul.mubr.msk.bf16.vlgmr.msra.gmra.mrb[72].mxu1 %vm97_vm1, %v2149_v61  ;;  %7729 = vmatmul.mubr.msk.bf16.vlgmr.msra.gmra.mrb[72].mxu0 %vm97_vm1, %v2149_v61 }
0x2153   :  { %7717 = vmatpush3.bf16.msra.mxu1 %v9110_v24  ;;  %7720 = vmatprep.mubr.msk.bf16.mxu1 %vm8754_vm0, %v8753_v0 }
0x2154   :  { %7718 = vmatprep.subr.bf16.mxu1 %v8753_v0  ;;  %7741 = vmatpush3.bf16.msra.mxu0 %v9294_v20 }
0x2155   :  { %7742 = vmatprep.subr.bf16.mxu0 %v8753_v0  ;;  %7744 = vmatprep.mubr.msk.bf16.mxu0 %vm8754_vm0, %v8753_v0 }
0x2157   :  { %7719 = vmatpush3.bf16.msra.mxu1 %v9123_v1 }
0x2158   :  { %7732 = vmatprep.subr.bf16.mxu1 %v8753_v0  ;;  %7743 = vmatpush3.bf16.msra.mxu0 %v9308_v23 }
0x2159   :  { %7756 = vmatprep.subr.bf16.mxu0 %v8753_v0 }
0x215a   :  { %7721 = vmatmul.mubr.msk.bf16.vlgmr.msra.gmra.mrb[76].mxu1 %vm97_vm1, %v6739_v32 }
0x215b   :  { %7733 = vmatpush3.bf16.msra.mxu1 %v9316_v37  ;;  %7736 = vmatprep.mubr.msk.bf16.mxu1 %vm8754_vm0, %v8753_v0 }
0x215c   :  { %7734 = vmatprep.subr.bf16.mxu1 %v8753_v0 }
0x215f   :  { %7735 = vmatpush3.bf16.msra.mxu1 %v9325_v25 }
0x2160   :  { %7748 = vmatprep.subr.bf16.mxu1 %v8753_v0 }
0x2225   :  { %v2187_v24 = vpop.f32.mrb[72].mxu1  ;;  %v9419_v1 = vpop.f32.mrb[72].mxu0 }
0x2226   :  { %v2188_v11 = vadd.f32 %v2187_v24, %v2141_v41  ;;  %v7706_v19 = vpop.f32.mrb[73].mxu1  ;;  %v7730_v57 = vpop.f32.mrb[73].mxu0 }
0x2227   :  { %v2190_v34 = vpop.f32.mrb[74].mxu1  ;;  %v2366_v58 = vpop.f32.mrb[74].mxu0  ;;  %v8746_v19 = vld [vmem:[%s10561_s2] sm:$0xff]  }
0x2228   :  { %v7707_v59 = vpop.f32.mrb[75].mxu1  ;;  %v7731_v60 = vpop.f32.mrb[75].mxu0  ;;  %v2193_v56 = vadd.f32 %v9340_v3, %v2188_v11 }
0x222a   :  { %v6738_v26 = vmul.f32 -1.442695, %v2193_v56 }
0x222d   :  { %v2297_v22 = vpop.f32.mrb[76].mxu1 }
0x222e   :  { %v2298_v29 = vadd.f32 %v2297_v22, %v2254_v45  ;;  %v7722_v62 = vpop.f32.mrb[77].mxu1 }
0x222f   :  { %v2300_v5 = vpop.f32.mrb[78].mxu1 }
0x2230   :  { %v2303_v6 = vadd.f32 %v9219_v31, %v2298_v29  ;;  %v7723_v12 = vpop.f32.mrb[79].mxu1 }
0x2232   :  { %8451 = vtanh.f32 %v2303_v6  ;;  %v6742_v16 = vmul.f32 -1.442695, %v2303_v6 }
0x2234   :  { %8453 = vpow2.f32 %v6742_v16 }
0x223c   :  { %v8452_v15 = vpop.eup %8451 }
0x223d   :  { %2313 = vrot.lane.b32.xlu0 %v8452_v15, %s8756_s9 }
0x223e   :  { %v8454_v18 = vpop.eup %8453 }
0x223f   :  { %v2307_v42 = vadd.f32 1.0, %v8454_v18 }
0x2241   :  { %8455 = vrcp.f32 %v2307_v42 }
0x224b   :  { %v8456_v43 = vpop.eup %8455 }
0x224c   :  { %v2311_v33 = vmul.f32 %v8456_v43, %v9335_v53 }
0x22af   :  { %v2314_v21 = vpop.permute.xlu0 %2313 }
0x22b0   :  { %v2316_v51 = vmul.f32 %v8456_v43, %v2314_v21 }
0x22b2   :  { %2318 = vrot.lane.b32.xlu1 %v2316_v51, %s8757_s10 }
0x2324   :  { %v2319_v35 = vpop.permute.xlu1 %2318 }
0x2325   :  { %v9425_v47 = vadd.f32 %v2319_v35, %v2311_v33  ;;  %v8748_v35 = vld [vmem:[%s10562_s1] sm:$0xff]  }
0x2327   :  { %8457 = vtanh.f32 %v9425_v47 }
0x2328   :  { %8459 = vtanh.f32 %v2193_v56  ;;  %v8749_v56 = vld [vmem:[%s10562_s1 + $0x8] sm:$0xff]  }
0x2329   :  { %8461 = vpow2.f32 %v6738_v26 }
0x2331   :  { %v8458_v2 = vpop.eup %8457 }
0x2332   :  { %2324 = vrot.lane.b32.xlu0 %v8458_v2, %s8756_s9  ;;  %v8460_v27 = vpop.eup %8459  ;;  %v6749_v2 = vld [vmem:[%s10563_s0 + $0x1c] sm:$0xf] }
0x2333   :  { %v8462_v36 = vpop.eup %8461 }
0x2334   :  { %v2197_v4 = vadd.f32 1.0, %v8462_v36 }
0x2336   :  { %2203 = vrot.lane.b32.xlu0 %v8460_v27, %s8756_s9  ;;  %8463 = vrcp.f32 %v2197_v4 }
0x2340   :  { %v8464_v49 = vpop.eup %8463 }
0x2341   :  { %v2201_v17 = vmul.f32 %v8464_v49, %v9358_v14 }
0x23a4   :  { %v2325_v53 = vpop.permute.xlu0 %2324 }
0x23a5   :  { %v2327_v38 = vmul.f32 %v8456_v43, %v2325_v53 }
0x23a7   :  { %v2328_v39 = vpack.c.bf16 %v2327_v38, %v2327_v38 }
0x23a8   :  { %v2204_v40 = vpop.permute.xlu0 %2203 }
0x23a9   :  { %v2206_v41 = vmul.f32 %v8464_v49, %v2204_v40  ;;  %2370 = vrot.lane.b32.xlu1 %v2328_v39, %s8757_s10 }
0x23ab   :  { %2208 = vrot.lane.b32.xlu0 %v2206_v41, %s8757_s10 }
0x241b   :  { %v2371_v30 = vpop.permute.xlu1 %2370 }
0x241c   :  { %7737 = vmatmul.mubr.msk.bf16.vlgmr.msra.gmra.mrb[80].mxu1 %vm97_vm1, %v2371_v30 }
0x241d   :  { %v2209_v44 = vpop.permute.xlu0 %2208  ;;  %7749 = vmatpush3.bf16.msra.mxu1 %v9353_v13  ;;  %7752 = vmatprep.mubr.msk.bf16.mxu1 %vm8754_vm0, %v8753_v0 }
0x241e   :  { %v9438_v45 = vadd.f32 %v2209_v44, %v2201_v17  ;;  %7750 = vmatprep.subr.bf16.mxu1 %v8753_v0 }
0x2420   :  { %8465 = vtanh.f32 %v9438_v45 }
0x2421   :  { %7751 = vmatpush3.bf16.msra.mxu1 %v9365_v7 }
0x2422   :  { %7764 = vmatprep.subr.bf16.mxu1 %v8753_v0 }
0x242a   :  { %v8466_v9 = vpop.eup %8465 }
0x242b   :  { %2214 = vrot.lane.b32.xlu0 %v8466_v9, %s8756_s9 }
0x249d   :  { %v2215_v14 = vpop.permute.xlu0 %2214 }
0x249e   :  { %v2217_v46 = vmul.f32 %v8464_v49, %v2215_v14 }
0x24a0   :  { %v2441_v48 = vpack.c.bf16 %v2217_v46, %v2217_v46 }
0x24a2   :  { %2443 = vrot.lane.b32.xlu0 %v2441_v48, %s8757_s10 }
0x24ef   :  { %v2409_v50 = vpop.f32.mrb[80].mxu1 }
0x24f0   :  { %v2410_v10 = vadd.f32 %v2409_v50, %v9419_v1  ;;  %v7738_v8 = vpop.f32.mrb[81].mxu1  ;;  %v8747_v1 = vld [vmem:[%s10561_s2 + $0x8] sm:$0xff]  }
0x24f1   :  { %v2412_v55 = vpop.f32.mrb[82].mxu1 }
0x24f2   :  { %v2415_v61 = vadd.f32 %v9250_v52, %v2410_v10  ;;  %v7739_v32 = vpop.f32.mrb[83].mxu1 }
0x24f4   :  { %8467 = vtanh.f32 %v2415_v61  ;;  %v6745_v57 = vmul.f32 -1.442695, %v2415_v61 }
0x24f6   :  { %8469 = vpow2.f32 %v6745_v57 }
0x24fe   :  { %v8468_v24 = vpop.eup %8467 }
0x24ff   :  { %2425 = vrot.lane.b32.xlu1 %v8468_v24, %s8756_s9 }
0x2500   :  { %v8470_v34 = vpop.eup %8469 }
0x2501   :  { %v2419_v58 = vadd.f32 1.0, %v8470_v34 }
0x2503   :  { %8471 = vrcp.f32 %v2419_v58 }
0x250d   :  { %v8472_v59 = vpop.eup %8471 }
0x2514   :  { %v2444_v11 = vpop.permute.xlu0 %2443 }
0x2515   :  { %7745 = vmatmul.mubr.msk.bf16.vlgmr.msra.gmra.mrb[76].mxu0 %vm97_vm1, %v2444_v11 }
0x2516   :  { %7757 = vmatpush3.bf16.msra.mxu0 %v8746_v19  ;;  %7760 = vmatprep.mubr.msk.bf16.mxu0 %vm8754_vm0, %v8753_v0 }
0x2517   :  { %7758 = vmatprep.subr.bf16.mxu0 %v8753_v0 }
0x251a   :  { %7759 = vmatpush3.bf16.msra.mxu0 %v8747_v1 }
0x251b   :  { %7772 = vmatprep.subr.bf16.mxu0 %v8753_v0 }
0x251d   :  { %7761 = vmatmul.mubr.msk.bf16.vlgmr.msra.gmra.mrb[80].mxu0 %vm97_vm1, %v2371_v30 }
0x251e   :  { %7773 = vmatpush3.bf16.msra.mxu0 %v9265_v54  ;;  %7776 = vmatprep.mubr.msk.bf16.mxu0 %vm8754_vm0, %v8753_v0  ;;  %v2423_v54 = vmul.f32 %v8472_v59, %v9390_v28 }
0x251f   :  { %7774 = vmatprep.subr.bf16.mxu0 %v8753_v0 }
0x2522   :  { %7775 = vmatpush3.bf16.msra.mxu0 %v9274_v63 }
0x2523   :  { %7788 = vmatprep.subr.bf16.mxu0 %v8753_v0 }
0x2571   :  { %v2426_v60 = vpop.permute.xlu1 %2425 }
0x2572   :  { %v2428_v22 = vmul.f32 %v8472_v59, %v2426_v60 }
0x2574   :  { %2430 = vrot.lane.b32.xlu1 %v2428_v22, %s8757_s10 }
0x25e6   :  { %v2431_v29 = vpop.permute.xlu1 %2430 }
0x25e7   :  { %v9469_v62 = vadd.f32 %v2431_v29, %v2423_v54 }
0x25e8   :  { %v2482_v5 = vpop.f32.mrb[76].mxu0 }
0x25e9   :  { %8473 = vtanh.f32 %v9469_v62  ;;  %v7746_v63 = vpop.f32.mrb[77].mxu0 }
0x25ea   :  { %v2485_v6 = vpop.f32.mrb[78].mxu0 }
0x25eb   :  { %v7747_v12 = vpop.f32.mrb[79].mxu0 }
0x25f0   :  { %v2595_v15 = vpop.f32.mrb[80].mxu0 }
0x25f1   :  { %v7762_v16 = vpop.f32.mrb[81].mxu0 }
0x25f2   :  { %v2598_v18 = vpop.f32.mrb[82].mxu0 }
0x25f3   :  { %v8474_v42 = vpop.eup %8473  ;;  %v7763_v43 = vpop.f32.mrb[83].mxu0 }
0x25f4   :  { %2436 = vrot.lane.b32.xlu1 %v8474_v42, %s8756_s9  ;;  %v8217_v43 = vld [vmem:[%s10561_s2 + $0x30] sm:$0xff]  }
0x2666   :  { %v2437_v21 = vpop.permute.xlu1 %2436 }
0x2667   :  { %v2439_v51 = vmul.f32 %v8472_v59, %v2437_v21 }
0x2669   :  { %v2440_v33 = vpack.c.bf16 %v2439_v51, %v2439_v51  ;;  %v8218_v51 = vld [vmem:[%s10561_s2 + $0x38] sm:$0xff]  }
0x266b   :  { %2489 = vrot.lane.b32.xlu1 %v2440_v33, %s8757_s10 }
0x26dd   :  { %v2490_v28 = vpop.permute.xlu1 %2489 }
0x26de   :  { %7753 = vmatmul.mubr.msk.bf16.vlgmr.msra.gmra.mrb[84].mxu1 %vm97_vm1, %v2490_v28  ;;  %7777 = vmatmul.mubr.msk.bf16.vlgmr.msra.gmra.mrb[84].mxu0 %vm97_vm1, %v2490_v28 }
0x26df   :  { %7765 = vmatpush3.bf16.msra.mxu1 %v8748_v35  ;;  %7768 = vmatprep.mubr.msk.bf16.mxu1 %vm8754_vm0, %v8753_v0 }
0x26e0   :  { %7766 = vmatprep.subr.bf16.mxu1 %v8753_v0  ;;  %7789 = vmatpush3.bf16.msra.mxu0 %v9294_v20 }
0x26e1   :  { %7790 = vmatprep.subr.bf16.mxu0 %v8753_v0  ;;  %7792 = vmatprep.mubr.msk.bf16.mxu0 %vm8754_vm0, %v8753_v0 }
0x26e3   :  { %7767 = vmatpush3.bf16.msra.mxu1 %v8749_v56 }
0x26e4   :  { %7780 = vmatprep.subr.bf16.mxu1 %v8753_v0  ;;  %7791 = vmatpush3.bf16.msra.mxu0 %v9308_v23 }
0x26e5   :  { %7804 = vmatprep.subr.bf16.mxu0 %v8753_v0 }
0x26e6   :  { %7769 = vmatmul.mubr.msk.bf16.vlgmr.msra.gmra.mrb[88].mxu1 %vm97_vm1, %v6749_v2 }
0x26e7   :  { %7781 = vmatpush3.bf16.msra.mxu1 %v9316_v37  ;;  %7784 = vmatprep.mubr.msk.bf16.mxu1 %vm8754_vm0, %v8753_v0 }
0x26e8   :  { %7782 = vmatprep.subr.bf16.mxu1 %v8753_v0 }
0x26eb   :  { %7783 = vmatpush3.bf16.msra.mxu1 %v9325_v25 }
0x26ec   :  { %7796 = vmatprep.subr.bf16.mxu1 %v8753_v0 }
0x27b1   :  { %v2528_v20 = vpop.f32.mrb[84].mxu1  ;;  %v9502_v27 = vpop.f32.mrb[84].mxu0 }
0x27b2   :  { %v2529_v26 = vadd.f32 %v2528_v20, %v2482_v5  ;;  %v7754_v23 = vpop.f32.mrb[85].mxu1  ;;  %v7778_v36 = vpop.f32.mrb[85].mxu0 }
0x27b3   :  { %v2531_v4 = vpop.f32.mrb[86].mxu1  ;;  %v2707_v53 = vpop.f32.mrb[86].mxu0 }
0x27b4   :  { %v7755_v38 = vpop.f32.mrb[87].mxu1  ;;  %v7779_v39 = vpop.f32.mrb[87].mxu0 }
0x27b5   :  { %v8219_v38 = vld [vmem:[%s10561_s2 + $0x40] sm:$0xff]   ;;  %v8220_v39 = vld [vmem:[%s10561_s2 + $0x48] sm:$0xff]  }
0x27b9   :  { %v2638_v37 = vpop.f32.mrb[88].mxu1 }
0x27ba   :  { %v2639_v49 = vadd.f32 %v2638_v37, %v2595_v15  ;;  %v7770_v40 = vpop.f32.mrb[89].mxu1 }
0x27bb   :  { %v2641_v41 = vpop.f32.mrb[90].mxu1 }
0x27bc   :  { %v2644_v30 = vadd.f32 %v9219_v31, %v2639_v49  ;;  %v7771_v17 = vpop.f32.mrb[91].mxu1  ;;  %v2534_v31 = vadd.f32 %v9340_v3, %v2529_v26 }
0x27be   :  { %8475 = vtanh.f32 %v2644_v30  ;;  %v6752_v44 = vmul.f32 -1.442695, %v2644_v30  ;;  %v6748_v24 = vmul.f32 -1.442695, %v2534_v31 }
0x27c0   :  { %8477 = vpow2.f32 %v6752_v44 }
0x27c8   :  { %v8476_v25 = vpop.eup %8475 }
0x27c9   :  { %2654 = vrot.lane.b32.xlu0 %v8476_v25, %s8756_s9 }
0x27ca   :  { %v8478_v9 = vpop.eup %8477 }
0x27cb   :  { %v2648_v14 = vadd.f32 1.0, %v8478_v9 }
0x27cd   :  { %8479 = vrcp.f32 %v2648_v14 }
0x27d7   :  { %v8480_v46 = vpop.eup %8479 }
0x27d8   :  { %v2652_v10 = vmul.f32 %v8480_v46, %v9425_v47 }
0x283b   :  { %v2655_v48 = vpop.permute.xlu0 %2654 }
0x283c   :  { %v2657_v50 = vmul.f32 %v8480_v46, %v2655_v48 }
0x283e   :  { %2659 = vrot.lane.b32.xlu1 %v2657_v50, %s8757_s10 }
0x28b0   :  { %v2660_v8 = vpop.permute.xlu1 %2659 }
0x28b1   :  { %v9508_v55 = vadd.f32 %v2660_v8, %v2652_v10 }
0x28b3   :  { %8481 = vtanh.f32 %v9508_v55 }
0x28b4   :  { %8483 = vtanh.f32 %v2534_v31 }
0x28b5   :  { %8485 = vpow2.f32 %v6748_v24 }
0x28bd   :  { %v8482_v61 = vpop.eup %8481 }
0x28be   :  { %2665 = vrot.lane.b32.xlu0 %v8482_v61, %s8756_s9  ;;  %v8484_v32 = vpop.eup %8483 }
0x28bf   :  { %v8486_v11 = vpop.eup %8485 }
0x28c0   :  { %v2538_v19 = vadd.f32 1.0, %v8486_v11 }
0x28c2   :  { %2544 = vrot.lane.b32.xlu0 %v8484_v32, %s8756_s9  ;;  %8487 = vrcp.f32 %v2538_v19 }
0x28cc   :  { %v8488_v34 = vpop.eup %8487 }
0x28cd   :  { %v2542_v22 = vmul.f32 %v8488_v34, %v9438_v45 }
0x2930   :  { %v2666_v47 = vpop.permute.xlu0 %2665 }
0x2931   :  { %v2668_v1 = vmul.f32 %v8480_v46, %v2666_v47 }
0x2933   :  { %v2669_v57 = vpack.c.bf16 %v2668_v1, %v2668_v1 }
0x2934   :  { %v2545_v58 = vpop.permute.xlu0 %2544 }
0x2935   :  { %v2547_v59 = vmul.f32 %v8488_v34, %v2545_v58  ;;  %2711 = vrot.lane.b32.xlu1 %v2669_v57, %s8757_s10 }
0x2937   :  { %2549 = vrot.lane.b32.xlu0 %v2547_v59, %s8757_s10 }
0x29a7   :  { %v2712_v60 = vpop.permute.xlu1 %2711 }
0x29a8   :  { %7785 = vmatmul.mubr.msk.bf16.vlgmr.msra.gmra.mrb[92].mxu1 %vm97_vm1, %v2712_v60 }
0x29a9   :  { %v2550_v54 = vpop.permute.xlu0 %2549  ;;  %7797 = vmatpush3.bf16.msra.mxu1 %v9353_v13  ;;  %7800 = vmatprep.mubr.msk.bf16.mxu1 %vm8754_vm0, %v8753_v0 }
0x29aa   :  { %v9521_v29 = vadd.f32 %v2550_v54, %v2542_v22  ;;  %7798 = vmatprep.subr.bf16.mxu1 %v8753_v0  ;;  %v8222_v22 = vld [vmem:[%s10561_s2 + $0x50] sm:$0xff]   ;;  %v8223_v54 = vld [vmem:[%s10562_s1 + $0x38] sm:$0xff]  }
0x29ac   :  { %8489 = vtanh.f32 %v9521_v29 }
0x29ad   :  { %7799 = vmatpush3.bf16.msra.mxu1 %v9365_v7 }
0x29ae   :  { %7812 = vmatprep.subr.bf16.mxu1 %v8753_v0 }
0x29b6   :  { %v8490_v5 = vpop.eup %8489 }
0x29b7   :  { %2555 = vrot.lane.b32.xlu0 %v8490_v5, %s8756_s9 }
0x2a29   :  { %v2556_v45 = vpop.permute.xlu0 %2555 }
0x2a2a   :  { %v2558_v63 = vmul.f32 %v8488_v34, %v2556_v45 }
0x2a2c   :  { %v2782_v6 = vpack.c.bf16 %v2558_v63, %v2558_v63 }
0x2a2e   :  { %2784 = vrot.lane.b32.xlu0 %v2782_v6, %s8757_s10 }
0x2a7b   :  { %v2750_v13 = vpop.f32.mrb[92].mxu1 }
0x2a7c   :  { %v2751_v12 = vadd.f32 %v2750_v13, %v9502_v27  ;;  %v7786_v15 = vpop.f32.mrb[93].mxu1 }
0x2a7d   :  { %v2753_v16 = vpop.f32.mrb[94].mxu1 }
0x2a7e   :  { %v2756_v18 = vadd.f32 %v9250_v52, %v2751_v12  ;;  %v7787_v42 = vpop.f32.mrb[95].mxu1  ;;  %v9605_v12 = vld [vmem:[%s10564_s3 + $0x3] ss:$0 sm:$0xff] }
0x2a80   :  { %8491 = vtanh.f32 %v2756_v18  ;;  %v6755_v52 = vmul.f32 -1.442695, %v2756_v18 }
0x2a82   :  { %8493 = vpow2.f32 %v6755_v52 }
0x2a8a   :  { %v8492_v7 = vpop.eup %8491 }
0x2a8b   :  { %2766 = vrot.lane.b32.xlu1 %v8492_v7, %s8756_s9 }
0x2a8c   :  { %v8494_v33 = vpop.eup %8493 }
0x2a8d   :  { %v2760_v28 = vadd.f32 1.0, %v8494_v33 }
0x2a8f   :  { %8495 = vrcp.f32 %v2760_v28 }
0x2a99   :  { %v8496_v35 = vpop.eup %8495 }
0x2a9a   :  { %v2764_v20 = vmul.f32 %v8496_v35, %v9469_v62 }
0x2aa0   :  { %v2785_v21 = vpop.permute.xlu0 %2784 }
0x2aa1   :  { %7793 = vmatmul.mubr.msk.bf16.vlgmr.msra.gmra.mrb[88].mxu0 %vm97_vm1, %v2785_v21 }
0x2aa2   :  { %7805 = vmatpush3.bf16.msra.mxu0 %v8217_v43  ;;  %7808 = vmatprep.mubr.msk.bf16.mxu0 %vm8754_vm0, %v8753_v0 }
0x2aa3   :  { %7806 = vmatprep.subr.bf16.mxu0 %v8753_v0 }
0x2aa6   :  { %7807 = vmatpush3.bf16.msra.mxu0 %v8218_v51 }
0x2aa7   :  { %7820 = vmatprep.subr.bf16.mxu0 %v8753_v0 }
0x2aa9   :  { %7809 = vmatmul.mubr.msk.bf16.vlgmr.msra.gmra.mrb[92].mxu0 %vm97_vm1, %v2712_v60  ;;  %v8221_v60 = vld [vmem:[%s10562_s1 + $0x30] sm:$0xff]  }
0x2aaa   :  { %7824 = vmatprep.mubr.msk.bf16.mxu0 %vm8754_vm0, %v8753_v0  ;;  %7821 = vmatpush3.bf16.msra.mxu0 %v8219_v38  ;;  %v8225_v38 = vld [vmem:[%s10562_s1 + $0x40] sm:$0xff]  }
0x2aab   :  { %7822 = vmatprep.subr.bf16.mxu0 %v8753_v0 }
0x2aae   :  { %7823 = vmatpush3.bf16.msra.mxu0 %v8220_v39  ;;  %v8226_v39 = vld [vmem:[%s10561_s2 + $0x30] sm:$0xff]  }
0x2aaf   :  { %7836 = vmatprep.subr.bf16.mxu0 %v8753_v0 }
0x2afd   :  { %v2767_v56 = vpop.permute.xlu1 %2766 }
0x2afe   :  { %v2769_v2 = vmul.f32 %v8496_v35, %v2767_v56 }
0x2b00   :  { %2771 = vrot.lane.b32.xlu1 %v2769_v2, %s8757_s10 }
0x2b72   :  { %v2772_v27 = vpop.permute.xlu1 %2771 }
0x2b73   :  { %v9548_v26 = vadd.f32 %v2772_v27, %v2764_v20 }
0x2b74   :  { %v2823_v23 = vpop.f32.mrb[88].mxu0 }
0x2b75   :  { %8497 = vtanh.f32 %v9548_v26  ;;  %v7794_v36 = vpop.f32.mrb[89].mxu0 }
0x2b76   :  { %v2826_v4 = vpop.f32.mrb[90].mxu0 }
0x2b77   :  { %v7795_v53 = vpop.f32.mrb[91].mxu0 }
0x2b7c   :  { %v9558_v62 = vpop.f32.mrb[92].mxu0 }
0x2b7d   :  { %v7810_v37 = vpop.f32.mrb[93].mxu0 }
0x2b7e   :  { %v2960_v49 = vpop.f32.mrb[94].mxu0 }
0x2b7f   :  { %v8498_v40 = vpop.eup %8497  ;;  %v7811_v41 = vpop.f32.mrb[95].mxu0 }
0x2b80   :  { %2777 = vrot.lane.b32.xlu1 %v8498_v40, %s8756_s9 }
0x2bf2   :  { %v2778_v30 = vpop.permute.xlu1 %2777 }
0x2bf3   :  { %v2780_v17 = vmul.f32 %v8496_v35, %v2778_v30 }
0x2bf5   :  { %v2781_v25 = vpack.c.bf16 %v2780_v17, %v2780_v17  ;;  %v9644_v17 = vld [vmem:[%s10564_s3 + $0x4] ss:$0 sm:$0xff] }
0x2bf7   :  { %2830 = vrot.lane.b32.xlu1 %v2781_v25, %s8757_s10 }
0x2c69   :  { %v2831_v44 = vpop.permute.xlu1 %2830 }
0x2c6a   :  { %7801 = vmatmul.mubr.msk.bf16.vlgmr.msra.gmra.mrb[96].mxu1 %vm97_vm1, %v2831_v44  ;;  %7825 = vmatmul.mubr.msk.bf16.vlgmr.msra.gmra.mrb[96].mxu0 %vm97_vm1, %v2831_v44 }
0x2c6b   :  { %7816 = vmatprep.mubr.msk.bf16.mxu1 %vm8754_vm0, %v8753_v0  ;;  %7840 = vmatprep.mubr.msk.bf16.mxu0 %vm8754_vm0, %v8753_v0 }
0x2c6c   :  { %7813 = vmatpush3.bf16.msra.mxu1 %v8221_v60  ;;  %7837 = vmatpush3.bf16.msra.mxu0 %v8222_v22  ;;  %v8230_v60 = vld [vmem:[%s10561_s2 + $0x40] sm:$0xff]   ;;  %v8231_v22 = vld [vmem:[%s10562_s1 + $0x58] sm:$0xff]  }
0x2c6d   :  { %7814 = vmatprep.subr.bf16.mxu1 %v8753_v0  ;;  %7838 = vmatprep.subr.bf16.mxu0 %v8753_v0 }
0x2c70   :  { %7815 = vmatpush3.bf16.msra.mxu1 %v8223_v54 }
0x2c71   :  { %7828 = vmatprep.subr.bf16.mxu1 %v8753_v0 }
0x2d3d   :  { %v2869_v9 = vpop.f32.mrb[96].mxu1  ;;  %v9569_v14 = vpop.f32.mrb[96].mxu0 }
0x2d3e   :  { %v2870_v46 = vadd.f32 %v2869_v9, %v2823_v23  ;;  %v7802_v48 = vpop.f32.mrb[97].mxu1  ;;  %v7826_v50 = vpop.f32.mrb[97].mxu0 }
0x2d3f   :  { %v2872_v10 = vpop.f32.mrb[98].mxu1  ;;  %v3106_v8 = vpop.f32.mrb[98].mxu0 }
0x2d40   :  { %v2875_v31 = vadd.f32 %v9340_v3, %v2870_v46  ;;  %v7803_v61 = vpop.f32.mrb[99].mxu1  ;;  %v7827_v32 = vpop.f32.mrb[99].mxu0 }
0x2d42   :  { %8499 = vtanh.f32 %v2875_v31  ;;  %v6758_v11 = vmul.f32 -1.442695, %v2875_v31 }
0x2d44   :  { %8501 = vpow2.f32 %v6758_v11 }
0x2d4c   :  { %v8500_v24 = vpop.eup %8499 }
0x2d4d   :  { %2885 = vrot.lane.b32.xlu0 %v8500_v24, %s8756_s9 }
0x2d4e   :  { %v8502_v19 = vpop.eup %8501 }
0x2d4f   :  { %v2879_v47 = vadd.f32 1.0, %v8502_v19 }
0x2d51   :  { %8503 = vrcp.f32 %v2879_v47 }
0x2d5b   :  { %v8504_v1 = vpop.eup %8503 }
0x2d5c   :  { %v2883_v58 = vmul.f32 %v8504_v1, %v9521_v29  ;;  %v8224_v29 = vld [vmem:[%s10561_s2 + $0x58] sm:$0xff]  }
0x2d5d   :  { %7839 = vmatpush3.bf16.msra.mxu0 %v8224_v29 }
0x2d5e   :  { %7852 = vmatprep.subr.bf16.mxu0 %v8753_v0 }
0x2dbf   :  { %v2886_v57 = vpop.permute.xlu0 %2885 }
0x2dc0   :  { %v2888_v34 = vmul.f32 %v8504_v1, %v2886_v57 }
0x2dc2   :  { %2890 = vrot.lane.b32.xlu1 %v2888_v34, %s8757_s10 }
0x2e34   :  { %v2891_v59 = vpop.permute.xlu1 %2890 }
0x2e35   :  { %v9575_v3 = vadd.f32 %v2891_v59, %v2883_v58  ;;  %v8229_v59 = vld [vmem:[%s10562_s1 + $0x50] sm:$0xff]  }
0x2e37   :  { %8505 = vtanh.f32 %v9575_v3 }
0x2e41   :  { %v8506_v5 = vpop.eup %8505 }
0x2e42   :  { %2896 = vrot.lane.b32.xlu0 %v8506_v5, %s8756_s9 }
0x2eb4   :  { %v2897_v45 = vpop.permute.xlu0 %2896 }
0x2eb5   :  { %v2899_v63 = vmul.f32 %v8504_v1, %v2897_v45 }
0x2eb7   :  { %v2900_v6 = vpack.c.bf16 %v2899_v63, %v2899_v63 }
0x2eb9   :  { %2964 = vrot.lane.b32.xlu1 %v2900_v6, %s8757_s10  ;;  %v9683_v6 = vld [vmem:[%s10564_s3 + $0x5] ss:$0 sm:$0xff] }
0x2f2b   :  { %v2965_v13 = vpop.permute.xlu1 %2964 }
0x2f2c   :  { %7817 = vmatmul.mubr.msk.bf16.vlgmr.msra.gmra.mrb[100].mxu1 %vm97_vm1, %v2965_v13  ;;  %7841 = vmatmul.mubr.msk.bf16.vlgmr.msra.gmra.mrb[100].mxu0 %vm97_vm1, %v2965_v13 }
0x2f2d   :  { %7832 = vmatprep.mubr.msk.bf16.mxu1 %vm8754_vm0, %v8753_v0  ;;  %7856 = vmatprep.mubr.msk.bf16.mxu0 %vm8754_vm0, %v8753_v0 }
0x2f2e   :  { %7829 = vmatpush3.bf16.msra.mxu1 %v8225_v38  ;;  %7853 = vmatpush3.bf16.msra.mxu0 %v8226_v39  ;;  %v8233_v38 = vld [vmem:[%s10562_s1 + $0x30] sm:$0xff]  }
0x2f2f   :  { %7830 = vmatprep.subr.bf16.mxu1 %v8753_v0  ;;  %7854 = vmatprep.subr.bf16.mxu0 %v8753_v0  ;;  %v8234_v39 = vld [vmem:[%s10561_s2 + $0x50] sm:$0xff]  }
0x2fff   :  { %v3015_v15 = vpop.f32.mrb[100].mxu1  ;;  %v9607_v16 = vpop.f32.mrb[100].mxu0 }
0x3000   :  { %v3016_v18 = vadd.f32 %v3015_v15, %v9558_v62  ;;  %v7818_v42 = vpop.f32.mrb[101].mxu1  ;;  %v7842_v7 = vpop.f32.mrb[101].mxu0  ;;  %v8227_v62 = vld [vmem:[%s10562_s1 + $0x48] sm:$0xff]  }
0x3001   :  { %v3018_v43 = vpop.f32.mrb[102].mxu1  ;;  %v3252_v21 = vpop.f32.mrb[102].mxu0  ;;  %7831 = vmatpush3.bf16.msra.mxu1 %v8227_v62  ;;  %v8235_v62 = vld [vmem:[%s10562_s1 + $0x38] sm:$0xff]  }
0x3002   :  { %v3021_v51 = vadd.f32 %v9605_v12, %v3016_v18  ;;  %v7819_v52 = vpop.f32.mrb[103].mxu1  ;;  %v7843_v33 = vpop.f32.mrb[103].mxu0  ;;  %7844 = vmatprep.subr.bf16.mxu1 %v8753_v0 }
0x3004   :  { %8507 = vtanh.f32 %v3021_v51  ;;  %v6773_v35 = vmul.f32 -1.442695, %v3021_v51 }
0x3006   :  { %8509 = vpow2.f32 %v6773_v35 }
0x300e   :  { %v8508_v28 = vpop.eup %8507 }
0x300f   :  { %3031 = vrot.lane.b32.xlu0 %v8508_v28, %s8756_s9 }
0x3010   :  { %v8510_v56 = vpop.eup %8509 }
0x3011   :  { %v3025_v2 = vadd.f32 1.0, %v8510_v56 }
0x3013   :  { %8511 = vrcp.f32 %v3025_v2 }
0x301d   :  { %v8512_v20 = vpop.eup %8511 }
0x301e   :  { %v3029_v36 = vmul.f32 %v8512_v20, %v9508_v55  ;;  %v8228_v55 = vld [vmem:[%s10561_s2 + $0x38] sm:$0xff]  }
0x301f   :  { %7855 = vmatpush3.bf16.msra.mxu0 %v8228_v55 }
0x3020   :  { %7868 = vmatprep.subr.bf16.mxu0 %v8753_v0 }
0x3081   :  { %v3032_v27 = vpop.permute.xlu0 %3031 }
0x3082   :  { %v3034_v23 = vmul.f32 %v8512_v20, %v3032_v27 }
0x3084   :  { %3036 = vrot.lane.b32.xlu1 %v3034_v23, %s8757_s10 }
0x30f6   :  { %v3037_v4 = vpop.permute.xlu1 %3036 }
0x30f7   :  { %v9614_v53 = vadd.f32 %v3037_v4, %v3029_v36 }
0x30f9   :  { %8513 = vtanh.f32 %v9614_v53 }
0x3103   :  { %v8514_v37 = vpop.eup %8513 }
0x3104   :  { %3042 = vrot.lane.b32.xlu0 %v8514_v37, %s8756_s9 }
0x3176   :  { %v3043_v49 = vpop.permute.xlu0 %3042 }
0x3177   :  { %v3045_v40 = vmul.f32 %v8512_v20, %v3043_v49 }
0x3179   :  { %v3046_v41 = vpack.c.bf16 %v3045_v40, %v3045_v40 }
0x317b   :  { %3110 = vrot.lane.b32.xlu1 %v3046_v41, %s8757_s10 }
0x31ed   :  { %v3111_v30 = vpop.permute.xlu1 %3110 }
0x31ee   :  { %7833 = vmatmul.mubr.msk.bf16.vlgmr.msra.gmra.mrb[104].mxu1 %vm97_vm1, %v3111_v30  ;;  %7857 = vmatmul.mubr.msk.bf16.vlgmr.msra.gmra.mrb[104].mxu0 %vm97_vm1, %v3111_v30 }
0x31ef   :  { %7848 = vmatprep.mubr.msk.bf16.mxu1 %vm8754_vm0, %v8753_v0  ;;  %7872 = vmatprep.mubr.msk.bf16.mxu0 %vm8754_vm0, %v8753_v0 }
0x31f0   :  { %7845 = vmatpush3.bf16.msra.mxu1 %v8229_v59  ;;  %7869 = vmatpush3.bf16.msra.mxu0 %v8230_v60  ;;  %v8237_v59 = vld [vmem:[%s10562_s1 + $0x40] sm:$0xff]   ;;  %v8238_v60 = vld [vmem:[%s10561_s2 + $0x30] sm:$0xff]  }
0x31f1   :  { %7846 = vmatprep.subr.bf16.mxu1 %v8753_v0  ;;  %7870 = vmatprep.subr.bf16.mxu0 %v8753_v0 }
0x31f4   :  { %7847 = vmatpush3.bf16.msra.mxu1 %v8231_v22  ;;  %v8239_v22 = vld [vmem:[%s10562_s1 + $0x48] sm:$0xff]  }
0x31f5   :  { %7860 = vmatprep.subr.bf16.mxu1 %v8753_v0 }
0x32c1   :  { %v3161_v25 = vpop.f32.mrb[104].mxu1  ;;  %v9646_v44 = vpop.f32.mrb[104].mxu0 }
0x32c2   :  { %v3162_v9 = vadd.f32 %v3161_v25, %v9569_v14  ;;  %v7834_v46 = vpop.f32.mrb[105].mxu1  ;;  %v7858_v48 = vpop.f32.mrb[105].mxu0 }
0x32c3   :  { %v3164_v50 = vpop.f32.mrb[106].mxu1  ;;  %v3401_v10 = vpop.f32.mrb[106].mxu0 }
0x32c4   :  { %v3167_v8 = vadd.f32 %v9644_v17, %v3162_v9  ;;  %v7835_v31 = vpop.f32.mrb[107].mxu1  ;;  %v7859_v61 = vpop.f32.mrb[107].mxu0 }
0x32c6   :  { %8515 = vtanh.f32 %v3167_v8  ;;  %v6788_v24 = vmul.f32 -1.442695, %v3167_v8 }
0x32c8   :  { %8517 = vpow2.f32 %v6788_v24 }
0x32d0   :  { %v8516_v32 = vpop.eup %8515 }
0x32d1   :  { %3177 = vrot.lane.b32.xlu0 %v8516_v32, %s8756_s9 }
0x32d2   :  { %v8518_v11 = vpop.eup %8517 }
0x32d3   :  { %v3171_v19 = vadd.f32 1.0, %v8518_v11 }
0x32d5   :  { %8519 = vrcp.f32 %v3171_v19 }
0x32df   :  { %v8520_v47 = vpop.eup %8519 }
0x32e0   :  { %v3175_v57 = vmul.f32 %v8520_v47, %v9548_v26  ;;  %v8232_v26 = vld [vmem:[%s10561_s2 + $0x48] sm:$0xff]  }
0x32e1   :  { %7871 = vmatpush3.bf16.msra.mxu0 %v8232_v26 }
0x32e2   :  { %7884 = vmatprep.subr.bf16.mxu0 %v8753_v0 }
0x3343   :  { %v3178_v1 = vpop.permute.xlu0 %3177 }
0x3344   :  { %v3180_v14 = vmul.f32 %v8520_v47, %v3178_v1 }
0x3346   :  { %3182 = vrot.lane.b32.xlu1 %v3180_v14, %s8757_s10 }
0x33b8   :  { %v3183_v34 = vpop.permute.xlu1 %3182 }
0x33b9   :  { %v9653_v58 = vadd.f32 %v3183_v34, %v3175_v57 }
0x33bb   :  { %8521 = vtanh.f32 %v9653_v58 }
0x33c5   :  { %v8522_v54 = vpop.eup %8521 }
0x33c6   :  { %3188 = vrot.lane.b32.xlu0 %v8522_v54, %s8756_s9 }
0x3438   :  { %v3189_v29 = vpop.permute.xlu0 %3188 }
0x3439   :  { %v3191_v5 = vmul.f32 %v8520_v47, %v3189_v29 }
0x343b   :  { %v3192_v45 = vpack.c.bf16 %v3191_v5, %v3191_v5 }
0x343d   :  { %3256 = vrot.lane.b32.xlu1 %v3192_v45, %s8757_s10 }
0x34af   :  { %v3257_v63 = vpop.permute.xlu1 %3256 }
0x34b0   :  { %7849 = vmatmul.mubr.msk.bf16.vlgmr.msra.gmra.mrb[108].mxu1 %vm97_vm1, %v3257_v63  ;;  %7873 = vmatmul.mubr.msk.bf16.vlgmr.msra.gmra.mrb[108].mxu0 %vm97_vm1, %v3257_v63 }
0x34b1   :  { %7864 = vmatprep.mubr.msk.bf16.mxu1 %vm8754_vm0, %v8753_v0  ;;  %7888 = vmatprep.mubr.msk.bf16.mxu0 %vm8754_vm0, %v8753_v0 }
0x34b2   :  { %7861 = vmatpush3.bf16.msra.mxu1 %v8233_v38  ;;  %7885 = vmatpush3.bf16.msra.mxu0 %v8234_v39  ;;  %v8241_v38 = vld [vmem:[%s10562_s1 + $0x50] sm:$0xff]   ;;  %v8242_v39 = vld [vmem:[%s10561_s2 + $0x40] sm:$0xff]  }
0x34b3   :  { %7862 = vmatprep.subr.bf16.mxu1 %v8753_v0  ;;  %7886 = vmatprep.subr.bf16.mxu0 %v8753_v0 }
0x34b6   :  { %7863 = vmatpush3.bf16.msra.mxu1 %v8235_v62  ;;  %v8243_v62 = vld [vmem:[%s10562_s1 + $0x58] sm:$0xff]  }
0x34b7   :  { %7876 = vmatprep.subr.bf16.mxu1 %v8753_v0 }
0x3583   :  { %v3307_v13 = vpop.f32.mrb[108].mxu1  ;;  %v9685_v15 = vpop.f32.mrb[108].mxu0 }
0x3584   :  { %v3308_v18 = vadd.f32 %v3307_v13, %v9607_v16  ;;  %v7850_v42 = vpop.f32.mrb[109].mxu1  ;;  %v7874_v7 = vpop.f32.mrb[109].mxu0 }
0x3585   :  { %v3310_v43 = vpop.f32.mrb[110].mxu1  ;;  %v3545_v21 = vpop.f32.mrb[110].mxu0 }
0x3586   :  { %v3313_v51 = vadd.f32 %v9683_v6, %v3308_v18  ;;  %v7851_v52 = vpop.f32.mrb[111].mxu1  ;;  %v7875_v33 = vpop.f32.mrb[111].mxu0 }
0x3588   :  { %8523 = vtanh.f32 %v3313_v51  ;;  %v6803_v35 = vmul.f32 -1.442695, %v3313_v51 }
0x358a   :  { %8525 = vpow2.f32 %v6803_v35 }
0x3592   :  { %v8524_v28 = vpop.eup %8523 }
0x3593   :  { %3323 = vrot.lane.b32.xlu0 %v8524_v28, %s8756_s9 }
0x3594   :  { %v8526_v56 = vpop.eup %8525 }
0x3595   :  { %v3317_v2 = vadd.f32 1.0, %v8526_v56 }
0x3597   :  { %8527 = vrcp.f32 %v3317_v2 }
0x35a1   :  { %v8528_v20 = vpop.eup %8527 }
0x35a2   :  { %v3321_v23 = vmul.f32 %v8528_v20, %v9575_v3  ;;  %v8236_v3 = vld [vmem:[%s10561_s2 + $0x58] sm:$0xff]  }
0x35a3   :  { %7887 = vmatpush3.bf16.msra.mxu0 %v8236_v3 }
0x35a4   :  { %7900 = vmatprep.subr.bf16.mxu0 %v8753_v0 }
0x3605   :  { %v3324_v27 = vpop.permute.xlu0 %3323 }
0x3606   :  { %v3326_v16 = vmul.f32 %v8528_v20, %v3324_v27 }
0x3608   :  { %3328 = vrot.lane.b32.xlu1 %v3326_v16, %s8757_s10 }
0x367a   :  { %v3329_v36 = vpop.permute.xlu1 %3328 }
0x367b   :  { %v9692_v4 = vadd.f32 %v3329_v36, %v3321_v23 }
0x367d   :  { %8529 = vtanh.f32 %v9692_v4 }
0x3687   :  { %v8530_v55 = vpop.eup %8529 }
0x3688   :  { %3334 = vrot.lane.b32.xlu0 %v8530_v55, %s8756_s9 }
0x36fa   :  { %v3335_v37 = vpop.permute.xlu0 %3334 }
0x36fb   :  { %v9712_v49 = vmul.f32 %v8528_v20, %v3335_v37 }
0x36fd   :  { %v3343_v40 = vpack.c.bf16 %v9712_v49, %v9712_v49 }
0x36ff   :  { %3405 = vrot.lane.b32.xlu1 %v3343_v40, %s8757_s10 }
0x3771   :  { %v3406_v41 = vpop.permute.xlu1 %3405 }
0x3772   :  { %7865 = vmatmul.mubr.msk.bf16.vlgmr.msra.gmra.mrb[112].mxu1 %vm97_vm1, %v3406_v41  ;;  %7889 = vmatmul.mubr.msk.bf16.vlgmr.msra.gmra.mrb[112].mxu0 %vm97_vm1, %v3406_v41 }
0x3773   :  { %7880 = vmatprep.mubr.msk.bf16.mxu1 %vm8754_vm0, %v8753_v0  ;;  %7904 = vmatprep.mubr.msk.bf16.mxu0 %vm8754_vm0, %v8753_v0 }
0x3774   :  { %7877 = vmatpush3.bf16.msra.mxu1 %v8237_v59  ;;  %7901 = vmatpush3.bf16.msra.mxu0 %v8238_v60  ;;  %v8245_v60 = vld [vmem:[%s10562_s1 + $0x30] sm:$0xff]  }
0x3775   :  { %7878 = vmatprep.subr.bf16.mxu1 %v8753_v0  ;;  %7902 = vmatprep.subr.bf16.mxu0 %v8753_v0 }
0x3778   :  { %7879 = vmatpush3.bf16.msra.mxu1 %v8239_v22  ;;  %v8246_v22 = vld [vmem:[%s10561_s2 + $0x50] sm:$0xff]  }
0x3779   :  { %7892 = vmatprep.subr.bf16.mxu1 %v8753_v0 }
0x3845   :  { %v3456_v30 = vpop.f32.mrb[112].mxu1  ;;  %v9723_v25 = vpop.f32.mrb[112].mxu0 }
0x3846   :  { %v3457_v9 = vadd.f32 %v3456_v30, %v9646_v44  ;;  %v7866_v46 = vpop.f32.mrb[113].mxu1  ;;  %v7890_v48 = vpop.f32.mrb[113].mxu0 }
0x3847   :  { %v3459_v50 = vpop.f32.mrb[114].mxu1  ;;  %v3689_v10 = vpop.f32.mrb[114].mxu0 }
0x3848   :  { %v3462_v8 = vadd.f32 %v9605_v12, %v3457_v9  ;;  %v7867_v31 = vpop.f32.mrb[115].mxu1  ;;  %v7891_v61 = vpop.f32.mrb[115].mxu0 }
0x384a   :  { %8531 = vtanh.f32 %v3462_v8  ;;  %v6818_v24 = vmul.f32 -1.442695, %v3462_v8 }
0x384c   :  { %8533 = vpow2.f32 %v6818_v24 }
0x3854   :  { %v8532_v32 = vpop.eup %8531 }
0x3855   :  { %3472 = vrot.lane.b32.xlu0 %v8532_v32, %s8756_s9 }
0x3856   :  { %v8534_v11 = vpop.eup %8533 }
0x3857   :  { %v3466_v19 = vadd.f32 1.0, %v8534_v11 }
0x3859   :  { %8535 = vrcp.f32 %v3466_v19 }
0x3863   :  { %v8536_v47 = vpop.eup %8535 }
0x3864   :  { %v3470_v14 = vmul.f32 %v8536_v47, %v9614_v53  ;;  %v8240_v53 = vld [vmem:[%s10561_s2 + $0x38] sm:$0xff]  }
0x3865   :  { %7903 = vmatpush3.bf16.msra.mxu0 %v8240_v53  ;;  %v8247_v53 = vld [vmem:[%s10562_s1 + $0x38] sm:$0xff]  }
0x3866   :  { %7916 = vmatprep.subr.bf16.mxu0 %v8753_v0 }
0x38c7   :  { %v3473_v1 = vpop.permute.xlu0 %3472 }
0x38c8   :  { %v3475_v44 = vmul.f32 %v8536_v47, %v3473_v1 }
0x38ca   :  { %3477 = vrot.lane.b32.xlu1 %v3475_v44, %s8757_s10 }
0x393c   :  { %v3478_v57 = vpop.permute.xlu1 %3477 }
0x393d   :  { %v9730_v34 = vadd.f32 %v3478_v57, %v3470_v14 }
0x393f   :  { %8537 = vtanh.f32 %v9730_v34 }
0x3949   :  { %v8538_v26 = vpop.eup %8537 }
0x394a   :  { %3483 = vrot.lane.b32.xlu0 %v8538_v26, %s8756_s9 }
0x39bc   :  { %v3484_v54 = vpop.permute.xlu0 %3483 }
0x39bd   :  { %v3486_v29 = vmul.f32 %v8536_v47, %v3484_v54 }
0x39bf   :  { %v3487_v5 = vpack.c.bf16 %v3486_v29, %v3486_v29 }
0x39c1   :  { %3549 = vrot.lane.b32.xlu1 %v3487_v5, %s8757_s10 }
0x3a33   :  { %v3550_v45 = vpop.permute.xlu1 %3549 }
0x3a34   :  { %7881 = vmatmul.mubr.msk.bf16.vlgmr.msra.gmra.mrb[116].mxu1 %vm97_vm1, %v3550_v45  ;;  %7905 = vmatmul.mubr.msk.bf16.vlgmr.msra.gmra.mrb[116].mxu0 %vm97_vm1, %v3550_v45 }
0x3a35   :  { %7896 = vmatprep.mubr.msk.bf16.mxu1 %vm8754_vm0, %v8753_v0  ;;  %7920 = vmatprep.mubr.msk.bf16.mxu0 %vm8754_vm0, %v8753_v0 }
0x3a36   :  { %7893 = vmatpush3.bf16.msra.mxu1 %v8241_v38  ;;  %7917 = vmatpush3.bf16.msra.mxu0 %v8242_v39  ;;  %v8249_v39 = vld [vmem:[%s10562_s1 + $0x40] sm:$0xff]  }
0x3a37   :  { %7894 = vmatprep.subr.bf16.mxu1 %v8753_v0  ;;  %7918 = vmatprep.subr.bf16.mxu0 %v8753_v0 }
0x3a3a   :  { %7895 = vmatpush3.bf16.msra.mxu1 %v8243_v62  ;;  %v8250_v62 = vld [vmem:[%s10561_s2 + $0x30] sm:$0xff]  }
0x3a3b   :  { %7908 = vmatprep.subr.bf16.mxu1 %v8753_v0 }
0x3b07   :  { %v3600_v63 = vpop.f32.mrb[116].mxu1  ;;  %v9757_v13 = vpop.f32.mrb[116].mxu0 }
0x3b08   :  { %v3601_v18 = vadd.f32 %v3600_v63, %v9685_v15  ;;  %v7882_v42 = vpop.f32.mrb[117].mxu1  ;;  %v7906_v7 = vpop.f32.mrb[117].mxu0 }
0x3b09   :  { %v3603_v43 = vpop.f32.mrb[118].mxu1  ;;  %v3838_v21 = vpop.f32.mrb[118].mxu0 }
0x3b0a   :  { %v3606_v51 = vadd.f32 %v9644_v17, %v3601_v18  ;;  %v7883_v52 = vpop.f32.mrb[119].mxu1  ;;  %v7907_v33 = vpop.f32.mrb[119].mxu0 }
0x3b0c   :  { %8539 = vtanh.f32 %v3606_v51  ;;  %v6833_v35 = vmul.f32 -1.442695, %v3606_v51 }
0x3b0e   :  { %8541 = vpow2.f32 %v6833_v35 }
0x3b16   :  { %v8540_v28 = vpop.eup %8539 }
0x3b17   :  { %3616 = vrot.lane.b32.xlu0 %v8540_v28, %s8756_s9 }
0x3b18   :  { %v8542_v56 = vpop.eup %8541 }
0x3b19   :  { %v3610_v2 = vadd.f32 1.0, %v8542_v56 }
0x3b1b   :  { %8543 = vrcp.f32 %v3610_v2 }
0x3b25   :  { %v8544_v20 = vpop.eup %8543 }
0x3b26   :  { %v3614_v16 = vmul.f32 %v8544_v20, %v9653_v58  ;;  %v8244_v58 = vld [vmem:[%s10561_s2 + $0x48] sm:$0xff]  }
0x3b27   :  { %7919 = vmatpush3.bf16.msra.mxu0 %v8244_v58  ;;  %v8251_v58 = vld [vmem:[%s10562_s1 + $0x48] sm:$0xff]  }
0x3b28   :  { %7932 = vmatprep.subr.bf16.mxu0 %v8753_v0 }
0x3b89   :  { %v3617_v27 = vpop.permute.xlu0 %3616 }
0x3b8a   :  { %v3619_v15 = vmul.f32 %v8544_v20, %v3617_v27 }
0x3b8c   :  { %3621 = vrot.lane.b32.xlu1 %v3619_v15, %s8757_s10 }
0x3bfe   :  { %v3622_v23 = vpop.permute.xlu1 %3621 }
0x3bff   :  { %v9764_v36 = vadd.f32 %v3622_v23, %v3614_v16 }
0x3c01   :  { %8545 = vtanh.f32 %v9764_v36 }
0x3c0b   :  { %v8546_v3 = vpop.eup %8545 }
0x3c0c   :  { %3627 = vrot.lane.b32.xlu0 %v8546_v3, %s8756_s9 }
0x3c7e   :  { %v3628_v55 = vpop.permute.xlu0 %3627 }
0x3c7f   :  { %v3630_v37 = vmul.f32 %v8544_v20, %v3628_v55 }
0x3c81   :  { %v3631_v40 = vpack.c.bf16 %v3630_v37, %v3630_v37 }
0x3c83   :  { %3693 = vrot.lane.b32.xlu1 %v3631_v40, %s8757_s10 }
0x3cf5   :  { %v3694_v41 = vpop.permute.xlu1 %3693 }
0x3cf6   :  { %7897 = vmatmul.mubr.msk.bf16.vlgmr.msra.gmra.mrb[120].mxu1 %vm97_vm1, %v3694_v41  ;;  %7921 = vmatmul.mubr.msk.bf16.vlgmr.msra.gmra.mrb[120].mxu0 %vm97_vm1, %v3694_v41 }
0x3cf7   :  { %7912 = vmatprep.mubr.msk.bf16.mxu1 %vm8754_vm0, %v8753_v0  ;;  %7936 = vmatprep.mubr.msk.bf16.mxu0 %vm8754_vm0, %v8753_v0 }
0x3cf8   :  { %7909 = vmatpush3.bf16.msra.mxu1 %v8245_v60  ;;  %7933 = vmatpush3.bf16.msra.mxu0 %v8246_v22  ;;  %v8253_v22 = vld [vmem:[%s10562_s1 + $0x50] sm:$0xff]  }
0x3cf9   :  { %7910 = vmatprep.subr.bf16.mxu1 %v8753_v0  ;;  %7934 = vmatprep.subr.bf16.mxu0 %v8753_v0 }
0x3cfc   :  { %7911 = vmatpush3.bf16.msra.mxu1 %v8247_v53  ;;  %v8254_v53 = vld [vmem:[%s10561_s2 + $0x40] sm:$0xff]  }
0x3cfd   :  { %7924 = vmatprep.subr.bf16.mxu1 %v8753_v0 }
0x3dc9   :  { %v3744_v30 = vpop.f32.mrb[120].mxu1  ;;  %v9791_v9 = vpop.f32.mrb[120].mxu0 }
0x3dca   :  { %v3745_v46 = vadd.f32 %v3744_v30, %v9723_v25  ;;  %v7898_v48 = vpop.f32.mrb[121].mxu1  ;;  %v7922_v50 = vpop.f32.mrb[121].mxu0 }
0x3dcb   :  { %v3747_v10 = vpop.f32.mrb[122].mxu1  ;;  %v3982_v8 = vpop.f32.mrb[122].mxu0 }
0x3dcc   :  { %v3750_v31 = vadd.f32 %v9683_v6, %v3745_v46  ;;  %v7899_v61 = vpop.f32.mrb[123].mxu1  ;;  %v7923_v32 = vpop.f32.mrb[123].mxu0 }
0x3dce   :  { %8547 = vtanh.f32 %v3750_v31  ;;  %v6848_v11 = vmul.f32 -1.442695, %v3750_v31 }
0x3dd0   :  { %8549 = vpow2.f32 %v6848_v11 }
0x3dd8   :  { %v8548_v24 = vpop.eup %8547 }
0x3dd9   :  { %3760 = vrot.lane.b32.xlu0 %v8548_v24, %s8756_s9 }
0x3dda   :  { %v8550_v19 = vpop.eup %8549 }
0x3ddb   :  { %v3754_v47 = vadd.f32 1.0, %v8550_v19 }
0x3ddd   :  { %8551 = vrcp.f32 %v3754_v47 }
0x3de7   :  { %v8552_v1 = vpop.eup %8551 }
0x3de8   :  { %v3758_v14 = vmul.f32 %v8552_v1, %v9692_v4  ;;  %v8248_v4 = vld [vmem:[%s10561_s2 + $0x58] sm:$0xff]  }
0x3de9   :  { %7935 = vmatpush3.bf16.msra.mxu0 %v8248_v4  ;;  %v8255_v4 = vld [vmem:[%s10562_s1 + $0x58] sm:$0xff]  }
0x3dea   :  { %7948 = vmatprep.subr.bf16.mxu0 %v8753_v0 }
0x3e4b   :  { %v3761_v44 = vpop.permute.xlu0 %3760 }
0x3e4c   :  { %v3763_v25 = vmul.f32 %v8552_v1, %v3761_v44 }
0x3e4e   :  { %3765 = vrot.lane.b32.xlu1 %v3763_v25, %s8757_s10 }
0x3ec0   :  { %v3766_v57 = vpop.permute.xlu1 %3765 }
0x3ec1   :  { %v9798_v59 = vadd.f32 %v3766_v57, %v3758_v14 }
0x3ec3   :  { %8553 = vtanh.f32 %v9798_v59 }
0x3ecd   :  { %v8554_v26 = vpop.eup %8553 }
0x3ece   :  { %3771 = vrot.lane.b32.xlu0 %v8554_v26, %s8756_s9 }
0x3f40   :  { %v3772_v54 = vpop.permute.xlu0 %3771 }
0x3f41   :  { %v9818_v29 = vmul.f32 %v8552_v1, %v3772_v54 }
0x3f43   :  { %v3780_v5 = vpack.c.bf16 %v9818_v29, %v9818_v29 }
0x3f45   :  { %3842 = vrot.lane.b32.xlu1 %v3780_v5, %s8757_s10 }
0x3fb7   :  { %v3843_v45 = vpop.permute.xlu1 %3842 }
0x3fb8   :  { %7913 = vmatmul.mubr.msk.bf16.vlgmr.msra.gmra.mrb[124].mxu1 %vm97_vm1, %v3843_v45  ;;  %7937 = vmatmul.mubr.msk.bf16.vlgmr.msra.gmra.mrb[124].mxu0 %vm97_vm1, %v3843_v45 }
0x3fb9   :  { %7928 = vmatprep.mubr.msk.bf16.mxu1 %vm8754_vm0, %v8753_v0  ;;  %7952 = vmatprep.mubr.msk.bf16.mxu0 %vm8754_vm0, %v8753_v0 }
0x3fba   :  { %7925 = vmatpush3.bf16.msra.mxu1 %v8249_v39  ;;  %7949 = vmatpush3.bf16.msra.mxu0 %v8250_v62 }
0x3fbb   :  { %7926 = vmatprep.subr.bf16.mxu1 %v8753_v0  ;;  %7950 = vmatprep.subr.bf16.mxu0 %v8753_v0 }
0x3fbe   :  { %7927 = vmatpush3.bf16.msra.mxu1 %v8251_v58  ;;  %v8257_v58 = vld [vmem:[%s10562_s1 + $0x30] sm:$0xff]  }
0x3fbf   :  { %7940 = vmatprep.subr.bf16.mxu1 %v8753_v0 }
0x408b   :  { %v3893_v63 = vpop.f32.mrb[124].mxu1  ;;  %v9829_v18 = vpop.f32.mrb[124].mxu0 }
0x408c   :  { %v3894_v42 = vadd.f32 %v3893_v63, %v9757_v13  ;;  %v7914_v7 = vpop.f32.mrb[125].mxu1  ;;  %v7938_v43 = vpop.f32.mrb[125].mxu0 }
0x408d   :  { %v3896_v21 = vpop.f32.mrb[126].mxu1  ;;  %v4126_v51 = vpop.f32.mrb[126].mxu0 }
0x408e   :  { %v3899_v52 = vadd.f32 %v9605_v12, %v3894_v42  ;;  %v7915_v33 = vpop.f32.mrb[127].mxu1  ;;  %v7939_v28 = vpop.f32.mrb[127].mxu0 }
0x4090   :  { %8555 = vtanh.f32 %v3899_v52  ;;  %v6863_v56 = vmul.f32 -1.442695, %v3899_v52 }
0x4092   :  { %8557 = vpow2.f32 %v6863_v56 }
0x409a   :  { %v8556_v35 = vpop.eup %8555 }
0x409b   :  { %3909 = vrot.lane.b32.xlu0 %v8556_v35, %s8756_s9 }
0x409c   :  { %v8558_v2 = vpop.eup %8557 }
0x409d   :  { %v3903_v20 = vadd.f32 1.0, %v8558_v2 }
0x409f   :  { %8559 = vrcp.f32 %v3903_v20 }
0x40a9   :  { %v8560_v27 = vpop.eup %8559 }
0x40aa   :  { %v3907_v16 = vmul.f32 %v8560_v27, %v9730_v34  ;;  %v8252_v34 = vld [vmem:[%s10561_s2 + $0x38] sm:$0xff]  }
0x40ab   :  { %7951 = vmatpush3.bf16.msra.mxu0 %v8252_v34  ;;  %v8258_v34 = vld [vmem:[%s10561_s2 + $0x50] sm:$0xff]  }
0x40ac   :  { %7964 = vmatprep.subr.bf16.mxu0 %v8753_v0 }
0x410d   :  { %v3910_v15 = vpop.permute.xlu0 %3909 }
0x410e   :  { %v3912_v13 = vmul.f32 %v8560_v27, %v3910_v15 }
0x4110   :  { %3914 = vrot.lane.b32.xlu1 %v3912_v13, %s8757_s10 }
0x4182   :  { %v3915_v23 = vpop.permute.xlu1 %3914 }
0x4183   :  { %v9836_v38 = vadd.f32 %v3915_v23, %v3907_v16 }
0x4185   :  { %8561 = vtanh.f32 %v9836_v38 }
0x418f   :  { %v8562_v3 = vpop.eup %8561 }
0x4190   :  { %3920 = vrot.lane.b32.xlu0 %v8562_v3, %s8756_s9  ;;  %v8259_v3 = vld [vmem:[%s10562_s1 + $0x38] sm:$0xff]  }
0x4202   :  { %v3921_v55 = vpop.permute.xlu0 %3920 }
0x4203   :  { %v3923_v37 = vmul.f32 %v8560_v27, %v3921_v55 }
0x4205   :  { %v3924_v40 = vpack.c.bf16 %v3923_v37, %v3923_v37 }
0x4207   :  { %3986 = vrot.lane.b32.xlu1 %v3924_v40, %s8757_s10 }
0x4279   :  { %v3987_v41 = vpop.permute.xlu1 %3986 }
0x427a   :  { %7929 = vmatmul.mubr.msk.bf16.vlgmr.msra.gmra.mrb[128].mxu1 %vm97_vm1, %v3987_v41  ;;  %7953 = vmatmul.mubr.msk.bf16.vlgmr.msra.gmra.mrb[128].mxu0 %vm97_vm1, %v3987_v41 }
0x427b   :  { %7944 = vmatprep.mubr.msk.bf16.mxu1 %vm8754_vm0, %v8753_v0  ;;  %7968 = vmatprep.mubr.msk.bf16.mxu0 %vm8754_vm0, %v8753_v0 }
0x427c   :  { %7941 = vmatpush3.bf16.msra.mxu1 %v8253_v22  ;;  %7965 = vmatpush3.bf16.msra.mxu0 %v8254_v53  ;;  %v8261_v53 = vld [vmem:[%s10562_s1 + $0x40] sm:$0xff]  }
0x427d   :  { %7942 = vmatprep.subr.bf16.mxu1 %v8753_v0  ;;  %7966 = vmatprep.subr.bf16.mxu0 %v8753_v0 }
0x4280   :  { %7943 = vmatpush3.bf16.msra.mxu1 %v8255_v4  ;;  %v8262_v4 = vld [vmem:[%s10561_s2 + $0x30] sm:$0xff]  }
0x4281   :  { %7956 = vmatprep.subr.bf16.mxu1 %v8753_v0 }
0x434d   :  { %v4037_v30 = vpop.f32.mrb[128].mxu1  ;;  %v9863_v46 = vpop.f32.mrb[128].mxu0 }
0x434e   :  { %v4038_v48 = vadd.f32 %v4037_v30, %v9791_v9  ;;  %v7930_v50 = vpop.f32.mrb[129].mxu1  ;;  %v7954_v10 = vpop.f32.mrb[129].mxu0 }
0x434f   :  { %v4040_v8 = vpop.f32.mrb[130].mxu1  ;;  %v4275_v31 = vpop.f32.mrb[130].mxu0 }
0x4350   :  { %v4043_v61 = vadd.f32 %v9644_v17, %v4038_v48  ;;  %v7931_v32 = vpop.f32.mrb[131].mxu1  ;;  %v7955_v24 = vpop.f32.mrb[131].mxu0 }
0x4352   :  { %8563 = vtanh.f32 %v4043_v61  ;;  %v6878_v19 = vmul.f32 -1.442695, %v4043_v61 }
0x4354   :  { %8565 = vpow2.f32 %v6878_v19 }
0x435c   :  { %v8564_v11 = vpop.eup %8563 }
0x435d   :  { %4053 = vrot.lane.b32.xlu0 %v8564_v11, %s8756_s9 }
0x435e   :  { %v8566_v47 = vpop.eup %8565 }
0x435f   :  { %v4047_v1 = vadd.f32 1.0, %v8566_v47 }
0x4361   :  { %8567 = vrcp.f32 %v4047_v1 }
0x436b   :  { %v8568_v44 = vpop.eup %8567 }
0x436c   :  { %v4051_v14 = vmul.f32 %v8568_v44, %v9764_v36  ;;  %v8256_v36 = vld [vmem:[%s10561_s2 + $0x48] sm:$0xff]  }
0x436d   :  { %7967 = vmatpush3.bf16.msra.mxu0 %v8256_v36  ;;  %v8263_v36 = vld [vmem:[%s10562_s1 + $0x48] sm:$0xff]  }
0x436e   :  { %7980 = vmatprep.subr.bf16.mxu0 %v8753_v0 }
0x43cf   :  { %v4054_v25 = vpop.permute.xlu0 %4053 }
0x43d0   :  { %v4056_v9 = vmul.f32 %v8568_v44, %v4054_v25 }
0x43d2   :  { %4058 = vrot.lane.b32.xlu1 %v4056_v9, %s8757_s10 }
0x4444   :  { %v4059_v57 = vpop.permute.xlu1 %4058 }
0x4445   :  { %v9870_v60 = vadd.f32 %v4059_v57, %v4051_v14 }
0x4447   :  { %8569 = vtanh.f32 %v9870_v60 }
0x4451   :  { %v8570_v26 = vpop.eup %8569 }
0x4452   :  { %4064 = vrot.lane.b32.xlu0 %v8570_v26, %s8756_s9 }
0x44c4   :  { %v4065_v54 = vpop.permute.xlu0 %4064 }
0x44c5   :  { %v4067_v5 = vmul.f32 %v8568_v44, %v4065_v54 }
0x44c7   :  { %v4068_v45 = vpack.c.bf16 %v4067_v5, %v4067_v5 }
0x44c9   :  { %4130 = vrot.lane.b32.xlu1 %v4068_v45, %s8757_s10 }
0x453b   :  { %v4131_v63 = vpop.permute.xlu1 %4130 }
0x453c   :  { %7945 = vmatmul.mubr.msk.bf16.vlgmr.msra.gmra.mrb[132].mxu1 %vm97_vm1, %v4131_v63  ;;  %7969 = vmatmul.mubr.msk.bf16.vlgmr.msra.gmra.mrb[132].mxu0 %vm97_vm1, %v4131_v63 }
0x453d   :  { %7960 = vmatprep.mubr.msk.bf16.mxu1 %vm8754_vm0, %v8753_v0  ;;  %7984 = vmatprep.mubr.msk.bf16.mxu0 %vm8754_vm0, %v8753_v0 }
0x453e   :  { %7957 = vmatpush3.bf16.msra.mxu1 %v8257_v58  ;;  %7981 = vmatpush3.bf16.msra.mxu0 %v8258_v34  ;;  %v8265_v58 = vld [vmem:[%s10562_s1 + $0x50] sm:$0xff]   ;;  %v8266_v34 = vld [vmem:[%s10561_s2 + $0x40] sm:$0xff]  }
0x453f   :  { %7958 = vmatprep.subr.bf16.mxu1 %v8753_v0  ;;  %7982 = vmatprep.subr.bf16.mxu0 %v8753_v0 }
0x4542   :  { %7959 = vmatpush3.bf16.msra.mxu1 %v8259_v3  ;;  %v8267_v3 = vld [vmem:[%s10562_s1 + $0x58] sm:$0xff]  }
0x4543   :  { %7972 = vmatprep.subr.bf16.mxu1 %v8753_v0 }
0x460f   :  { %v4181_v42 = vpop.f32.mrb[132].mxu1  ;;  %v9897_v7 = vpop.f32.mrb[132].mxu0 }
0x4610   :  { %v4182_v43 = vadd.f32 %v4181_v42, %v9829_v18  ;;  %v7946_v21 = vpop.f32.mrb[133].mxu1  ;;  %v7970_v51 = vpop.f32.mrb[133].mxu0 }
0x4611   :  { %v4184_v52 = vpop.f32.mrb[134].mxu1  ;;  %v4419_v33 = vpop.f32.mrb[134].mxu0 }
0x4612   :  { %v4187_v28 = vadd.f32 %v9683_v6, %v4182_v43  ;;  %v7947_v35 = vpop.f32.mrb[135].mxu1  ;;  %v7971_v56 = vpop.f32.mrb[135].mxu0 }
0x4614   :  { %8571 = vtanh.f32 %v4187_v28  ;;  %v6893_v20 = vmul.f32 -1.442695, %v4187_v28 }
0x4616   :  { %8573 = vpow2.f32 %v6893_v20 }
0x461e   :  { %v8572_v2 = vpop.eup %8571 }
0x461f   :  { %4197 = vrot.lane.b32.xlu0 %v8572_v2, %s8756_s9 }
0x4620   :  { %v8574_v27 = vpop.eup %8573 }
0x4621   :  { %v4191_v15 = vadd.f32 1.0, %v8574_v27 }
0x4623   :  { %8575 = vrcp.f32 %v4191_v15 }
0x462d   :  { %v8576_v13 = vpop.eup %8575 }
0x462e   :  { %v4195_v23 = vmul.f32 %v8576_v13, %v9798_v59  ;;  %v8260_v59 = vld [vmem:[%s10561_s2 + $0x58] sm:$0xff]  }
0x462f   :  { %7983 = vmatpush3.bf16.msra.mxu0 %v8260_v59 }
0x4630   :  { %7996 = vmatprep.subr.bf16.mxu0 %v8753_v0 }
0x4691   :  { %v4198_v16 = vpop.permute.xlu0 %4197 }
0x4692   :  { %v4200_v18 = vmul.f32 %v8576_v13, %v4198_v16 }
0x4694   :  { %4202 = vrot.lane.b32.xlu1 %v4200_v18, %s8757_s10 }
0x4706   :  { %v4203_v39 = vpop.permute.xlu1 %4202 }
0x4707   :  { %v9904_v62 = vadd.f32 %v4203_v39, %v4195_v23 }
0x4709   :  { %8577 = vtanh.f32 %v9904_v62 }
0x4713   :  { %v8578_v55 = vpop.eup %8577 }
0x4714   :  { %4208 = vrot.lane.b32.xlu0 %v8578_v55, %s8756_s9 }
0x4786   :  { %v4209_v37 = vpop.permute.xlu0 %4208 }
0x4787   :  { %v9924_v40 = vmul.f32 %v8576_v13, %v4209_v37 }
0x4789   :  { %v4217_v41 = vpack.c.bf16 %v9924_v40, %v9924_v40 }
0x478b   :  { %4279 = vrot.lane.b32.xlu1 %v4217_v41, %s8757_s10 }
0x47fd   :  { %v4280_v30 = vpop.permute.xlu1 %4279 }
0x47fe   :  { %7961 = vmatmul.mubr.msk.bf16.vlgmr.msra.gmra.mrb[136].mxu1 %vm97_vm1, %v4280_v30  ;;  %7985 = vmatmul.mubr.msk.bf16.vlgmr.msra.gmra.mrb[136].mxu0 %vm97_vm1, %v4280_v30 }
0x47ff   :  { %7976 = vmatprep.mubr.msk.bf16.mxu1 %vm8754_vm0, %v8753_v0  ;;  %8000 = vmatprep.mubr.msk.bf16.mxu0 %vm8754_vm0, %v8753_v0 }
0x4800   :  { %7973 = vmatpush3.bf16.msra.mxu1 %v8261_v53  ;;  %7997 = vmatpush3.bf16.msra.mxu0 %v8262_v4  ;;  %v8269_v53 = vld [vmem:[%s10562_s1 + $0x30] sm:$0xff]  }
0x4801   :  { %7974 = vmatprep.subr.bf16.mxu1 %v8753_v0  ;;  %7998 = vmatprep.subr.bf16.mxu0 %v8753_v0  ;;  %v8270_v4 = vld [vmem:[%s10561_s2 + $0x50] sm:$0xff]  }
0x4804   :  { %7975 = vmatpush3.bf16.msra.mxu1 %v8263_v36  ;;  %v8271_v36 = vld [vmem:[%s10562_s1 + $0x38] sm:$0xff]  }
0x4805   :  { %7988 = vmatprep.subr.bf16.mxu1 %v8753_v0 }
0x48d1   :  { %v4330_v48 = vpop.f32.mrb[136].mxu1  ;;  %v9935_v50 = vpop.f32.mrb[136].mxu0 }
0x48d2   :  { %v4331_v10 = vadd.f32 %v4330_v48, %v9863_v46  ;;  %v7962_v8 = vpop.f32.mrb[137].mxu1  ;;  %v7986_v31 = vpop.f32.mrb[137].mxu0 }
0x48d3   :  { %v4333_v61 = vpop.f32.mrb[138].mxu1  ;;  %v4563_v32 = vpop.f32.mrb[138].mxu0 }
0x48d4   :  { %v4336_v24 = vadd.f32 %v9605_v12, %v4331_v10  ;;  %v7963_v11 = vpop.f32.mrb[139].mxu1  ;;  %v7987_v19 = vpop.f32.mrb[139].mxu0 }
0x48d6   :  { %8579 = vtanh.f32 %v4336_v24  ;;  %v6908_v1 = vmul.f32 -1.442695, %v4336_v24 }
0x48d8   :  { %8581 = vpow2.f32 %v6908_v1 }
0x48e0   :  { %v8580_v47 = vpop.eup %8579 }
0x48e1   :  { %4346 = vrot.lane.b32.xlu0 %v8580_v47, %s8756_s9 }
0x48e2   :  { %v8582_v44 = vpop.eup %8581 }
0x48e3   :  { %v4340_v25 = vadd.f32 1.0, %v8582_v44 }
0x48e5   :  { %8583 = vrcp.f32 %v4340_v25 }
0x48ef   :  { %v8584_v9 = vpop.eup %8583 }
0x48f0   :  { %v4344_v57 = vmul.f32 %v8584_v9, %v9836_v38  ;;  %v8264_v38 = vld [vmem:[%s10561_s2 + $0x38] sm:$0xff]  }
0x48f1   :  { %7999 = vmatpush3.bf16.msra.mxu0 %v8264_v38 }
0x48f2   :  { %8012 = vmatprep.subr.bf16.mxu0 %v8753_v0 }
0x4953   :  { %v4347_v14 = vpop.permute.xlu0 %4346 }
0x4954   :  { %v4349_v46 = vmul.f32 %v8584_v9, %v4347_v14 }
0x4956   :  { %4351 = vrot.lane.b32.xlu1 %v4349_v46, %s8757_s10 }
0x49c8   :  { %v4352_v22 = vpop.permute.xlu1 %4351 }
0x49c9   :  { %v9942_v12 = vadd.f32 %v4352_v22, %v4344_v57 }
0x49cb   :  { %8585 = vtanh.f32 %v9942_v12 }
0x49d5   :  { %v8586_v26 = vpop.eup %8585 }
0x49d6   :  { %4357 = vrot.lane.b32.xlu0 %v8586_v26, %s8756_s9 }
0x4a48   :  { %v4358_v54 = vpop.permute.xlu0 %4357 }
0x4a49   :  { %v4360_v5 = vmul.f32 %v8584_v9, %v4358_v54 }
0x4a4b   :  { %v4361_v45 = vpack.c.bf16 %v4360_v5, %v4360_v5 }
0x4a4d   :  { %4423 = vrot.lane.b32.xlu1 %v4361_v45, %s8757_s10 }
0x4abf   :  { %v4424_v63 = vpop.permute.xlu1 %4423 }
0x4ac0   :  { %7977 = vmatmul.mubr.msk.bf16.vlgmr.msra.gmra.mrb[140].mxu1 %vm97_vm1, %v4424_v63  ;;  %8001 = vmatmul.mubr.msk.bf16.vlgmr.msra.gmra.mrb[140].mxu0 %vm97_vm1, %v4424_v63 }
0x4ac1   :  { %7992 = vmatprep.mubr.msk.bf16.mxu1 %vm8754_vm0, %v8753_v0  ;;  %8016 = vmatprep.mubr.msk.bf16.mxu0 %vm8754_vm0, %v8753_v0 }
0x4ac2   :  { %7989 = vmatpush3.bf16.msra.mxu1 %v8265_v58  ;;  %8013 = vmatpush3.bf16.msra.mxu0 %v8266_v34  ;;  %v8273_v34 = vld [vmem:[%s10562_s1 + $0x40] sm:$0xff]  }
0x4ac3   :  { %7990 = vmatprep.subr.bf16.mxu1 %v8753_v0  ;;  %8014 = vmatprep.subr.bf16.mxu0 %v8753_v0 }
0x4ac6   :  { %7991 = vmatpush3.bf16.msra.mxu1 %v8267_v3  ;;  %v8274_v3 = vld [vmem:[%s10561_s2 + $0x30] sm:$0xff]  }
0x4ac7   :  { %8004 = vmatprep.subr.bf16.mxu1 %v8753_v0 }
0x4b93   :  { %v4474_v42 = vpop.f32.mrb[140].mxu1  ;;  %v9969_v43 = vpop.f32.mrb[140].mxu0 }
0x4b94   :  { %v4475_v21 = vadd.f32 %v4474_v42, %v9897_v7  ;;  %v7978_v51 = vpop.f32.mrb[141].mxu1  ;;  %v8002_v52 = vpop.f32.mrb[141].mxu0 }
0x4b95   :  { %v4477_v33 = vpop.f32.mrb[142].mxu1  ;;  %v4712_v28 = vpop.f32.mrb[142].mxu0 }
0x4b96   :  { %v4480_v35 = vadd.f32 %v9644_v17, %v4475_v21  ;;  %v7979_v56 = vpop.f32.mrb[143].mxu1  ;;  %v8003_v2 = vpop.f32.mrb[143].mxu0 }
0x4b98   :  { %8587 = vtanh.f32 %v4480_v35  ;;  %v6923_v27 = vmul.f32 -1.442695, %v4480_v35  ;;  %v10047_v35 = vld [vmem:[%s10564_s3 + $0x3] ss:$0 sm:$0xff] }
0x4b9a   :  { %8589 = vpow2.f32 %v6923_v27 }
0x4ba2   :  { %v8588_v20 = vpop.eup %8587 }
0x4ba3   :  { %4490 = vrot.lane.b32.xlu0 %v8588_v20, %s8756_s9 }
0x4ba4   :  { %v8590_v15 = vpop.eup %8589 }
0x4ba5   :  { %v4484_v13 = vadd.f32 1.0, %v8590_v15 }
0x4ba7   :  { %8591 = vrcp.f32 %v4484_v13 }
0x4bb1   :  { %v8592_v16 = vpop.eup %8591 }
0x4bb2   :  { %v4488_v23 = vmul.f32 %v8592_v16, %v9870_v60  ;;  %v8268_v60 = vld [vmem:[%s10561_s2 + $0x48] sm:$0xff]  }
0x4bb3   :  { %8015 = vmatpush3.bf16.msra.mxu0 %v8268_v60  ;;  %v8275_v60 = vld [vmem:[%s10562_s1 + $0x48] sm:$0xff]  }
0x4bb4   :  { %8028 = vmatprep.subr.bf16.mxu0 %v8753_v0 }
0x4c15   :  { %v4491_v18 = vpop.permute.xlu0 %4490 }
0x4c16   :  { %v4493_v7 = vmul.f32 %v8592_v16, %v4491_v18 }
0x4c18   :  { %4495 = vrot.lane.b32.xlu1 %v4493_v7, %s8757_s10 }
0x4c8a   :  { %v4496_v39 = vpop.permute.xlu1 %4495 }
0x4c8b   :  { %v9976_v17 = vadd.f32 %v4496_v39, %v4488_v23 }
0x4c8d   :  { %8593 = vtanh.f32 %v9976_v17 }
0x4c97   :  { %v8594_v59 = vpop.eup %8593 }
0x4c98   :  { %4501 = vrot.lane.b32.xlu0 %v8594_v59, %s8756_s9 }
0x4d0a   :  { %v4502_v55 = vpop.permute.xlu0 %4501 }
0x4d0b   :  { %v4504_v37 = vmul.f32 %v8592_v16, %v4502_v55 }
0x4d0d   :  { %v4505_v41 = vpack.c.bf16 %v4504_v37, %v4504_v37 }
0x4d0f   :  { %4567 = vrot.lane.b32.xlu1 %v4505_v41, %s8757_s10 }
0x4d81   :  { %v4568_v30 = vpop.permute.xlu1 %4567 }
0x4d82   :  { %7993 = vmatmul.mubr.msk.bf16.vlgmr.msra.gmra.mrb[144].mxu1 %vm97_vm1, %v4568_v30  ;;  %8017 = vmatmul.mubr.msk.bf16.vlgmr.msra.gmra.mrb[144].mxu0 %vm97_vm1, %v4568_v30 }
0x4d83   :  { %8008 = vmatprep.mubr.msk.bf16.mxu1 %vm8754_vm0, %v8753_v0  ;;  %8032 = vmatprep.mubr.msk.bf16.mxu0 %vm8754_vm0, %v8753_v0 }
0x4d84   :  { %8005 = vmatpush3.bf16.msra.mxu1 %v8269_v53  ;;  %8029 = vmatpush3.bf16.msra.mxu0 %v8270_v4 }
0x4d85   :  { %8006 = vmatprep.subr.bf16.mxu1 %v8753_v0  ;;  %8030 = vmatprep.subr.bf16.mxu0 %v8753_v0 }
0x4d88   :  { %8007 = vmatpush3.bf16.msra.mxu1 %v8271_v36  ;;  %v8277_v36 = vld [vmem:[%s10562_s1 + $0x50] sm:$0xff]  }
0x4d89   :  { %8020 = vmatprep.subr.bf16.mxu1 %v8753_v0 }
0x4e55   :  { %v4618_v48 = vpop.f32.mrb[144].mxu1  ;;  %v10003_v10 = vpop.f32.mrb[144].mxu0 }
0x4e56   :  { %v4619_v8 = vadd.f32 %v4618_v48, %v9935_v50  ;;  %v7994_v31 = vpop.f32.mrb[145].mxu1  ;;  %v8018_v61 = vpop.f32.mrb[145].mxu0 }
0x4e57   :  { %v4621_v32 = vpop.f32.mrb[146].mxu1  ;;  %v4856_v24 = vpop.f32.mrb[146].mxu0 }
0x4e58   :  { %v4624_v11 = vadd.f32 %v9683_v6, %v4619_v8  ;;  %v7995_v19 = vpop.f32.mrb[147].mxu1  ;;  %v8019_v47 = vpop.f32.mrb[147].mxu0 }
0x4e59   :  { %v10086_v19 = vld [vmem:[%s10564_s3 + $0x4] ss:$0 sm:$0xff] }
0x4e5a   :  { %8595 = vtanh.f32 %v4624_v11  ;;  %v6938_v44 = vmul.f32 -1.442695, %v4624_v11 }
0x4e5c   :  { %8597 = vpow2.f32 %v6938_v44 }
0x4e64   :  { %v8596_v1 = vpop.eup %8595 }
0x4e65   :  { %4634 = vrot.lane.b32.xlu0 %v8596_v1, %s8756_s9 }
0x4e66   :  { %v8598_v25 = vpop.eup %8597 }
0x4e67   :  { %v4628_v9 = vadd.f32 1.0, %v8598_v25 }
0x4e69   :  { %8599 = vrcp.f32 %v4628_v9 }
0x4e73   :  { %v8600_v14 = vpop.eup %8599 }
0x4e74   :  { %v4632_v57 = vmul.f32 %v8600_v14, %v9904_v62  ;;  %v8272_v62 = vld [vmem:[%s10561_s2 + $0x58] sm:$0xff]  }
0x4e75   :  { %8031 = vmatpush3.bf16.msra.mxu0 %v8272_v62  ;;  %v8278_v62 = vld [vmem:[%s10561_s2 + $0x40] sm:$0xff]  }
0x4e76   :  { %8044 = vmatprep.subr.bf16.mxu0 %v8753_v0 }
0x4ed7   :  { %v4635_v46 = vpop.permute.xlu0 %4634 }
0x4ed8   :  { %v4637_v50 = vmul.f32 %v8600_v14, %v4635_v46 }
0x4eda   :  { %4639 = vrot.lane.b32.xlu1 %v4637_v50, %s8757_s10 }
0x4f4c   :  { %v4640_v22 = vpop.permute.xlu1 %4639 }
0x4f4d   :  { %v10010_v6 = vadd.f32 %v4640_v22, %v4632_v57 }
0x4f4f   :  { %8601 = vtanh.f32 %v10010_v6 }
0x4f59   :  { %v8602_v38 = vpop.eup %8601 }
0x4f5a   :  { %4645 = vrot.lane.b32.xlu0 %v8602_v38, %s8756_s9  ;;  %v8279_v38 = vld [vmem:[%s10562_s1 + $0x58] sm:$0xff]  }
0x4fcc   :  { %v4646_v26 = vpop.permute.xlu0 %4645 }
0x4fcd   :  { %v10030_v54 = vmul.f32 %v8600_v14, %v4646_v26 }
0x4fcf   :  { %v4654_v5 = vpack.c.bf16 %v10030_v54, %v10030_v54 }
0x4fd1   :  { %4716 = vrot.lane.b32.xlu1 %v4654_v5, %s8757_s10 }
0x5043   :  { %v4717_v45 = vpop.permute.xlu1 %4716 }
0x5044   :  { %8009 = vmatmul.mubr.msk.bf16.vlgmr.msra.gmra.mrb[148].mxu1 %vm97_vm1, %v4717_v45  ;;  %8033 = vmatmul.mubr.msk.bf16.vlgmr.msra.gmra.mrb[148].mxu0 %vm97_vm1, %v4717_v45 }
0x5045   :  { %8024 = vmatprep.mubr.msk.bf16.mxu1 %vm8754_vm0, %v8753_v0  ;;  %8048 = vmatprep.mubr.msk.bf16.mxu0 %vm8754_vm0, %v8753_v0 }
0x5046   :  { %8021 = vmatpush3.bf16.msra.mxu1 %v8273_v34  ;;  %8045 = vmatpush3.bf16.msra.mxu0 %v8274_v3 }
0x5047   :  { %8022 = vmatprep.subr.bf16.mxu1 %v8753_v0  ;;  %8046 = vmatprep.subr.bf16.mxu0 %v8753_v0 }
0x504a   :  { %8023 = vmatpush3.bf16.msra.mxu1 %v8275_v60 }
0x504b   :  { %8036 = vmatprep.subr.bf16.mxu1 %v8753_v0 }
0x5117   :  { %v4767_v63 = vpop.f32.mrb[148].mxu1  ;;  %v10041_v42 = vpop.f32.mrb[148].mxu0 }
0x5118   :  { %v4768_v21 = vadd.f32 %v4767_v63, %v9969_v43  ;;  %v8010_v51 = vpop.f32.mrb[149].mxu1  ;;  %v8034_v52 = vpop.f32.mrb[149].mxu0 }
0x5119   :  { %v4770_v33 = vpop.f32.mrb[150].mxu1  ;;  %v5000_v28 = vpop.f32.mrb[150].mxu0 }
0x511a   :  { %v4773_v56 = vadd.f32 %v10047_v35, %v4768_v21  ;;  %v8011_v2 = vpop.f32.mrb[151].mxu1  ;;  %v8035_v20 = vpop.f32.mrb[151].mxu0 }
0x511c   :  { %8603 = vtanh.f32 %v4773_v56  ;;  %v6953_v15 = vmul.f32 -1.442695, %v4773_v56 }
0x511e   :  { %8605 = vpow2.f32 %v6953_v15 }
0x5126   :  { %v8604_v27 = vpop.eup %8603 }
0x5127   :  { %4783 = vrot.lane.b32.xlu0 %v8604_v27, %s8756_s9  ;;  %v10125_v27 = vld [vmem:[%s10564_s3 + $0x5] ss:$0 sm:$0xff] }
0x5128   :  { %v8606_v43 = vpop.eup %8605 }
0x5129   :  { %v4777_v13 = vadd.f32 1.0, %v8606_v43 }
0x512b   :  { %8607 = vrcp.f32 %v4777_v13 }
0x5135   :  { %v8608_v16 = vpop.eup %8607 }
0x5136   :  { %v4781_v23 = vmul.f32 %v8608_v16, %v9942_v12  ;;  %v8276_v12 = vld [vmem:[%s10561_s2 + $0x38] sm:$0xff]  }
0x5137   :  { %8047 = vmatpush3.bf16.msra.mxu0 %v8276_v12 }
0x5138   :  { %8060 = vmatprep.subr.bf16.mxu0 %v8753_v0 }
0x5199   :  { %v4784_v18 = vpop.permute.xlu0 %4783 }
0x519a   :  { %v4786_v7 = vmul.f32 %v8608_v16, %v4784_v18 }
0x519c   :  { %4788 = vrot.lane.b32.xlu1 %v4786_v7, %s8757_s10 }
0x520e   :  { %v4789_v39 = vpop.permute.xlu1 %4788 }
0x520f   :  { %v10053_v58 = vadd.f32 %v4789_v39, %v4781_v23 }
0x5211   :  { %8609 = vtanh.f32 %v10053_v58 }
0x521b   :  { %v8610_v59 = vpop.eup %8609 }
0x521c   :  { %4794 = vrot.lane.b32.xlu0 %v8610_v59, %s8756_s9  ;;  %v8281_v59 = vld [vmem:[%s10562_s1 + $0x30] sm:$0xff]  }
0x528e   :  { %v4795_v55 = vpop.permute.xlu0 %4794 }
0x528f   :  { %v4797_v37 = vmul.f32 %v8608_v16, %v4795_v55  ;;  %v8282_v55 = vld [vmem:[%s10561_s2 + $0x50] sm:$0xff]  }
0x5291   :  { %v4798_v41 = vpack.c.bf16 %v4797_v37, %v4797_v37  ;;  %v8283_v37 = vld [vmem:[%s10562_s1 + $0x38] sm:$0xff]  }
0x5293   :  { %4860 = vrot.lane.b32.xlu1 %v4798_v41, %s8757_s10 }
0x5305   :  { %v4861_v30 = vpop.permute.xlu1 %4860 }
0x5306   :  { %8025 = vmatmul.mubr.msk.bf16.vlgmr.msra.gmra.mrb[152].mxu1 %vm97_vm1, %v4861_v30  ;;  %8049 = vmatmul.mubr.msk.bf16.vlgmr.msra.gmra.mrb[152].mxu0 %vm97_vm1, %v4861_v30 }
0x5307   :  { %8040 = vmatprep.mubr.msk.bf16.mxu1 %vm8754_vm0, %v8753_v0  ;;  %8064 = vmatprep.mubr.msk.bf16.mxu0 %vm8754_vm0, %v8753_v0 }
0x5308   :  { %8037 = vmatpush3.bf16.msra.mxu1 %v8277_v36  ;;  %8061 = vmatpush3.bf16.msra.mxu0 %v8278_v62 }
0x5309   :  { %8038 = vmatprep.subr.bf16.mxu1 %v8753_v0  ;;  %8062 = vmatprep.subr.bf16.mxu0 %v8753_v0 }
0x530c   :  { %8039 = vmatpush3.bf16.msra.mxu1 %v8279_v38 }
0x530d   :  { %8052 = vmatprep.subr.bf16.mxu1 %v8753_v0 }
0x53d9   :  { %v4911_v48 = vpop.f32.mrb[152].mxu1  ;;  %v10080_v8 = vpop.f32.mrb[152].mxu0 }
0x53da   :  { %v4912_v31 = vadd.f32 %v4911_v48, %v10003_v10  ;;  %v8026_v61 = vpop.f32.mrb[153].mxu1  ;;  %v8050_v32 = vpop.f32.mrb[153].mxu0 }
0x53db   :  { %v4914_v24 = vpop.f32.mrb[154].mxu1  ;;  %v5149_v11 = vpop.f32.mrb[154].mxu0 }
0x53dc   :  { %v4917_v47 = vadd.f32 %v10086_v19, %v4912_v31  ;;  %v8027_v1 = vpop.f32.mrb[155].mxu1  ;;  %v8051_v44 = vpop.f32.mrb[155].mxu0 }
0x53de   :  { %8611 = vtanh.f32 %v4917_v47  ;;  %v6968_v9 = vmul.f32 -1.442695, %v4917_v47 }
0x53e0   :  { %8613 = vpow2.f32 %v6968_v9 }
0x53e8   :  { %v8612_v25 = vpop.eup %8611 }
0x53e9   :  { %4927 = vrot.lane.b32.xlu0 %v8612_v25, %s8756_s9 }
0x53ea   :  { %v8614_v10 = vpop.eup %8613 }
0x53eb   :  { %v4921_v14 = vadd.f32 1.0, %v8614_v10 }
0x53ed   :  { %8615 = vrcp.f32 %v4921_v14 }
0x53f7   :  { %v8616_v46 = vpop.eup %8615 }
0x53f8   :  { %v4925_v22 = vmul.f32 %v8616_v46, %v9976_v17  ;;  %v8280_v17 = vld [vmem:[%s10561_s2 + $0x48] sm:$0xff]  }
0x53f9   :  { %8063 = vmatpush3.bf16.msra.mxu0 %v8280_v17 }
0x53fa   :  { %8076 = vmatprep.subr.bf16.mxu0 %v8753_v0 }
0x545b   :  { %v4928_v50 = vpop.permute.xlu0 %4927 }
0x545c   :  { %v4930_v57 = vmul.f32 %v8616_v46, %v4928_v50 }
0x545e   :  { %4932 = vrot.lane.b32.xlu1 %v4930_v57, %s8757_s10 }
0x54d0   :  { %v4933_v53 = vpop.permute.xlu1 %4932 }
0x54d1   :  { %v10092_v4 = vadd.f32 %v4933_v53, %v4925_v22 }
0x54d3   :  { %8617 = vtanh.f32 %v10092_v4 }
0x54dd   :  { %v8618_v26 = vpop.eup %8617 }
0x54de   :  { %4938 = vrot.lane.b32.xlu0 %v8618_v26, %s8756_s9  ;;  %v8285_v26 = vld [vmem:[%s10562_s1 + $0x40] sm:$0xff]  }
0x5550   :  { %v4939_v5 = vpop.permute.xlu0 %4938 }
0x5551   :  { %v4941_v45 = vmul.f32 %v8616_v46, %v4939_v5  ;;  %v8286_v5 = vld [vmem:[%s10561_s2 + $0x30] sm:$0xff]  }
0x5553   :  { %v4942_v63 = vpack.c.bf16 %v4941_v45, %v4941_v45  ;;  %v8287_v45 = vld [vmem:[%s10562_s1 + $0x48] sm:$0xff]  }
0x5555   :  { %5004 = vrot.lane.b32.xlu1 %v4942_v63, %s8757_s10 }
0x55c7   :  { %v5005_v21 = vpop.permute.xlu1 %5004 }
0x55c8   :  { %8041 = vmatmul.mubr.msk.bf16.vlgmr.msra.gmra.mrb[156].mxu1 %vm97_vm1, %v5005_v21  ;;  %8065 = vmatmul.mubr.msk.bf16.vlgmr.msra.gmra.mrb[156].mxu0 %vm97_vm1, %v5005_v21 }
0x55c9   :  { %8056 = vmatprep.mubr.msk.bf16.mxu1 %vm8754_vm0, %v8753_v0  ;;  %8080 = vmatprep.mubr.msk.bf16.mxu0 %vm8754_vm0, %v8753_v0 }
0x55ca   :  { %8053 = vmatpush3.bf16.msra.mxu1 %v8281_v59  ;;  %8077 = vmatpush3.bf16.msra.mxu0 %v8282_v55 }
0x55cb   :  { %8054 = vmatprep.subr.bf16.mxu1 %v8753_v0  ;;  %8078 = vmatprep.subr.bf16.mxu0 %v8753_v0 }
0x55ce   :  { %8055 = vmatpush3.bf16.msra.mxu1 %v8283_v37 }
0x55cf   :  { %8068 = vmatprep.subr.bf16.mxu1 %v8753_v0 }
0x569b   :  { %v5055_v51 = vpop.f32.mrb[156].mxu1  ;;  %v10119_v52 = vpop.f32.mrb[156].mxu0 }
0x569c   :  { %v5056_v33 = vadd.f32 %v5055_v51, %v10041_v42  ;;  %v8042_v28 = vpop.f32.mrb[157].mxu1  ;;  %v8066_v56 = vpop.f32.mrb[157].mxu0 }
0x569d   :  { %v5058_v2 = vpop.f32.mrb[158].mxu1  ;;  %v5293_v20 = vpop.f32.mrb[158].mxu0 }
0x569e   :  { %v5061_v15 = vadd.f32 %v10125_v27, %v5056_v33  ;;  %v8043_v43 = vpop.f32.mrb[159].mxu1  ;;  %v8067_v13 = vpop.f32.mrb[159].mxu0 }
0x56a0   :  { %8619 = vtanh.f32 %v5061_v15  ;;  %v6983_v18 = vmul.f32 -1.442695, %v5061_v15 }
0x56a2   :  { %8621 = vpow2.f32 %v6983_v18 }
0x56aa   :  { %v8620_v16 = vpop.eup %8619 }
0x56ab   :  { %5071 = vrot.lane.b32.xlu0 %v8620_v16, %s8756_s9 }
0x56ac   :  { %v8622_v42 = vpop.eup %8621 }
0x56ad   :  { %v5065_v7 = vadd.f32 1.0, %v8622_v42 }
0x56af   :  { %8623 = vrcp.f32 %v5065_v7 }
0x56b9   :  { %v8624_v23 = vpop.eup %8623 }
0x56ba   :  { %v5069_v3 = vmul.f32 %v8624_v23, %v10010_v6  ;;  %v8284_v6 = vld [vmem:[%s10561_s2 + $0x58] sm:$0xff]  }
0x56bb   :  { %8079 = vmatpush3.bf16.msra.mxu0 %v8284_v6 }
0x56bc   :  { %8092 = vmatprep.subr.bf16.mxu0 %v8753_v0 }
0x571d   :  { %v5072_v39 = vpop.permute.xlu0 %5071 }
0x571e   :  { %v5074_v34 = vmul.f32 %v8624_v23, %v5072_v39 }
0x5720   :  { %5076 = vrot.lane.b32.xlu1 %v5074_v34, %s8757_s10 }
0x5792   :  { %v5077_v60 = vpop.permute.xlu1 %5076 }
0x5793   :  { %v10131_v12 = vadd.f32 %v5077_v60, %v5069_v3 }
0x5795   :  { %8625 = vtanh.f32 %v10131_v12 }
0x579f   :  { %v8626_v41 = vpop.eup %8625 }
0x57a0   :  { %5082 = vrot.lane.b32.xlu0 %v8626_v41, %s8756_s9  ;;  %v8289_v41 = vld [vmem:[%s10562_s1 + $0x50] sm:$0xff]  }
0x5812   :  { %v5083_v30 = vpop.permute.xlu0 %5082 }
0x5813   :  { %v10151_v48 = vmul.f32 %v8624_v23, %v5083_v30  ;;  %v8290_v30 = vld [vmem:[%s10561_s2 + $0x40] sm:$0xff]  }
0x5815   :  { %v5091_v31 = vpack.c.bf16 %v10151_v48, %v10151_v48 }
0x5817   :  { %5153 = vrot.lane.b32.xlu1 %v5091_v31, %s8757_s10  ;;  %v8291_v31 = vld [vmem:[%s10562_s1 + $0x58] sm:$0xff]  }
0x5889   :  { %v5154_v61 = vpop.permute.xlu1 %5153 }
0x588a   :  { %8057 = vmatmul.mubr.msk.bf16.vlgmr.msra.gmra.mrb[160].mxu1 %vm97_vm1, %v5154_v61  ;;  %8081 = vmatmul.mubr.msk.bf16.vlgmr.msra.gmra.mrb[160].mxu0 %vm97_vm1, %v5154_v61 }
0x588b   :  { %8072 = vmatprep.mubr.msk.bf16.mxu1 %vm8754_vm0, %v8753_v0  ;;  %8096 = vmatprep.mubr.msk.bf16.mxu0 %vm8754_vm0, %v8753_v0 }
0x588c   :  { %8069 = vmatpush3.bf16.msra.mxu1 %v8285_v26  ;;  %8093 = vmatpush3.bf16.msra.mxu0 %v8286_v5 }
0x588d   :  { %8070 = vmatprep.subr.bf16.mxu1 %v8753_v0  ;;  %8094 = vmatprep.subr.bf16.mxu0 %v8753_v0 }
0x5890   :  { %8071 = vmatpush3.bf16.msra.mxu1 %v8287_v45 }
0x5891   :  { %8084 = vmatprep.subr.bf16.mxu1 %v8753_v0 }
0x595d   :  { %v5204_v32 = vpop.f32.mrb[160].mxu1  ;;  %v10162_v24 = vpop.f32.mrb[160].mxu0 }
0x595e   :  { %v5205_v11 = vadd.f32 %v5204_v32, %v10080_v8  ;;  %v8058_v47 = vpop.f32.mrb[161].mxu1  ;;  %v8082_v1 = vpop.f32.mrb[161].mxu0 }
0x595f   :  { %v5207_v44 = vpop.f32.mrb[162].mxu1  ;;  %v5437_v25 = vpop.f32.mrb[162].mxu0 }
0x5960   :  { %v5210_v9 = vadd.f32 %v10047_v35, %v5205_v11  ;;  %v8059_v10 = vpop.f32.mrb[163].mxu1  ;;  %v8083_v14 = vpop.f32.mrb[163].mxu0 }
0x5962   :  { %8627 = vtanh.f32 %v5210_v9  ;;  %v6998_v50 = vmul.f32 -1.442695, %v5210_v9 }
0x5964   :  { %8629 = vpow2.f32 %v6998_v50 }
0x596c   :  { %v8628_v46 = vpop.eup %8627 }
0x596d   :  { %5220 = vrot.lane.b32.xlu0 %v8628_v46, %s8756_s9 }
0x596e   :  { %v8630_v57 = vpop.eup %8629 }
0x596f   :  { %v5214_v22 = vadd.f32 1.0, %v8630_v57 }
0x5971   :  { %8631 = vrcp.f32 %v5214_v22 }
0x597b   :  { %v8632_v53 = vpop.eup %8631 }
0x597c   :  { %v5218_v62 = vmul.f32 %v8632_v53, %v10053_v58  ;;  %v8288_v58 = vld [vmem:[%s10561_s2 + $0x38] sm:$0xff]  }
0x597d   :  { %8095 = vmatpush3.bf16.msra.mxu0 %v8288_v58 }
0x597e   :  { %8108 = vmatprep.subr.bf16.mxu0 %v8753_v0 }
0x59df   :  { %v5221_v36 = vpop.permute.xlu0 %5220 }
0x59e0   :  { %v5223_v8 = vmul.f32 %v8632_v53, %v5221_v36 }
0x59e2   :  { %5225 = vrot.lane.b32.xlu1 %v5223_v8, %s8757_s10 }
0x5a54   :  { %v5226_v38 = vpop.permute.xlu1 %5225 }
0x5a55   :  { %v10169_v17 = vadd.f32 %v5226_v38, %v5218_v62 }
0x5a57   :  { %8633 = vtanh.f32 %v10169_v17 }
0x5a61   :  { %v8634_v63 = vpop.eup %8633 }
0x5a62   :  { %5231 = vrot.lane.b32.xlu0 %v8634_v63, %s8756_s9 }
0x5ad4   :  { %v5232_v21 = vpop.permute.xlu0 %5231 }
0x5ad5   :  { %v5234_v51 = vmul.f32 %v8632_v53, %v5232_v21  ;;  %v8293_v21 = vld [vmem:[%s10562_s1 + $0x30] sm:$0xff]  }
0x5ad7   :  { %v5235_v33 = vpack.c.bf16 %v5234_v51, %v5234_v51  ;;  %v8294_v51 = vld [vmem:[%s10561_s2 + $0x50] sm:$0xff]  }
0x5ad9   :  { %5297 = vrot.lane.b32.xlu1 %v5235_v33, %s8757_s10  ;;  %v8295_v33 = vld [vmem:[%s10562_s1 + $0x38] sm:$0xff]  }
0x5b4b   :  { %v5298_v28 = vpop.permute.xlu1 %5297 }
0x5b4c   :  { %8073 = vmatmul.mubr.msk.bf16.vlgmr.msra.gmra.mrb[164].mxu1 %vm97_vm1, %v5298_v28  ;;  %8097 = vmatmul.mubr.msk.bf16.vlgmr.msra.gmra.mrb[164].mxu0 %vm97_vm1, %v5298_v28 }
0x5b4d   :  { %8088 = vmatprep.mubr.msk.bf16.mxu1 %vm8754_vm0, %v8753_v0  ;;  %8112 = vmatprep.mubr.msk.bf16.mxu0 %vm8754_vm0, %v8753_v0 }
0x5b4e   :  { %8085 = vmatpush3.bf16.msra.mxu1 %v8289_v41  ;;  %8109 = vmatpush3.bf16.msra.mxu0 %v8290_v30 }
0x5b4f   :  { %8086 = vmatprep.subr.bf16.mxu1 %v8753_v0  ;;  %8110 = vmatprep.subr.bf16.mxu0 %v8753_v0 }
0x5b52   :  { %8087 = vmatpush3.bf16.msra.mxu1 %v8291_v31 }
0x5b53   :  { %8100 = vmatprep.subr.bf16.mxu1 %v8753_v0 }
0x5c1f   :  { %v5348_v56 = vpop.f32.mrb[164].mxu1  ;;  %v10196_v2 = vpop.f32.mrb[164].mxu0 }
0x5c20   :  { %v5349_v20 = vadd.f32 %v5348_v56, %v10119_v52  ;;  %v8074_v15 = vpop.f32.mrb[165].mxu1  ;;  %v8098_v43 = vpop.f32.mrb[165].mxu0 }
0x5c21   :  { %v5351_v13 = vpop.f32.mrb[166].mxu1  ;;  %v5586_v16 = vpop.f32.mrb[166].mxu0 }
0x5c22   :  { %v5354_v18 = vadd.f32 %v10086_v19, %v5349_v20  ;;  %v8075_v42 = vpop.f32.mrb[167].mxu1  ;;  %v8099_v7 = vpop.f32.mrb[167].mxu0 }
0x5c24   :  { %8635 = vtanh.f32 %v5354_v18  ;;  %v7013_v39 = vmul.f32 -1.442695, %v5354_v18 }
0x5c26   :  { %8637 = vpow2.f32 %v7013_v39 }
0x5c2e   :  { %v8636_v23 = vpop.eup %8635 }
0x5c2f   :  { %5364 = vrot.lane.b32.xlu0 %v8636_v23, %s8756_s9 }
0x5c30   :  { %v8638_v34 = vpop.eup %8637 }
0x5c31   :  { %v5358_v3 = vadd.f32 1.0, %v8638_v34 }
0x5c33   :  { %8639 = vrcp.f32 %v5358_v3 }
0x5c3d   :  { %v8640_v60 = vpop.eup %8639 }
0x5c3e   :  { %v5362_v55 = vmul.f32 %v8640_v60, %v10092_v4  ;;  %v8292_v4 = vld [vmem:[%s10561_s2 + $0x48] sm:$0xff]  }
0x5c3f   :  { %8111 = vmatpush3.bf16.msra.mxu0 %v8292_v4 }
0x5c40   :  { %8124 = vmatprep.subr.bf16.mxu0 %v8753_v0 }
0x5ca1   :  { %v5365_v59 = vpop.permute.xlu0 %5364 }
0x5ca2   :  { %v5367_v52 = vmul.f32 %v8640_v60, %v5365_v59 }
0x5ca4   :  { %5369 = vrot.lane.b32.xlu1 %v5367_v52, %s8757_s10 }
0x5d16   :  { %v5370_v37 = vpop.permute.xlu1 %5369 }
0x5d17   :  { %v10203_v6 = vadd.f32 %v5370_v37, %v5362_v55 }
0x5d19   :  { %8641 = vtanh.f32 %v10203_v6 }
0x5d23   :  { %v8642_v61 = vpop.eup %8641 }
0x5d24   :  { %5375 = vrot.lane.b32.xlu0 %v8642_v61, %s8756_s9 }
0x5d96   :  { %v5376_v32 = vpop.permute.xlu0 %5375 }
0x5d97   :  { %v5378_v11 = vmul.f32 %v8640_v60, %v5376_v32  ;;  %v8297_v32 = vld [vmem:[%s10562_s1 + $0x40] sm:$0xff]  }
0x5d99   :  { %v5379_v47 = vpack.c.bf16 %v5378_v11, %v5378_v11  ;;  %v8298_v11 = vld [vmem:[%s10561_s2 + $0x30] sm:$0xff]  }
0x5d9b   :  { %5441 = vrot.lane.b32.xlu1 %v5379_v47, %s8757_s10  ;;  %v8299_v47 = vld [vmem:[%s10562_s1 + $0x48] sm:$0xff]  }
0x5e0d   :  { %v5442_v1 = vpop.permute.xlu1 %5441 }
0x5e0e   :  { %8089 = vmatmul.mubr.msk.bf16.vlgmr.msra.gmra.mrb[168].mxu1 %vm97_vm1, %v5442_v1  ;;  %8113 = vmatmul.mubr.msk.bf16.vlgmr.msra.gmra.mrb[168].mxu0 %vm97_vm1, %v5442_v1 }
0x5e0f   :  { %8104 = vmatprep.mubr.msk.bf16.mxu1 %vm8754_vm0, %v8753_v0  ;;  %8128 = vmatprep.mubr.msk.bf16.mxu0 %vm8754_vm0, %v8753_v0 }
0x5e10   :  { %8101 = vmatpush3.bf16.msra.mxu1 %v8293_v21  ;;  %8125 = vmatpush3.bf16.msra.mxu0 %v8294_v51 }
0x5e11   :  { %8102 = vmatprep.subr.bf16.mxu1 %v8753_v0  ;;  %8126 = vmatprep.subr.bf16.mxu0 %v8753_v0 }
0x5e14   :  { %8103 = vmatpush3.bf16.msra.mxu1 %v8295_v33 }
0x5e15   :  { %8116 = vmatprep.subr.bf16.mxu1 %v8753_v0 }
0x5ee1   :  { %v5492_v44 = vpop.f32.mrb[168].mxu1  ;;  %v10230_v25 = vpop.f32.mrb[168].mxu0 }
0x5ee2   :  { %v5493_v9 = vadd.f32 %v5492_v44, %v10162_v24  ;;  %v8090_v10 = vpop.f32.mrb[169].mxu1  ;;  %v8114_v14 = vpop.f32.mrb[169].mxu0 }
0x5ee3   :  { %v5495_v46 = vpop.f32.mrb[170].mxu1  ;;  %v5730_v50 = vpop.f32.mrb[170].mxu0 }
0x5ee4   :  { %v5498_v57 = vadd.f32 %v10125_v27, %v5493_v9  ;;  %v8091_v22 = vpop.f32.mrb[171].mxu1  ;;  %v8115_v53 = vpop.f32.mrb[171].mxu0 }
0x5ee6   :  { %8643 = vtanh.f32 %v5498_v57  ;;  %v7028_v8 = vmul.f32 -1.442695, %v5498_v57 }
0x5ee8   :  { %8645 = vpow2.f32 %v7028_v8 }
0x5ef0   :  { %v8644_v36 = vpop.eup %8643 }
0x5ef1   :  { %5508 = vrot.lane.b32.xlu0 %v8644_v36, %s8756_s9 }
0x5ef2   :  { %v8646_v62 = vpop.eup %8645 }
0x5ef3   :  { %v5502_v38 = vadd.f32 1.0, %v8646_v62 }
0x5ef5   :  { %8647 = vrcp.f32 %v5502_v38 }
0x5eff   :  { %v8648_v26 = vpop.eup %8647 }
0x5f00   :  { %v5506_v45 = vmul.f32 %v8648_v26, %v10131_v12  ;;  %v8296_v12 = vld [vmem:[%s10561_s2 + $0x58] sm:$0xff]  }
0x5f01   :  { %8127 = vmatpush3.bf16.msra.mxu0 %v8296_v12 }
0x5f02   :  { %8140 = vmatprep.subr.bf16.mxu0 %v8753_v0 }
0x5f63   :  { %v5509_v5 = vpop.permute.xlu0 %5508 }
0x5f64   :  { %v5511_v24 = vmul.f32 %v8648_v26, %v5509_v5 }
0x5f66   :  { %5513 = vrot.lane.b32.xlu1 %v5511_v24, %s8757_s10 }
0x5fd8   :  { %v5514_v58 = vpop.permute.xlu1 %5513 }
0x5fd9   :  { %v10237_v63 = vadd.f32 %v5514_v58, %v5506_v45 }
0x5fdb   :  { %8649 = vtanh.f32 %v10237_v63 }
0x5fe5   :  { %v8650_v28 = vpop.eup %8649 }
0x5fe6   :  { %5519 = vrot.lane.b32.xlu0 %v8650_v28, %s8756_s9 }
0x6058   :  { %v5520_v56 = vpop.permute.xlu0 %5519 }
0x6059   :  { %v10257_v20 = vmul.f32 %v8648_v26, %v5520_v56  ;;  %v8301_v56 = vld [vmem:[%s10562_s1 + $0x50] sm:$0xff]  }
0x605b   :  { %v5528_v15 = vpack.c.bf16 %v10257_v20, %v10257_v20 }
0x605d   :  { %5590 = vrot.lane.b32.xlu1 %v5528_v15, %s8757_s10  ;;  %v8302_v15 = vld [vmem:[%s10561_s2 + $0x40] sm:$0xff]  }
0x60cf   :  { %v5591_v43 = vpop.permute.xlu1 %5590 }
0x60d0   :  { %8105 = vmatmul.mubr.msk.bf16.vlgmr.msra.gmra.mrb[172].mxu1 %vm97_vm1, %v5591_v43  ;;  %8129 = vmatmul.mubr.msk.bf16.vlgmr.msra.gmra.mrb[172].mxu0 %vm97_vm1, %v5591_v43  ;;  %v8303_v43 = vld [vmem:[%s10562_s1 + $0x58] sm:$0xff]  }
0x60d1   :  { %8120 = vmatprep.mubr.msk.bf16.mxu1 %vm8754_vm0, %v8753_v0  ;;  %8144 = vmatprep.mubr.msk.bf16.mxu0 %vm8754_vm0, %v8753_v0 }
0x60d2   :  { %8117 = vmatpush3.bf16.msra.mxu1 %v8297_v32  ;;  %8141 = vmatpush3.bf16.msra.mxu0 %v8298_v11 }
0x60d3   :  { %8118 = vmatprep.subr.bf16.mxu1 %v8753_v0  ;;  %8142 = vmatprep.subr.bf16.mxu0 %v8753_v0 }
0x60d6   :  { %8119 = vmatpush3.bf16.msra.mxu1 %v8299_v47 }
0x60d7   :  { %8132 = vmatprep.subr.bf16.mxu1 %v8753_v0 }
0x61a3   :  { %v5641_v13 = vpop.f32.mrb[172].mxu1  ;;  %v10268_v16 = vpop.f32.mrb[172].mxu0 }
0x61a4   :  { %v5642_v18 = vadd.f32 %v5641_v13, %v10196_v2  ;;  %v8106_v42 = vpop.f32.mrb[173].mxu1  ;;  %v8130_v7 = vpop.f32.mrb[173].mxu0 }
0x61a5   :  { %v5644_v23 = vpop.f32.mrb[174].mxu1  ;;  %v5874_v39 = vpop.f32.mrb[174].mxu0 }
0x61a6   :  { %v5647_v34 = vadd.f32 %v10047_v35, %v5642_v18  ;;  %v8107_v3 = vpop.f32.mrb[175].mxu1  ;;  %v8131_v60 = vpop.f32.mrb[175].mxu0 }
0x61a8   :  { %8651 = vtanh.f32 %v5647_v34  ;;  %v7043_v52 = vmul.f32 -1.442695, %v5647_v34 }
0x61aa   :  { %8653 = vpow2.f32 %v7043_v52 }
0x61b2   :  { %v8652_v59 = vpop.eup %8651 }
0x61b3   :  { %5657 = vrot.lane.b32.xlu0 %v8652_v59, %s8756_s9 }
0x61b4   :  { %v8654_v55 = vpop.eup %8653 }
0x61b5   :  { %v5651_v37 = vadd.f32 1.0, %v8654_v55 }
0x61b7   :  { %8655 = vrcp.f32 %v5651_v37 }
0x61c1   :  { %v8656_v41 = vpop.eup %8655 }
0x61c2   :  { %v5655_v31 = vmul.f32 %v8656_v41, %v10169_v17  ;;  %v8300_v17 = vld [vmem:[%s10561_s2 + $0x38] sm:$0xff]  }
0x61c3   :  { %8143 = vmatpush3.bf16.msra.mxu0 %v8300_v17 }
0x61c4   :  { %8156 = vmatprep.subr.bf16.mxu0 %v8753_v0 }
0x6225   :  { %v5658_v30 = vpop.permute.xlu0 %5657 }
0x6226   :  { %v5660_v2 = vmul.f32 %v8656_v41, %v5658_v30 }
0x6228   :  { %5662 = vrot.lane.b32.xlu1 %v5660_v2, %s8757_s10 }
0x629a   :  { %v5663_v4 = vpop.permute.xlu1 %5662 }
0x629b   :  { %v10275_v61 = vadd.f32 %v5663_v4, %v5655_v31 }
0x629d   :  { %8657 = vtanh.f32 %v10275_v61 }
0x62a7   :  { %v8658_v1 = vpop.eup %8657 }
0x62a8   :  { %5668 = vrot.lane.b32.xlu0 %v8658_v1, %s8756_s9 }
0x631a   :  { %v5669_v44 = vpop.permute.xlu0 %5668 }
0x631b   :  { %v5671_v9 = vmul.f32 %v8656_v41, %v5669_v44 }
0x631d   :  { %v5672_v10 = vpack.c.bf16 %v5671_v9, %v5671_v9  ;;  %v8305_v9 = vld [vmem:[%s10562_s1 + $0x30] sm:$0xff]  }
0x631f   :  { %5734 = vrot.lane.b32.xlu1 %v5672_v10, %s8757_s10  ;;  %v8306_v10 = vld [vmem:[%s10561_s2 + $0x50] sm:$0xff]  }
0x6391   :  { %v5735_v14 = vpop.permute.xlu1 %5734 }
0x6392   :  { %8121 = vmatmul.mubr.msk.bf16.vlgmr.msra.gmra.mrb[176].mxu1 %vm97_vm1, %v5735_v14  ;;  %8145 = vmatmul.mubr.msk.bf16.vlgmr.msra.gmra.mrb[176].mxu0 %vm97_vm1, %v5735_v14  ;;  %v8307_v14 = vld [vmem:[%s10562_s1 + $0x38] sm:$0xff]  }
0x6393   :  { %8136 = vmatprep.mubr.msk.bf16.mxu1 %vm8754_vm0, %v8753_v0  ;;  %8160 = vmatprep.mubr.msk.bf16.mxu0 %vm8754_vm0, %v8753_v0 }
0x6394   :  { %8133 = vmatpush3.bf16.msra.mxu1 %v8301_v56  ;;  %8157 = vmatpush3.bf16.msra.mxu0 %v8302_v15 }
0x6395   :  { %8134 = vmatprep.subr.bf16.mxu1 %v8753_v0  ;;  %8158 = vmatprep.subr.bf16.mxu0 %v8753_v0 }
0x6398   :  { %8135 = vmatpush3.bf16.msra.mxu1 %v8303_v43 }
0x6399   :  { %8148 = vmatprep.subr.bf16.mxu1 %v8753_v0 }
0x6465   :  { %v5785_v46 = vpop.f32.mrb[176].mxu1  ;;  %v10302_v50 = vpop.f32.mrb[176].mxu0 }
0x6466   :  { %v5786_v57 = vadd.f32 %v5785_v46, %v10230_v25  ;;  %v8122_v22 = vpop.f32.mrb[177].mxu1  ;;  %v8146_v53 = vpop.f32.mrb[177].mxu0 }
0x6467   :  { %v5788_v36 = vpop.f32.mrb[178].mxu1  ;;  %v6023_v8 = vpop.f32.mrb[178].mxu0 }
0x6468   :  { %v5791_v62 = vadd.f32 %v10086_v19, %v5786_v57  ;;  %v8123_v38 = vpop.f32.mrb[179].mxu1  ;;  %v8147_v26 = vpop.f32.mrb[179].mxu0 }
0x646a   :  { %8659 = vtanh.f32 %v5791_v62  ;;  %v7058_v24 = vmul.f32 -1.442695, %v5791_v62 }
0x646c   :  { %8661 = vpow2.f32 %v7058_v24 }
0x6474   :  { %v8660_v5 = vpop.eup %8659 }
0x6475   :  { %5801 = vrot.lane.b32.xlu0 %v8660_v5, %s8756_s9 }
0x6476   :  { %v8662_v45 = vpop.eup %8661 }
0x6477   :  { %v5795_v58 = vadd.f32 1.0, %v8662_v45 }
0x6479   :  { %8663 = vrcp.f32 %v5795_v58 }
0x6483   :  { %v8664_v21 = vpop.eup %8663 }
0x6484   :  { %v5799_v33 = vmul.f32 %v8664_v21, %v10203_v6  ;;  %v8304_v6 = vld [vmem:[%s10561_s2 + $0x48] sm:$0xff]  }
0x6485   :  { %8159 = vmatpush3.bf16.msra.mxu0 %v8304_v6 }
0x6486   :  { %8172 = vmatprep.subr.bf16.mxu0 %v8753_v0 }
0x64e7   :  { %v5802_v51 = vpop.permute.xlu0 %5801 }
0x64e8   :  { %v5804_v25 = vmul.f32 %v8664_v21, %v5802_v51 }
0x64ea   :  { %5806 = vrot.lane.b32.xlu1 %v5804_v25, %s8757_s10 }
0x655c   :  { %v5807_v12 = vpop.permute.xlu1 %5806 }
0x655d   :  { %v10309_v28 = vadd.f32 %v5807_v12, %v5799_v33 }
0x655f   :  { %8665 = vtanh.f32 %v10309_v28 }
0x6569   :  { %v8666_v13 = vpop.eup %8665 }
0x656a   :  { %5812 = vrot.lane.b32.xlu0 %v8666_v13, %s8756_s9 }
0x65dc   :  { %v5813_v18 = vpop.permute.xlu0 %5812 }
0x65dd   :  { %v5815_v42 = vmul.f32 %v8664_v21, %v5813_v18  ;;  %v8309_v18 = vld [vmem:[%s10562_s1 + $0x40] sm:$0xff]  }
0x65df   :  { %v5816_v7 = vpack.c.bf16 %v5815_v42, %v5815_v42  ;;  %v8310_v42 = vld [vmem:[%s10562_s1 + $0x48] sm:$0xff]  }
0x65e1   :  { %5878 = vrot.lane.b32.xlu1 %v5816_v7, %s8757_s10 }
0x6653   :  { %v5879_v23 = vpop.permute.xlu1 %5878 }
0x6654   :  { %8137 = vmatmul.mubr.msk.bf16.vlgmr.msra.gmra.mrb[180].mxu1 %vm97_vm1, %v5879_v23  ;;  %8161 = vmatmul.mubr.msk.bf16.vlgmr.msra.gmra.mrb[180].mxu0 %vm97_vm1, %v5879_v23 }
0x6655   :  { %8152 = vmatprep.mubr.msk.bf16.mxu1 %vm8754_vm0, %v8753_v0  ;;  %8176 = vmatprep.mubr.msk.bf16.mxu0 %vm8754_vm0, %v8753_v0 }
0x6656   :  { %8149 = vmatpush3.bf16.msra.mxu1 %v8305_v9  ;;  %8173 = vmatpush3.bf16.msra.mxu0 %v8306_v10 }
0x6657   :  { %8150 = vmatprep.subr.bf16.mxu1 %v8753_v0  ;;  %8174 = vmatprep.subr.bf16.mxu0 %v8753_v0 }
0x665a   :  { %8151 = vmatpush3.bf16.msra.mxu1 %v8307_v14 }
0x665b   :  { %8164 = vmatprep.subr.bf16.mxu1 %v8753_v0 }
0x6727   :  { %v5929_v39 = vpop.f32.mrb[180].mxu1  ;;  %v10336_v34 = vpop.f32.mrb[180].mxu0 }
0x6728   :  { %v5930_v3 = vadd.f32 %v5929_v39, %v10268_v16  ;;  %v8138_v60 = vpop.f32.mrb[181].mxu1  ;;  %v8162_v59 = vpop.f32.mrb[181].mxu0 }
0x6729   :  { %v5932_v52 = vpop.f32.mrb[182].mxu1  ;;  %v6167_v55 = vpop.f32.mrb[182].mxu0 }
0x672a   :  { %v5935_v37 = vadd.f32 %v10125_v27, %v5930_v3  ;;  %v8139_v41 = vpop.f32.mrb[183].mxu1  ;;  %v8163_v30 = vpop.f32.mrb[183].mxu0 }
0x672c   :  { %8667 = vtanh.f32 %v5935_v37  ;;  %v7073_v31 = vmul.f32 -1.442695, %v5935_v37 }
0x672e   :  { %8669 = vpow2.f32 %v7073_v31 }
0x6736   :  { %v8668_v2 = vpop.eup %8667 }
0x6737   :  { %5945 = vrot.lane.b32.xlu0 %v8668_v2, %s8756_s9 }
0x6738   :  { %v8670_v4 = vpop.eup %8669 }
0x6739   :  { %v5939_v32 = vadd.f32 1.0, %v8670_v4 }
0x673b   :  { %8671 = vrcp.f32 %v5939_v32 }
0x6745   :  { %v8672_v11 = vpop.eup %8671 }
0x6746   :  { %v5943_v17 = vmul.f32 %v8672_v11, %v10237_v63  ;;  %v8308_v63 = vld [vmem:[%s10561_s2 + $0x58] sm:$0xff]  }
0x6747   :  { %8175 = vmatpush3.bf16.msra.mxu0 %v8308_v63 }
0x67a9   :  { %v5946_v47 = vpop.permute.xlu0 %5945 }
0x67aa   :  { %v5948_v16 = vmul.f32 %v8672_v11, %v5946_v47 }
0x67ac   :  { %5950 = vrot.lane.b32.xlu1 %v5948_v16, %s8757_s10 }
0x681e   :  { %v5951_v1 = vpop.permute.xlu1 %5950 }
0x681f   :  { %v10343_v44 = vadd.f32 %v5951_v1, %v5943_v17  ;;  %v8312_v1 = vld [vmem:[%s10562_s1 + $0x58] sm:$0xff]  }
0x6821   :  { %8673 = vtanh.f32 %v10343_v44 }
0x682b   :  { %v8674_v46 = vpop.eup %8673 }
0x682c   :  { %5956 = vrot.lane.b32.xlu0 %v8674_v46, %s8756_s9 }
0x689e   :  { %v5957_v57 = vpop.permute.xlu0 %5956 }
0x689f   :  { %v10362_v22 = vmul.f32 %v8672_v11, %v5957_v57 }
0x68a1   :  { %v5965_v53 = vpack.c.bf16 %v10362_v22, %v10362_v22 }
0x68a3   :  { %6027 = vrot.lane.b32.xlu1 %v5965_v53, %s8757_s10 }
0x6915   :  { %v6028_v36 = vpop.permute.xlu1 %6027 }
0x6916   :  { %8153 = vmatmul.mubr.msk.bf16.vlgmr.msra.gmra.mrb[184].mxu1 %vm97_vm1, %v6028_v36  ;;  %8177 = vmatmul.mubr.msk.bf16.vlgmr.msra.gmra.mrb[184].mxu0 %vm97_vm1, %v6028_v36 }
0x6917   :  { %8168 = vmatprep.mubr.msk.bf16.mxu1 %vm8754_vm0, %v8753_v0  ;;  %8165 = vmatpush3.bf16.msra.mxu1 %v8309_v18 }
0x6918   :  { %8166 = vmatprep.subr.bf16.mxu1 %v8753_v0 }
0x691b   :  { %8167 = vmatpush3.bf16.msra.mxu1 %v8310_v42 }
0x691c   :  { %8180 = vmatprep.subr.bf16.mxu1 %v8753_v0 }
0x69e9   :  { %v6078_v8 = vpop.f32.mrb[184].mxu1  ;;  %v10371_v62 = vpop.f32.mrb[184].mxu0 }
0x69ea   :  { %v6079_v38 = vadd.f32 %v6078_v8, %v10302_v50  ;;  %v8154_v26 = vpop.f32.mrb[185].mxu1  ;;  %v8178_v5 = vpop.f32.mrb[185].mxu0 }
0x69eb   :  { %v6081_v24 = vpop.f32.mrb[186].mxu1  ;;  %v6311_v45 = vpop.f32.mrb[186].mxu0 }
0x69ec   :  { %v6084_v58 = vadd.f32 %v10047_v35, %v6079_v38  ;;  %v8155_v21 = vpop.f32.mrb[187].mxu1  ;;  %v8179_v51 = vpop.f32.mrb[187].mxu0 }
0x69ee   :  { %8675 = vtanh.f32 %v6084_v58  ;;  %v7088_v33 = vmul.f32 -1.442695, %v6084_v58 }
0x69f0   :  { %8677 = vpow2.f32 %v7088_v33 }
0x69f8   :  { %v8676_v25 = vpop.eup %8675 }
0x69f9   :  { %6094 = vrot.lane.b32.xlu0 %v8676_v25, %s8756_s9 }
0x69fa   :  { %v8678_v12 = vpop.eup %8677 }
0x69fb   :  { %v6088_v56 = vadd.f32 1.0, %v8678_v12 }
0x69fd   :  { %8679 = vrcp.f32 %v6088_v56 }
0x6a07   :  { %v8680_v15 = vpop.eup %8679 }
0x6a08   :  { %v6092_v6 = vmul.f32 %v8680_v15, %v10275_v61 }
0x6a6b   :  { %v6095_v43 = vpop.permute.xlu0 %6094 }
0x6a6c   :  { %v6097_v50 = vmul.f32 %v8680_v15, %v6095_v43 }
0x6a6e   :  { %6099 = vrot.lane.b32.xlu1 %v6097_v50, %s8757_s10 }
0x6ae0   :  { %v6100_v13 = vpop.permute.xlu1 %6099 }
0x6ae1   :  { %v6102_v35 = vadd.f32 %v6100_v13, %v6092_v6 }
0x6ae3   :  { %8681 = vtanh.f32 %v6102_v35 }
0x6aed   :  { %v8682_v7 = vpop.eup %8681 }
0x6aee   :  { %6105 = vrot.lane.b32.xlu0 %v8682_v7, %s8756_s9 }
0x6b60   :  { %v6106_v61 = vpop.permute.xlu0 %6105 }
0x6b61   :  { %v6108_v23 = vmul.f32 %v8680_v15, %v6106_v61 }
0x6b63   :  { %v6109_v39 = vpack.c.bf16 %v6108_v23, %v6108_v23 }
0x6b65   :  { %6171 = vrot.lane.b32.xlu1 %v6109_v39, %s8757_s10 }
0x6bd7   :  { %v6172_v3 = vpop.permute.xlu1 %6171 }
0x6bd8   :  { %8169 = vmatmul.mubr.msk.bf16.vlgmr.msra.gmra.mrb[188].mxu1 %vm97_vm1, %v6172_v3 }
0x6bd9   :  { %8184 = vmatprep.mubr.msk.bf16.mxu1 %vm8754_vm0, %v8753_v0 }
0x6cab   :  { %v6222_v60 = vpop.f32.mrb[188].mxu1 }
0x6cac   :  { %v6223_v59 = vadd.f32 %v6222_v60, %v10336_v34  ;;  %v8170_v52 = vpop.f32.mrb[189].mxu1  ;;  %v10448_v60 = vld [vmem:[%s10566_s5] ss:$0 sm:$0xff] }
0x6cad   :  { %v6225_v55 = vpop.f32.mrb[190].mxu1 }
0x6cae   :  { %v6228_v37 = vadd.f32 %v10086_v19, %v6223_v59  ;;  %v8171_v41 = vpop.f32.mrb[191].mxu1  ;;  %v8311_v19 = vld [vmem:[%s10562_s1 + $0x50] sm:$0xff]  }
0x6caf   :  { %8181 = vmatpush3.bf16.msra.mxu1 %v8311_v19 }
0x6cb0   :  { %8683 = vtanh.f32 %v6228_v37  ;;  %v7103_v2 = vmul.f32 -1.442695, %v6228_v37  ;;  %8182 = vmatprep.subr.bf16.mxu1 %v8753_v0 }
0x6cb2   :  { %8685 = vpow2.f32 %v7103_v2 }
0x6cb3   :  { %8183 = vmatpush3.bf16.msra.mxu1 %v8312_v1 }
0x6cba   :  { %v8684_v30 = vpop.eup %8683 }
0x6cbb   :  { %6238 = vrot.lane.b32.xlu0 %v8684_v30, %s8756_s9 }
0x6cbc   :  { %v8686_v31 = vpop.eup %8685 }
0x6cbd   :  { %v6232_v4 = vadd.f32 1.0, %v8686_v31 }
0x6cbf   :  { %8687 = vrcp.f32 %v6232_v4 }
0x6cc9   :  { %v8688_v32 = vpop.eup %8687 }
0x6cca   :  { %v6236_v34 = vmul.f32 %v8688_v32, %v10309_v28 }
0x6d2d   :  { %v6239_v11 = vpop.permute.xlu0 %6238 }
0x6d2e   :  { %v6241_v47 = vmul.f32 %v8688_v32, %v6239_v11 }
0x6d30   :  { %6243 = vrot.lane.b32.xlu1 %v6241_v47, %s8757_s10 }
0x6da2   :  { %v6244_v16 = vpop.permute.xlu1 %6243 }
0x6da3   :  { %v6246_v17 = vadd.f32 %v6244_v16, %v6236_v34 }
0x6da5   :  { %8689 = vtanh.f32 %v6246_v17 }
0x6daf   :  { %v8690_v9 = vpop.eup %8689 }
0x6db0   :  { %6249 = vrot.lane.b32.xlu0 %v8690_v9, %s8756_s9 }
0x6e22   :  { %v6250_v10 = vpop.permute.xlu0 %6249 }
0x6e23   :  { %v6252_v28 = vmul.f32 %v8688_v32, %v6250_v10 }
0x6e25   :  { %v6253_v14 = vpack.c.bf16 %v6252_v28, %v6252_v28 }
0x6e27   :  { %6315 = vrot.lane.b32.xlu1 %v6253_v14, %s8757_s10 }
0x6e99   :  { %v6316_v63 = vpop.permute.xlu1 %6315 }
0x6e9a   :  { %8185 = vmatmul.mubr.msk.bf16.vlgmr.msra.gmra.mrb[192].mxu1 %vm97_vm1, %v6316_v63 }
0x6f6d   :  { %v6366_v46 = vpop.f32.mrb[192].mxu1 }
0x6f6e   :  { %v6367_v57 = vadd.f32 %v6366_v46, %v10371_v62  ;;  %v8186_v53 = vpop.f32.mrb[193].mxu1 }
0x6f6f   :  { %v6369_v36 = vpop.f32.mrb[194].mxu1 }
0x6f70   :  { %v6372_v8 = vadd.f32 %v10125_v27, %v6367_v57  ;;  %v8187_v0 = vpop.f32.mrb[195].mxu1  ;;  %v6621_v57 = vlaneseq }
0x6f72   :  { %8691 = vtanh.f32 %v6372_v8  ;;  %v7118_v26 = vmul.f32 -1.442695, %v6372_v8 }
0x6f74   :  { %8693 = vpow2.f32 %v7118_v26 }
0x6f7c   :  { %v8692_v38 = vpop.eup %8691 }
0x6f7d   :  { %6382 = vrot.lane.b32.xlu0 %v8692_v38, %s8756_s9  ;;  %v10466_v38 = vand.u32 127, %v6621_v57 }
0x6f7e   :  { %v8694_v5 = vpop.eup %8693 }
0x6f7f   :  { %v6376_v24 = vadd.f32 1.0, %v8694_v5  ;;  %vm6623_vm3 = vcmp.lt.s32.totalorder %v10466_v38, 24 }
0x6f81   :  { %8695 = vrcp.f32 %v6376_v24 }
0x6f8b   :  { %v8696_v45 = vpop.eup %8695 }
0x6f8c   :  { %v6380_v27 = vmul.f32 %v8696_v45, %v10343_v44  ;;  %v8314_v44 = vld [vmem:[%s10565_s4 + $0x8] sm:$0xff]  }
0x6fef   :  { %v6383_v58 = vpop.permute.xlu0 %6382 }
0x6ff0   :  { %v6385_v21 = vmul.f32 %v8696_v45, %v6383_v58 }
0x6ff2   :  { %6387 = vrot.lane.b32.xlu1 %v6385_v21, %s8757_s10 }
0x6ff6   :  { %3339 = vrot.lane.b32.xlu1 %v9712_v49, %s8757_s10  ;;  %v8313_v49 = vld [vmem:[%s10565_s4] sm:$0xff]  }
0x6ff7   :  { %8188 = vmatprep.subr.bf16.mxu0 %v8313_v49 }
0x6ff8   :  { %8189 = vmatpush3.bf16.msra.mxu0 %v8313_v49 }
0x6ff9   :  { %8190 = vmatprep.subr.bf16.mxu0 %v8314_v44 }
0x6ffa   :  { %4213 = vrot.lane.b32.xlu1 %v9924_v40, %s8757_s10 }
0x6ffc   :  { %8191 = vmatpush3.bf16.msra.mxu0 %v8314_v44 }
0x6ffe   :  { %5087 = vrot.lane.b32.xlu1 %v10151_v48, %s8757_s10 }
0x7002   :  { %5961 = vrot.lane.b32.xlu1 %v10362_v22, %s8757_s10 }
0x7064   :  { %v6388_v62 = vpop.permute.xlu1 %6387 }
0x7065   :  { %v6390_v51 = vadd.f32 %v6388_v62, %v6380_v27 }
0x7067   :  { %8697 = vtanh.f32 %v6390_v51 }
0x7068   :  { %v3340_v25 = vpop.permute.xlu1 %3339 }
0x7069   :  { %3342 = vst.msk [vmem:[#allocation2] sm:$0xff] %vm97_vm1, %v3340_v25 }
0x706c   :  { %v4214_v33 = vpop.permute.xlu1 %4213 }
0x706d   :  { %4216 = vst.msk [vmem:[#allocation2 + $0x10] sm:$0xff] %vm97_vm1, %v4214_v33 }
0x7070   :  { %v5088_v40 = vpop.permute.xlu1 %5087  ;;  %v6402_v6 = vld [vmem:[#allocation2] sm:$0xff] }
0x7071   :  { %v8698_v48 = vpop.eup %8697  ;;  %5090 = vst.msk [vmem:[#allocation2 + $0x20] sm:$0xff] %vm97_vm1, %v5088_v40 }
0x7072   :  { %6393 = vrot.lane.b32.xlu0 %v8698_v48, %s8756_s9 }
0x7074   :  { %v5962_v22 = vpop.permute.xlu1 %5961 }
0x7075   :  { %5964 = vst.msk [vmem:[#allocation2 + $0x30] sm:$0xff] %vm97_vm1, %v5962_v22 }
0x7076   :  { %3776 = vrot.lane.b32.xlu0 %v9818_v29, %s8757_s10 }
0x7078   :  { %v6406_v18 = vld [vmem:[#allocation2 + $0x20] sm:$0xff] }
0x707a   :  { %4650 = vrot.lane.b32.xlu0 %v10030_v54, %s8757_s10  ;;  %v6404_v54 = vld [vmem:[#allocation2 + $0x10] sm:$0xff] }
0x707c   :  { %v6408_v23 = vld [vmem:[#allocation2 + $0x30] sm:$0xff] }
0x707e   :  { %5524 = vrot.lane.b32.xlu0 %v10257_v20, %s8757_s10 }
0x70e4   :  { %v6394_v12 = vpop.permute.xlu0 %6393 }
0x70e5   :  { %v6396_v56 = vmul.f32 %v8696_v45, %v6394_v12 }
0x70e7   :  { %6398 = vrot.lane.b32.xlu0 %v6396_v56, %s8757_s10 }
0x70e8   :  { %v3777_v15 = vpop.permute.xlu0 %3776 }
0x70e9   :  { %3779 = vst.msk [vmem:[#allocation2 + $0x8] sm:$0xff] %vm97_vm1, %v3777_v15 }
0x70ec   :  { %v4651_v43 = vpop.permute.xlu0 %4650 }
0x70ed   :  { %4653 = vst.msk [vmem:[#allocation2 + $0x18] sm:$0xff] %vm97_vm1, %v4651_v43 }
0x70f0   :  { %v5525_v50 = vpop.permute.xlu0 %5524  ;;  %v6403_v13 = vld [vmem:[#allocation2 + $0x8] sm:$0xff] }
0x70f1   :  { %5527 = vst.msk [vmem:[#allocation2 + $0x28] sm:$0xff] %vm97_vm1, %v5525_v50  ;;  %v6410_v29 = vpack.c.bf16 %v6403_v13, %v6402_v6 }
0x70f3   :  { %8192 = vmatprep.mubr.msk.bf16.mxu0 %vm97_vm1, %v6410_v29 }
0x70f4   :  { %v6405_v20 = vld [vmem:[#allocation2 + $0x18] sm:$0xff] }
0x70f5   :  { %v6411_v35 = vpack.c.bf16 %v6405_v20, %v6404_v54 }
0x70f7   :  { %8193 = vmatmul.mubr.msk.bf16.vlgmr.msra.gmra.mrb[188].mxu0 %vm97_vm1, %v6411_v35 }
0x70f8   :  { %v6407_v42 = vld [vmem:[#allocation2 + $0x28] sm:$0xff] }
0x70f9   :  { %v6412_v7 = vpack.c.bf16 %v6407_v42, %v6406_v18 }
0x70fb   :  { %8196 = vmatprep.mubr.msk.bf16.mxu0 %vm97_vm1, %v6412_v7 }
0x7159   :  { %v6399_v61 = vpop.permute.xlu0 %6398 }
0x715a   :  { %6401 = vst.msk [vmem:[#allocation2 + $0x38] sm:$0xff] %vm97_vm1, %v6399_v61 }
0x7161   :  { %v6409_v39 = vld [vmem:[#allocation2 + $0x38] sm:$0xff] }
0x7162   :  { %v6413_v3 = vpack.c.bf16 %v6409_v39, %v6408_v23 }
0x7164   :  { %8197 = vmatmul.mubr.msk.bf16.gmra.mrb[192].mxu0 %vm97_vm1, %v6413_v3 }
0x71ca   :  { %v8194_v59 = vpop.f32.mrb[188].mxu0 }
0x71cb   :  { %v10451_v52 = vadd.f32 %v8194_v59, %v10448_v60  ;;  %v6478_v55 = vpop.f32.mrb[189].mxu0 }
0x71cc   :  { %v10454_v37 = vadd.f32 %v10448_v60, %v6478_v55  ;;  %v8195_v41 = vpop.f32.mrb[190].mxu0 }
0x71cd   :  { %v6519_v30 = vmin.f32 %v10451_v52, 20.0  ;;  %v10458_v2 = vadd.f32 %v8195_v41, %v10448_v60  ;;  %v6481_v31 = vpop.f32.mrb[191].mxu0  ;;  %vm6511_vm2 = vcmp.gt.f32.partialorder %v10451_v52, 20.0 }
0x71ce   :  { %v6517_v4 = vmin.f32 %v10454_v37, 20.0  ;;  %v10462_v32 = vadd.f32 %v10448_v60, %v6481_v31  ;;  %vm6509_vm4 = vcmp.gt.f32.partialorder %v10454_v37, 20.0 }
0x71cf   :  { %v6529_v11 = vmul.f32 1.442695, %v6519_v30  ;;  %v6520_v47 = vmin.f32 %v10458_v2, 20.0  ;;  %vm6512_vm5 = vcmp.gt.f32.partialorder %v10458_v2, 20.0 }
0x71d0   :  { %v6525_v34 = vmul.f32 1.442695, %v6517_v4  ;;  %v6518_v16 = vmin.f32 %v10462_v32, 20.0  ;;  %vm6510_vm10 = vcmp.gt.f32.partialorder %v10462_v32, 20.0 }
0x71d1   :  { %8699 = vpow2.f32 %v6529_v11  ;;  %v6531_v17 = vmul.f32 1.442695, %v6520_v47 }
0x71d2   :  { %8701 = vpow2.f32 %v6525_v34  ;;  %v6527_v19 = vmul.f32 1.442695, %v6518_v16 }
0x71d3   :  { %8703 = vpow2.f32 %v6531_v17 }
0x71d4   :  { %8705 = vpow2.f32 %v6527_v19 }
0x71db   :  { %v8700_v1 = vpop.eup %8699 }
0x71dc   :  { %v8702_v9 = vpop.eup %8701  ;;  %v6559_v10 = vadd.f32 1.0, %v8700_v1  ;;  %v6562_v36 = vmul.f32 -0.5, %v8700_v1  ;;  %v6565_v24 = vand.u32 2147483647, %v8700_v1 }
0x71dd   :  { %v8704_v28 = vpop.eup %8703  ;;  %v6541_v14 = vadd.f32 1.0, %v8702_v9  ;;  %v6544_v8 = vmul.f32 -0.5, %v8702_v9  ;;  %v6547_v58 = vand.u32 2147483647, %v8702_v9 }
0x71de   :  { %v8706_v63 = vpop.eup %8705  ;;  %8707 = vlog2.f32 %v6559_v10  ;;  %v6568_v46 = vadd.f32 1.0, %v8704_v28  ;;  %v6571_v0 = vmul.f32 -0.5, %v8704_v28  ;;  %v6563_v5 = vadd.f32 1.0, %v6562_v36 }
0x71df   :  { %8709 = vlog2.f32 %v6541_v14  ;;  %v6550_v53 = vadd.f32 1.0, %v8706_v63  ;;  %v6553_v26 = vmul.f32 -0.5, %v8706_v63  ;;  %v6545_v45 = vadd.f32 1.0, %v6544_v8 }
0x71e0   :  { %8711 = vlog2.f32 %v6568_v46  ;;  %v6572_v21 = vadd.f32 1.0, %v6571_v0  ;;  %v6574_v62 = vand.u32 2147483647, %v8704_v28  ;;  %v6564_v49 = vmul.f32 %v8700_v1, %v6563_v5 }
0x71e1   :  { %8713 = vlog2.f32 %v6550_v53  ;;  %v6554_v51 = vadd.f32 1.0, %v6553_v26  ;;  %vm6566_vm6 = vcmp.lt.f32.partialorder %v6565_v24, 0.0004427343  ;;  %v6546_v44 = vmul.f32 %v8702_v9, %v6545_v45 }
0x71e2   :  { %v6556_v22 = vand.u32 2147483647, %v8706_v63  ;;  %vm6548_vm7 = vcmp.lt.f32.partialorder %v6547_v58, 0.0004427343  ;;  %v6573_v15 = vmul.f32 %v8704_v28, %v6572_v21  ;;  %vm6575_vm8 = vcmp.lt.f32.partialorder %v6574_v62, 0.0004427343 }
0x71e3   :  { %v6555_v13 = vmul.f32 %v8706_v63, %v6554_v51 }
0x71e4   :  { %vm6557_vm9 = vcmp.lt.f32.partialorder %v6556_v22, 0.0004427343 }
0x71e8   :  { %v8708_v27 = vpop.eup %8707 }
0x71e9   :  { %v8710_v25 = vpop.eup %8709  ;;  %v6561_v33 = vmul.f32 0.6931472, %v8708_v27 }
0x71ea   :  { %v8712_v40 = vpop.eup %8711  ;;  %v6543_v48 = vmul.f32 0.6931472, %v8710_v25 }
0x71eb   :  { %v6567_v12 = vsel %vm6566_vm6, %v6564_v49, %v6561_v33  ;;  %v6570_v56 = vmul.f32 0.6931472, %v8712_v40  ;;  %v8714_v43 = vpop.eup %8713 }
0x71ec   :  { %v6615_v50 = vsel %vm6511_vm2, %v10451_v52, %v6567_v12  ;;  %v6549_v6 = vsel %vm6548_vm7, %v6546_v44, %v6543_v48  ;;  %v6552_v35 = vmul.f32 0.6931472, %v8714_v43 }
0x71ed   :  { %v6626_v29 = vsel %vm6623_vm3, %v6615_v50, %v10451_v52  ;;  %v6613_v54 = vsel %vm6509_vm4, %v10454_v37, %v6549_v6  ;;  %v6576_v20 = vsel %vm6575_vm8, %v6573_v15, %v6570_v56 }
0x71ee   :  { %6634 = vst [vmem:[%s10567_s6 + $0x10] sm:$0xff] %v6626_v29  ;;  %v6624_v18 = vsel %vm6623_vm3, %v6613_v54, %v10454_v37  ;;  %v6616_v42 = vsel %vm6512_vm5, %v10458_v2, %v6576_v20  ;;  %v6558_v61 = vsel %vm6557_vm9, %v6555_v13, %v6552_v35 }
0x71ef   :  { %6632 = vst [vmem:[%s10567_s6] sm:$0xff] %v6624_v18  ;;  %v6627_v7 = vsel %vm6623_vm3, %v6616_v42, %v10458_v2  ;;  %v6614_v23 = vsel %vm6510_vm10, %v10462_v32, %v6558_v61 }
0x71f0   :  { %6635 = vst [vmem:[%s10567_s6 + $0x18] sm:$0xff] %v6627_v7  ;;  %v6625_v39 = vsel %vm6623_vm3, %v6614_v23, %v10462_v32 }
0x71f1   :  { %6633 = vst [vmem:[%s10567_s6 + $0x8] sm:$0xff] %v6625_v39 }
0x7237   :  { %v8198_v3 = vpop.f32.mrb[192].mxu0 }
0x7238   :  { %v10508_v59 = vadd.f32 %v8198_v3, %v10448_v60  ;;  %v6494_v52 = vpop.f32.mrb[193].mxu0 }
0x7239   :  { %v10511_v55 = vadd.f32 %v10448_v60, %v6494_v52  ;;  %v8199_v37 = vpop.f32.mrb[194].mxu0 }
0x723a   :  { %v6523_v41 = vmin.f32 %v10508_v59, 20.0  ;;  %v10515_v30 = vadd.f32 %v8199_v37, %v10448_v60  ;;  %v6497_v2 = vpop.f32.mrb[195].mxu0  ;;  %vm6515_vm11 = vcmp.gt.f32.partialorder %v10508_v59, 20.0 }
0x723b   :  { %v6521_v31 = vmin.f32 %v10511_v55, 20.0  ;;  %v10519_v4 = vadd.f32 %v10448_v60, %v6497_v2  ;;  %vm6513_vm12 = vcmp.gt.f32.partialorder %v10511_v55, 20.0 }
0x723c   :  { %v6537_v32 = vmul.f32 1.442695, %v6523_v41  ;;  %v6524_v11 = vmin.f32 %v10515_v30, 20.0  ;;  %vm6516_vm13 = vcmp.gt.f32.partialorder %v10515_v30, 20.0 }
0x723d   :  { %v6533_v47 = vmul.f32 1.442695, %v6521_v31  ;;  %v6522_v34 = vmin.f32 %v10519_v4, 20.0  ;;  %vm6514_vm2 = vcmp.gt.f32.partialorder %v10519_v4, 20.0 }
0x723e   :  { %8715 = vpow2.f32 %v6537_v32  ;;  %v6539_v16 = vmul.f32 1.442695, %v6524_v11 }
0x723f   :  { %8717 = vpow2.f32 %v6533_v47  ;;  %v6535_v17 = vmul.f32 1.442695, %v6522_v34 }
0x7240   :  { %8719 = vpow2.f32 %v6539_v16 }
0x7241   :  { %8721 = vpow2.f32 %v6535_v17 }
0x7248   :  { %v8716_v19 = vpop.eup %8715 }
0x7249   :  { %v8718_v1 = vpop.eup %8717  ;;  %v6595_v9 = vadd.f32 1.0, %v8716_v19  ;;  %v6598_v46 = vmul.f32 -0.5, %v8716_v19  ;;  %v6601_v0 = vand.u32 2147483647, %v8716_v19 }
0x724a   :  { %v8720_v10 = vpop.eup %8719  ;;  %v6577_v28 = vadd.f32 1.0, %v8718_v1  ;;  %v6580_v57 = vmul.f32 -0.5, %v8718_v1  ;;  %v6583_v5 = vand.u32 2147483647, %v8718_v1 }
0x724b   :  { %v8722_v14 = vpop.eup %8721  ;;  %8723 = vlog2.f32 %v6595_v9  ;;  %v6604_v60 = vadd.f32 1.0, %v8720_v10  ;;  %v6607_v53 = vmul.f32 -0.5, %v8720_v10  ;;  %v6599_v8 = vadd.f32 1.0, %v6598_v46 }
0x724c   :  { %8725 = vlog2.f32 %v6577_v28  ;;  %v6586_v63 = vadd.f32 1.0, %v8722_v14  ;;  %v6589_v36 = vmul.f32 -0.5, %v8722_v14  ;;  %v6581_v26 = vadd.f32 1.0, %v6580_v57 }
0x724d   :  { %8727 = vlog2.f32 %v6604_v60  ;;  %v6608_v24 = vadd.f32 1.0, %v6607_v53  ;;  %v6610_v58 = vand.u32 2147483647, %v8720_v10  ;;  %v6600_v51 = vmul.f32 %v8716_v19, %v6599_v8 }
0x724e   :  { %8729 = vlog2.f32 %v6586_v63  ;;  %v6590_v21 = vadd.f32 1.0, %v6589_v36  ;;  %vm6602_vm14 = vcmp.lt.f32.partialorder %v6601_v0, 0.0004427343  ;;  %v6582_v49 = vmul.f32 %v8718_v1, %v6581_v26 }
0x724f   :  { %v6592_v40 = vand.u32 2147483647, %v8722_v14  ;;  %vm6584_vm15 = vcmp.lt.f32.partialorder %v6583_v5, 0.0004427343  ;;  %v6609_v22 = vmul.f32 %v8720_v10, %v6608_v24  ;;  %vm6611_vm0 = vcmp.lt.f32.partialorder %v6610_v58, 0.0004427343 }
0x7250   :  { %v6591_v43 = vmul.f32 %v8722_v14, %v6590_v21 }
0x7251   :  { %vm6593_vm1 = vcmp.lt.f32.partialorder %v6592_v40, 0.0004427343 }
0x7255   :  { %v8724_v45 = vpop.eup %8723 }
0x7256   :  { %v8726_v27 = vpop.eup %8725  ;;  %v6597_v62 = vmul.f32 0.6931472, %v8724_v45 }
0x7257   :  { %v8728_v25 = vpop.eup %8727  ;;  %v6579_v33 = vmul.f32 0.6931472, %v8726_v27 }
0x7258   :  { %v6603_v48 = vsel %vm6602_vm14, %v6600_v51, %v6597_v62  ;;  %v6606_v44 = vmul.f32 0.6931472, %v8728_v25  ;;  %v8730_v12 = vpop.eup %8729 }
0x7259   :  { %v6619_v56 = vsel %vm6515_vm11, %v10508_v59, %v6603_v48  ;;  %v6585_v15 = vsel %vm6584_vm15, %v6582_v49, %v6579_v33  ;;  %v6588_v29 = vmul.f32 0.6931472, %v8730_v12 }
0x725a   :  { %v6630_v50 = vsel %vm6623_vm3, %v6619_v56, %v10508_v59  ;;  %v6617_v6 = vsel %vm6513_vm12, %v10511_v55, %v6585_v15  ;;  %v6612_v13 = vsel %vm6611_vm0, %v6609_v22, %v6606_v44 }
0x725b   :  { %6638 = vst [vmem:[%s10567_s6 + $0x30] sm:$0xff] %v6630_v50  ;;  %v6628_v54 = vsel %vm6623_vm3, %v6617_v6, %v10511_v55  ;;  %v6620_v20 = vsel %vm6516_vm13, %v10515_v30, %v6612_v13  ;;  %v6594_v18 = vsel %vm6593_vm1, %v6591_v43, %v6588_v29 }
0x725c   :  { %6636 = vst [vmem:[%s10567_s6 + $0x20] sm:$0xff] %v6628_v54  ;;  %v6631_v35 = vsel %vm6623_vm3, %v6620_v20, %v10515_v30  ;;  %v6618_v42 = vsel %vm6514_vm2, %v10519_v4, %v6594_v18 }
0x725d   :  { %6639 = vst [vmem:[%s10567_s6 + $0x38] sm:$0xff] %v6631_v35  ;;  %v6629_v7 = vsel %vm6623_vm3, %v6618_v42, %v10519_v4 }
0x725e   :  { %6637 = vst [vmem:[%s10567_s6 + $0x28] sm:$0xff] %v6629_v7 }

</bundles_post_ra>
